<compile_context>
chip_gen: v5e
topology: v5e:2x2
jax: 0.10.0
libtpu: 0.0.40
codegen_flags: <defaults>
</compile_context>

<pallas_src>
import jax
import jax.numpy as jnp
from jax.experimental import pallas as pl
from jax.experimental.pallas import tpu as pltpu


def _elu(v):
    # F.elu with alpha=1.0 (select, not multiply -> no NaN/Inf leak)
    return jnp.where(v > 0, v, jnp.exp(v) - 1.0)


def rff_critic_kernel(x_ref,
                      w1_ref, b1_ref,
                      w2_ref, b2_ref,
                      w3_ref, b3_ref,
                      o_ref):
    x = x_ref[...].astype(jnp.float32)

    # z1 = cos(l1(x))                                        (tb, H)
    z1 = jnp.cos(
        jnp.dot(x, w1_ref[...], preferred_element_type=jnp.float32) + b1_ref[...]
    )

    # both branches' hidden layers fused into one matmul      (tb, 2H)
    z2 = _elu(
        jnp.dot(z1, w2_ref[...], preferred_element_type=jnp.float32) + b2_ref[...]
    )

    # both output heads fused via block-diagonal weights      (tb, 2)
    z3 = jnp.dot(z2, w3_ref[...], preferred_element_type=jnp.float32) + b3_ref[...]

    # q = z3_1 * z3_2                                         (tb, 1)
    o_ref[...] = (z3[:, 0:1] * z3[:, 1:2]).astype(o_ref.dtype)


def rff_complex_critic(x, packed, *, tb=512):
    """x: (B, feature_dim) float32.  packed: dict from pack_params()."""
    B, F = x.shape
    H = packed["w1"].shape[1]
    H2 = packed["w2_cat"].shape[1]          # 2*H

    # Tile selection: biggest tile <= tb that evenly divides B; otherwise fall
    # back to one full-batch block (full-array block dims are always legal).
    tb = min(tb, B)
    if B % tb != 0:
        tb = B
    grid = (B // tb,)

    # Constant (broadcast) blocks: same block for every grid step -> loaded once.
    def const_spec(shape):
        return pl.BlockSpec(shape, lambda i: (0, 0))

    return pl.pallas_call(
        rff_critic_kernel,
        out_shape=jax.ShapeDtypeStruct((B, 1), jnp.float32),
        grid_spec=pltpu.PrefetchScalarGridSpec(
            num_scalar_prefetch=0,
            grid=grid,
            in_specs=[
                pl.BlockSpec((tb, F), lambda i: (i, 0)),     # x   (batch-tiled)
                const_spec((F, H)),                          # w1
                const_spec((1, H)),                          # b1
                const_spec((H, H2)),                         # w2_cat  (H, 2H)
                const_spec((1, H2)),                         # b2_cat  (1, 2H)
                const_spec((H2, 2)),                         # w3_bd   (2H, 2)
                const_spec((1, 2)),                          # b3_cat  (1, 2)
            ],
            out_specs=pl.BlockSpec((tb, 1), lambda i: (i, 0)),
        ),
        compiler_params=pltpu.CompilerParams(
            # batch grid axis is embarrassingly parallel -> megacore sharding
            dimension_semantics=("parallel",),
        ),
    )(x,
      packed["w1"], packed["b1"],
      packed["w2_cat"], packed["b2_cat"],
      packed["w3_bd"], packed["b3_cat"])


def init_params(key, feature_dim, hidden_dim):
    """Deterministic synthetic parameters.  All weights stored transposed
    relative to PyTorch nn.Linear, i.e. shape (in_features, out_features)."""
    ks = jax.random.split(key, 10)

    def lin(kw, kb, fan_in, fan_out):
        # mimic PyTorch default uniform(-1/sqrt(fan_in), 1/sqrt(fan_in))
        bound = 1.0 / jnp.sqrt(jnp.float32(fan_in))
        w = jax.random.uniform(kw, (fan_in, fan_out), jnp.float32, -bound, bound)
        b = jax.random.uniform(kb, (1, fan_out), jnp.float32, -bound, bound)
        return w, b

    w1, b1 = lin(ks[0], ks[1], feature_dim, hidden_dim)
    w2_1, b2_1 = lin(ks[2], ks[3], hidden_dim, hidden_dim)
    w3_1, b3_1 = lin(ks[4], ks[5], hidden_dim, 1)
    w2_2, b2_2 = lin(ks[6], ks[7], hidden_dim, hidden_dim)
    w3_2, b3_2 = lin(ks[8], ks[9], hidden_dim, 1)
    return dict(w1=w1, b1=b1,
                w2_1=w2_1, b2_1=b2_1, w3_1=w3_1, b3_1=b3_1,
                w2_2=w2_2, b2_2=b2_2, w3_2=w3_2, b3_2=b3_2)


def pack_params(p):
    """One-time fusion of the two branches into concatenated / block-diagonal
    weights so the kernel runs 3 matmuls instead of 5."""
    w2_cat = jnp.concatenate([p["w2_1"], p["w2_2"]], axis=1)          # (H, 2H)
    b2_cat = jnp.concatenate([p["b2_1"], p["b2_2"]], axis=1)          # (1, 2H)
    zero = jnp.zeros_like(p["w3_1"])                                  # (H, 1)
    w3_bd = jnp.concatenate(
        [jnp.concatenate([p["w3_1"], zero], axis=1),                  # rows 0:H
         jnp.concatenate([zero, p["w3_2"]], axis=1)],                 # rows H:2H
        axis=0)                                                       # (2H, 2)
    b3_cat = jnp.concatenate([p["b3_1"], p["b3_2"]], axis=1)          # (1, 2)
    return dict(w1=p["w1"], b1=p["b1"],
                w2_cat=w2_cat, b2_cat=b2_cat,
                w3_bd=w3_bd, b3_cat=b3_cat)


def reference_forward(x, p):
    """Plain-JAX reference matching the PyTorch module semantics."""
    z1 = jnp.cos(x @ p["w1"] + p["b1"])
    z2_1 = jax.nn.elu(z1 @ p["w2_1"] + p["b2_1"])
    z3_1 = z2_1 @ p["w3_1"] + p["b3_1"]
    z2_2 = jax.nn.elu(z1 @ p["w2_2"] + p["b2_2"])
    z3_2 = z2_2 @ p["w3_2"] + p["b3_2"]
    return z3_1 * z3_2


if __name__ == "__main__":
    # Small but tiling-exercising shapes: two 256-row grid steps.
    B, FEATURE_DIM, HIDDEN_DIM = 512, 32, 32

    key = jax.random.PRNGKey(0)
    kx, kp = jax.random.split(key)
    x = jax.random.normal(kx, (B, FEATURE_DIM), jnp.float32)
    params = init_params(kp, FEATURE_DIM, HIDDEN_DIM)
    packed = pack_params(params)

    q = rff_complex_critic(x, packed, tb=256)
    q = jax.block_until_ready(q)

    q_ref = reference_forward(x, params)
    assert q.shape == (B, 1)
    assert jnp.allclose(q, q_ref, atol=1e-5, rtol=1e-5), (
        f"max abs err = {jnp.max(jnp.abs(q - q_ref))}"
    )

    print("KERNEL_OK")
</pallas_src>

<mosaic_0001>
module attributes {stable_mosaic.version = 11 : i64} {
  func.func @rff_critic_kernel(%arg0: i32, %arg1: memref<256x32xf32, #tpu.memory_space<vmem>>, %arg2: memref<32x32xf32, #tpu.memory_space<vmem>>, %arg3: memref<1x32xf32, #tpu.memory_space<vmem>>, %arg4: memref<32x64xf32, #tpu.memory_space<vmem>>, %arg5: memref<1x64xf32, #tpu.memory_space<vmem>>, %arg6: memref<64x2xf32, #tpu.memory_space<vmem>>, %arg7: memref<1x2xf32, #tpu.memory_space<vmem>>, %arg8: memref<256x1xf32, #tpu.memory_space<vmem>>) attributes {dimension_semantics = [#tpu.dimension_semantics<parallel>], iteration_bounds = array<i64: 2>, scalar_prefetch = 0 : i64, scratch_operands = 0 : i64, tpu.core_type = #tpu.core_type<tc>, window_params = [{transform_indices = @transform_0, window_bounds = array<i64: 256, 32>}, {pipeline_mode = #tpu.pipeline_mode<synchronous>, transform_indices = @transform_1, window_bounds = array<i64: 32, 32>}, {pipeline_mode = #tpu.pipeline_mode<synchronous>, transform_indices = @transform_2, window_bounds = array<i64: 1, 32>}, {pipeline_mode = #tpu.pipeline_mode<synchronous>, transform_indices = @transform_3, window_bounds = array<i64: 32, 64>}, {pipeline_mode = #tpu.pipeline_mode<synchronous>, transform_indices = @transform_4, window_bounds = array<i64: 1, 64>}, {pipeline_mode = #tpu.pipeline_mode<synchronous>, transform_indices = @transform_5, window_bounds = array<i64: 64, 2>}, {pipeline_mode = #tpu.pipeline_mode<synchronous>, transform_indices = @transform_6, window_bounds = array<i64: 1, 2>}, {transform_indices = @transform_7, window_bounds = array<i64: 256, 1>}]} {
    %c0 = arith.constant 0 : index
    %c0_0 = arith.constant 0 : index
    %0 = vector.load %arg1[%c0, %c0_0] : memref<256x32xf32, #tpu.memory_space<vmem>>, vector<256x32xf32>
    %c0_1 = arith.constant 0 : index
    %c0_2 = arith.constant 0 : index
    %1 = vector.load %arg2[%c0_1, %c0_2] : memref<32x32xf32, #tpu.memory_space<vmem>>, vector<32x32xf32>
    %cst = arith.constant dense<0.000000e+00> : vector<256x32xf32>
    %2 = tpu.matmul %0, %1, %cst {dimension_numbers = #tpu.dot_dimension_numbers<[1], [0], [0], [1], [0, 0, 1, 1], [], []>} : vector<256x32xf32>, vector<32x32xf32>, vector<256x32xf32> -> vector<256x32xf32>
    %c0_3 = arith.constant 0 : index
    %c0_4 = arith.constant 0 : index
    %3 = vector.load %arg3[%c0_3, %c0_4] : memref<1x32xf32, #tpu.memory_space<vmem>>, vector<1x32xf32>
    %4 = vector.broadcast %3 : vector<1x32xf32> to vector<256x32xf32>
    %5 = arith.addf %2, %4 : vector<256x32xf32>
    %6 = math.cos %5 : vector<256x32xf32>
    %c0_5 = arith.constant 0 : index
    %c0_6 = arith.constant 0 : index
    %7 = vector.load %arg4[%c0_5, %c0_6] : memref<32x64xf32, #tpu.memory_space<vmem>>, vector<32x64xf32>
    %cst_7 = arith.constant dense<0.000000e+00> : vector<256x64xf32>
    %8 = tpu.matmul %6, %7, %cst_7 {dimension_numbers = #tpu.dot_dimension_numbers<[1], [0], [0], [1], [0, 0, 1, 1], [], []>} : vector<256x32xf32>, vector<32x64xf32>, vector<256x64xf32> -> vector<256x64xf32>
    %c0_8 = arith.constant 0 : index
    %c0_9 = arith.constant 0 : index
    %9 = vector.load %arg5[%c0_8, %c0_9] : memref<1x64xf32, #tpu.memory_space<vmem>>, vector<1x64xf32>
    %10 = vector.broadcast %9 : vector<1x64xf32> to vector<256x64xf32>
    %11 = arith.addf %8, %10 : vector<256x64xf32>
    %cst_10 = arith.constant 0.000000e+00 : f32
    %12 = vector.broadcast %cst_10 : f32 to vector<256x64xf32>
    %13 = arith.cmpf ogt, %11, %12 : vector<256x64xf32>
    %14 = math.exp %11 : vector<256x64xf32>
    %cst_11 = arith.constant 1.000000e+00 : f32
    %15 = vector.broadcast %cst_11 : f32 to vector<256x64xf32>
    %16 = arith.subf %14, %15 : vector<256x64xf32>
    %17 = arith.select %13, %11, %16 : vector<256x64xi1>, vector<256x64xf32>
    %c0_12 = arith.constant 0 : index
    %c0_13 = arith.constant 0 : index
    %18 = vector.load %arg6[%c0_12, %c0_13] : memref<64x2xf32, #tpu.memory_space<vmem>>, vector<64x2xf32>
    %cst_14 = arith.constant dense<0.000000e+00> : vector<256x2xf32>
    %19 = tpu.matmul %17, %18, %cst_14 {dimension_numbers = #tpu.dot_dimension_numbers<[1], [0], [0], [1], [0, 0, 1, 1], [], []>} : vector<256x64xf32>, vector<64x2xf32>, vector<256x2xf32> -> vector<256x2xf32>
    %c0_15 = arith.constant 0 : index
    %c0_16 = arith.constant 0 : index
    %20 = vector.load %arg7[%c0_15, %c0_16] : memref<1x2xf32, #tpu.memory_space<vmem>>, vector<1x2xf32>
    %21 = vector.broadcast %20 : vector<1x2xf32> to vector<256x2xf32>
    %22 = arith.addf %19, %21 : vector<256x2xf32>
    %23 = vector.extract_strided_slice %22 {offsets = [0, 0], sizes = [256, 1], strides = [1, 1]} : vector<256x2xf32> to vector<256x1xf32>
    %24 = vector.extract_strided_slice %22 {offsets = [0, 1], sizes = [256, 1], strides = [1, 1]} : vector<256x2xf32> to vector<256x1xf32>
    %25 = arith.mulf %23, %24 : vector<256x1xf32>
    %c0_17 = arith.constant 0 : index
    %c0_18 = arith.constant 0 : index
    %26 = vector.load %arg8[%c0_17, %c0_18] : memref<256x1xf32, #tpu.memory_space<vmem>>, vector<256x1xf32>
    tpu.vector_store %arg8[%c0_17, %c0_18], %25 {strides = array<i32>} : memref<256x1xf32, #tpu.memory_space<vmem>>, vector<256x1xf32>,
    return
  }
  func.func @transform_0(%arg0: i32) -> (i32, i32) {
    %c0_i32 = arith.constant 0 : i32
    %c0_i32_0 = arith.constant 0 : i32
    return %arg0, %c0_i32 : i32, i32
  }
  func.func @transform_1(%arg0: i32) -> (i32, i32) {
    %c0_i32 = arith.constant 0 : i32
    %c0_i32_0 = arith.constant 0 : i32
    %c0_i32_1 = arith.constant 0 : i32
    return %c0_i32, %c0_i32_0 : i32, i32
  }
  func.func @transform_2(%arg0: i32) -> (i32, i32) {
    %c0_i32 = arith.constant 0 : i32
    %c0_i32_0 = arith.constant 0 : i32
    %c0_i32_1 = arith.constant 0 : i32
    return %c0_i32, %c0_i32_0 : i32, i32
  }
  func.func @transform_3(%arg0: i32) -> (i32, i32) {
    %c0_i32 = arith.constant 0 : i32
    %c0_i32_0 = arith.constant 0 : i32
    %c0_i32_1 = arith.constant 0 : i32
    return %c0_i32, %c0_i32_0 : i32, i32
  }
  func.func @transform_4(%arg0: i32) -> (i32, i32) {
    %c0_i32 = arith.constant 0 : i32
    %c0_i32_0 = arith.constant 0 : i32
    %c0_i32_1 = arith.constant 0 : i32
    return %c0_i32, %c0_i32_0 : i32, i32
  }
  func.func @transform_5(%arg0: i32) -> (i32, i32) {
    %c0_i32 = arith.constant 0 : i32
    %c0_i32_0 = arith.constant 0 : i32
    %c0_i32_1 = arith.constant 0 : i32
    return %c0_i32, %c0_i32_0 : i32, i32
  }
  func.func @transform_6(%arg0: i32) -> (i32, i32) {
    %c0_i32 = arith.constant 0 : i32
    %c0_i32_0 = arith.constant 0 : i32
    %c0_i32_1 = arith.constant 0 : i32
    return %c0_i32, %c0_i32_0 : i32, i32
  }
  func.func @transform_7(%arg0: i32) -> (i32, i32) {
    %c0_i32 = arith.constant 0 : i32
    %c0_i32_0 = arith.constant 0 : i32
    return %arg0, %c0_i32 : i32, i32
  }
}

</mosaic_0001>

<bundles_post_ra>
// kernel: tpu_custom_call.1
= control target key start
LH: loop header
LB: loop body
LE: loop exit
PB: predicated region body
PF: predicated region fallthrough
CT: control target
= control target key end

     0   :  { %s6704_s24 = smov 0   ;;  %s12337_s0 = inlined_call_operand.vmem [shape: f32[512,32], index: 0, kind: input, shape index: {}]   ;;  %s12338_s1 = inlined_call_operand.vmem [shape: f32[32,32], index: 1, kind: input, shape index: {}]   ;;  %s12339_s2 = inlined_call_operand.vmem [shape: f32[1,32], index: 2, kind: input, shape index: {}]   ;;  %s12340_s3 = inlined_call_operand.vmem [shape: f32[32,64], index: 3, kind: input, shape index: {}]   ;;  %s12341_s4 = inlined_call_operand.vmem [shape: f32[1,64], index: 4, kind: input, shape index: {}]   ;;  %s12342_s5 = inlined_call_operand.vmem [shape: f32[64,2], index: 5, kind: input, shape index: {}]   ;;  %s12343_s6 = inlined_call_operand.vmem [shape: f32[1,2], index: 6, kind: input, shape index: {}]   ;;  %s12344_s7 = inlined_call_operand.vmem [shape: f32[512,1], index: 7, kind: output, shape index: {}]  }
   0x1 LB: > { %s6308_s25 = sadd.s32 4294967295, %s6654_s24   ;;  %p6312_p0 = scmp.ge.s32.totalorder %s6654_s24, 1  ;;  %s6654_s24 = sphi %s6704_s24, %s17_s24  }
   0x2   : > { %p238_p1 = scmp.lt.s32.totalorder %s6654_s24, 3 }
   0x4   : > { %p239_p2 = pnand %p6312_p0, %p238_p1 }
   0x6   : > { %242 = sbr.rel (%p239_p2) target bundleno = 1849 (0x739), region = 48 }
   0xb   : > { %v317_v0 = vld [vmem:[%s12338_s1 + $0x18] sm:$0xff]  ;;  %v316_v1 = vld [vmem:[%s12338_s1 + $0x10] sm:$0xff]  ;;  %s6313_s30 = sshll.u32 %s6308_s25, 5  ;;  %v315_v2 = vld [vmem:[%s12338_s1 + $0x8] sm:$0xff]  ;;  %vm322_vm0 = vcmask 261120   ;;  %s6663_s18 = smov 127  }
   0xc   : > { %431 = vmatpush.msra.mxu0 %v317_v0  ;;  %p271_p3 = scmp.lt.s32.totalorder %s6313_s30, 63  ;;  %6543 = vmatpush.msra.mxu3 %v317_v0  ;;  %v314_v3 = vld [vmem:[%s12338_s1] sm:$0xff]  ;;  %v12355_v44 = vmov 920167782   ;;  %v12368_v46 = vmov 1326507024  }
   0xd   : > { %v6783_v27 = vld [vmem:[%s12339_s2] ss:$0 sm:$0xff]  ;;  %v12353_v49 = vmov 2102212464   ;;  %v12350_v53 = vmov 2475754826  }
   0xe   : > { %432 = vmatpush.msra.mxu0 %v316_v1  ;;  %s13158_s30 = smov (!%p271_p3, %s6313_s30), 63  ;;  %6544 = vmatpush.msra.mxu3 %v316_v1  ;;  %v12348_v55 = vmov 2131351028   ;;  %v12359_v63 = vmov 683565275  }
   0xf   : > { %s6314_s12 = sshll.u32 %s13158_s30, 3 }
  0x10   : > { %433 = vmatpush.msra.mxu0 %v315_v2  ;;  %6545 = vmatpush.msra.mxu3 %v315_v2  ;;  %s6732_s15 = scalar_lea.vmem %s12337_s0, %s6314_s12  ;;  %s12178_s21 = scalar_lea.vmem %s12344_s7, %s6314_s12 }
  0x11   : > { %v282_v4 = vld [vmem:[%s6732_s15] sm:$0xff]  ;;  %v283_v5 = vld [vmem:[%s6732_s15 + $0x8] sm:$0xff]  ;;  %v284_v6 = vld [vmem:[%s6732_s15 + $0x10] sm:$0xff] }
  0x12   : > { %434 = vmatpush.msra.mxu0 %v314_v3  ;;  %6546 = vmatpush.msra.mxu3 %v314_v3  ;;  %v285_v7 = vld [vmem:[%s6732_s15 + $0x18] sm:$0xff]  ;;  %v286_v8 = vld [vmem:[%s6732_s15 + $0x20] sm:$0xff]  ;;  %v287_v9 = vld [vmem:[%s6732_s15 + $0x28] sm:$0xff] }
  0x13   : > { %6317 = vmatmul.msk.f32.vlgmr.msra.gmra.mxu0 %vm322_vm0, %v282_v4  ;;  %v288_v10 = vld [vmem:[%s6732_s15 + $0x30] sm:$0xff]  ;;  %v307_v11 = vld [vmem:[%s6732_s15 + $0xc8] sm:$0xff]  ;;  %v289_v12 = vld [vmem:[%s6732_s15 + $0x38] sm:$0xff] }
  0x14   : > { %6342 = vmatmul.msk.f32.vlgmr.msra.gmra.mxu3 %vm322_vm0, %v307_v11  ;;  %v308_v13 = vld [vmem:[%s6732_s15 + $0xd0] sm:$0xff]  ;;  %v290_v14 = vld [vmem:[%s6732_s15 + $0x40] sm:$0xff]  ;;  %v309_v15 = vld [vmem:[%s6732_s15 + $0xd8] sm:$0xff] }
  0x15   : > { %v291_v16 = vld [vmem:[%s6732_s15 + $0x48] sm:$0xff]  ;;  %v310_v17 = vld [vmem:[%s6732_s15 + $0xe0] sm:$0xff]  ;;  %v292_v18 = vld [vmem:[%s6732_s15 + $0x50] sm:$0xff] }
  0x16   : > { %v311_v19 = vld [vmem:[%s6732_s15 + $0xe8] sm:$0xff]  ;;  %v293_v20 = vld [vmem:[%s6732_s15 + $0x58] sm:$0xff]  ;;  %v312_v21 = vld [vmem:[%s6732_s15 + $0xf0] sm:$0xff] }
  0x17   : > { %v294_v22 = vld [vmem:[%s6732_s15 + $0x60] sm:$0xff]  ;;  %v313_v23 = vld [vmem:[%s6732_s15 + $0xf8] sm:$0xff]  ;;  %v295_v24 = vld [vmem:[%s6732_s15 + $0x68] sm:$0xff] }
  0x18   : > { %v296_v25 = vld [vmem:[%s6732_s15 + $0x70] sm:$0xff]  ;;  %v297_v26 = vld [vmem:[%s6732_s15 + $0x78] sm:$0xff]  ;;  %v298_v29 = vld [vmem:[%s6732_s15 + $0x80] sm:$0xff] }
  0x19   : > { %v299_v35 = vld [vmem:[%s6732_s15 + $0x88] sm:$0xff]  ;;  %v300_v38 = vld [vmem:[%s6732_s15 + $0x90] sm:$0xff]  ;;  %v301_v43 = vld [vmem:[%s6732_s15 + $0x98] sm:$0xff] }
  0x1a   : > { %v302_v61 = vld [vmem:[%s6732_s15 + $0xa0] sm:$0xff] }
  0x1b   : > { %6318 = vmatmul.msk.f32.gmra.mxu0 %vm322_vm0, %v283_v5 }
  0x1c   : > { %6343 = vmatmul.msk.f32.gmra.mxu3 %vm322_vm0, %v308_v13 }
  0x23   : > { %6319 = vmatmul.msk.f32.gmra.mxu0 %vm322_vm0, %v284_v6 }
  0x24   : > { %6344 = vmatmul.msk.f32.gmra.mxu3 %vm322_vm0, %v309_v15 }
  0x2b   : > { %6320 = vmatmul.msk.f32.gmra.mxu0 %vm322_vm0, %v285_v7 }
  0x2c   : > { %6345 = vmatmul.msk.f32.gmra.mxu3 %vm322_vm0, %v310_v17 }
  0x33   : > { %6321 = vmatmul.msk.f32.gmra.mxu0 %vm322_vm0, %v286_v8 }
  0x34   : > { %6346 = vmatmul.msk.f32.gmra.mxu3 %vm322_vm0, %v311_v19 }
  0x3b   : > { %6322 = vmatmul.msk.f32.gmra.mxu0 %vm322_vm0, %v287_v9 }
  0x3c   : > { %6347 = vmatmul.msk.f32.gmra.mxu3 %vm322_vm0, %v312_v21 }
  0x43   : > { %6323 = vmatmul.msk.f32.gmra.mxu0 %vm322_vm0, %v288_v10 }
  0x44   : > { %6348 = vmatmul.msk.f32.gmra.mxu3 %vm322_vm0, %v313_v23 }
  0x4b   : > { %6324 = vmatmul.msk.f32.gmra.mxu0 %vm322_vm0, %v289_v12 }
  0x53   : > { %6325 = vmatmul.msk.f32.gmra.mxu0 %vm322_vm0, %v290_v14  ;;  %v303_v14 = vld [vmem:[%s6732_s15 + $0xa8] sm:$0xff] }
  0x5b   : > { %6326 = vmatmul.msk.f32.gmra.mxu0 %vm322_vm0, %v291_v16 }
  0x63   : > { %6327 = vmatmul.msk.f32.gmra.mxu0 %vm322_vm0, %v292_v18 }
  0x6b   : > { %6328 = vmatmul.msk.f32.gmra.mxu0 %vm322_vm0, %v293_v20 }
  0x73   : > { %6329 = vmatmul.msk.f32.gmra.mxu0 %vm322_vm0, %v294_v22 }
  0x7b   : > { %6330 = vmatmul.msk.f32.gmra.mxu0 %vm322_vm0, %v295_v24 }
  0x83   : > { %6331 = vmatmul.msk.f32.gmra.mxu0 %vm322_vm0, %v296_v25 }
  0x8b   : > { %6332 = vmatmul.msk.f32.gmra.mxu0 %vm322_vm0, %v297_v26 }
  0x90   : > { %v436_v28 = vpop.f32.mrf.mxu0 }
  0x91   : > { %v6787_v30 = vadd.f32 %v6783_v27, %v436_v28 }
  0x93   : > { %v535_v31 = vand.u32 2139095040, %v6787_v30  ;;  %6333 = vmatmul.msk.f32.gmra.mxu0 %vm322_vm0, %v298_v29  ;;  %v12347_v51 = vand.u32 2147483647, %v6787_v30 }
  0x95   : > { %v536_v32 = vshrl.u32 %v535_v31, 23  ;;  %v539_v3 = vand.u32 8388607, %v12347_v51 }
  0x97   : > { %v6349_v33 = vadd.s32 4294967169, %v536_v32  ;;  %v540_v11 = vor.u32 8388608, %v539_v3  ;;  %v304_v32 = vld [vmem:[%s6732_s15 + $0xb0] sm:$0xff] }
  0x98   : > { %v439_v34 = vpop.f32.mrf.mxu0 }
  0x99   : > { %v542_v36 = vadd.s32 1, %v6349_v33  ;;  %v6815_v59 = vadd.f32 %v6783_v27, %v439_v34  ;;  %v6862_v22 = vshll.u32 %v540_v11, 8 }
  0x9b   : > { %6334 = vmatmul.msk.f32.gmra.mxu0 %vm322_vm0, %v299_v35  ;;  %vm543_vm1 = vcmp.gt.s32.totalorder %v542_v36, 0  ;;  %v689_v9 = vand.u32 2139095040, %v6815_v59  ;;  %v581_v29 = vand.u32 65535, %v6862_v22 }
  0x9c   : > { %v544_v39 = vsel %vm543_vm1, %v542_v36, 0 }
  0x9d   : > { %v546_v40 = vand.u32 31, %v544_v39  ;;  %v6803_v48 = vshrl.u32 %v544_v39, 5  ;;  %v690_v17 = vshrl.u32 %v689_v9, 23 }
  0x9f   : > { %v6795_v41 = vsub.s32 32, %v546_v40  ;;  %v558_v50 = vshll.u32 %v12353_v49, %v546_v40  ;;  %v561_v52 = vshll.u32 %v12355_v44, %v546_v40  ;;  %v549_v0 = vshll.u32 %v12359_v63, %v546_v40 }
  0xa0   : > { %v442_v37 = vpop.f32.mrf.mxu0  ;;  %v552_v1 = vshll.u32 %v12350_v53, %v546_v40  ;;  %v555_v2 = vshll.u32 %v12348_v55, %v546_v40  ;;  %vm567_vm2 = vcmp.lt.s32.totalorder %v6803_v48, 4  ;;  %vm564_vm3 = vcmp.lt.s32.totalorder %v6803_v48, 1 }
  0xa1   : > { %v559_v45 = vshrl.u32 %v12355_v44, %v6795_v41  ;;  %v562_v47 = vshrl.u32 %v12368_v46, %v6795_v41  ;;  %v550_v54 = vshrl.u32 %v12350_v53, %v6795_v41  ;;  %v553_v56 = vshrl.u32 %v12348_v55, %v6795_v41 }
  0xa2   : > { %v556_v57 = vshrl.u32 %v12353_v49, %v6795_v41  ;;  %vm566_vm4 = vcmp.lt.s32.totalorder %v6803_v48, 3  ;;  %v6839_v10 = vadd.f32 %v6783_v27, %v442_v37  ;;  %vm565_vm5 = vcmp.lt.s32.totalorder %v6803_v48, 2 }
  0xa3   : > { %6335 = vmatmul.msk.f32.gmra.mxu0 %vm322_vm0, %v300_v38  ;;  %v560_v58 = vor.u32 %v559_v45, %v558_v50  ;;  %v563_v62 = vor.u32 %v562_v47, %v561_v52  ;;  %v6825_v4 = vor.u32 %v550_v54, %v549_v0  ;;  %v6827_v5 = vor.u32 %v553_v56, %v552_v1 }
  0xa4   : > { %v6829_v6 = vor.u32 %v556_v57, %v555_v2  ;;  %v843_v20 = vand.u32 2139095040, %v6839_v10  ;;  %v6352_v24 = vadd.s32 4294967169, %v690_v17 }
  0xa5   : > { %v573_v7 = vsel %vm567_vm2, %v560_v58, 920167782  ;;  %v577_v8 = vsel %vm567_vm2, %v563_v62, 1326507024  ;;  %v572_v12 = vsel %vm564_vm3, %v6825_v4, %v6827_v5 }
  0xa6   : > { %v574_v13 = vsel %vm566_vm4, %v6829_v6, %v573_v7  ;;  %v576_v15 = vsel %vm564_vm3, %v6827_v5, %v6829_v6  ;;  %v578_v16 = vsel %vm566_vm4, %v560_v58, %v577_v8  ;;  %v844_v28 = vshrl.u32 %v843_v20, 23 }
  0xa7   : > { %v575_v19 = vsel %vm565_vm5, %v572_v12, %v574_v13  ;;  %v579_v21 = vsel %vm565_vm5, %v576_v15, %v578_v16  ;;  %v696_v33 = vadd.s32 1, %v6352_v24  ;;  %v5463_v12 = vld [vmem:[%s12340_s3 + $0x18] sm:$0xff] }
  0xa8   : > { %v445_v42 = vpop.f32.mrf.mxu0  ;;  %v606_v25 = vshrl.u32 %v575_v19, 16  ;;  %v584_v26 = vshrl.u32 %v579_v21, 16  ;;  %v6355_v36 = vadd.s32 4294967169, %v844_v28  ;;  %v605_v38 = vand.u32 65535, %v575_v19  ;;  %5576 = vmatpush.msra.mxu1 %v5463_v12  ;;  %6547 = vmatpush.msrb.mxu3 %v5463_v12  ;;  %v5462_v28 = vld [vmem:[%s12340_s3 + $0x10] sm:$0xff] }
  0xa9   : > { %v6865_v23 = vadd.f32 %v6783_v27, %v445_v42  ;;  %v583_v42 = vand.u32 65535, %v579_v21  ;;  %vm697_vm6 = vcmp.gt.s32.totalorder %v696_v33, 0 }
  0xaa   : > { %v6870_v34 = vmul.u32 %v606_v25, %v581_v29  ;;  %v6872_v35 = vmul.u32 %v584_v26, %v581_v29  ;;  %v850_v52 = vadd.s32 1, %v6355_v36  ;;  %v607_v56 = vmul.u32 %v605_v38, %v581_v29  ;;  %5577 = vmatpush.msra.mxu1 %v5462_v28  ;;  %6548 = vmatpush.msrb.mxu3 %v5462_v28 }
  0xab   : > { %6336 = vmatmul.msk.f32.gmra.mxu0 %vm322_vm0, %v301_v43  ;;  %v997_v31 = vand.u32 2139095040, %v6865_v23  ;;  %v582_v43 = vshrl.u32 %v6862_v22, 16  ;;  %v698_v58 = vsel %vm697_vm6, %v696_v33, 0  ;;  %v585_v62 = vmul.u32 %v583_v42, %v581_v29  ;;  %v306_v33 = vld [vmem:[%s6732_s15 + $0xc0] sm:$0xff] }
  0xac   : > { %v611_v45 = vshll.u32 %v6870_v34, 16  ;;  %v589_v50 = vshll.u32 %v6872_v35, 16  ;;  %v6893_v7 = vand.u32 31, %v698_v58  ;;  %vm851_vm9 = vcmp.gt.s32.totalorder %v850_v52, 0 }
  0xad   : > { %v998_v39 = vshrl.u32 %v997_v31, 23  ;;  %v6885_v57 = vmul.u32 %v605_v38, %v582_v43  ;;  %v6888_v0 = vmul.u32 %v583_v42, %v582_v43  ;;  %v852_v20 = vsel %vm851_vm9, %v850_v52, 0 }
  0xae   : > { %vm615_vm7 = vc.u32 %v607_v56, %v611_v45  ;;  %v6890_v1 = vadd.s32 %v611_v45, %v607_v56  ;;  %vm593_vm8 = vc.u32 %v585_v62, %v589_v50  ;;  %v595_v3 = vadd.s32 %v589_v50, %v585_v62 }
  0xaf   : > { %v613_v9 = vshll.u32 %v6885_v57, 16  ;;  %v591_v13 = vshll.u32 %v6888_v0, 16  ;;  %v588_v29 = vmul.u32 %v584_v26, %v582_v43  ;;  %v6917_v31 = vsub.s32 32, %v6893_v7 }
  0xb0   : > { %v448_v60 = vpop.f32.mrf.mxu0  ;;  %v548_v36 = vshrl.u32 %v12359_v63, %v6795_v41  ;;  %v569_v41 = vsel %vm567_vm2, %v6829_v6, 2102212464  ;;  %v712_v52 = vshll.u32 %v12353_v49, %v6893_v7  ;;  %v715_v12 = vshll.u32 %v12355_v44, %v6893_v7 }
  0xb1   : > { %v6875_v37 = vadd.f32 %v6783_v27, %v448_v60  ;;  %v6358_v60 = vadd.s32 4294967169, %v998_v39  ;;  %vm6909_vm10 = vc.u32 %v6890_v1, %v613_v9  ;;  %vm597_vm11 = vc.u32 %v595_v3, %v591_v13 }
  0xb2   : > { %v568_v50 = vsel %vm564_vm3, %v548_v36, %v6825_v4  ;;  %v570_v3 = vsel %vm566_vm4, %v6827_v5, %v569_v41  ;;  %v590_v13 = vshrl.u32 %v6872_v35, 16  ;;  %v5461_v5 = vld [vmem:[%s12340_s3 + $0x8] sm:$0xff]  ;;  %v6973_v28 = vshrl.u32 %v852_v20, 5 }
  0xb3   : > { %6337 = vmatmul.msk.f32.gmra.mxu0 %vm322_vm0, %v302_v61  ;;  %12639 = vst [vmem:[#allocation2_spill] sm:$0xff] %v6875_v37  ;;  %v1151_v54 = vand.u32 2139095040, %v6875_v37  ;;  %v305_v61 = vld [vmem:[%s6732_s15 + $0xb8] sm:$0xff]  ;;  %v1004_v11 = vadd.s32 1, %v6358_v60  ;;  %v716_v60 = vshrl.u32 %v12368_v46, %v6917_v31  ;;  %5578 = vmatpush.msra.mxu1 %v5461_v5 }
  0xb4   : > { %6549 = vmatpush.msrb.mxu3 %v5461_v5  ;;  %vm875_vm1 = vcmp.lt.s32.totalorder %v6973_v28, 4 }
  0xb5   : > { %v1152_v8 = vshrl.u32 %v1151_v54, 23  ;;  %vm1005_vm12 = vcmp.gt.s32.totalorder %v1004_v11, 0  ;;  %v713_v54 = vshrl.u32 %v12355_v44, %v6917_v31 }
  0xb8   : > { %v451_v18 = vpop.f32.mrf.mxu0 }
  0xb9   : > { %v6881_v47 = vadd.f32 %v6783_v27, %v451_v18  ;;  %v610_v18 = vmul.u32 %v606_v25, %v582_v43  ;;  %v6361_v25 = vadd.s32 4294967169, %v1152_v8  ;;  %v6929_v43 = vshrl.u32 %v698_v58, 5 }
  0xba   : > { %v612_v8 = vshrl.u32 %v6870_v34, 16  ;;  %v717_v34 = vor.u32 %v716_v60, %v715_v12 }
  0xbb   : > { %6338 = vmatmul.msk.f32.gmra.mxu0 %vm322_vm0, %v303_v14  ;;  %12640 = vst [vmem:[#allocation3_spill] sm:$0xff] %v6881_v47  ;;  %v1305_v2 = vand.u32 2139095040, %v6881_v47  ;;  %v12345_v14 = vmov 0   ;;  %v1158_v56 = vadd.s32 1, %v6361_v25  ;;  %vm721_vm13 = vcmp.lt.s32.totalorder %v6929_v43, 4 }
  0xbc   : > { %v616_v15 = vsel %vm615_vm7, 1, %v12345_v14  ;;  %v594_v17 = vsel %vm593_vm8, 1, %v12345_v14  ;;  %v620_v39 = vsel %vm6909_vm10, 1, %v12345_v14  ;;  %v598_v42 = vsel %vm597_vm11, 1, %v12345_v14 }
  0xbd   : > { %v1306_v21 = vshrl.u32 %v1305_v2, 23  ;;  %v596_v38 = vadd.s32 %v594_v17, %v588_v29  ;;  %vm1159_vm14 = vcmp.gt.s32.totalorder %v1158_v56, 0 }
  0xbe   : > { %v1160_v48 = vsel %vm1159_vm14, %v1158_v56, 0 }
  0xbf   : > { %v6364_v45 = vadd.s32 4294967169, %v1306_v21  ;;  %v600_v62 = vadd.s32 %v598_v42, %v596_v38  ;;  %v511_v38 = vpop.f32.mrf.mxu3 }
  0xc0   : > { %v454_v40 = vpop.f32.mrf.mxu0  ;;  %v7005_v60 = vadd.f32 %v6783_v27, %v511_v38 }
  0xc1   : > { %v6903_v16 = vadd.f32 %v6783_v27, %v454_v40  ;;  %v6925_v40 = vand.u32 31, %v852_v20  ;;  %v601_v35 = vadd.s32 %v600_v62, %v590_v13  ;;  %v592_v20 = vshrl.u32 %v6888_v0, 16 }
  0xc2   : > { %12648 = vst [vmem:[#allocation9_spill] sm:$0xff] %v7005_v60  ;;  %v7009_v62 = vsel %vm721_vm13, %v717_v34, 1326507024 }
  0xc3   : > { %6339 = vmatmul.msk.f32.gmra.mxu0 %vm322_vm0, %v304_v32  ;;  %12641 = vst [vmem:[#allocation4_spill] sm:$0xff] %v6903_v16  ;;  %v618_v32 = vadd.s32 %v616_v15, %v610_v18  ;;  %v1459_v26 = vand.u32 2139095040, %v6903_v16  ;;  %v6950_v6 = vsub.s32 32, %v6925_v40  ;;  %v6960_v15 = vor.u32 %v713_v54, %v712_v52 }
  0xc4   : > { %v869_v41 = vshll.u32 %v12355_v44, %v6925_v40  ;;  %v7000_v52 = vadd.s32 %v601_v35, %v592_v20  ;;  %v7002_v54 = vand.u32 31, %v1160_v48 }
  0xc5   : > { %v622_v58 = vadd.s32 %v620_v39, %v618_v32  ;;  %v1460_v2 = vshrl.u32 %v1459_v26, 23  ;;  %v867_v29 = vshrl.u32 %v12355_v44, %v6950_v6  ;;  %v5460_v32 = vld [vmem:[%s12340_s3] sm:$0xff]  ;;  %v870_v36 = vshrl.u32 %v12368_v46, %v6950_v6 }
  0xc6   : > { %5579 = vmatpush.msra.mxu1 %v5460_v32  ;;  %6550 = vmatpush.msrb.mxu3 %v5460_v32  ;;  %v6988_v39 = vsel %vm721_vm13, %v6960_v15, 920167782  ;;  %12647 = vst [vmem:[#allocation8_spill] sm:$0xff] %v7002_v54 }
  0xc7   : > { %v623_v18 = vadd.s32 %v622_v58, %v612_v8  ;;  %v6367_v25 = vadd.s32 4294967169, %v1460_v2  ;;  %v621_v8 = vadd.s32 %v6890_v1, %v613_v9  ;;  %v7028_v1 = vsub.s32 32, %v7002_v54 }
  0xc8   : > { %v457_v24 = vpop.f32.mrf.mxu0  ;;  %v4385_v9 = vand.u32 2139095040, %v7005_v60 }
  0xc9   : > { %v6947_v4 = vadd.f32 %v6783_v27, %v457_v24  ;;  %v6971_v24 = vsel %vm565_vm5, %v568_v50, %v570_v3  ;;  %v866_v50 = vshll.u32 %v12353_v49, %v6925_v40  ;;  %v1466_v58 = vadd.s32 1, %v6367_v25  ;;  %12650 = vst [vmem:[#allocation11_spill] sm:$0xff] %v7028_v1 }
  0xca   : > { %v871_v3 = vor.u32 %v870_v36, %v869_v41  ;;  %vm627_vm2 = vc.u32 %v7000_v52, %v621_v8  ;;  %v625_v41 = vmul.u32 %v6862_v22, %v6971_v24  ;;  %v1174_v24 = vshll.u32 %v12353_v49, %v7002_v54 }
  0xcb   : > { %6340 = vmatmul.msk.f32.gmra.mxu0 %vm322_vm0, %v305_v61  ;;  %v6944_v61 = vsel %vm1005_vm12, %v1004_v11, 0  ;;  %12644 = vst [vmem:[#allocation5_spill] sm:$0xff] %v6947_v4  ;;  %v1312_v11 = vadd.s32 1, %v6364_v45  ;;  %v1613_v19 = vand.u32 2139095040, %v6947_v4  ;;  %v7011_v2 = vor.u32 %v867_v29, %v866_v50 }
  0xcc   : > { %v6963_v17 = vand.u32 31, %v6944_v61  ;;  %vm1467_vm3 = vcmp.gt.s32.totalorder %v1466_v58, 0  ;;  %v7041_v35 = vshrl.u32 %v6944_v61, 5  ;;  %v1175_v61 = vshrl.u32 %v12355_v44, %v7028_v1 }
  0xcd   : > { %vm1313_vm15 = vcmp.gt.s32.totalorder %v1312_v11, 0  ;;  %v1614_v0 = vshrl.u32 %v1613_v19, 23  ;;  %v7034_v19 = vsel %vm875_vm1, %v7011_v2, 920167782  ;;  %v1468_v20 = vsel %vm1467_vm3, %v1466_v58, 0 }
  0xce   : > { %12645 = vst [vmem:[#allocation6_spill] sm:$0xff] %v6963_v17  ;;  %v6991_v26 = vsub.s32 32, %v6963_v17  ;;  %v1314_v56 = vsel %vm1313_vm15, %v1312_v11, 0  ;;  %v1020_v5 = vshll.u32 %v12353_v49, %v6963_v17  ;;  %v1023_v32 = vshll.u32 %v12355_v44, %v6963_v17 }
  0xcf   : > { %v6370_v34 = vadd.s32 4294967169, %v1614_v0  ;;  %12651 = vst [vmem:[#allocation12_spill] sm:$0xff] %v7041_v35  ;;  %vm1029_vm4 = vcmp.lt.s32.totalorder %v7041_v35, 4  ;;  %v12670_v4 = vmov 920167782  }
  0xd0   : > { %v460_v21 = vpop.f32.mrf.mxu0  ;;  %v1021_v12 = vshrl.u32 %v12355_v44, %v6991_v26 }
  0xd1   : > { %v6994_v42 = vadd.f32 %v6783_v27, %v460_v21  ;;  %v7038_v21 = vsel %vm875_vm1, %v871_v3, 1326507024  ;;  %v1620_v50 = vadd.s32 1, %v6370_v34 }
  0xd2   : > { %v7043_v25 = vor.u32 %v1021_v12, %v1020_v5  ;;  %v4386_v12 = vshrl.u32 %v4385_v9, 23 }
  0xd3   : > { %6341 = vmatmul.msk.f32.gmra.mxu0 %vm322_vm0, %v306_v33  ;;  %v614_v33 = vshrl.u32 %v6885_v57, 16  ;;  %12646 = vst [vmem:[#allocation7_spill] sm:$0xff] %v6994_v42  ;;  %v1767_v11 = vand.u32 2139095040, %v6994_v42  ;;  %v1024_v57 = vshrl.u32 %v12368_v46, %v6991_v26  ;;  %vm1621_vm5 = vcmp.gt.s32.totalorder %v1620_v50, 0 }
  0xd4   : > { %12652 = vst [vmem:[#allocation13_spill] sm:$0xff] %v7043_v25  ;;  %v7067_v22 = vsel %vm1029_vm4, %v7043_v25, 920167782 }
  0xd5   : > { %v624_v45 = vadd.s32 %v623_v18, %v614_v33  ;;  %v7022_v18 = vand.u32 31, %v1314_v56  ;;  %v1768_v33 = vshrl.u32 %v1767_v11, 23  ;;  %v1025_v0 = vor.u32 %v1024_v57, %v1023_v32  ;;  %12656 = vst [vmem:[#allocation17_spill] sm:$0xff] %v7067_v22 }
  0xd6   : > { %v7058_v11 = vshrl.u32 %v1160_v48, 5  ;;  %v1177_v48 = vshll.u32 %v12355_v44, %v7002_v54  ;;  %v12352_v57 = vand.u32 2147483647, %v6815_v59 }
  0xd7   : > { %v628_v13 = vadd.s32 1, %v624_v45  ;;  %12649 = vst [vmem:[#allocation10_spill] sm:$0xff] %v7022_v18  ;;  %v7048_v38 = vsub.s32 32, %v7022_v18  ;;  %v6373_v5 = vadd.s32 4294967169, %v1768_v33  ;;  %v7080_v9 = vsel %vm1029_vm4, %v1025_v0, 1326507024 }
  0xd8   : > { %v463_v29 = vpop.f32.mrf.mxu0  ;;  %12655 = vst [vmem:[#allocation16_spill] sm:$0xff] %v7058_v11  ;;  %v7085_v33 = vshrl.u32 %v1314_v56, 5  ;;  %v1328_v14 = vshll.u32 %v12353_v49, %v7022_v18  ;;  %v1622_v0 = vsel %vm1621_vm5, %v1620_v50, 0  ;;  %vm1183_vm6 = vcmp.lt.s32.totalorder %v7058_v11, 4 }
  0xd9   : > { %v629_v36 = vsel %vm627_vm2, %v628_v13, %v624_v45  ;;  %12653 = vst [vmem:[#allocation14_spill] sm:$0xff] %v7048_v38  ;;  %v7055_v3 = vadd.f32 %v6783_v27, %v463_v29  ;;  %v1178_v45 = vshrl.u32 %v12368_v46, %v7028_v1  ;;  %v7071_v13 = vand.u32 31, %v1468_v20 }
  0xda   : > { %v7062_v58 = vadd.s32 %v629_v36, %v625_v41  ;;  %v1329_v34 = vshrl.u32 %v12355_v44, %v7048_v38  ;;  %12658 = vst [vmem:[#allocation19_spill] sm:$0xff] %v7080_v9  ;;  %v7082_v29 = vor.u32 %v1175_v61, %v1174_v24  ;;  %v6424_v36 = vadd.s32 4294967169, %v4386_v12 }
  0xdb   : > { %12654 = vst [vmem:[#allocation15_spill] sm:$0xff] %v7055_v3  ;;  %v1921_v32 = vand.u32 2139095040, %v7055_v3  ;;  %v1179_v41 = vor.u32 %v1178_v45, %v1177_v48  ;;  %v1332_v55 = vshrl.u32 %v12368_v46, %v7048_v38  ;;  %v7093_v53 = vsub.s32 32, %v7071_v13 }
  0xdc   : > { %12657 = vst [vmem:[#allocation18_spill] sm:$0xff] %v7071_v13  ;;  %v631_v51 = vadd.s32 536870912, %v7062_v58  ;;  %v1774_v61 = vadd.s32 1, %v6373_v5  ;;  %v7096_v24 = vor.u32 %v1329_v34, %v1328_v14  ;;  %v7099_v56 = vadd.s32 %v621_v8, %v7000_v52 }
  0xdd   : > { %12659 = vst [vmem:[#allocation20_spill] sm:$0xff] %v7082_v29  ;;  %v7103_v12 = vand.u32 8388607, %v12352_v57  ;;  %v7108_v45 = vsel %vm1183_vm6, %v7082_v29, 920167782  ;;  %v1331_v50 = vshll.u32 %v12355_v44, %v7022_v18  ;;  %v1922_v5 = vshrl.u32 %v1921_v32, 23 }
  0xde   : > { %12660 = vst [vmem:[#allocation21_spill] sm:$0xff] %v7085_v33  ;;  %v4392_v48 = vadd.s32 1, %v6424_v36  ;;  %v7114_v14 = vsel %vm1183_vm6, %v1179_v41, 1326507024  ;;  %vm1337_vm7 = vcmp.lt.s32.totalorder %v7085_v33, 4  ;;  %v7117_v52 = vand.u32 31, %v1622_v0 }
  0xdf   : > { %12661 = vst [vmem:[#allocation22_spill] sm:$0xff] %v7093_v53  ;;  %v7119_v8 = vshrl.u32 %v631_v51, 30  ;;  %v1333_v34 = vor.u32 %v1332_v55, %v1331_v50  ;;  %v1483_v57 = vshrl.u32 %v12355_v44, %v7093_v53  ;;  %vm1775_vm8 = vcmp.gt.s32.totalorder %v1774_v61, 0 }
  0xe0   : > { %12662 = vst [vmem:[#allocation23_spill] sm:$0xff] %v7096_v24  ;;  %v703_v49 = vshll.u32 %v12359_v63, %v6893_v7  ;;  %v7128_v32 = vsel %vm1337_vm7, %v7096_v24, 920167782  ;;  %v7130_v36 = vshrl.u32 %v1468_v20, 5  ;;  %v1486_v41 = vshrl.u32 %v12368_v46, %v7093_v53  ;;  %v466_v51 = vpop.f32.mrf.mxu0 }
  0xe1   : > { %12663 = vst [vmem:[#allocation24_spill] sm:$0xff] %v7108_v45  ;;  %v12668_v50 = vmov 2102212464   ;;  %v6376_v3 = vadd.s32 4294967169, %v1922_v5  ;;  %vm4393_vm9 = vcmp.gt.s32.totalorder %v4392_v48, 0  ;;  %v1485_v16 = vshll.u32 %v12670_v4, %v7071_v13 }
  0xe2   : > { %12664 = vst [vmem:[#allocation25_spill] sm:$0xff] %v7114_v14  ;;  %v1482_v44 = vshll.u32 %v12668_v50, %v7071_v13  ;;  %v12669_v63 = vmov 2475754826   ;;  %v7142_v20 = vsub.s32 32, %v7117_v52  ;;  %v1776_v24 = vsel %vm1775_vm8, %v1774_v61, 0 }
  0xe3   : > { %12665 = vst [vmem:[#allocation26_spill] sm:$0xff] %v7117_v52  ;;  %v704_v42 = vshrl.u32 %v12669_v63, %v6917_v31  ;;  %v633_v46 = vshll.u32 %v7119_v8, 30  ;;  %v7147_v55 = vsel %vm1337_vm7, %v1333_v34, 1326507024  ;;  %v7152_v5 = vadd.f32 %v6783_v27, %v466_v51 }
  0xe4   : > { %12666 = vst [vmem:[#allocation27_spill] sm:$0xff] %v7128_v32  ;;  %v7149_v53 = vor.u32 %v1483_v57, %v1482_v44  ;;  %v12675_v32 = vmov 683565275   ;;  %v1487_v13 = vor.u32 %v1486_v41, %v1485_v16  ;;  %vm12416_vm10 = vcmp.lt.s32.totalorder %v7130_v36, 4 }
  0xe5   : > { %12667 = vst [vmem:[#allocation28_spill] sm:$0xff] %v7130_v36  ;;  %v7156_v18 = vshrl.u32 %v12675_v32, %v6917_v31  ;;  %v4394_v38 = vsel %vm4393_vm9, %v4392_v48, 0  ;;  %v706_v61 = vshll.u32 %v12669_v63, %v6893_v7  ;;  %v7161_v47 = vand.u32 31, %v1776_v24 }
  0xe6   : > { %12671 = vst [vmem:[#allocation29_spill] sm:$0xff] %v7142_v20  ;;  %v1928_v34 = vadd.s32 1, %v6376_v3  ;;  %v12677_v44 = vmov 2131351028   ;;  %v7167_v51 = vshrl.u32 %v1622_v0, 5  ;;  %v1637_v33 = vshrl.u32 %v12670_v4, %v7142_v20 }
  0xe7   : > { %12672 = vst [vmem:[#allocation30_spill] sm:$0xff] %v7147_v55  ;;  %v7163_v55 = vor.u32 %v704_v42, %v703_v49  ;;  %v707_v57 = vshrl.u32 %v12677_v44, %v6917_v31  ;;  %v12679_v16 = vmov 1326507024   ;;  %v7174_v48 = vsub.s32 %v7062_v58, %v633_v46 }
  0xe8   : > { %12673 = vst [vmem:[#allocation31_spill] sm:$0xff] %v7149_v53  ;;  %v1640_v41 = vshrl.u32 %v12679_v16, %v7142_v20  ;;  %v7179_v3 = vsel %vm12416_vm10, %v7149_v53, 920167782  ;;  %v2075_v49 = vand.u32 2139095040, %v7152_v5  ;;  %v4396_v42 = vand.u32 31, %v4394_v38  ;;  %v514_v53 = vpop.f32.mrf.mxu3 }
  0xe9   : > { %12674 = vst [vmem:[#allocation32_spill] sm:$0xff] %v7152_v5  ;;  %v7184_v0 = vshll.u32 %v12677_v44, %v6893_v7  ;;  %v7188_v29 = vsel %vm12416_vm10, %v1487_v13, 1326507024  ;;  %v1636_v46 = vshll.u32 %v12668_v50, %v7117_v52  ;;  %v1639_v58 = vshll.u32 %v12670_v4, %v7117_v52 }
  0xea   : > { %12676 = vst [vmem:[#allocation33_spill] sm:$0xff] %v7161_v47  ;;  %v7196_v5 = vsub.s32 32, %v7161_v47  ;;  %vm1929_vm11 = vcmp.gt.s32.totalorder %v1928_v34, 0  ;;  %v7202_v7 = vshrl.u32 %v12668_v50, %v6917_v31  ;;  %vm12415_vm12 = vcmp.lt.s32.totalorder %v7167_v51, 4 }
  0xeb   : > { %12678 = vst [vmem:[#allocation34_spill] sm:$0xff] %v7167_v51  ;;  %v7204_v13 = vor.u32 %v1637_v33, %v1636_v46  ;;  %vm635_vm14 = vcmp.lt.s32.totalorder %v7174_v48, 0  ;;  %v2076_v52 = vshrl.u32 %v2075_v49, 23  ;;  %v4397_v20 = vsub.s32 32, %v4396_v42 }
  0xec   : > { %12680 = vst [vmem:[#allocation35_spill] sm:$0xff] %v7179_v3  ;;  %v7198_v3 = vor.u32 %v707_v57, %v706_v61  ;;  %v7209_v36 = vadd.f32 %v6783_v27, %v514_v53  ;;  %v636_v14 = vsub.s32 0, %v7174_v48  ;;  %v7212_v61 = vshrl.u32 %v1776_v24, 5 }
  0xed   : > { %12681 = vst [vmem:[#allocation36_spill] sm:$0xff] %v7188_v29  ;;  %v1641_v29 = vor.u32 %v1640_v41, %v1639_v58  ;;  %v1930_v57 = vsel %vm1929_vm11, %v1928_v34, 0  ;;  %v12686_v31 = vand.u32 2147483647, %v7005_v60  ;;  %v4408_v33 = vshll.u32 %v12668_v50, %v4396_v42 }
  0xee   : > { %12682 = vst [vmem:[#allocation37_spill] sm:$0xff] %v7196_v5  ;;  %v1791_v41 = vshrl.u32 %v12670_v4, %v7196_v5  ;;  %v1794_v49 = vshrl.u32 %v12679_v16, %v7196_v5  ;;  %v7223_v46 = vshrl.u32 %v4394_v38, 5  ;;  %v637_v53 = vsel %vm635_vm14, %v636_v14, %v7174_v48 }
  0xef   : > { %12683 = vst [vmem:[#allocation38_spill] sm:$0xff] %v7204_v13  ;;  %v7216_v45 = vand.u32 8388607, %v12686_v31  ;;  %v7229_v24 = vsel %vm12415_vm12, %v7204_v13, 920167782  ;;  %v1790_v58 = vshll.u32 %v12668_v50, %v7161_v47  ;;  %v638_v31 = vclz %v637_v53 }
  0xf0   : > { %12684 = vst [vmem:[#allocation39_spill] sm:$0xff] %v7209_v36  ;;  %v7233_v34 = vsel %vm12415_vm12, %v1641_v29, 1326507024  ;;  %v1793_v60 = vshll.u32 %v12670_v4, %v7161_v47  ;;  %v7239_v38 = vand.u32 31, %v1930_v57  ;;  %v6379_v5 = vadd.s32 4294967169, %v2076_v52 }
  0xf1   : > { %12685 = vst [vmem:[#allocation40_spill] sm:$0xff] %v7212_v61  ;;  %v4399_v14 = vshll.u32 %v12675_v32, %v4396_v42  ;;  %v4400_v11 = vshrl.u32 %v12669_v63, %v4397_v20  ;;  %v4403_v13 = vshrl.u32 %v12677_v44, %v4397_v20  ;;  %v6350_v29 = vadd.s32 4294967294, %v638_v31 }
  0xf2   : > { %12687 = vst [vmem:[#allocation41_spill] sm:$0xff] %v7229_v24  ;;  %v4402_v24 = vshll.u32 %v12669_v63, %v4396_v42  ;;  %v1795_v51 = vor.u32 %v1794_v49, %v1793_v60  ;;  %vm12414_vm15 = vcmp.lt.s32.totalorder %v7212_v61, 4  ;;  %v4405_v47 = vshll.u32 %v12677_v44, %v4396_v42 }
  0xf3   : > { %12688 = vst [vmem:[#allocation42_spill] sm:$0xff] %v7233_v34  ;;  %v7245_v34 = vor.u32 %v1791_v41, %v1790_v58  ;;  %v4406_v52 = vshrl.u32 %v12668_v50, %v4397_v20  ;;  %v4409_v54 = vshrl.u32 %v12670_v4, %v4397_v20  ;;  %vm6351_vm2 = vcmp.lt.s32.totalorder %v6350_v29, 0  ;;  %v469_v58 = vpop.f32.mrf.mxu0 }
  0xf4   : > { %12689 = vst [vmem:[#allocation43_spill] sm:$0xff] %v7239_v38  ;;  %v7253_v1 = vsub.s32 32, %v7239_v38  ;;  %v2082_v37 = vadd.s32 1, %v6379_v5  ;;  %v4398_v31 = vshrl.u32 %v12675_v32, %v4397_v20  ;;  %v641_v41 = vsel %vm6351_vm2, 0, %v6350_v29 }
  0xf5   : > { %12690 = vst [vmem:[#allocation44_spill] sm:$0xff] %v7245_v34  ;;  %v4401_v60 = vor.u32 %v4400_v11, %v4399_v14  ;;  %v4404_v49 = vor.u32 %v4403_v13, %v4402_v24  ;;  %v7257_v22 = vshll.u32 %v12670_v4, %v4396_v42  ;;  %v642_v53 = vsub.s32 32, %v641_v41 }
  0xf6   : > { %12691 = vst [vmem:[#allocation45_spill] sm:$0xff] %v7253_v1  ;;  %v7262_v25 = vsel %vm12414_vm15, %v7245_v34, 920167782  ;;  %v7266_v9 = vsel %vm12414_vm15, %v1795_v51, 1326507024  ;;  %v7268_v5 = vshrl.u32 %v1930_v57, 5  ;;  %v4407_v29 = vor.u32 %v4406_v52, %v4405_v47 }
  0xf7   : > { %12692 = vst [vmem:[#allocation46_spill] sm:$0xff] %v7262_v25  ;;  %v646_v35 = vsub.s32 4294967266, %v641_v41  ;;  %v7270_v17 = vor.u32 %v4409_v54, %v4408_v33  ;;  %v4412_v11 = vshrl.u32 %v12679_v16, %v4397_v20  ;;  %vm4414_vm3 = vcmp.lt.s32.totalorder %v7223_v46, 1 }
  0xf8   : > { %12693 = vst [vmem:[#allocation47_spill] sm:$0xff] %v7266_v9  ;;  %v1945_v42 = vshrl.u32 %v12670_v4, %v7253_v1  ;;  %vm2083_vm5 = vcmp.gt.s32.totalorder %v2082_v37, 0  ;;  %v7277_v13 = vadd.f32 %v6783_v27, %v469_v58  ;;  %vm4415_vm8 = vcmp.lt.s32.totalorder %v7223_v46, 2 }
  0xf9   : > { %12694 = vst [vmem:[#allocation48_spill] sm:$0xff] %v7268_v5  ;;  %vm4417_vm9 = vcmp.lt.s32.totalorder %v7223_v46, 4  ;;  %v643_v51 = vshll.u32 %v7174_v48, %v641_v41  ;;  %v644_v47 = vshrl.u32 %v7099_v56, %v642_v53  ;;  %v647_v54 = vadd.s32 127, %v646_v35 }
  0xfa   : > { %12695 = vst [vmem:[#allocation49_spill] sm:$0xff] %v7277_v13  ;;  %v1944_v20 = vshll.u32 %v12668_v50, %v7239_v38  ;;  %v1947_v57 = vshll.u32 %v12670_v4, %v7239_v38  ;;  %v1948_v33 = vshrl.u32 %v12679_v16, %v7253_v1  ;;  %v4419_v27 = vsel %vm4417_vm9, %v4407_v29, 2102212464 }
  0xfb   : > { %v2084_v24 = vsel %vm2083_vm5, %v2082_v37, 0  ;;  %v645_v14 = vor.u32 %v644_v47, %v643_v51  ;;  %v648_v52 = vshll.u32 %v647_v54, 23  ;;  %v7293_v48 = vor.u32 %v7202_v7, %v7184_v0 }
  0xfc   : > { %vm1953_vm11 = vcmp.lt.s32.totalorder %v7268_v5, 4  ;;  %v2229_v35 = vand.u32 2139095040, %v7277_v13  ;;  %v4413_v56 = vor.u32 %v4412_v11, %v7257_v22  ;;  %vm4416_vm14 = vcmp.lt.s32.totalorder %v7223_v46, 3 }
  0xfd   : > { %vm534_vm2 = vcmp.lt.s32.totalorder %v6787_v30, 0  ;;  %v7300_v53 = vor.u32 %v1945_v42, %v1944_v20  ;;  %v4418_v37 = vsel %vm4414_vm3, %v4398_v31, %v4401_v60  ;;  %v4422_v41 = vsel %vm4414_vm3, %v4401_v60, %v4404_v49 }
  0xfe   : > { %v12697_v0 = vand.u32 2147483647, %v6787_v30  ;;  %v649_v58 = vor.u32 4788187, %v648_v52  ;;  %v1949_v22 = vor.u32 %v1948_v33, %v1947_v57  ;;  %v7312_v11 = vand.u32 31, %v2084_v24 }
  0xff   : > { %12696 = vst [vmem:[#allocation50_spill] sm:$0xff] %v7300_v53  ;;  %v4420_v42 = vsel %vm4416_vm14, %v4404_v49, %v4419_v27  ;;  %vm718_vm15 = vcmp.lt.s32.totalorder %v6929_v43, 1  ;;  %v652_v31 = vcvt.s32.f32 %v645_v14  ;;  %vm720_vm12 = vcmp.lt.s32.totalorder %v6929_v43, 3 }
 0x100   : > { %vm7308_vm5 = vcmp.le.f32.partialorder %v12697_v0, 0.7853982  ;;  %12700 = vst [vmem:[#allocation51_spill] sm:$0xff] %v7312_v11  ;;  %v650_v51 = vand.u32 2147483647, %v649_v58  ;;  %v730_v60 = vsel %vm718_vm15, %v7198_v3, %v7293_v48  ;;  %v2230_v47 = vshrl.u32 %v2229_v35, 23 }
 0x101   : > { %vm719_vm10 = vcmp.lt.s32.totalorder %v6929_v43, 2  ;;  %v732_v54 = vsel %vm720_vm12, %v6960_v15, %v7009_v62  ;;  %v12701_v20 = vor.u32 8388608, %v7103_v12  ;;  %v7331_v33 = vshrl.u32 %v2084_v24, 5 }
 0x102   : > { %v7335_v27 = vsel %vm4415_vm8, %v4418_v37, %v4420_v42  ;;  %v653_v14 = vmul.f32 %v652_v31, %v650_v51  ;;  %v733_v52 = vsel %vm719_vm10, %v730_v60, %v732_v54  ;;  %v7342_v35 = vsel %vm1953_vm11, %v7300_v53, 920167782 }
 0x103   : > { %v7329_v57 = vshll.u32 %v12701_v20, 8  ;;  %12702 = vst [vmem:[#allocation52_spill] sm:$0xff] %v7331_v33  ;;  %v7346_v15 = vsel %vm1953_vm11, %v1949_v22, 1326507024  ;;  %v4423_v62 = vsel %vm4417_vm9, %v7270_v17, 920167782  ;;  %v4426_v12 = vsel %vm4414_vm3, %v4404_v49, %v4407_v29 }
 0x104   : > { %12703 = vst [vmem:[#allocation53_spill] sm:$0xff] %v7335_v27  ;;  %v7354_v24 = vsub.s32 32, %v7312_v11  ;;  %v654_v37 = vxor.u32 2147483648, %v653_v14  ;;  %v738_v58 = vshrl.u32 %v733_v52, 16  ;;  %v2098_v42 = vshll.u32 %v12668_v50, %v7312_v11 }
 0x105   : > { %12704 = vst [vmem:[#allocation54_spill] sm:$0xff] %v7342_v35  ;;  %v7357_v0 = vand.u32 65535, %v7329_v57  ;;  %v7363_v22 = vshll.u32 %v12670_v4, %v7312_v11  ;;  %v6382_v51 = vadd.s32 4294967169, %v2230_v47  ;;  %v4427_v31 = vsel %vm4417_vm9, %v4413_v56, 1326507024 }
 0x106   : > { %12705 = vst [vmem:[#allocation55_spill] sm:$0xff] %v7346_v15  ;;  %v4424_v49 = vsel %vm4416_vm14, %v4407_v29, %v4423_v62  ;;  %v655_v60 = vsel %vm534_vm2, %v654_v37, %v653_v14  ;;  %v656_v54 = vsub.s32 4, %v7119_v8  ;;  %v726_v56 = vsel %vm718_vm15, %v7163_v55, %v7198_v3 }
 0x107   : > { %12706 = vst [vmem:[#allocation56_spill] sm:$0xff] %v7354_v24  ;;  %v7373_v20 = vmul.u32 %v738_v58, %v7357_v0  ;;  %v658_v13 = vsel %vm7308_vm5, %v6787_v30, %v655_v60  ;;  %v728_v29 = vsel %vm720_vm12, %v7293_v48, %v6988_v39  ;;  %v737_v47 = vand.u32 65535, %v733_v52 }
 0x108   : > { %v2099_v14 = vshrl.u32 %v12670_v4, %v7354_v24  ;;  %v4428_v62 = vsel %vm4416_vm14, %v7270_v17, %v4427_v31  ;;  %v12707_v37 = vor.u32 8388608, %v7216_v45  ;;  %v660_v11 = vmul.f32 %v658_v13, %v658_v13 }
 0x109   : > { %v7397_v35 = vshrl.u32 %v12679_v16, %v7354_v24  ;;  %v7401_v39 = vsel %vm4415_vm8, %v4422_v41, %v4424_v49  ;;  %v736_v52 = vshrl.u32 %v7329_v57, 16  ;;  %v743_v53 = vshll.u32 %v7373_v20, 16 }
 0x10a   : > { %v7393_v60 = vshll.u32 %v12707_v37, 8  ;;  %v657_v17 = vsel %vm534_vm2, %v656_v54, %v7119_v8  ;;  %v661_v45 = vmul.f32 -0.001358992, %v660_v11  ;;  %v668_v31 = vmul.f32 -0.00019511016, %v660_v11 }
 0x10b   : > { %v729_v37 = vsel %vm719_vm10, %v726_v56, %v728_v29  ;;  %v7410_v15 = vadd.s32 1, %v6382_v51  ;;  %v7414_v24 = vsel %vm4415_vm8, %v4426_v12, %v4428_v62  ;;  %v739_v41 = vmul.u32 %v737_v47, %v7357_v0 }
 0x10c   : > { %12708 = vst [vmem:[#allocation57_spill] sm:$0xff] %v7393_v60  ;;  %v7417_v49 = vmul.u32 %v737_v47, %v736_v52  ;;  %v7420_v5 = vand.u32 65535, %v7393_v60  ;;  %v7423_v8 = vshrl.u32 %v7393_v60, 16  ;;  %v662_v54 = vadd.f32 0.041655596, %v661_v45 }
 0x10d   : > { %v669_v38 = vadd.f32 0.008332121, %v668_v31  ;;  %v7425_v1 = vor.u32 %v2099_v14, %v2098_v42  ;;  %v659_v51 = vsel %vm7308_vm5, 0, %v657_v17  ;;  %v749_v46 = vadd.s32 %v743_v53, %v739_v41 }
 0x10e   : > { %v760_v12 = vshrl.u32 %v729_v37, 16  ;;  %v2103_v56 = vor.u32 %v7397_v35, %v7363_v22  ;;  %v663_v29 = vmul.f32 %v662_v54, %v660_v11  ;;  %vm747_vm3 = vc.u32 %v739_v41, %v743_v53 }
 0x10f   : > { %12709 = vst [vmem:[#allocation58_spill] sm:$0xff] %v7425_v1  ;;  %v670_v47 = vmul.f32 %v669_v38, %v660_v11  ;;  %v4433_v62 = vand.u32 65535, %v7414_v24  ;;  %v745_v45 = vshll.u32 %v7417_v49, 16  ;;  %v759_v31 = vand.u32 65535, %v729_v37 }
 0x110   : > { %v12434_v42 = vand.u32 65535, %v7401_v39  ;;  %v664_v14 = vadd.f32 -0.4999988, %v663_v29  ;;  %v676_v17 = vand.u32 3, %v659_v51  ;;  %v742_v34 = vmul.u32 %v738_v58, %v736_v52 }
 0x111   : > { %v671_v7 = vadd.f32 -0.16666654, %v670_v47  ;;  %v12710_v9 = vmov 0   ;;  %vm751_vm8 = vc.u32 %v749_v46, %v745_v45  ;;  %v762_v54 = vmul.u32 %v760_v12, %v7357_v0 }
 0x112   : > { %v748_v61 = vsel %vm747_vm3, 1, %v12710_v9  ;;  %v665_v41 = vmul.f32 %v664_v14, %v660_v11  ;;  %vm675_vm9 = vweird.f32 %v6787_v30  ;;  %v722_v37 = vsel %vm718_vm15, %v7156_v18, %v7163_v55 }
 0x113   : > { %v672_v25 = vmul.f32 %v671_v7, %v660_v11  ;;  %v750_v58 = vadd.s32 %v748_v61, %v742_v34  ;;  %v752_v51 = vsel %vm751_vm8, 1, %v12710_v9  ;;  %v763_v46 = vmul.u32 %v759_v31, %v736_v52 }
 0x114   : > { %v666_v29 = vadd.f32 1.0, %v665_v41  ;;  %vm677_vm14 = vcmp.lt.s32.totalorder %v676_v17, 2  ;;  %v723_v45 = vsel %vm721_vm13, %v7293_v48, 2102212464  ;;  %v744_v11 = vshrl.u32 %v7373_v20, 16 }
 0x115   : > { %v673_v47 = vadd.f32 1.0, %v672_v25  ;;  %v754_v14 = vadd.s32 %v752_v51, %v750_v58  ;;  %v761_v7 = vmul.u32 %v759_v31, %v7357_v0  ;;  %v765_v53 = vshll.u32 %v762_v54, 16 }
 0x116   : > { %vm678_vm2 = vcmp.eq.s32.totalorder %v676_v17, 0  ;;  %v682_v18 = vxor.u32 2147483648, %v666_v29  ;;  %v764_v55 = vmul.u32 %v760_v12, %v736_v52  ;;  %v767_v34 = vshll.u32 %v763_v46, 16 }
 0x117   : > { %v674_v38 = vmul.f32 %v673_v47, %v658_v13  ;;  %v755_v61 = vadd.s32 %v754_v14, %v744_v11  ;;  %vm769_vm15 = vc.u32 %v761_v7, %v765_v53  ;;  %v771_v41 = vadd.s32 %v765_v53, %v761_v7 }
 0x118   : > { %vm2107_vm5 = vcmp.lt.s32.totalorder %v7331_v33, 4  ;;  %vm2237_vm3 = vcmp.gt.s32.totalorder %v7410_v15, 0  ;;  %vm681_vm13 = vcmp.eq.s32.totalorder %v676_v17, 2  ;;  %v770_v48 = vsel %vm769_vm15, 1, %v12710_v9 }
 0x119   : > { %v679_v25 = vxor.u32 2147483648, %v674_v38  ;;  %v12433_v20 = vand.u32 2147483647, %v6839_v10  ;;  %v724_v13 = vsel %vm720_vm12, %v7198_v3, %v723_v45  ;;  %v746_v0 = vshrl.u32 %v7417_v49, 16 }
 0x11a   : > { %v772_v52 = vadd.s32 %v770_v48, %v764_v55  ;;  %vm773_vm8 = vc.u32 %v771_v41, %v767_v34  ;;  %v683_v31 = vsel %vm681_vm13, %v682_v18, %v674_v38  ;;  %v766_v53 = vshrl.u32 %v762_v54, 16 }
 0x11b   : > { %v680_v12 = vsel %vm678_vm2, %v666_v29, %v679_v25  ;;  %v774_v58 = vsel %vm773_vm8, 1, %v12710_v9  ;;  %v7462_v47 = vadd.s32 %v755_v61, %v746_v0  ;;  %v768_v11 = vshrl.u32 %v763_v46, 16 }
 0x11c   : > { %v684_v51 = vsel %vm677_vm14, %v680_v12, %v683_v31  ;;  %v776_v14 = vadd.s32 %v774_v58, %v772_v52  ;;  %v7466_v3 = vadd.s32 %v771_v41, %v767_v34  ;;  %v847_v49 = vand.u32 8388607, %v12433_v20 }
 0x11d   : > { %v685_v7 = vsel %vm675_vm9, nan, %v684_v51  ;;  %v857_v38 = vshll.u32 %v12675_v32, %v6925_v40  ;;  %v858_v17 = vshrl.u32 %v12669_v63, %v6950_v6  ;;  %v860_v46 = vshll.u32 %v12669_v63, %v6925_v40 }
 0x11e   : > { %6445 = vmatmul.msk.f32.vlgmr.msra.gmra.mxu1 %vm322_vm0, %v685_v7  ;;  %v777_v54 = vadd.s32 %v776_v14, %v766_v53  ;;  %v861_v30 = vshrl.u32 %v12677_v44, %v6950_v6  ;;  %v725_v29 = vsel %vm719_vm10, %v722_v37, %v724_v13  ;;  %v848_v45 = vor.u32 8388608, %v847_v49 }
 0x11f   : > { %v863_v18 = vshll.u32 %v12677_v44, %v6925_v40  ;;  %v864_v55 = vshrl.u32 %v12668_v50, %v6950_v6  ;;  %vm781_vm12 = vc.u32 %v7462_v47, %v7466_v3  ;;  %v7487_v34 = vor.u32 %v858_v17, %v857_v38  ;;  %v472_v17 = vpop.f32.mrf.mxu0 }
 0x120   : > { %v778_v61 = vadd.s32 %v777_v54, %v768_v11  ;;  %v7489_v41 = vor.u32 %v861_v30, %v860_v46  ;;  %vm872_vm9 = vcmp.lt.s32.totalorder %v6973_v28, 1  ;;  %vm874_vm10 = vcmp.lt.s32.totalorder %v6973_v28, 3 }
 0x121   : > { %v7491_v25 = vor.u32 %v864_v55, %v863_v18  ;;  %v7495_v43 = vshll.u32 %v848_v45, 8  ;;  %v7500_v40 = vsel %vm2107_vm5, %v7425_v1, 920167782  ;;  %v886_v13 = vsel %vm874_vm10, %v7011_v2, %v7038_v21 }
 0x122   : > { %12711 = vst [vmem:[#allocation59_spill] sm:$0xff] %v7500_v40  ;;  %v782_v37 = vadd.s32 1, %v778_v61  ;;  %v880_v48 = vsel %vm872_vm9, %v7487_v34, %v7489_v41  ;;  %v779_v0 = vmul.u32 %v7329_v57, %v725_v29  ;;  %vm873_vm14 = vcmp.lt.s32.totalorder %v6973_v28, 2 }
 0x123   : > { %v882_v52 = vsel %vm874_vm10, %v7491_v25, %v7034_v19  ;;  %v884_v12 = vsel %vm872_vm9, %v7489_v41, %v7491_v25  ;;  %v2238_v31 = vsel %vm2237_vm3, %v7410_v15, 0  ;;  %v7535_v19 = vsel %vm2107_vm5, %v2103_v56, 1326507024 }
 0x124   : > { %v783_v2 = vsel %vm781_vm12, %v782_v37, %v778_v61  ;;  %v883_v21 = vsel %vm873_vm14, %v880_v48, %v882_v52  ;;  %v887_v57 = vsel %vm873_vm14, %v884_v12, %v886_v13  ;;  %12712 = vst [vmem:[#allocation60_spill] sm:$0xff] %v7535_v19  ;;  %v889_v15 = vand.u32 65535, %v7495_v43 }
 0x125   : > { %v784_v53 = vadd.s32 %v783_v2, %v779_v0  ;;  %v891_v58 = vand.u32 65535, %v887_v57  ;;  %v890_v51 = vshrl.u32 %v7495_v43, 16  ;;  %v892_v11 = vshrl.u32 %v887_v57, 16 }
 0x126   : > { %v913_v14 = vand.u32 65535, %v883_v21  ;;  %v914_v7 = vshrl.u32 %v883_v21, 16  ;;  %v7539_v49 = vshrl.u32 %v2238_v31, 5  ;;  %v7541_v38 = vand.u32 31, %v2238_v31 }
 0x127   : > { %v7546_v35 = vmul.u32 %v4433_v62, %v7420_v5  ;;  %v785_v22 = vadd.s32 536870912, %v784_v53  ;;  %v12715_v56 = vshrl.u32 %v7414_v24, 16  ;;  %v894_v46 = vmul.u32 %v892_v11, %v889_v15 }
 0x128   : > { %12713 = vst [vmem:[#allocation61_spill] sm:$0xff] %v7539_v49  ;;  %v895_v30 = vmul.u32 %v891_v58, %v890_v51  ;;  %v916_v29 = vmul.u32 %v914_v7, %v889_v15  ;;  %v7556_v45 = vmul.u32 %v4433_v62, %v7423_v8  ;;  %v893_v37 = vmul.u32 %v891_v58, %v889_v15  ;;  %v7573_v62 = vld [vmem:[%s12339_s2] ss:$0 sm:$0xff] }
 0x129   : > { %12714 = vst [vmem:[#allocation62_spill] sm:$0xff] %v7541_v38  ;;  %v7551_v54 = vmul.u32 %v12715_v56, %v7420_v5  ;;  %v12717_v18 = vmov %v12715_v56  ;;  %v7563_v61 = vshrl.u32 %v785_v22, 30  ;;  %v897_v48 = vshll.u32 %v894_v46, 16 }
 0x12a   : > { %12716 = vst [vmem:[#allocation63_spill] sm:$0xff] %v7556_v45  ;;  %v7561_v55 = vmul.u32 %v12717_v18, %v7423_v8  ;;  %v915_v13 = vmul.u32 %v913_v14, %v889_v15  ;;  %v917_v0 = vmul.u32 %v913_v14, %v890_v51  ;;  %v919_v52 = vshll.u32 %v916_v29, 16 }
 0x12b   : > { %v7568_v12 = vmul.u32 %v12434_v42, %v7420_v5  ;;  %v7576_v24 = vadd.f32 %v7573_v62, %v472_v17  ;;  %v787_v31 = vshll.u32 %v7563_v61, 30  ;;  %v896_v2 = vmul.u32 %v892_v11, %v890_v51 }
 0x12c   : > { %12718 = vst [vmem:[#allocation64_spill] sm:$0xff] %v7561_v55  ;;  %v899_v21 = vshll.u32 %v895_v30, 16  ;;  %vm901_vm2 = vc.u32 %v893_v37, %v897_v48  ;;  %v903_v57 = vadd.s32 %v897_v48, %v893_v37  ;;  %vm923_vm15 = vc.u32 %v915_v13, %v919_v52 }
 0x12d   : > { %12719 = vst [vmem:[#allocation65_spill] sm:$0xff] %v7568_v12  ;;  %v788_v15 = vsub.s32 %v784_v53, %v787_v31  ;;  %v902_v58 = vsel %vm901_vm2, 1, %v12710_v9  ;;  %v918_v14 = vmul.u32 %v914_v7, %v890_v51  ;;  %v924_v22 = vsel %vm923_vm15, 1, %v12710_v9 }
 0x12e   : > { %12720 = vst [vmem:[#allocation66_spill] sm:$0xff] %v7576_v24  ;;  %v904_v56 = vadd.s32 %v902_v58, %v896_v2  ;;  %vm905_vm3 = vc.u32 %v903_v57, %v899_v21  ;;  %v921_v18 = vshll.u32 %v917_v0, 16  ;;  %v925_v20 = vadd.s32 %v919_v52, %v915_v13 }
 0x12f   : > { %v4539_v17 = vand.u32 2139095040, %v7209_v36  ;;  %vm789_vm13 = vcmp.lt.s32.totalorder %v788_v15, 0  ;;  %v790_v42 = vsub.s32 0, %v788_v15  ;;  %v906_v11 = vsel %vm905_vm3, 1, %v12710_v9 }
 0x130   : > { %v898_v27 = vshrl.u32 %v894_v46, 16  ;;  %v908_v60 = vadd.s32 %v906_v11, %v904_v56  ;;  %v926_v37 = vadd.s32 %v924_v22, %v918_v14  ;;  %vm927_vm8 = vc.u32 %v925_v20, %v921_v18 }
 0x131   : > { %v2383_v53 = vand.u32 2139095040, %v7576_v24  ;;  %v791_v48 = vsel %vm789_vm13, %v790_v42, %v788_v15  ;;  %v856_v51 = vshrl.u32 %v12675_v32, %v6950_v6  ;;  %v877_v7 = vsel %vm875_vm1, %v7491_v25, 2102212464 }
 0x132   : > { %v792_v13 = vclz %v791_v48  ;;  %v900_v52 = vshrl.u32 %v895_v30, 16  ;;  %v909_v31 = vadd.s32 %v908_v60, %v898_v27  ;;  %v928_v2 = vsel %vm927_vm8, 1, %v12710_v9 }
 0x133   : > { %v12721_v46 = vshrl.u32 %v7401_v39, 16  ;;  %v12723_v42 = vand.u32 65535, %v7401_v39  ;;  %v920_v6 = vshrl.u32 %v916_v29, 16  ;;  %v930_v58 = vadd.s32 %v928_v2, %v926_v37 }
 0x134   : > { %v6353_v14 = vadd.s32 4294967294, %v792_v13  ;;  %v876_v25 = vsel %vm872_vm9, %v856_v51, %v7487_v34  ;;  %v878_v27 = vsel %vm874_vm10, %v7489_v41, %v877_v7  ;;  %v7606_v60 = vadd.s32 %v909_v31, %v900_v52 }
 0x135   : > { %v7593_v21 = vmul.u32 %v12721_v46, %v7420_v5  ;;  %v7598_v57 = vmul.u32 %v12723_v42, %v7423_v8  ;;  %v2384_v5 = vshrl.u32 %v2383_v53, 23  ;;  %v4540_v30 = vshrl.u32 %v4539_v17, 23 }
 0x136   : > { %v922_v22 = vshrl.u32 %v917_v0, 16  ;;  %v931_v56 = vadd.s32 %v930_v58, %v920_v6  ;;  %v7609_v11 = vsub.s32 32, %v7541_v38  ;;  %v2252_v29 = vshll.u32 %v12668_v50, %v7541_v38 }
 0x137   : > { %12722 = vst [vmem:[#allocation67_spill] sm:$0xff] %v7593_v21  ;;  %vm6354_vm1 = vcmp.lt.s32.totalorder %v6353_v14, 0  ;;  %v7613_v37 = vadd.s32 %v925_v20, %v921_v18  ;;  %v7617_v34 = vshll.u32 %v12670_v4, %v7541_v38  ;;  %v879_v53 = vsel %vm873_vm14, %v876_v25, %v878_v27 }
 0x138   : > { %12724 = vst [vmem:[#allocation68_spill] sm:$0xff] %v7598_v57  ;;  %v795_v41 = vsel %vm6354_vm1, 0, %v6353_v14  ;;  %v932_v17 = vadd.s32 %v931_v56, %v922_v22  ;;  %v780_v0 = vadd.s32 %v7466_v3, %v7462_v47  ;;  %v12437_v20 = vshll.u32 %v7551_v54, 16  ;;  %v12746_v57 = vld [vmem:[#allocation17_spill] sm:$0xff] }
 0x139   : > { %12725 = vst [vmem:[#allocation69_spill] sm:$0xff] %v7609_v11  ;;  %v796_v48 = vsub.s32 32, %v795_v41  ;;  %v800_v51 = vsub.s32 4294967266, %v795_v41  ;;  %vm935_vm12 = vc.u32 %v7606_v60, %v7613_v37  ;;  %v6385_v18 = vadd.s32 4294967169, %v2384_v5 }
 0x13a   : > { %v6427_v7 = vadd.s32 4294967169, %v4540_v30  ;;  %v936_v13 = vadd.s32 1, %v932_v17  ;;  %v797_v52 = vshll.u32 %v788_v15, %v795_v41  ;;  %v933_v28 = vmul.u32 %v7495_v43, %v879_v53  ;;  %v12726_v43 = vld [vmem:[#allocation6_spill] sm:$0xff] }
 0x13b   : > { %v798_v31 = vshrl.u32 %v780_v0, %v796_v48  ;;  %v801_v2 = vadd.s32 127, %v800_v51  ;;  %v12438_v42 = vand.u32 2147483647, %v6865_v23  ;;  %v1015_v47 = vshrl.u32 %v12677_v44, %v6991_v26 }
 0x13c   : > { %v937_v46 = vsel %vm935_vm12, %v936_v13, %v932_v17  ;;  %v1018_v3 = vshrl.u32 %v12668_v50, %v6991_v26  ;;  %v2253_v6 = vshrl.u32 %v12670_v4, %v7609_v11  ;;  %v2390_v15 = vadd.s32 1, %v6385_v18 }
 0x13d   : > { %v799_v58 = vor.u32 %v798_v31, %v797_v52  ;;  %v802_v14 = vshll.u32 %v801_v2, 23  ;;  %v938_v25 = vadd.s32 %v937_v46, %v933_v28  ;;  %v4546_v27 = vadd.s32 1, %v6427_v7  ;;  %v12733_v46 = vld [vmem:[#allocation12_spill] sm:$0xff] }
 0x13e   : > { %vm688_vm9 = vcmp.lt.s32.totalorder %v6815_v59, 0  ;;  %v1014_v5 = vshll.u32 %v12669_v63, %v12726_v43  ;;  %v1017_v30 = vshll.u32 %v12677_v44, %v12726_v43  ;;  %vm2261_vm10 = vcmp.lt.s32.totalorder %v7539_v49, 4 }
 0x13f   : > { %v12727_v56 = vshrl.u32 %v7401_v39, 16  ;;  %v12729_v53 = vand.u32 2147483647, %v6815_v59  ;;  %v803_v0 = vor.u32 4788187, %v802_v14  ;;  %v939_v48 = vadd.s32 536870912, %v938_v25 }
 0x140   : > { %v1001_v51 = vand.u32 8388607, %v12438_v42  ;;  %v7654_v18 = vor.u32 %v1015_v47, %v1014_v5  ;;  %v7656_v7 = vor.u32 %v1018_v3, %v1017_v30  ;;  %v7658_v13 = vor.u32 %v2253_v6, %v2252_v29  ;;  %v12734_v6 = vld [vmem:[#allocation19_spill] sm:$0xff] }
 0x141   : > { %v7644_v41 = vmul.u32 %v12727_v56, %v7423_v8  ;;  %vm7648_vm14 = vcmp.le.f32.partialorder %v12729_v53, 0.7853982  ;;  %v2256_v39 = vshrl.u32 %v12679_v16, %v7609_v11  ;;  %v804_v8 = vand.u32 2147483647, %v803_v0 }
 0x142   : > { %12732 = vst [vmem:[#allocation70_spill] sm:$0xff] %v7658_v13  ;;  %v806_v52 = vcvt.s32.f32 %v799_v58  ;;  %vm4443_vm2 = vc.u32 %v7546_v35, %v12437_v20  ;;  %vm2391_vm15 = vcmp.gt.s32.totalorder %v2390_v15, 0  ;;  %vm4547_vm3 = vcmp.gt.s32.totalorder %v4546_v27, 0  ;;  %v12735_v58 = vld [vmem:[#allocation13_spill] sm:$0xff] }
 0x143   : > { %12728 = vst [vmem:[#allocation6_spill] sm:$0xff] %v7644_v41  ;;  %v7665_v31 = vshrl.u32 %v939_v48, 30  ;;  %v810_v28 = vsub.s32 4, %v7563_v61  ;;  %vm1026_vm13 = vcmp.lt.s32.totalorder %v12733_v46, 1  ;;  %vm1028_vm8 = vcmp.lt.s32.totalorder %v12733_v46, 3 }
 0x144   : > { %v807_v2 = vmul.f32 %v806_v52, %v804_v8  ;;  %v1002_v47 = vor.u32 8388608, %v1001_v51  ;;  %v1038_v3 = vsel %vm1026_vm13, %v7654_v18, %v7656_v7  ;;  %v1040_v14 = vsel %vm1028_vm8, %v12735_v58, %v12734_v6  ;;  %v475_v51 = vpop.f32.mrf.mxu0  ;;  %v517_v52 = vpop.f32.mrf.mxu3 }
 0x145   : > { %v941_v29 = vshll.u32 %v7665_v31, 30  ;;  %v2257_v5 = vor.u32 %v2256_v39, %v7617_v34  ;;  %v7683_v30 = vsel %vm2261_vm10, %v7658_v13, 920167782  ;;  %v7686_v56 = vsel %vm4443_vm2, 1, %v12710_v9 }
 0x146   : > { %12736 = vst [vmem:[#allocation12_spill] sm:$0xff] %v7683_v30  ;;  %v808_v53 = vxor.u32 2147483648, %v807_v2  ;;  %v2392_v0 = vsel %vm2391_vm15, %v2390_v15, 0  ;;  %v4548_v48 = vsel %vm4547_vm3, %v4546_v27, 0  ;;  %vm1027_vm1 = vcmp.lt.s32.totalorder %v12733_v46, 2 }
 0x147   : > { %12737 = vst [vmem:[#allocation19_spill] sm:$0xff] %v7686_v56  ;;  %v7688_v8 = vsub.s32 %v938_v25, %v941_v29  ;;  %v811_v39 = vsel %vm688_vm9, %v810_v28, %v7563_v61  ;;  %v1012_v6 = vshrl.u32 %v12669_v63, %v6991_v26  ;;  %v7700_v15 = vsel %vm1027_vm1, %v1038_v3, %v1040_v14 }
 0x148   : > { %v809_v34 = vsel %vm688_vm9, %v808_v53, %v807_v2  ;;  %v7707_v2 = vshll.u32 %v1002_v47, 8  ;;  %v7709_v29 = vand.u32 31, %v4548_v48  ;;  %v7712_v61 = vadd.f32 %v7573_v62, %v475_v51 }
 0x149   : > { %v812_v25 = vsel %vm7648_vm14, %v6815_v59, %v809_v34  ;;  %vm943_vm12 = vcmp.lt.s32.totalorder %v7688_v8, 0  ;;  %v944_v27 = vsub.s32 0, %v7688_v8  ;;  %v1011_v3 = vshll.u32 %v12675_v32, %v12726_v43 }
 0x14a   : > { %12738 = vst [vmem:[#allocation13_spill] sm:$0xff] %v7709_v29  ;;  %v814_v28 = vmul.f32 %v812_v25, %v812_v25  ;;  %v7718_v58 = vsel %vm2261_vm10, %v2257_v5, 1326507024  ;;  %v7721_v14 = vadd.f32 %v7573_v62, %v517_v52  ;;  %v813_v47 = vsel %vm7648_vm14, 0, %v811_v39 }
 0x14b   : > { %12739 = vst [vmem:[#allocation71_spill] sm:$0xff] %v7712_v61  ;;  %v945_v51 = vsel %vm943_vm12, %v944_v27, %v7688_v8  ;;  %v7727_v20 = vor.u32 %v1012_v6, %v1011_v3  ;;  %v7729_v42 = vshrl.u32 %v2392_v0, 5  ;;  %v7731_v43 = vand.u32 31, %v2392_v0 }
 0x14c   : > { %12740 = vst [vmem:[#allocation72_spill] sm:$0xff] %v7718_v58  ;;  %v815_v34 = vmul.f32 -0.001358992, %v814_v28  ;;  %v822_v22 = vmul.f32 -0.00019511016, %v814_v28  ;;  %v7733_v5 = vshrl.u32 %v4548_v48, 5  ;;  %v946_v3 = vclz %v945_v51 }
 0x14d   : > { %12741 = vst [vmem:[#allocation73_spill] sm:$0xff] %v7721_v14  ;;  %v7736_v52 = vand.u32 65535, %v7707_v2  ;;  %v7739_v17 = vsub.s32 32, %v7709_v29  ;;  %v2537_v39 = vand.u32 2139095040, %v7712_v61  ;;  %v4693_v27 = vand.u32 2139095040, %v7721_v14 }
 0x14e   : > { %12742 = vst [vmem:[#allocation74_spill] sm:$0xff] %v7731_v43  ;;  %v816_v53 = vadd.f32 0.041655596, %v815_v34  ;;  %v823_v36 = vadd.f32 0.008332121, %v822_v22  ;;  %v830_v6 = vand.u32 3, %v813_v47  ;;  %v1034_v12 = vsel %vm1026_vm13, %v7727_v20, %v7654_v18 }
 0x14f   : > { %12743 = vst [vmem:[#allocation75_spill] sm:$0xff] %v7733_v5  ;;  %v12745_v0 = vshrl.u32 %v7700_v15, 16  ;;  %v1036_v22 = vsel %vm1028_vm8, %v7656_v7, %v12746_v57  ;;  %v7757_v47 = vsub.s32 32, %v7731_v43  ;;  %v7761_v34 = vshll.u32 %v12668_v50, %v7709_v29 }
 0x150   : > { %12744 = vst [vmem:[#allocation76_spill] sm:$0xff] %v7739_v17  ;;  %v817_v48 = vmul.f32 %v816_v53, %v814_v28  ;;  %v824_v41 = vmul.f32 %v823_v36, %v814_v28  ;;  %v7765_v36 = vshll.u32 %v12670_v4, %v7709_v29  ;;  %v1045_v53 = vand.u32 65535, %v7700_v15 }
 0x151   : > { %v7746_v24 = vmul.u32 %v12745_v0, %v7736_v52  ;;  %12747 = vst [vmem:[#allocation17_spill] sm:$0xff] %v7757_v47  ;;  %v7770_v51 = vshll.u32 %v12668_v50, %v7731_v43  ;;  %v2538_v0 = vshrl.u32 %v2537_v39, 23  ;;  %v6356_v61 = vadd.s32 4294967294, %v946_v3 }
 0x152   : > { %v818_v14 = vadd.f32 -0.4999988, %v817_v48  ;;  %v825_v57 = vadd.f32 -0.16666654, %v824_v41  ;;  %v1037_v21 = vsel %vm1027_vm1, %v1034_v12, %v1036_v22  ;;  %v1044_v45 = vshrl.u32 %v7707_v2, 16 }
 0x153   : > { %v1051_v30 = vshll.u32 %v7746_v24, 16  ;;  %v4694_v13 = vshrl.u32 %v4693_v27, 23  ;;  %vm831_vm9 = vcmp.lt.s32.totalorder %v830_v6, 2  ;;  %vm832_vm14 = vcmp.eq.s32.totalorder %v830_v6, 0 }
 0x154   : > { %v819_v29 = vmul.f32 %v818_v14, %v814_v28  ;;  %v826_v58 = vmul.f32 %v825_v57, %v814_v28  ;;  %vm6357_vm2 = vcmp.lt.s32.totalorder %v6356_v61, 0  ;;  %v1047_v49 = vmul.u32 %v1045_v53, %v7736_v52 }
 0x155   : > { %v7777_v38 = vmul.u32 %v1045_v53, %v1044_v45  ;;  %v949_v3 = vsel %vm6357_vm2, 0, %v6356_v61  ;;  %v1068_v48 = vshrl.u32 %v1037_v21, 16  ;;  %v934_v12 = vadd.s32 %v7613_v37, %v7606_v60 }
 0x156   : > { %v820_v39 = vadd.f32 1.0, %v819_v29  ;;  %v827_v41 = vadd.f32 1.0, %v826_v58  ;;  %v950_v22 = vsub.s32 32, %v949_v3  ;;  %v954_v11 = vsub.s32 4294967266, %v949_v3 }
 0x157   : > { %vm1055_vm15 = vc.u32 %v1047_v49, %v1051_v30  ;;  %v1057_v28 = vadd.s32 %v1051_v30, %v1047_v49  ;;  %v1067_v57 = vand.u32 65535, %v1037_v21  ;;  %v951_v40 = vshll.u32 %v7688_v8, %v949_v3 }
 0x158   : > { %v828_v27 = vmul.f32 %v827_v41, %v812_v25  ;;  %v836_v14 = vxor.u32 2147483648, %v820_v39  ;;  %v952_v1 = vshrl.u32 %v934_v12, %v950_v22  ;;  %v955_v19 = vadd.s32 127, %v954_v11 }
 0x159   : > { %v1053_v53 = vshll.u32 %v7777_v38, 16  ;;  %vm835_vm3 = vcmp.eq.s32.totalorder %v830_v6, 2  ;;  %v1056_v61 = vsel %vm1055_vm15, 1, %v12710_v9  ;;  %v1070_v58 = vmul.u32 %v1068_v48, %v7736_v52 }
 0x15a   : > { %v833_v29 = vxor.u32 2147483648, %v828_v27  ;;  %v953_v60 = vor.u32 %v952_v1, %v951_v40  ;;  %v956_v37 = vshll.u32 %v955_v19, 23  ;;  %v12748_v33 = vshrl.u32 %v7700_v15, 16 }
 0x15b   : > { %vm1059_vm12 = vc.u32 %v1057_v28, %v1053_v53  ;;  %v837_v21 = vsel %vm835_vm3, %v836_v14, %v828_v27  ;;  %v7788_v30 = vmul.u32 %v1067_v57, %v1044_v45  ;;  %v1073_v11 = vshll.u32 %v1070_v58, 16 }
 0x15c   : > { %v1050_v25 = vmul.u32 %v12748_v33, %v1044_v45  ;;  %v834_v49 = vsel %vm832_vm14, %v820_v39, %v833_v29  ;;  %vm829_vm2 = vweird.f32 %v6815_v59  ;;  %v957_v41 = vor.u32 4788187, %v956_v37 }
 0x15d   : > { %v838_v8 = vsel %vm831_vm9, %v834_v49, %v837_v21  ;;  %v6388_v12 = vadd.s32 4294967169, %v2538_v0  ;;  %v1060_v1 = vsel %vm1059_vm12, 1, %v12710_v9  ;;  %v1069_v40 = vmul.u32 %v1067_v57, %v7736_v52 }
 0x15e   : > { %v1058_v3 = vadd.s32 %v1056_v61, %v1050_v25  ;;  %v839_v22 = vsel %vm829_vm2, nan, %v838_v8  ;;  %v7796_v33 = vshll.u32 %v12670_v4, %v7731_v43  ;;  %v6430_v19 = vadd.s32 4294967169, %v4694_v13 }
 0x15f   : > { %6446 = vmatmul.msk.f32.gmra.mxu1 %vm322_vm0, %v839_v22  ;;  %v958_v15 = vand.u32 2147483647, %v957_v41  ;;  %v960_v39 = vcvt.s32.f32 %v953_v60  ;;  %vm12528_vm14 = vcmp.lt.s32.totalorder %v7733_v5, 4  ;;  %v1072_v59 = vmul.u32 %v1068_v48, %v1044_v45 }
 0x160   : > { %v1075_v6 = vshll.u32 %v7788_v30, 16  ;;  %vm1077_vm9 = vc.u32 %v1069_v40, %v1073_v11  ;;  %v1079_v0 = vadd.s32 %v1073_v11, %v1069_v40  ;;  %v4563_v27 = vshrl.u32 %v12670_v4, %v7739_v17 }
 0x161   : > { %v961_v52 = vmul.f32 %v960_v39, %v958_v15  ;;  %v1062_v14 = vadd.s32 %v1060_v1, %v1058_v3  ;;  %v1078_v28 = vsel %vm1077_vm9, 1, %v12710_v9  ;;  %v4566_v13 = vshrl.u32 %v12679_v16, %v7739_v17 }
 0x162   : > { %v2544_v57 = vadd.s32 1, %v6388_v12  ;;  %v1080_v53 = vadd.s32 %v1078_v28, %v1072_v59  ;;  %vm1081_vm15 = vc.u32 %v1079_v0, %v1075_v6  ;;  %v2407_v45 = vshrl.u32 %v12670_v4, %v7757_v47 }
 0x163   : > { %v962_v48 = vxor.u32 2147483648, %v961_v52  ;;  %v1052_v29 = vshrl.u32 %v7746_v24, 16  ;;  %v1082_v61 = vsel %vm1081_vm15, 1, %v12710_v9  ;;  %v4700_v60 = vadd.s32 1, %v6430_v19 }
 0x164   : > { %vm842_vm3 = vcmp.lt.s32.totalorder %v6839_v10, 0  ;;  %v1074_v37 = vshrl.u32 %v1070_v58, 16  ;;  %v1084_v25 = vadd.s32 %v1082_v61, %v1080_v53  ;;  %v7813_v49 = vshrl.u32 %v12679_v16, %v7757_v47 }
 0x165   : > { %vm12530_vm12 = vcmp.lt.s32.totalorder %v7729_v42, 4  ;;  %v12749_v21 = vand.u32 2147483647, %v6839_v10  ;;  %v963_v24 = vsel %vm842_vm3, %v962_v48, %v961_v52  ;;  %v1063_v8 = vadd.s32 %v1062_v14, %v1052_v29  ;;  %v12758_v29 = vld [vmem:[#allocation2_spill] sm:$0xff] }
 0x166   : > { %vm2545_vm9 = vcmp.gt.s32.totalorder %v2544_v57, 0  ;;  %v1076_v41 = vshrl.u32 %v7788_v30, 16  ;;  %v1085_v3 = vadd.s32 %v1084_v25, %v1074_v37  ;;  %v7829_v12 = vor.u32 %v4563_v27, %v7761_v34 }
 0x167   : > { %vm7818_vm2 = vcmp.le.f32.partialorder %v12749_v21, 0.7853982  ;;  %v1031_v1 = vsel %vm1029_vm4, %v7656_v7, 2102212464  ;;  %v1054_v40 = vshrl.u32 %v7777_v38, 16  ;;  %vm4701_vm15 = vcmp.gt.s32.totalorder %v4700_v60, 0 }
 0x168   : > { %v966_v58 = vsel %vm7818_vm2, %v6839_v10, %v963_v24  ;;  %12752 = vst [vmem:[#allocation77_spill] sm:$0xff] %v7829_v12  ;;  %v964_v19 = vsub.s32 4, %v7665_v31  ;;  %v1010_v15 = vshrl.u32 %v12675_v32, %v6991_v26  ;;  %v1086_v39 = vadd.s32 %v1085_v3, %v1076_v41 }
 0x169   : > { %v968_v22 = vmul.f32 %v966_v58, %v966_v58  ;;  %v2546_v59 = vsel %vm2545_vm9, %v2544_v57, 0  ;;  %v7838_v14 = vadd.s32 %v1063_v8, %v1054_v40  ;;  %v7841_v34 = vor.u32 %v2407_v45, %v7770_v51 }
 0x16a   : > { %v4567_v27 = vor.u32 %v4566_v13, %v7765_v36  ;;  %v1030_v38 = vsel %vm1026_vm13, %v1010_v15, %v7727_v20  ;;  %v1032_v7 = vsel %vm1028_vm8, %v7654_v18, %v1031_v1  ;;  %v7853_v26 = vsel %vm12528_vm14, %v7829_v12, 920167782  ;;  %v478_v1 = vpop.f32.mrf.mxu0  ;;  %v12763_v15 = vld [vmem:[#allocation11_spill] sm:$0xff] }
 0x16b   : > { %v969_v30 = vmul.f32 -0.001358992, %v968_v22  ;;  %v976_v52 = vmul.f32 -0.00019511016, %v968_v22  ;;  %12753 = vst [vmem:[#allocation78_spill] sm:$0xff] %v7841_v34  ;;  %v7855_v53 = vadd.s32 %v1079_v0, %v1075_v6  ;;  %v7857_v51 = vand.u32 31, %v2546_v59 }
 0x16c   : > { %12754 = vst [vmem:[#allocation79_spill] sm:$0xff] %v7853_v26  ;;  %v4702_v36 = vsel %vm4701_vm15, %v4700_v60, 0  ;;  %v965_v20 = vsel %vm842_vm3, %v964_v19, %v7665_v31  ;;  %v1090_v13 = vadd.s32 1, %v1086_v39  ;;  %v1033_v48 = vsel %vm1027_vm1, %v1030_v38, %v1032_v7 }
 0x16d   : > { %v970_v28 = vadd.f32 0.041655596, %v969_v30  ;;  %v977_v57 = vadd.f32 0.008332121, %v976_v52  ;;  %12755 = vst [vmem:[#allocation80_spill] sm:$0xff] %v7857_v51  ;;  %vm1089_vm4 = vc.u32 %v7838_v14, %v7855_v53  ;;  %v7879_v60 = vshrl.u32 %v2546_v59, 5 }
 0x16e   : > { %v7872_v0 = vsel %vm12530_vm12, %v7841_v34, 920167782  ;;  %v7876_v31 = vsel %vm12528_vm14, %v4567_v27, 1326507024  ;;  %v12464_v61 = vand.u32 2147483647, %v12758_v29  ;;  %v1087_v8 = vmul.u32 %v7707_v2, %v1033_v48 }
 0x16f   : > { %v971_v45 = vmul.f32 %v970_v28, %v968_v22  ;;  %v978_v18 = vmul.f32 %v977_v57, %v968_v22  ;;  %12756 = vst [vmem:[#allocation81_spill] sm:$0xff] %v7872_v0  ;;  %v967_v46 = vsel %vm7818_vm2, 0, %v965_v20  ;;  %v7883_v21 = vshrl.u32 %v4702_v36, 5  ;;  %v12764_v27 = vld [vmem:[#allocation8_spill] sm:$0xff] }
 0x170   : > { %12757 = vst [vmem:[#allocation82_spill] sm:$0xff] %v7876_v31  ;;  %v7885_v24 = vand.u32 31, %v4702_v36  ;;  %v1091_v41 = vsel %vm1089_vm4, %v1090_v13, %v1086_v39  ;;  %v7889_v3 = vsub.s32 32, %v7857_v51  ;;  %v1166_v59 = vshrl.u32 %v12669_v63, %v12763_v15  ;;  %v520_v39 = vpop.f32.mrf.mxu3 }
 0x171   : > { %12759 = vst [vmem:[#allocation2_spill] sm:$0xff] %v7879_v60  ;;  %v972_v37 = vadd.f32 -0.4999988, %v971_v45  ;;  %v979_v25 = vadd.f32 -0.16666654, %v978_v18  ;;  %vm983_vm13 = vweird.f32 %v6839_v10  ;;  %v984_v11 = vand.u32 3, %v967_v46 }
 0x172   : > { %12760 = vst [vmem:[#allocation83_spill] sm:$0xff] %v7883_v21  ;;  %v1092_v30 = vadd.s32 %v1091_v41, %v1087_v8  ;;  %v1155_v52 = vand.u32 8388607, %v12464_v61  ;;  %v1165_v2 = vshll.u32 %v12675_v32, %v12764_v27  ;;  %v1168_v28 = vshll.u32 %v12669_v63, %v12764_v27 }
 0x173   : > { %12761 = vst [vmem:[#allocation84_spill] sm:$0xff] %v7885_v24  ;;  %v973_v40 = vmul.f32 %v972_v37, %v968_v22  ;;  %v980_v19 = vmul.f32 %v979_v25, %v968_v22  ;;  %v1169_v22 = vshrl.u32 %v12677_v44, %v12763_v15  ;;  %v7903_v57 = vadd.f32 %v7573_v62, %v478_v1 }
 0x174   : > { %12762 = vst [vmem:[#allocation85_spill] sm:$0xff] %v7889_v3  ;;  %v1093_v36 = vadd.s32 536870912, %v1092_v30  ;;  %v1171_v20 = vshll.u32 %v12677_v44, %v12764_v27  ;;  %v1172_v13 = vshrl.u32 %v12668_v50, %v12763_v15  ;;  %v7909_v48 = vor.u32 %v1166_v59, %v1165_v2  ;;  %v12768_v2 = vld [vmem:[#allocation24_spill] sm:$0xff] }
 0x175   : > { %v974_v38 = vadd.f32 1.0, %v973_v40  ;;  %v981_v7 = vadd.f32 1.0, %v980_v19  ;;  %12765 = vst [vmem:[#allocation11_spill] sm:$0xff] %v7903_v57  ;;  %v7911_v46 = vor.u32 %v1169_v22, %v1168_v28  ;;  %v7914_v37 = vadd.f32 %v7573_v62, %v520_v39  ;;  %v12767_v19 = vld [vmem:[#allocation16_spill] sm:$0xff] }
 0x176   : > { %vm985_vm8 = vcmp.lt.s32.totalorder %v984_v11, 2  ;;  %v7916_v25 = vshrl.u32 %v1093_v36, 30  ;;  %v7918_v8 = vor.u32 %v1172_v13, %v1171_v20  ;;  %vm986_vm1 = vcmp.eq.s32.totalorder %v984_v11, 0  ;;  %v12769_v20 = vld [vmem:[#allocation25_spill] sm:$0xff]  ;;  %v12770_v13 = vld [vmem:[#allocation20_spill] sm:$0xff] }
 0x177   : > { %v982_v45 = vmul.f32 %v981_v7, %v966_v58  ;;  %v990_v18 = vxor.u32 2147483648, %v974_v38  ;;  %12766 = vst [vmem:[#allocation8_spill] sm:$0xff] %v7914_v37  ;;  %vm989_vm3 = vcmp.eq.s32.totalorder %v984_v11, 2  ;;  %v1156_v1 = vor.u32 8388608, %v1155_v52 }
 0x178   : > { %v1095_v58 = vshll.u32 %v7916_v25, 30  ;;  %vm1180_vm2 = vcmp.lt.s32.totalorder %v12767_v19, 1  ;;  %vm1182_vm9 = vcmp.lt.s32.totalorder %v12767_v19, 3  ;;  %v2691_v7 = vand.u32 2139095040, %v7903_v57 }
 0x179   : > { %v987_v41 = vxor.u32 2147483648, %v982_v45  ;;  %v991_v40 = vsel %vm989_vm3, %v990_v18, %v982_v45  ;;  %v1188_v27 = vsel %vm1180_vm2, %v7909_v48, %v7911_v46  ;;  %v1190_v39 = vsel %vm1182_vm9, %v7918_v8, %v12768_v2 }
 0x17a   : > { %v1192_v52 = vsel %vm1180_vm2, %v7911_v46, %v7918_v8  ;;  %v4847_v28 = vand.u32 2139095040, %v7914_v37  ;;  %v1096_v22 = vsub.s32 %v1092_v30, %v1095_v58  ;;  %vm1181_vm15 = vcmp.lt.s32.totalorder %v12767_v19, 2 }
 0x17b   : > { %v988_v59 = vsel %vm986_vm1, %v974_v38, %v987_v41  ;;  %v1194_v45 = vsel %vm1182_vm9, %v12770_v13, %v12769_v20  ;;  %v7945_v18 = vshll.u32 %v1156_v1, 8  ;;  %v1191_v11 = vsel %vm1181_vm15, %v1188_v27, %v1190_v39 }
 0x17c   : > { %v992_v38 = vsel %vm985_vm8, %v988_v59, %v991_v40  ;;  %vm1097_vm4 = vcmp.lt.s32.totalorder %v1096_v22, 0  ;;  %v1098_v41 = vsub.s32 0, %v1096_v22  ;;  %v1195_v10 = vsel %vm1181_vm15, %v1192_v52, %v1194_v45 }
 0x17d   : > { %v993_v36 = vsel %vm983_vm13, nan, %v992_v38  ;;  %v1197_v30 = vand.u32 65535, %v7945_v18  ;;  %v1198_v40 = vshrl.u32 %v7945_v18, 16  ;;  %v1199_v58 = vand.u32 65535, %v1195_v10 }
 0x17e   : > { %6447 = vmatmul.msk.f32.gmra.mxu1 %vm322_vm0, %v993_v36  ;;  %v1200_v59 = vshrl.u32 %v1195_v10, 16  ;;  %v7956_v1 = vshll.u32 %v12668_v50, %v7857_v51  ;;  %v7960_v2 = vshll.u32 %v12670_v4, %v7857_v51  ;;  %v2692_v38 = vshrl.u32 %v2691_v7, 23 }
 0x17f   : > { %v1099_v36 = vsel %vm1097_vm4, %v1098_v41, %v1096_v22  ;;  %v7963_v27 = vsub.s32 32, %v7885_v24  ;;  %v1203_v20 = vmul.u32 %v1199_v58, %v1198_v40  ;;  %v7967_v13 = vshrl.u32 %v12670_v4, %v7889_v3 }
 0x180   : > { %v1100_v39 = vclz %v1099_v36  ;;  %v1202_v52 = vmul.u32 %v1200_v59, %v1197_v30  ;;  %v7971_v45 = vshll.u32 %v12668_v50, %v7885_v24  ;;  %v1221_v10 = vand.u32 65535, %v1191_v11 }
 0x181   : > { %12771 = vst [vmem:[#allocation16_spill] sm:$0xff] %v7963_v27  ;;  %v1222_v61 = vshrl.u32 %v1191_v11, 16  ;;  %v4848_v6 = vshrl.u32 %v4847_v28, 23  ;;  %v1201_v7 = vmul.u32 %v1199_v58, %v1197_v30  ;;  %v6391_v57 = vadd.s32 4294967169, %v2692_v38 }
 0x182   : > { %v6359_v37 = vadd.s32 4294967294, %v1100_v39  ;;  %v1205_v41 = vshll.u32 %v1202_v52, 16  ;;  %v1204_v51 = vmul.u32 %v1200_v59, %v1198_v40  ;;  %v1207_v26 = vshll.u32 %v1203_v20, 16 }
 0x183   : > { %v1224_v36 = vmul.u32 %v1222_v61, %v1197_v30  ;;  %v1223_v31 = vmul.u32 %v1221_v10, %v1197_v30  ;;  %v1225_v0 = vmul.u32 %v1221_v10, %v1198_v40  ;;  %v1088_v11 = vadd.s32 %v7855_v53, %v7838_v14 }
 0x184   : > { %vm6360_vm13 = vcmp.lt.s32.totalorder %v6359_v37, 0  ;;  %vm1209_vm8 = vc.u32 %v1201_v7, %v1205_v41  ;;  %v1211_v12 = vadd.s32 %v1205_v41, %v1201_v7  ;;  %v1226_v59 = vmul.u32 %v1222_v61, %v1198_v40 }
 0x185   : > { %v1103_v5 = vsel %vm6360_vm13, 0, %v6359_v37  ;;  %v1210_v17 = vsel %vm1209_vm8, 1, %v12710_v9  ;;  %v1227_v34 = vshll.u32 %v1224_v36, 16  ;;  %v1206_v30 = vshrl.u32 %v1202_v52, 16 }
 0x186   : > { %v1104_v28 = vsub.s32 32, %v1103_v5  ;;  %v1108_v39 = vsub.s32 4294967266, %v1103_v5  ;;  %v1212_v58 = vadd.s32 %v1210_v17, %v1204_v51  ;;  %v1105_v43 = vshll.u32 %v1096_v22, %v1103_v5 }
 0x187   : > { %vm1213_vm1 = vc.u32 %v1211_v12, %v1207_v26  ;;  %vm1231_vm3 = vc.u32 %v1223_v31, %v1227_v34  ;;  %v1229_v10 = vshll.u32 %v1225_v0, 16  ;;  %v1233_v56 = vadd.s32 %v1227_v34, %v1223_v31 }
 0x188   : > { %v1106_v38 = vshrl.u32 %v1088_v11, %v1104_v28  ;;  %v1109_v47 = vadd.s32 127, %v1108_v39  ;;  %v1214_v7 = vsel %vm1213_vm1, 1, %v12710_v9  ;;  %v1232_v37 = vsel %vm1231_vm3, 1, %v12710_v9 }
 0x189   : > { %v1216_v41 = vadd.s32 %v1214_v7, %v1212_v58  ;;  %v2564_v14 = vshrl.u32 %v12679_v16, %v7889_v3  ;;  %v1234_v17 = vadd.s32 %v1232_v37, %v1226_v59  ;;  %v4719_v5 = vshll.u32 %v12670_v4, %v7885_v24 }
 0x18a   : > { %v1107_v53 = vor.u32 %v1106_v38, %v1105_v43  ;;  %v1110_v55 = vshll.u32 %v1109_v47, 23  ;;  %v6433_v12 = vadd.s32 4294967169, %v4848_v6  ;;  %vm1235_vm4 = vc.u32 %v1233_v56, %v1229_v10 }
 0x18b   : > { %v1217_v26 = vadd.s32 %v1216_v41, %v1206_v30  ;;  %vm12520_vm13 = vcmp.lt.s32.totalorder %v7879_v60, 4  ;;  %v4717_v51 = vshrl.u32 %v12670_v4, %v7963_v27  ;;  %v4720_v34 = vshrl.u32 %v12679_v16, %v7963_v27 }
 0x18c   : > { %v1111_v31 = vor.u32 4788187, %v1110_v55  ;;  %v1185_v43 = vsel %vm1183_vm6, %v7918_v8, 2102212464  ;;  %v2698_v47 = vadd.s32 1, %v6391_v57  ;;  %v1164_v61 = vshrl.u32 %v12675_v32, %v12763_v15 }
 0x18d   : > { %v1208_v6 = vshrl.u32 %v1203_v20, 16  ;;  %v1236_v22 = vsel %vm1235_vm4, 1, %v12710_v9  ;;  %v1114_v52 = vcvt.s32.f32 %v1107_v53  ;;  %v1228_v11 = vshrl.u32 %v1224_v36, 16 }
 0x18e   : > { %v1112_v40 = vand.u32 2147483647, %v1111_v31  ;;  %v1238_v28 = vadd.s32 %v1236_v22, %v1234_v17  ;;  %v4854_v39 = vadd.s32 1, %v6433_v12  ;;  %v1184_v55 = vsel %vm1180_vm2, %v1164_v61, %v7909_v48  ;;  %v481_v17 = vpop.f32.mrf.mxu0 }
 0x18f   : > { %v1186_v8 = vsel %vm1182_vm9, %v7911_v46, %v1185_v43  ;;  %v7999_v57 = vadd.s32 %v1217_v26, %v1208_v6  ;;  %vm12481_vm6 = vcmp.lt.s32.totalorder %v7883_v21, 4  ;;  %v1230_v20 = vshrl.u32 %v1225_v0, 16 }
 0x190   : > { %v1115_v15 = vmul.f32 %v1114_v52, %v1112_v40  ;;  %v1239_v58 = vadd.s32 %v1238_v28, %v1228_v11  ;;  %v8004_v36 = vor.u32 %v7967_v13, %v7956_v1  ;;  %v2565_v59 = vor.u32 %v2564_v14, %v7960_v2  ;;  %v523_v11 = vpop.f32.mrf.mxu3 }
 0x191   : > { %vm2699_vm8 = vcmp.gt.s32.totalorder %v2698_v47, 0  ;;  %v8007_v38 = vadd.s32 %v1233_v56, %v1229_v10  ;;  %v8010_v48 = vor.u32 %v4717_v51, %v7971_v45  ;;  %v1187_v7 = vsel %vm1181_vm15, %v1184_v55, %v1186_v8  ;;  %v12788_v55 = vld [vmem:[#allocation3_spill] sm:$0xff] }
 0x192   : > { %12772 = vst [vmem:[#allocation24_spill] sm:$0xff] %v8004_v36  ;;  %v1116_v46 = vxor.u32 2147483648, %v1115_v15  ;;  %v1240_v37 = vadd.s32 %v1239_v58, %v1230_v20  ;;  %v4721_v30 = vor.u32 %v4720_v34, %v4719_v5  ;;  %vm4855_vm2 = vcmp.gt.s32.totalorder %v4854_v39, 0  ;;  %v12790_v58 = vld [vmem:[#allocation14_spill] sm:$0xff] }
 0x193   : > { %12773 = vst [vmem:[#allocation25_spill] sm:$0xff] %v8010_v48  ;;  %vm996_vm9 = vcmp.lt.s32.totalorder %v6865_v23, 0  ;;  %vm1243_vm1 = vc.u32 %v7999_v57, %v8007_v38  ;;  %v2700_v0 = vsel %vm2699_vm8, %v2698_v47, 0  ;;  %v12774_v1 = vand.u32 2147483647, %v6865_v23 }
 0x194   : > { %v1117_v2 = vsel %vm996_vm9, %v1116_v46, %v1115_v15  ;;  %v1244_v19 = vadd.s32 1, %v1240_v37  ;;  %v12777_v13 = vor.u32 %v7813_v49, %v7796_v33  ;;  %v8035_v41 = vsel %vm12520_vm13, %v8004_v36, 920167782 }
 0x195   : > { %vm8019_vm3 = vcmp.le.f32.partialorder %v12774_v1, 0.7853982  ;;  %12778 = vst [vmem:[#allocation20_spill] sm:$0xff] %v8035_v41  ;;  %v1241_v14 = vmul.u32 %v7945_v18, %v1187_v7  ;;  %v4856_v53 = vsel %vm4855_vm2, %v4854_v39, 0  ;;  %v1118_v5 = vsub.s32 4, %v7916_v25 }
 0x196   : > { %v8030_v45 = vsel %vm12530_vm12, %v12777_v13, 1326507024  ;;  %v1120_v10 = vsel %vm8019_vm3, %v6865_v23, %v1117_v2  ;;  %v1245_v49 = vsel %vm1243_vm1, %v1244_v19, %v1240_v37  ;;  %v8044_v12 = vsel %vm12520_vm13, %v2565_v59, 1326507024  ;;  %v12792_v2 = vld [vmem:[#allocation10_spill] sm:$0xff] }
 0x197   : > { %v1122_v33 = vmul.f32 %v1120_v10, %v1120_v10  ;;  %12779 = vst [vmem:[#allocation86_spill] sm:$0xff] %v8044_v12  ;;  %v8049_v26 = vsel %vm12481_vm6, %v8010_v48, 920167782  ;;  %v8051_v51 = vand.u32 31, %v2700_v0  ;;  %v1246_v34 = vadd.s32 %v1245_v49, %v1241_v14 }
 0x198   : > { %12780 = vst [vmem:[#allocation87_spill] sm:$0xff] %v8049_v26  ;;  %v12782_v18 = vshll.u32 %v7551_v54, 16  ;;  %v8060_v43 = vsel %vm12481_vm6, %v4721_v30, 1326507024  ;;  %v8062_v6 = vshrl.u32 %v2700_v0, 5  ;;  %v8064_v22 = vshrl.u32 %v4856_v53, 5 }
 0x199   : > { %12781 = vst [vmem:[#allocation88_spill] sm:$0xff] %v8051_v51  ;;  %v1123_v47 = vmul.f32 -0.001358992, %v1122_v33  ;;  %v1130_v61 = vmul.f32 -0.00019511016, %v1122_v33  ;;  %v8066_v40 = vand.u32 31, %v4856_v53  ;;  %v8069_v52 = vadd.f32 %v7573_v62, %v481_v17 }
 0x19a   : > { %v8056_v31 = vadd.s32 %v12782_v18, %v7546_v35  ;;  %12783 = vst [vmem:[#allocation89_spill] sm:$0xff] %v8060_v43  ;;  %v1119_v35 = vsel %vm996_vm9, %v1118_v5, %v7916_v25  ;;  %v12482_v8 = vand.u32 2147483647, %v12788_v55  ;;  %v8076_v15 = vsub.s32 32, %v8051_v51 }
 0x19b   : > { %12784 = vst [vmem:[#allocation90_spill] sm:$0xff] %v8062_v6  ;;  %v1124_v28 = vadd.f32 0.041655596, %v1123_v47  ;;  %v1131_v39 = vadd.f32 0.008332121, %v1130_v61  ;;  %v1247_v20 = vadd.s32 536870912, %v1246_v34  ;;  %v1323_v59 = vshrl.u32 %v12677_v44, %v12790_v58 }
 0x19c   : > { %12785 = vst [vmem:[#allocation91_spill] sm:$0xff] %v8064_v22  ;;  %v1326_v46 = vshrl.u32 %v12668_v50, %v12790_v58  ;;  %v8083_v7 = vadd.f32 %v7573_v62, %v523_v11  ;;  %v1320_v25 = vshrl.u32 %v12669_v63, %v12790_v58  ;;  %v2845_v0 = vand.u32 2139095040, %v8069_v52 }
 0x19d   : > { %12786 = vst [vmem:[#allocation92_spill] sm:$0xff] %v8066_v40  ;;  %v1125_v37 = vmul.f32 %v1124_v28, %v1122_v33  ;;  %v1132_v30 = vmul.f32 %v1131_v39, %v1122_v33  ;;  %v1121_v1 = vsel %vm8019_vm3, 0, %v1119_v35  ;;  %v1322_v19 = vshll.u32 %v12669_v63, %v12792_v2 }
 0x19e   : > { %12787 = vst [vmem:[#allocation93_spill] sm:$0xff] %v8069_v52  ;;  %v1325_v13 = vshll.u32 %v12677_v44, %v12792_v2  ;;  %v1309_v62 = vand.u32 8388607, %v12482_v8  ;;  %v1319_v17 = vshll.u32 %v12675_v32, %v12792_v2  ;;  %v8100_v5 = vshll.u32 %v12668_v50, %v8051_v51 }
 0x19f   : > { %12789 = vst [vmem:[#allocation3_spill] sm:$0xff] %v8076_v15  ;;  %v1126_v14 = vadd.f32 -0.4999988, %v1125_v37  ;;  %v1133_v53 = vadd.f32 -0.16666654, %v1132_v30  ;;  %v8102_v56 = vshrl.u32 %v1247_v20, 30  ;;  %v8104_v49 = vor.u32 %v1323_v59, %v1322_v19 }
 0x1a0   : > { %12791 = vst [vmem:[#allocation14_spill] sm:$0xff] %v8083_v7  ;;  %v8106_v18 = vor.u32 %v1326_v46, %v1325_v13  ;;  %v8110_v47 = vshll.u32 %v12670_v4, %v8051_v51  ;;  %v8112_v35 = vor.u32 %v1320_v25, %v1319_v17  ;;  %v2846_v28 = vshrl.u32 %v2845_v0, 23  ;;  %v12793_v19 = vld [vmem:[#allocation21_spill] sm:$0xff]  ;;  %v12794_v13 = vld [vmem:[#allocation27_spill] sm:$0xff] }
 0x1a1   : > { %v1127_v61 = vmul.f32 %v1126_v14, %v1122_v33  ;;  %v1134_v11 = vmul.f32 %v1133_v53, %v1122_v33  ;;  %v5001_v39 = vand.u32 2139095040, %v8083_v7  ;;  %v1138_v37 = vand.u32 3, %v1121_v1  ;;  %v12795_v53 = vld [vmem:[#allocation30_spill] sm:$0xff] }
 0x1a2   : > { %v1249_v30 = vshll.u32 %v8102_v56, 30  ;;  %v1310_v59 = vor.u32 8388608, %v1309_v62  ;;  %vm1334_vm15 = vcmp.lt.s32.totalorder %v12793_v19, 1  ;;  %vm1137_vm4 = vweird.f32 %v6865_v23  ;;  %v12796_v62 = vld [vmem:[#allocation23_spill] sm:$0xff] }
 0x1a3   : > { %v1128_v20 = vadd.f32 1.0, %v1127_v61  ;;  %v1135_v2 = vadd.f32 1.0, %v1134_v11  ;;  %vm1336_vm8 = vcmp.lt.s32.totalorder %v12793_v19, 3  ;;  %v1346_v33 = vsel %vm1334_vm15, %v8104_v49, %v8106_v18 }
 0x1a4   : > { %v1250_v46 = vsub.s32 %v1246_v34, %v1249_v30  ;;  %v1342_v1 = vsel %vm1334_vm15, %v8112_v35, %v8104_v49  ;;  %v1344_v14 = vsel %vm1336_vm8, %v8106_v18, %v12794_v13  ;;  %vm1335_vm9 = vcmp.lt.s32.totalorder %v12793_v19, 2 }
 0x1a5   : > { %v1136_v25 = vmul.f32 %v1135_v2, %v1120_v10  ;;  %v1144_v0 = vxor.u32 2147483648, %v1128_v20  ;;  %v1348_v10 = vsel %vm1336_vm8, %v12796_v62, %v12795_v53  ;;  %vm1139_vm1 = vcmp.lt.s32.totalorder %v1138_v37, 2 }
 0x1a6   : > { %vm1251_vm2 = vcmp.lt.s32.totalorder %v1250_v46, 0  ;;  %v1252_v34 = vsub.s32 0, %v1250_v46  ;;  %v1349_v61 = vsel %vm1335_vm9, %v1346_v33, %v1348_v10  ;;  %v8138_v11 = vshll.u32 %v1310_v59, 8 }
 0x1a7   : > { %v1141_v17 = vxor.u32 2147483648, %v1136_v25  ;;  %vm1140_vm3 = vcmp.eq.s32.totalorder %v1138_v37, 0  ;;  %vm1143_vm6 = vcmp.eq.s32.totalorder %v1138_v37, 2  ;;  %v1345_v2 = vsel %vm1335_vm9, %v1342_v1, %v1344_v14 }
 0x1a8   : > { %v1253_v30 = vsel %vm1251_vm2, %v1252_v34, %v1250_v46  ;;  %v1145_v8 = vsel %vm1143_vm6, %v1144_v0, %v1136_v25  ;;  %v1351_v52 = vand.u32 65535, %v8138_v11  ;;  %v1352_v53 = vshrl.u32 %v8138_v11, 16 }
 0x1a9   : > { %v1142_v13 = vsel %vm1140_vm3, %v1128_v20, %v1141_v17  ;;  %v1254_v7 = vclz %v1253_v30  ;;  %v1353_v62 = vand.u32 65535, %v1349_v61  ;;  %v1354_v26 = vshrl.u32 %v1349_v61, 16 }
 0x1aa   : > { %v1146_v51 = vsel %vm1139_vm1, %v1142_v13, %v1145_v8  ;;  %v1375_v10 = vand.u32 65535, %v1345_v2  ;;  %v1376_v37 = vshrl.u32 %v1345_v2, 16  ;;  %v8147_v34 = vsub.s32 32, %v8066_v40 }
 0x1ab   : > { %v1147_v59 = vsel %vm1137_vm4, nan, %v1146_v51  ;;  %v6362_v33 = vadd.s32 4294967294, %v1254_v7  ;;  %v5002_v1 = vshrl.u32 %v5001_v39, 23  ;;  %v1356_v20 = vmul.u32 %v1354_v26, %v1351_v52 }
 0x1ac   : > { %12797 = vst [vmem:[#allocation10_spill] sm:$0xff] %v8147_v34  ;;  %6448 = vmatmul.msk.f32.gmra.mxu1 %vm322_vm0, %v1147_v59  ;;  %v1357_v25 = vmul.u32 %v1353_v62, %v1352_v53  ;;  %v6394_v0 = vadd.s32 4294967169, %v2846_v28  ;;  %v1242_v8 = vadd.s32 %v8007_v38, %v7999_v57  ;;  %v1378_v14 = vmul.u32 %v1376_v37, %v1351_v52 }
 0x1ad   : > { %vm6363_vm6 = vcmp.lt.s32.totalorder %v6362_v33, 0  ;;  %v1355_v23 = vmul.u32 %v1353_v62, %v1351_v52  ;;  %v1358_v51 = vmul.u32 %v1354_v26, %v1352_v53  ;;  %v1359_v7 = vshll.u32 %v1356_v20, 16 }
 0x1ae   : > { %v1257_v17 = vsel %vm6363_vm6, 0, %v6362_v33  ;;  %v1377_v2 = vmul.u32 %v1375_v10, %v1351_v52  ;;  %v1379_v13 = vmul.u32 %v1375_v10, %v1352_v53  ;;  %v1361_v48 = vshll.u32 %v1357_v25, 16 }
 0x1af   : > { %v1258_v61 = vsub.s32 32, %v1257_v17  ;;  %v1262_v30 = vsub.s32 4294967266, %v1257_v17  ;;  %vm1363_vm4 = vc.u32 %v1355_v23, %v1359_v7  ;;  %v1365_v39 = vadd.s32 %v1359_v7, %v1355_v23 }
 0x1b0   : > { %v1381_v59 = vshll.u32 %v1378_v14, 16  ;;  %v1259_v43 = vshll.u32 %v1250_v46, %v1257_v17  ;;  %v1364_v27 = vsel %vm1363_vm4, 1, %v12710_v9  ;;  %v1360_v57 = vshrl.u32 %v1356_v20, 16 }
 0x1b1   : > { %v1260_v21 = vshrl.u32 %v1242_v8, %v1258_v61  ;;  %v1263_v28 = vadd.s32 127, %v1262_v30  ;;  %v1366_v38 = vadd.s32 %v1364_v27, %v1358_v51  ;;  %vm1367_vm2 = vc.u32 %v1365_v39, %v1361_v48 }
 0x1b2   : > { %v1380_v33 = vmul.u32 %v1376_v37, %v1352_v53  ;;  %v1368_v24 = vsel %vm1367_vm2, 1, %v12710_v9  ;;  %vm1385_vm1 = vc.u32 %v1377_v2, %v1381_v59  ;;  %v1383_v10 = vshll.u32 %v1379_v13, 16 }
 0x1b3   : > { %v1261_v62 = vor.u32 %v1260_v21, %v1259_v43  ;;  %v1264_v26 = vshll.u32 %v1263_v28, 23  ;;  %v1370_v52 = vadd.s32 %v1368_v24, %v1366_v38  ;;  %v1386_v36 = vsel %vm1385_vm1, 1, %v12710_v9 }
 0x1b4   : > { %v1387_v23 = vadd.s32 %v1381_v59, %v1377_v2  ;;  %v2715_v46 = vshrl.u32 %v12670_v4, %v8076_v15  ;;  %v2718_v8 = vshrl.u32 %v12679_v16, %v8076_v15  ;;  %v4870_v27 = vshll.u32 %v12668_v50, %v8066_v40 }
 0x1b5   : > { %v1265_v48 = vor.u32 4788187, %v1264_v26  ;;  %v6436_v21 = vadd.s32 4294967169, %v5002_v1  ;;  %v1371_v43 = vadd.s32 %v1370_v52, %v1360_v57  ;;  %v1388_v53 = vadd.s32 %v1386_v36, %v1380_v33 }
 0x1b6   : > { %vm1389_vm3 = vc.u32 %v1387_v23, %v1383_v10  ;;  %v2852_v37 = vadd.s32 1, %v6394_v0  ;;  %v1268_v20 = vcvt.s32.f32 %v1261_v62  ;;  %v4871_v51 = vshrl.u32 %v12670_v4, %v8147_v34 }
 0x1b7   : > { %v1266_v24 = vand.u32 2147483647, %v1265_v48  ;;  %v1390_v17 = vsel %vm1389_vm3, 1, %v12710_v9  ;;  %v1362_v7 = vshrl.u32 %v1357_v25, 16  ;;  %v1382_v61 = vshrl.u32 %v1378_v14, 16 }
 0x1b8   : > { %v1392_v30 = vadd.s32 %v1390_v17, %v1388_v53  ;;  %v4873_v2 = vshll.u32 %v12670_v4, %v8066_v40  ;;  %v4874_v1 = vshrl.u32 %v12679_v16, %v8147_v34  ;;  %v1339_v36 = vsel %vm1337_vm7, %v8106_v18, 2102212464  ;;  %v12806_v17 = vld [vmem:[#allocation64_spill] sm:$0xff] }
 0x1b9   : > { %v1269_v39 = vmul.f32 %v1268_v20, %v1266_v24  ;;  %v1318_v0 = vshrl.u32 %v12675_v32, %v12790_v58  ;;  %v8173_v59 = vadd.s32 %v1371_v43, %v1362_v7  ;;  %v1384_v28 = vshrl.u32 %v1379_v13, 16 }
 0x1ba   : > { %v1393_v25 = vadd.s32 %v1392_v30, %v1382_v61  ;;  %vm2853_vm6 = vcmp.gt.s32.totalorder %v2852_v37, 0  ;;  %v5008_v14 = vadd.s32 1, %v6436_v21  ;;  %vm1150_vm4 = vcmp.lt.s32.totalorder %v12758_v29, 0 }
 0x1bb   : > { %v1270_v57 = vxor.u32 2147483648, %v1269_v39  ;;  %v1338_v38 = vsel %vm1334_vm15, %v1318_v0, %v8112_v35  ;;  %v1340_v18 = vsel %vm1336_vm8, %v8104_v49, %v1339_v36  ;;  %v8182_v33 = vadd.s32 %v1387_v23, %v1383_v10 }
 0x1bc   : > { %v1394_v58 = vadd.s32 %v1393_v25, %v1384_v28  ;;  %v8185_v62 = vor.u32 %v2715_v46, %v8100_v5  ;;  %v2719_v13 = vor.u32 %v2718_v8, %v8110_v47  ;;  %v12799_v26 = vand.u32 2147483647, %v12758_v29 }
 0x1bd   : > { %v1271_v35 = vsel %vm1150_vm4, %v1270_v57, %v1269_v39  ;;  %v1272_v48 = vsub.s32 4, %v8102_v56  ;;  %vm1397_vm15 = vc.u32 %v8173_v59, %v8182_v33  ;;  %vm12519_vm8 = vcmp.lt.s32.totalorder %v8062_v6, 4 }
 0x1be   : > { %12798 = vst [vmem:[#allocation21_spill] sm:$0xff] %v8185_v62  ;;  %vm8190_vm7 = vcmp.le.f32.partialorder %v12799_v26, 0.7853982  ;;  %v1398_v5 = vadd.s32 1, %v1394_v58  ;;  %v2854_v47 = vsel %vm2853_vm6, %v2852_v37, 0  ;;  %v1341_v23 = vsel %vm1335_vm9, %v1338_v38, %v1340_v18 }
 0x1bf   : > { %v1274_v49 = vsel %vm8190_vm7, %v12758_v29, %v1271_v35  ;;  %v8206_v46 = vor.u32 %v4871_v51, %v4870_v27  ;;  %v4875_v8 = vor.u32 %v4874_v1, %v4873_v2  ;;  %vm12502_vm2 = vcmp.lt.s32.totalorder %v8064_v22, 4  ;;  %v12807_v51 = vld [vmem:[#allocation19_spill] sm:$0xff] }
 0x1c0   : > { %v1276_v10 = vmul.f32 %v1274_v49, %v1274_v49  ;;  %vm5009_vm1 = vcmp.gt.s32.totalorder %v5008_v14, 0  ;;  %v8212_v21 = vsel %vm12519_vm8, %v8185_v62, 920167782  ;;  %v1399_v24 = vsel %vm1397_vm15, %v1398_v5, %v1394_v58  ;;  %v12814_v58 = vld [vmem:[#allocation22_spill] sm:$0xff] }
 0x1c1   : > { %12802 = vst [vmem:[#allocation27_spill] sm:$0xff] %v8206_v46  ;;  %v8216_v37 = vsel %vm12519_vm8, %v2719_v13, 1326507024  ;;  %v8218_v19 = vand.u32 31, %v2854_v47  ;;  %v1273_v27 = vsel %vm1150_vm4, %v1272_v48, %v8102_v56  ;;  %v1395_v20 = vmul.u32 %v8138_v11, %v1341_v23  ;;  %v12810_v56 = vld [vmem:[#allocation4_spill] sm:$0xff] }
 0x1c2   : > { %12803 = vst [vmem:[#allocation30_spill] sm:$0xff] %v8212_v21  ;;  %v1277_v43 = vmul.f32 -0.001358992, %v1276_v10  ;;  %v1284_v53 = vmul.f32 -0.00019511016, %v1276_v10  ;;  %v8226_v7 = vadd.s32 %v12807_v51, %v12806_v17  ;;  %v5010_v61 = vsel %vm5009_vm1, %v5008_v14, 0 }
 0x1c3   : > { %12804 = vst [vmem:[#allocation23_spill] sm:$0xff] %v8216_v37  ;;  %v8231_v1 = vsel %vm12502_vm2, %v8206_v46, 920167782  ;;  %v8235_v39 = vsel %vm12502_vm2, %v4875_v8, 1326507024  ;;  %v1400_v36 = vadd.s32 %v1399_v24, %v1395_v20  ;;  %v8238_v11 = vshrl.u32 %v2854_v47, 5 }
 0x1c4   : > { %12805 = vst [vmem:[#allocation94_spill] sm:$0xff] %v8218_v19  ;;  %v1278_v30 = vadd.f32 0.041655596, %v1277_v43  ;;  %v1285_v2 = vadd.f32 0.008332121, %v1284_v53  ;;  %v1275_v28 = vsel %vm8190_vm7, 0, %v1273_v27  ;;  %v8247_v38 = vshll.u32 %v12668_v50, %v8218_v19 }
 0x1c5   : > { %12808 = vst [vmem:[#allocation64_spill] sm:$0xff] %v8231_v1  ;;  %v12497_v0 = vand.u32 2147483647, %v12810_v56  ;;  %v8243_v57 = vsub.s32 32, %v8218_v19  ;;  %v8249_v18 = vand.u32 31, %v5010_v61  ;;  %v1474_v13 = vshrl.u32 %v12669_v63, %v12814_v58  ;;  %v12815_v8 = vld [vmem:[#allocation18_spill] sm:$0xff] }
 0x1c6   : > { %12809 = vst [vmem:[#allocation19_spill] sm:$0xff] %v8235_v39  ;;  %v1279_v25 = vmul.f32 %v1278_v30, %v1276_v10  ;;  %v1286_v14 = vmul.f32 %v1285_v2, %v1276_v10  ;;  %v1477_v52 = vshrl.u32 %v12677_v44, %v12814_v58  ;;  %v1480_v48 = vshrl.u32 %v12668_v50, %v12814_v58 }
 0x1c7   : > { %12811 = vst [vmem:[#allocation4_spill] sm:$0xff] %v8238_v11  ;;  %v1292_v5 = vand.u32 3, %v1275_v28  ;;  %v1401_v47 = vadd.s32 536870912, %v1400_v36  ;;  %v1463_v23 = vand.u32 8388607, %v12497_v0  ;;  %v1473_v43 = vshll.u32 %v12675_v32, %v12815_v8  ;;  %v12821_v0 = vld [vmem:[#allocation31_spill] sm:$0xff] }
 0x1c8   : > { %12812 = vst [vmem:[#allocation95_spill] sm:$0xff] %v8243_v57  ;;  %v1280_v26 = vadd.f32 -0.4999988, %v1279_v25  ;;  %v1287_v35 = vadd.f32 -0.16666654, %v1286_v14  ;;  %v1476_v27 = vshll.u32 %v12669_v63, %v12815_v8  ;;  %v1479_v20 = vshll.u32 %v12677_v44, %v12815_v8 }
 0x1c9   : > { %12813 = vst [vmem:[#allocation96_spill] sm:$0xff] %v8249_v18  ;;  %v8267_v17 = vshll.u32 %v12670_v4, %v8218_v19  ;;  %v8269_v51 = vshrl.u32 %v5010_v61, 5  ;;  %v8271_v30 = vshrl.u32 %v1401_v47, 30  ;;  %v8273_v2 = vor.u32 %v1474_v13, %v1473_v43 }
 0x1ca   : > { %v1281_v53 = vmul.f32 %v1280_v26, %v1276_v10  ;;  %v1288_v24 = vmul.f32 %v1287_v35, %v1276_v10  ;;  %v8275_v14 = vor.u32 %v1477_v52, %v1476_v27  ;;  %v8277_v10 = vor.u32 %v1480_v48, %v1479_v20  ;;  %v12818_v48 = vld [vmem:[#allocation28_spill] sm:$0xff]  ;;  %v12819_v27 = vld [vmem:[#allocation35_spill] sm:$0xff] }
 0x1cb   : > { %12816 = vst [vmem:[#allocation22_spill] sm:$0xff] %v8269_v51  ;;  %v2869_v26 = vshrl.u32 %v12670_v4, %v8243_v57  ;;  %v8283_v35 = vshrl.u32 %v12679_v16, %v8243_v57  ;;  %v8286_v61 = vsub.s32 32, %v8249_v18  ;;  %v1403_v47 = vshll.u32 %v8271_v30, 30 }
 0x1cc   : > { %v1282_v28 = vadd.f32 1.0, %v1281_v53  ;;  %v1289_v25 = vadd.f32 1.0, %v1288_v24  ;;  %vm1293_vm9 = vcmp.lt.s32.totalorder %v1292_v5, 2  ;;  %v1464_v43 = vor.u32 8388608, %v1463_v23 }
 0x1cd   : > { %12817 = vst [vmem:[#allocation18_spill] sm:$0xff] %v8286_v61  ;;  %vm1294_vm3 = vcmp.eq.s32.totalorder %v1292_v5, 0  ;;  %v1404_v52 = vsub.s32 %v1400_v36, %v1403_v47  ;;  %vm1488_vm6 = vcmp.lt.s32.totalorder %v12818_v48, 1  ;;  %vm1490_vm4 = vcmp.lt.s32.totalorder %v12818_v48, 3  ;;  %v12820_v47 = vld [vmem:[#allocation36_spill] sm:$0xff] }
 0x1ce   : > { %v1290_v13 = vmul.f32 %v1289_v25, %v1274_v49  ;;  %v1298_v8 = vxor.u32 2147483648, %v1282_v28  ;;  %vm1297_vm7 = vcmp.eq.s32.totalorder %v1292_v5, 2  ;;  %v1496_v24 = vsel %vm1488_vm6, %v8273_v2, %v8275_v14 }
 0x1cf   : > { %v1498_v49 = vsel %vm1490_vm4, %v8277_v10, %v12819_v27  ;;  %vm1405_vm15 = vcmp.lt.s32.totalorder %v1404_v52, 0  ;;  %v1406_v23 = vsub.s32 0, %v1404_v52  ;;  %vm1489_vm1 = vcmp.lt.s32.totalorder %v12818_v48, 2 }
 0x1d0   : > { %v1295_v53 = vxor.u32 2147483648, %v1290_v13  ;;  %v1500_v36 = vsel %vm1488_vm6, %v8275_v14, %v8277_v10  ;;  %v1299_v25 = vsel %vm1297_vm7, %v1298_v8, %v1290_v13  ;;  %v1502_v19 = vsel %vm1490_vm4, %v12821_v0, %v12820_v47 }
 0x1d1   : > { %v8308_v57 = vshll.u32 %v1464_v43, 8  ;;  %vm1291_vm2 = vweird.f32 %v12758_v29  ;;  %v1407_v1 = vsel %vm1405_vm15, %v1406_v23, %v1404_v52  ;;  %v1499_v46 = vsel %vm1489_vm1, %v1496_v24, %v1498_v49 }
 0x1d2   : > { %v1296_v20 = vsel %vm1294_vm3, %v1282_v28, %v1295_v53  ;;  %v8316_v39 = vshll.u32 %v12668_v50, %v8249_v18  ;;  %v1408_v13 = vclz %v1407_v1  ;;  %v1503_v8 = vsel %vm1489_vm1, %v1500_v36, %v1502_v19 }
 0x1d3   : > { %v1300_v27 = vsel %vm1293_vm9, %v1296_v20, %v1299_v25  ;;  %v1505_v0 = vand.u32 65535, %v8308_v57  ;;  %v1506_v29 = vshrl.u32 %v8308_v57, 16  ;;  %v1507_v5 = vand.u32 65535, %v1503_v8 }
 0x1d4   : > { %v1301_v28 = vsel %vm1291_vm2, nan, %v1300_v27  ;;  %v1508_v43 = vshrl.u32 %v1503_v8, 16  ;;  %v8325_v53 = vshll.u32 %v12670_v4, %v8249_v18  ;;  %v6365_v24 = vadd.s32 4294967294, %v1408_v13 }
 0x1d5   : > { %6449 = vmatmul.msk.f32.gmra.mxu1 %vm322_vm0, %v1301_v28  ;;  %v1529_v49 = vand.u32 65535, %v1499_v46  ;;  %v1530_v23 = vshrl.u32 %v1499_v46, 16  ;;  %v8328_v1 = vor.u32 %v2869_v26, %v8247_v38  ;;  %v2873_v19 = vor.u32 %v8283_v35, %v8267_v17 }
 0x1d6   : > { %vm12518_vm2 = vcmp.lt.s32.totalorder %v8238_v11, 4  ;;  %v1510_v36 = vmul.u32 %v1508_v43, %v1505_v0  ;;  %v1511_v20 = vmul.u32 %v1507_v5, %v1506_v29  ;;  %v5025_v25 = vshrl.u32 %v12670_v4, %v8286_v61 }
 0x1d7   : > { %12822 = vst [vmem:[#allocation28_spill] sm:$0xff] %v8328_v1  ;;  %v1396_v47 = vadd.s32 %v8182_v33, %v8173_v59  ;;  %vm6366_vm9 = vcmp.lt.s32.totalorder %v6365_v24, 0  ;;  %v1532_v27 = vmul.u32 %v1530_v23, %v1505_v0  ;;  %v1509_v46 = vmul.u32 %v1507_v5, %v1505_v0 }
 0x1d8   : > { %v1411_v28 = vsel %vm6366_vm9, 0, %v6365_v24  ;;  %v1512_v13 = vmul.u32 %v1508_v43, %v1506_v29  ;;  %v1513_v38 = vshll.u32 %v1510_v36, 16  ;;  %v1531_v18 = vmul.u32 %v1529_v49, %v1505_v0 }
 0x1d9   : > { %v1412_v26 = vsub.s32 32, %v1411_v28  ;;  %v1416_v8 = vsub.s32 4294967266, %v1411_v28  ;;  %v1533_v17 = vmul.u32 %v1529_v49, %v1506_v29  ;;  %v1515_v35 = vshll.u32 %v1511_v20, 16 }
 0x1da   : > { %vm1517_vm3 = vc.u32 %v1509_v46, %v1513_v38  ;;  %v1519_v22 = vadd.s32 %v1513_v38, %v1509_v46  ;;  %v1535_v34 = vshll.u32 %v1532_v27, 16  ;;  %v1413_v40 = vshll.u32 %v1404_v52, %v1411_v28 }
 0x1db   : > { %v1414_v21 = vshrl.u32 %v1396_v47, %v1412_v26  ;;  %v1417_v62 = vadd.s32 127, %v1416_v8  ;;  %v1518_v37 = vsel %vm1517_vm3, 1, %v12710_v9  ;;  %v1514_v59 = vshrl.u32 %v1510_v36, 16 }
 0x1dc   : > { %v1520_v33 = vadd.s32 %v1518_v37, %v1512_v13  ;;  %vm1521_vm7 = vc.u32 %v1519_v22, %v1515_v35  ;;  %v1534_v24 = vmul.u32 %v1530_v23, %v1506_v29  ;;  %vm1539_vm15 = vc.u32 %v1531_v18, %v1535_v34  ;;  %v484_v22 = vpop.f32.mrf.mxu0 }
 0x1dd   : > { %v1415_v5 = vor.u32 %v1414_v21, %v1413_v40  ;;  %v1418_v43 = vshll.u32 %v1417_v62, 23  ;;  %v1522_v6 = vsel %vm1521_vm7, 1, %v12710_v9  ;;  %v1537_v49 = vshll.u32 %v1533_v17, 16 }
 0x1de   : > { %v1524_v0 = vadd.s32 %v1522_v6, %v1520_v33  ;;  %v1540_v15 = vsel %vm1539_vm15, 1, %v12710_v9  ;;  %v1541_v46 = vadd.s32 %v1535_v34, %v1531_v18  ;;  %v8343_v52 = vsel %vm12518_vm2, %v8328_v1, 920167782  ;;  %v526_v18 = vpop.f32.mrf.mxu3  ;;  %v12828_v33 = vld [vmem:[#allocation5_spill] sm:$0xff] }
 0x1df   : > { %12823 = vst [vmem:[#allocation35_spill] sm:$0xff] %v8343_v52  ;;  %v8347_v37 = vshrl.u32 %v12679_v16, %v8286_v61  ;;  %v1419_v40 = vor.u32 4788187, %v1418_v43  ;;  %v1542_v62 = vadd.s32 %v1540_v15, %v1534_v24  ;;  %v1472_v21 = vshrl.u32 %v12675_v32, %v12814_v58  ;;  %v8363_v58 = vld [vmem:[%s12339_s2] ss:$0 sm:$0xff] }
 0x1e0   : > { %vm12824_vm9 = vcmp.lt.s32.totalorder %v12818_v48, 4  ;;  %v1525_v34 = vadd.s32 %v1524_v0, %v1514_v59  ;;  %vm1543_vm3 = vc.u32 %v1541_v46, %v1537_v49  ;;  %vm5033_vm7 = vcmp.lt.s32.totalorder %v8269_v51, 4 }
 0x1e1   : > { %v1493_v6 = vsel %vm12824_vm9, %v8277_v10, 2102212464  ;;  %v1420_v29 = vand.u32 2147483647, %v1419_v40  ;;  %v1422_v23 = vcvt.s32.f32 %v1415_v5  ;;  %v1516_v36 = vshrl.u32 %v1511_v20, 16 }
 0x1e2   : > { %v1544_v47 = vsel %vm1543_vm3, 1, %v12710_v9  ;;  %v8358_v15 = vsel %vm12518_vm2, %v2873_v19, 1326507024  ;;  %v8366_v10 = vadd.f32 %v8363_v58, %v484_v22  ;;  %v1536_v28 = vshrl.u32 %v1532_v27, 16 }
 0x1e3   : > { %12825 = vst [vmem:[#allocation36_spill] sm:$0xff] %v8358_v15  ;;  %v1546_v13 = vadd.s32 %v1544_v47, %v1542_v62  ;;  %v1423_v38 = vmul.f32 %v1422_v23, %v1420_v29  ;;  %v1492_v20 = vsel %vm1488_vm6, %v1472_v21, %v8273_v2  ;;  %v1494_v19 = vsel %vm1490_vm4, %v8275_v14, %v1493_v6 }
 0x1e4   : > { %12826 = vst [vmem:[#allocation31_spill] sm:$0xff] %v8366_v10  ;;  %v8374_v26 = vadd.s32 %v1525_v34, %v1516_v36  ;;  %v8377_v8 = vadd.f32 %v8363_v58, %v526_v18  ;;  %v1538_v35 = vshrl.u32 %v1533_v17, 16  ;;  %v12517_v24 = vand.u32 2147483647, %v12828_v33  ;;  %v12834_v18 = vld [vmem:[#allocation26_spill] sm:$0xff] }
 0x1e5   : > { %v1547_v59 = vadd.s32 %v1546_v13, %v1536_v28  ;;  %v8381_v27 = vor.u32 %v5025_v25, %v8316_v39  ;;  %vm1304_vm15 = vcmp.lt.s32.totalorder %v12788_v55, 0  ;;  %v1424_v5 = vxor.u32 2147483648, %v1423_v38  ;;  %v12833_v25 = vld [vmem:[#allocation29_spill] sm:$0xff] }
 0x1e6   : > { %12827 = vst [vmem:[#allocation97_spill] sm:$0xff] %v8377_v8  ;;  %v8384_v2 = vadd.s32 %v1541_v46, %v1537_v49  ;;  %v2999_v43 = vand.u32 2139095040, %v8366_v10  ;;  %v12830_v14 = vand.u32 2147483647, %v12788_v55  ;;  %v1495_v17 = vsel %vm1489_vm1, %v1492_v20, %v1494_v19 }
 0x1e7   : > { %12829 = vst [vmem:[#allocation5_spill] sm:$0xff] %v8381_v27  ;;  %v1548_v22 = vadd.s32 %v1547_v59, %v1538_v35  ;;  %v1425_v39 = vsel %vm1304_vm15, %v1424_v5, %v1423_v38  ;;  %v1631_v49 = vshrl.u32 %v12677_v44, %v12833_v25  ;;  %v1634_v46 = vshrl.u32 %v12668_v50, %v12833_v25 }
 0x1e8   : > { %vm8389_vm6 = vcmp.le.f32.partialorder %v12830_v14, 0.7853982  ;;  %vm1551_vm4 = vc.u32 %v8374_v26, %v8384_v2  ;;  %v5155_v40 = vand.u32 2139095040, %v8377_v8  ;;  %v1617_v21 = vand.u32 8388607, %v12517_v24 }
 0x1e9   : > { %v1428_v48 = vsel %vm8389_vm6, %v12788_v55, %v1425_v39  ;;  %v1552_v62 = vadd.s32 1, %v1548_v22  ;;  %v1426_v6 = vsub.s32 4, %v8271_v30  ;;  %v1630_v29 = vshll.u32 %v12669_v63, %v12834_v18 }
 0x1ea   : > { %v1430_v34 = vmul.f32 %v1428_v48, %v1428_v48  ;;  %v1633_v23 = vshll.u32 %v12677_v44, %v12834_v18  ;;  %v3000_v36 = vshrl.u32 %v2999_v43, 23  ;;  %v1549_v47 = vmul.u32 %v8308_v57, %v1495_v17 }
 0x1eb   : > { %v1553_v28 = vsel %vm1551_vm4, %v1552_v62, %v1548_v22  ;;  %v1628_v13 = vshrl.u32 %v12669_v63, %v12833_v25  ;;  %v8417_v19 = vor.u32 %v1631_v49, %v1630_v29  ;;  %v8424_v59 = vsel %vm5033_vm7, %v8381_v27, 920167782  ;;  %v12836_v29 = vld [vmem:[#allocation34_spill] sm:$0xff] }
 0x1ec   : > { %v1431_v38 = vmul.f32 -0.001358992, %v1430_v34  ;;  %v1438_v20 = vmul.f32 -0.00019511016, %v1430_v34  ;;  %v8419_v35 = vor.u32 %v1634_v46, %v1633_v23  ;;  %12835 = vst [vmem:[#allocation29_spill] sm:$0xff] %v8424_v59  ;;  %v1554_v5 = vadd.s32 %v1553_v28, %v1549_v47 }
 0x1ed   : > { %v1618_v14 = vor.u32 8388608, %v1617_v21  ;;  %v1627_v57 = vshll.u32 %v12675_v32, %v12834_v18  ;;  %v5156_v43 = vshrl.u32 %v5155_v40, 23  ;;  %v1427_v17 = vsel %vm1304_vm15, %v1426_v6, %v8271_v30  ;;  %v12837_v6 = vld [vmem:[#allocation42_spill] sm:$0xff] }
 0x1ee   : > { %v1432_v22 = vadd.f32 0.041655596, %v1431_v38  ;;  %v1439_v39 = vadd.f32 0.008332121, %v1438_v20  ;;  %v6397_v49 = vadd.s32 4294967169, %v3000_v36  ;;  %v1555_v46 = vadd.s32 536870912, %v1554_v5 }
 0x1ef   : > { %v8431_v62 = vor.u32 %v1628_v13, %v1627_v57  ;;  %vm1642_vm1 = vcmp.lt.s32.totalorder %v12836_v29, 1  ;;  %vm1644_vm9 = vcmp.lt.s32.totalorder %v12836_v29, 3  ;;  %v1429_v30 = vsel %vm8389_vm6, 0, %v1427_v17  ;;  %v12838_v18 = vld [vmem:[#allocation38_spill] sm:$0xff] }
 0x1f0   : > { %v1433_v23 = vmul.f32 %v1432_v22, %v1430_v34  ;;  %v1440_v24 = vmul.f32 %v1439_v39, %v1430_v34  ;;  %v1654_v40 = vsel %vm1642_vm1, %v8417_v19, %v8419_v35  ;;  %v8441_v21 = vshrl.u32 %v1555_v46, 30 }
 0x1f1   : > { %v1656_v36 = vsel %vm1644_vm9, %v12838_v18, %v12837_v6  ;;  %v8447_v47 = vshll.u32 %v1618_v14, 8  ;;  %vm1643_vm3 = vcmp.lt.s32.totalorder %v12836_v29, 2  ;;  %v3006_v20 = vadd.s32 1, %v6397_v49 }
 0x1f2   : > { %v1434_v13 = vadd.f32 -0.4999988, %v1433_v23  ;;  %v1441_v38 = vadd.f32 -0.16666654, %v1440_v24  ;;  %v6439_v57 = vadd.s32 4294967169, %v5156_v43  ;;  %v1557_v0 = vshll.u32 %v8441_v21, 30 }
 0x1f3   : > { %v1657_v17 = vsel %vm1643_vm3, %v1654_v40, %v1656_v36  ;;  %v1446_v46 = vand.u32 3, %v1429_v30  ;;  %v1650_v14 = vsel %vm1642_vm1, %v8431_v62, %v8417_v19  ;;  %v12839_v23 = vld [vmem:[#allocation41_spill] sm:$0xff]  ;;  %v1659_v43 = vand.u32 65535, %v8447_v47 }
 0x1f4   : > { %v1435_v22 = vmul.f32 %v1434_v13, %v1430_v34  ;;  %v1442_v39 = vmul.f32 %v1441_v38, %v1430_v34  ;;  %v1558_v6 = vsub.s32 %v1554_v5, %v1557_v0  ;;  %v1652_v24 = vsel %vm1644_vm9, %v8419_v35, %v12839_v23 }
 0x1f5   : > { %v1661_v49 = vand.u32 65535, %v1657_v17  ;;  %v1660_v40 = vshrl.u32 %v8447_v47, 16  ;;  %v1662_v34 = vshrl.u32 %v1657_v17, 16  ;;  %vm3007_vm15 = vcmp.gt.s32.totalorder %v3006_v20, 0 }
 0x1f6   : > { %v1436_v18 = vadd.f32 1.0, %v1435_v22  ;;  %v1443_v28 = vadd.f32 1.0, %v1442_v39  ;;  %v5162_v30 = vadd.s32 1, %v6439_v57  ;;  %vm1559_vm6 = vcmp.lt.s32.totalorder %v1558_v6, 0 }
 0x1f7   : > { %v1560_v36 = vsub.s32 0, %v1558_v6  ;;  %v1664_v5 = vmul.u32 %v1662_v34, %v1659_v43  ;;  %v8465_v0 = vmul.u32 %v1661_v49, %v1660_v40  ;;  %vm1445_vm4 = vweird.f32 %v12788_v55 }
 0x1f8   : > { %v1444_v13 = vmul.f32 %v1443_v28, %v1428_v48  ;;  %v1452_v38 = vxor.u32 2147483648, %v1436_v18  ;;  %vm1447_vm2 = vcmp.lt.s32.totalorder %v1446_v46, 2  ;;  %v1653_v22 = vsel %vm1643_vm3, %v1650_v14, %v1652_v24 }
 0x1f9   : > { %v1561_v23 = vsel %vm1559_vm6, %v1560_v36, %v1558_v6  ;;  %vm1448_vm8 = vcmp.eq.s32.totalorder %v1446_v46, 0  ;;  %vm1451_vm13 = vcmp.eq.s32.totalorder %v1446_v46, 2  ;;  %v1663_v57 = vmul.u32 %v1661_v49, %v1659_v43 }
 0x1fa   : > { %v1449_v39 = vxor.u32 2147483648, %v1444_v13  ;;  %v1562_v17 = vclz %v1561_v23  ;;  %v1453_v8 = vsel %vm1451_vm13, %v1452_v38, %v1444_v13  ;;  %v1666_v10 = vmul.u32 %v1662_v34, %v1660_v40 }
 0x1fb   : > { %v1667_v59 = vshll.u32 %v1664_v5, 16  ;;  %v1669_v27 = vshll.u32 %v8465_v0, 16  ;;  %v1684_v61 = vshrl.u32 %v1653_v22, 16  ;;  %v1683_v36 = vand.u32 65535, %v1653_v22 }
 0x1fc   : > { %v1450_v48 = vsel %vm1448_vm8, %v1436_v18, %v1449_v39  ;;  %v6368_v28 = vadd.s32 4294967294, %v1562_v17  ;;  %vm5163_vm6 = vcmp.gt.s32.totalorder %v5162_v30, 0  ;;  %v1550_v34 = vadd.s32 %v8384_v2, %v8374_v26 }
 0x1fd   : > { %v1454_v52 = vsel %vm1447_vm2, %v1450_v48, %v1453_v8  ;;  %vm1671_vm14 = vc.u32 %v1663_v57, %v1667_v59  ;;  %v1673_v1 = vadd.s32 %v1667_v59, %v1663_v57  ;;  %v1686_v18 = vmul.u32 %v1684_v61, %v1659_v43 }
 0x1fe   : > { %v1455_v14 = vsel %vm1445_vm4, nan, %v1454_v52  ;;  %vm6369_vm12 = vcmp.lt.s32.totalorder %v6368_v28, 0  ;;  %v1672_v46 = vsel %vm1671_vm14, 1, %v12710_v9  ;;  %v1685_v23 = vmul.u32 %v1683_v36, %v1659_v43 }
 0x1ff   : > { %6450 = vmatmul.msk.f32.gmra.mxu1 %vm322_vm0, %v1455_v14  ;;  %v1565_v24 = vsel %vm6369_vm12, 0, %v6368_v28  ;;  %v1674_v49 = vadd.s32 %v1672_v46, %v1666_v10  ;;  %vm1675_vm13 = vc.u32 %v1673_v1, %v1669_v27  ;;  %v1687_v55 = vmul.u32 %v1683_v36, %v1660_v40 }
 0x200   : > { %v1566_v8 = vsub.s32 32, %v1565_v24  ;;  %v1570_v13 = vsub.s32 4294967266, %v1565_v24  ;;  %v1676_v59 = vsel %vm1675_vm13, 1, %v12710_v9  ;;  %v1689_v52 = vshll.u32 %v1686_v18, 16 }
 0x201   : > { %v1678_v38 = vadd.s32 %v1676_v59, %v1674_v49  ;;  %v3008_v22 = vsel %vm3007_vm15, %v3006_v20, 0  ;;  %v1567_v39 = vshll.u32 %v1558_v6, %v1565_v24  ;;  %v1668_v48 = vshrl.u32 %v1664_v5, 16 }
 0x202   : > { %v1568_v17 = vshrl.u32 %v1550_v34, %v1566_v8  ;;  %v1571_v57 = vadd.s32 127, %v1570_v13  ;;  %v1688_v10 = vmul.u32 %v1684_v61, %v1660_v40  ;;  %v1691_v1 = vshll.u32 %v1687_v55, 16 }
 0x203   : > { %vm1693_vm14 = vc.u32 %v1685_v23, %v1689_v52  ;;  %v1695_v2 = vadd.s32 %v1689_v52, %v1685_v23  ;;  %v12840_v14 = vor.u32 %v8347_v37, %v8325_v53  ;;  %v5164_v20 = vsel %vm5163_vm6, %v5162_v30, 0 }
 0x204   : > { %v1569_v27 = vor.u32 %v1568_v17, %v1567_v39  ;;  %v1572_v28 = vshll.u32 %v1571_v57, 23  ;;  %v1694_v26 = vsel %vm1693_vm14, 1, %v12710_v9  ;;  %v1679_v6 = vadd.s32 %v1678_v38, %v1668_v48  ;;  %v12844_v38 = vld [vmem:[#allocation7_spill] sm:$0xff]  ;;  %v12846_v39 = vld [vmem:[#allocation37_spill] sm:$0xff] }
 0x205   : > { %v8485_v43 = vsel %vm5033_vm7, %v12840_v14, 1326507024  ;;  %v1696_v36 = vadd.s32 %v1694_v26, %v1688_v10  ;;  %v8488_v5 = vshrl.u32 %v3008_v22, 5  ;;  %vm12842_vm12 = vcmp.lt.s32.totalorder %v12836_v29, 4 }
 0x206   : > { %12841 = vst [vmem:[#allocation26_spill] sm:$0xff] %v8485_v43  ;;  %v1573_v61 = vor.u32 4788187, %v1572_v28  ;;  %v1647_v40 = vsel %vm12842_vm12, %v8419_v35, 2102212464  ;;  %vm1697_vm8 = vc.u32 %v1695_v2, %v1691_v1  ;;  %v8493_v46 = vand.u32 31, %v3008_v22 }
 0x207   : > { %v1626_v53 = vshrl.u32 %v12675_v32, %v12833_v25  ;;  %v1670_v37 = vshrl.u32 %v8465_v0, 16  ;;  %v1698_v24 = vsel %vm1697_vm8, 1, %v12710_v9  ;;  %v1576_v49 = vcvt.s32.f32 %v1569_v27 }
 0x208   : > { %12843 = vst [vmem:[#allocation34_spill] sm:$0xff] %v8493_v46  ;;  %v1574_v30 = vand.u32 2147483647, %v1573_v61  ;;  %v1690_v34 = vshrl.u32 %v1686_v18, 16  ;;  %v1700_v8 = vadd.s32 %v1698_v24, %v1696_v36  ;;  %v1648_v35 = vsel %vm1644_vm9, %v8417_v19, %v1647_v40 }
 0x209   : > { %v1646_v13 = vsel %vm1642_vm1, %v1626_v53, %v8431_v62  ;;  %v8505_v59 = vadd.s32 %v1679_v6, %v1670_v37  ;;  %v12531_v25 = vand.u32 2147483647, %v12844_v38  ;;  %v8508_v23 = vshrl.u32 %v5164_v20, 5 }
 0x20a   : > { %v1577_v0 = vmul.f32 %v1576_v49, %v1574_v30  ;;  %v1692_v52 = vshrl.u32 %v1687_v55, 16  ;;  %v1701_v22 = vadd.s32 %v1700_v8, %v1690_v34  ;;  %vm1458_vm2 = vcmp.lt.s32.totalorder %v12810_v56, 0 }
 0x20b   : > { %12845 = vst [vmem:[#allocation42_spill] sm:$0xff] %v8508_v23  ;;  %v8511_v18 = vadd.s32 %v1695_v2, %v1691_v1  ;;  %v1785_v62 = vshrl.u32 %v12677_v44, %v12846_v39  ;;  %v1788_v17 = vshrl.u32 %v12668_v50, %v12846_v39  ;;  %v1580_v57 = vsub.s32 4, %v8441_v21  ;;  %v12847_v1 = vld [vmem:[#allocation33_spill] sm:$0xff] }
 0x20c   : > { %v1578_v19 = vxor.u32 2147483648, %v1577_v0  ;;  %v1649_v48 = vsel %vm1643_vm3, %v1646_v13, %v1648_v35  ;;  %v1702_v10 = vadd.s32 %v1701_v22, %v1692_v52  ;;  %v1771_v55 = vand.u32 8388607, %v12531_v25  ;;  %v12857_v25 = vld [vmem:[#allocation46_spill] sm:$0xff] }
 0x20d   : > { %vm1705_vm1 = vc.u32 %v8505_v59, %v8511_v18  ;;  %v1784_v27 = vshll.u32 %v12669_v63, %v12847_v1  ;;  %v1787_v28 = vshll.u32 %v12677_v44, %v12847_v1  ;;  %v8528_v26 = vand.u32 31, %v5164_v20 }
 0x20e   : > { %v12849_v2 = vand.u32 2147483647, %v12810_v56  ;;  %v1579_v14 = vsel %vm1458_vm2, %v1578_v19, %v1577_v0  ;;  %v1706_v6 = vadd.s32 1, %v1702_v10  ;;  %v1703_v61 = vmul.u32 %v8447_v47, %v1649_v48  ;;  %v12853_v0 = vld [vmem:[#allocation40_spill] sm:$0xff] }
 0x20f   : > { %12848 = vst [vmem:[#allocation38_spill] sm:$0xff] %v8528_v26  ;;  %v8542_v40 = vor.u32 %v1785_v62, %v1784_v27  ;;  %v8544_v20 = vor.u32 %v1788_v17, %v1787_v28  ;;  %v8547_v53 = vsub.s32 32, %v8493_v46  ;;  %v8551_v37 = vshll.u32 %v12668_v50, %v8493_v46  ;;  %v12854_v62 = vld [vmem:[#allocation47_spill] sm:$0xff]  ;;  %v12855_v17 = vld [vmem:[#allocation44_spill] sm:$0xff] }
 0x210   : > { %vm8532_vm9 = vcmp.le.f32.partialorder %v12849_v2, 0.7853982  ;;  %v1707_v30 = vsel %vm1705_vm1, %v1706_v6, %v1702_v10  ;;  %v1581_v49 = vsel %vm1458_vm2, %v1580_v57, %v8441_v21  ;;  %v1772_v8 = vor.u32 8388608, %v1771_v55 }
 0x211   : > { %v1582_v36 = vsel %vm8532_vm9, %v12810_v56, %v1579_v14  ;;  %12852 = vst [vmem:[#allocation41_spill] sm:$0xff] %v8547_v53  ;;  %v1708_v34 = vadd.s32 %v1707_v30, %v1703_v61  ;;  %v1782_v47 = vshrl.u32 %v12669_v63, %v12846_v39  ;;  %vm1796_vm3 = vcmp.lt.s32.totalorder %v12853_v0, 1 }
 0x212   : > { %v1584_v24 = vmul.f32 %v1582_v36, %v1582_v36  ;;  %vm1798_vm15 = vcmp.lt.s32.totalorder %v12853_v0, 3  ;;  %v1781_v22 = vshll.u32 %v12675_v32, %v12847_v1  ;;  %v1808_v21 = vsel %vm1796_vm3, %v8542_v40, %v8544_v20 }
 0x213   : > { %v1709_v52 = vadd.s32 536870912, %v1708_v34  ;;  %v1810_v19 = vsel %vm1798_vm15, %v12855_v17, %v12854_v62  ;;  %v8572_v57 = vshll.u32 %v12670_v4, %v8493_v46  ;;  %v8575_v48 = vsub.s32 32, %v8528_v26 }
 0x214   : > { %v1585_v13 = vmul.f32 -0.001358992, %v1584_v24  ;;  %v1592_v35 = vmul.f32 -0.00019511016, %v1584_v24  ;;  %v8579_v1 = vshll.u32 %v12668_v50, %v8528_v26  ;;  %v8583_v28 = vor.u32 %v1782_v47, %v1781_v22 }
 0x215   : > { %12856 = vst [vmem:[#allocation7_spill] sm:$0xff] %v8575_v48  ;;  %v8581_v27 = vshrl.u32 %v1709_v52, 30  ;;  %vm1797_vm4 = vcmp.lt.s32.totalorder %v12853_v0, 2  ;;  %v1583_v2 = vsel %vm8532_vm9, 0, %v1581_v49  ;;  %v8592_v30 = vshrl.u32 %v12670_v4, %v8547_v53 }
 0x216   : > { %v1586_v10 = vadd.f32 0.041655596, %v1585_v13  ;;  %v1593_v55 = vadd.f32 0.008332121, %v1592_v35  ;;  %v1811_v61 = vsel %vm1797_vm4, %v1808_v21, %v1810_v19  ;;  %v8596_v13 = vshrl.u32 %v12679_v16, %v8547_v53  ;;  %v487_v21 = vpop.f32.mrf.mxu0 }
 0x217   : > { %v1711_v47 = vshll.u32 %v8581_v27, 30  ;;  %v8599_v35 = vshll.u32 %v1772_v8, 8  ;;  %v8603_v29 = vshrl.u32 %v12670_v4, %v8575_v48  ;;  %v8607_v49 = vshll.u32 %v12670_v4, %v8528_v26 }
 0x218   : > { %v1587_v14 = vmul.f32 %v1586_v10, %v1584_v24  ;;  %v1594_v6 = vmul.f32 %v1593_v55, %v1584_v24  ;;  %v1600_v62 = vand.u32 3, %v1583_v2  ;;  %v1804_v8 = vsel %vm1796_vm3, %v8583_v28, %v8542_v40 }
 0x219   : > { %v8609_v17 = vsub.s32 %v1708_v34, %v1711_v47  ;;  %v1815_v19 = vand.u32 65535, %v1811_v61  ;;  %v1806_v26 = vsel %vm1798_vm15, %v8544_v20, %v12857_v25  ;;  %v8623_v2 = vshrl.u32 %v8599_v35, 16 }
 0x21a   : > { %v1588_v52 = vadd.f32 -0.4999988, %v1587_v14  ;;  %v1595_v22 = vadd.f32 -0.16666654, %v1594_v6  ;;  %v1813_v14 = vand.u32 65535, %v8599_v35  ;;  %v1816_v6 = vshrl.u32 %v1811_v61, 16 }
 0x21b   : > { %vm1713_vm6 = vcmp.lt.s32.totalorder %v8609_v17, 0  ;;  %v1714_v34 = vsub.s32 0, %v8609_v17  ;;  %v8626_v47 = vadd.f32 %v8363_v58, %v487_v21  ;;  %vm1599_vm13 = vweird.f32 %v12810_v56 }
 0x21c   : > { %v1589_v10 = vmul.f32 %v1588_v52, %v1584_v24  ;;  %v1596_v55 = vmul.f32 %v1595_v22, %v1584_v24  ;;  %vm1601_vm14 = vcmp.lt.s32.totalorder %v1600_v62, 2  ;;  %v1818_v22 = vmul.u32 %v1816_v6, %v1813_v14 }
 0x21d   : > { %12858 = vst [vmem:[#allocation37_spill] sm:$0xff] %v8626_v47  ;;  %v1715_v25 = vsel %vm1713_vm6, %v1714_v34, %v8609_v17  ;;  %v8631_v53 = vmul.u32 %v1815_v19, %v8623_v2  ;;  %v1807_v61 = vsel %vm1797_vm4, %v1804_v8, %v1806_v26  ;;  %vm1602_vm12 = vcmp.eq.s32.totalorder %v1600_v62, 0  ;;  %v529_v26 = vpop.f32.mrf.mxu3 }
 0x21e   : > { %v1590_v52 = vadd.f32 1.0, %v1589_v10  ;;  %v1597_v24 = vadd.f32 1.0, %v1596_v55  ;;  %v1716_v51 = vclz %v1715_v25  ;;  %vm1605_vm8 = vcmp.eq.s32.totalorder %v1600_v62, 2 }
 0x21f   : > { %v1817_v21 = vmul.u32 %v1815_v19, %v1813_v14  ;;  %v1821_v10 = vshll.u32 %v1818_v22, 16  ;;  %v1820_v12 = vmul.u32 %v1816_v6, %v8623_v2  ;;  %v1823_v34 = vshll.u32 %v8631_v53, 16 }
 0x220   : > { %v1598_v46 = vmul.f32 %v1597_v24, %v1582_v36  ;;  %v1606_v43 = vxor.u32 2147483648, %v1590_v52  ;;  %v6371_v11 = vadd.s32 4294967294, %v1716_v51  ;;  %v1837_v60 = vand.u32 65535, %v1807_v61 }
 0x221   : > { %vm1825_vm2 = vc.u32 %v1817_v21, %v1821_v10  ;;  %v1827_v41 = vadd.s32 %v1821_v10, %v1817_v21  ;;  %v1838_v25 = vshrl.u32 %v1807_v61, 16  ;;  %vm3031_vm6 = vcmp.lt.s32.totalorder %v8488_v5, 4 }
 0x222   : > { %v1603_v55 = vxor.u32 2147483648, %v1598_v46  ;;  %v1607_v15 = vsel %vm1605_vm8, %v1606_v43, %v1598_v46  ;;  %vm6372_vm1 = vcmp.lt.s32.totalorder %v6371_v11, 0  ;;  %v1826_v24 = vsel %vm1825_vm2, 1, %v12710_v9 }
 0x223   : > { %v1719_v19 = vsel %vm6372_vm1, 0, %v6371_v11  ;;  %v1828_v3 = vadd.s32 %v1826_v24, %v1820_v12  ;;  %vm1829_vm9 = vc.u32 %v1827_v41, %v1823_v34  ;;  %v1704_v43 = vadd.s32 %v8511_v18, %v8505_v59 }
 0x224   : > { %v1604_v36 = vsel %vm1602_vm12, %v1590_v52, %v1603_v55  ;;  %v1720_v46 = vsub.s32 32, %v1719_v19  ;;  %v1724_v6 = vsub.s32 4294967266, %v1719_v19  ;;  %v8645_v52 = vshrl.u32 %v12679_v16, %v8575_v48 }
 0x225   : > { %v1608_v8 = vsel %vm1601_vm14, %v1604_v36, %v1607_v15  ;;  %v1830_v62 = vsel %vm1829_vm9, 1, %v12710_v9  ;;  %v1840_v15 = vmul.u32 %v1838_v25, %v1813_v14  ;;  %v1841_v12 = vmul.u32 %v1837_v60, %v8623_v2 }
 0x226   : > { %v1609_v51 = vsel %vm1599_vm13, nan, %v1608_v8  ;;  %v8652_v41 = vadd.f32 %v8363_v58, %v529_v26  ;;  %v1721_v56 = vshll.u32 %v8609_v17, %v1719_v19  ;;  %v1722_v11 = vshrl.u32 %v1704_v43, %v1720_v46 }
 0x227   : > { %6451 = vmatmul.msk.f32.gmra.mxu1 %vm322_vm0, %v1609_v51  ;;  %v1725_v59 = vadd.s32 127, %v1724_v6  ;;  %v8657_v18 = vor.u32 %v8592_v30, %v8551_v37  ;;  %v1832_v61 = vadd.s32 %v1830_v62, %v1828_v3  ;;  %v1839_v21 = vmul.u32 %v1837_v60, %v1813_v14 }
 0x228   : > { %12859 = vst [vmem:[#allocation33_spill] sm:$0xff] %v8652_v41  ;;  %v1843_v10 = vshll.u32 %v1840_v15, 16  ;;  %v3027_v55 = vor.u32 %v8596_v13, %v8572_v57  ;;  %v3153_v34 = vand.u32 2139095040, %v8626_v47  ;;  %v1723_v36 = vor.u32 %v1722_v11, %v1721_v56 }
 0x229   : > { %12860 = vst [vmem:[#allocation40_spill] sm:$0xff] %v8657_v18  ;;  %v1726_v24 = vshll.u32 %v1725_v59, 23  ;;  %v1822_v26 = vshrl.u32 %v1818_v22, 16  ;;  %v1845_v8 = vshll.u32 %v1841_v12, 16  ;;  %vm12547_vm14 = vcmp.lt.s32.totalorder %v8508_v23, 4  ;;  %v12864_v59 = vld [vmem:[#allocation15_spill] sm:$0xff] }
 0x22a   : > { %vm1847_vm13 = vc.u32 %v1839_v21, %v1843_v10  ;;  %v1849_v17 = vadd.s32 %v1843_v10, %v1839_v21  ;;  %v5309_v19 = vand.u32 2139095040, %v8652_v41  ;;  %v1780_v60 = vshrl.u32 %v12675_v32, %v12846_v39 }
 0x22b   : > { %v1727_v37 = vor.u32 4788187, %v1726_v24  ;;  %v1842_v3 = vmul.u32 %v1838_v25, %v8623_v2  ;;  %vm12861_vm12 = vcmp.lt.s32.totalorder %v12853_v0, 4  ;;  %v1833_v30 = vadd.s32 %v1832_v61, %v1822_v26 }
 0x22c   : > { %v1801_v57 = vsel %vm12861_vm12, %v8544_v20, 2102212464  ;;  %v1848_v13 = vsel %vm1847_vm13, 1, %v12710_v9  ;;  %vm1851_vm8 = vc.u32 %v1849_v17, %v1845_v8  ;;  %v1730_v22 = vcvt.s32.f32 %v1723_v36 }
 0x22d   : > { %v1728_v14 = vand.u32 2147483647, %v1727_v37  ;;  %v1850_v51 = vadd.s32 %v1848_v13, %v1842_v3  ;;  %v1852_v43 = vsel %vm1851_vm8, 1, %v12710_v9  ;;  %v8674_v46 = vor.u32 %v8603_v29, %v8579_v1 }
 0x22e   : > { %v5183_v39 = vor.u32 %v8645_v52, %v8607_v49  ;;  %v1800_v20 = vsel %vm1796_vm3, %v1780_v60, %v8583_v28  ;;  %v1824_v2 = vshrl.u32 %v8631_v53, 16  ;;  %v1802_v6 = vsel %vm1798_vm15, %v8542_v40, %v1801_v57  ;;  %v12869_v57 = vld [vmem:[#allocation43_spill] sm:$0xff] }
 0x22f   : > { %12862 = vst [vmem:[#allocation47_spill] sm:$0xff] %v8674_v46  ;;  %v1731_v25 = vmul.f32 %v1730_v22, %v1728_v14  ;;  %v1844_v62 = vshrl.u32 %v1840_v15, 16  ;;  %v1854_v56 = vadd.s32 %v1852_v43, %v1850_v51  ;;  %v8688_v1 = vsel %vm3031_vm6, %v8657_v18, 920167782 }
 0x230   : > { %12863 = vst [vmem:[#allocation44_spill] sm:$0xff] %v8688_v1  ;;  %v3154_v29 = vshrl.u32 %v3153_v34, 23  ;;  %v8690_v11 = vadd.s32 %v1833_v30, %v1824_v2  ;;  %v12546_v61 = vand.u32 2147483647, %v12864_v59  ;;  %v5310_v28 = vshrl.u32 %v5309_v19, 23  ;;  %v12868_v19 = vld [vmem:[#allocation45_spill] sm:$0xff] }
 0x231   : > { %v1732_v21 = vxor.u32 2147483648, %v1731_v25  ;;  %v1846_v53 = vshrl.u32 %v1841_v12, 16  ;;  %v1855_v10 = vadd.s32 %v1854_v56, %v1844_v62  ;;  %v12865_v36 = vand.u32 2147483647, %v12828_v33 }
 0x232   : > { %vm1612_vm15 = vcmp.lt.s32.totalorder %v12828_v33, 0  ;;  %v1803_v15 = vsel %vm1797_vm4, %v1800_v20, %v1802_v6  ;;  %v8702_v34 = vadd.s32 %v1849_v17, %v1845_v8  ;;  %v1939_v12 = vshrl.u32 %v12677_v44, %v12868_v19 }
 0x233   : > { %vm8695_vm3 = vcmp.le.f32.partialorder %v12865_v36, 0.7853982  ;;  %v1733_v24 = vsel %vm1612_vm15, %v1732_v21, %v1731_v25  ;;  %v1856_v26 = vadd.s32 %v1855_v10, %v1846_v53  ;;  %v1942_v37 = vshrl.u32 %v12668_v50, %v12868_v19 }
 0x234   : > { %v1734_v60 = vsub.s32 4, %v8581_v27  ;;  %v1736_v3 = vsel %vm8695_vm3, %v12828_v33, %v1733_v24  ;;  %vm1859_vm4 = vc.u32 %v8690_v11, %v8702_v34  ;;  %v1925_v0 = vand.u32 8388607, %v12546_v61 }
 0x235   : > { %v1738_v8 = vmul.f32 %v1736_v3, %v1736_v3  ;;  %v1860_v17 = vadd.s32 1, %v1856_v26  ;;  %v1938_v30 = vshll.u32 %v12669_v63, %v12869_v57  ;;  %v1941_v13 = vshll.u32 %v12677_v44, %v12869_v57 }
 0x236   : > { %v8724_v14 = vsel %vm3031_vm6, %v3027_v55, 1326507024  ;;  %v8729_v22 = vsel %vm12547_vm14, %v8674_v46, 920167782  ;;  %v6400_v51 = vadd.s32 4294967169, %v3154_v29  ;;  %v1936_v43 = vshrl.u32 %v12669_v63, %v12868_v19 }
 0x237   : > { %12870 = vst [vmem:[#allocation46_spill] sm:$0xff] %v8729_v22  ;;  %v1739_v20 = vmul.f32 -0.001358992, %v1738_v8  ;;  %v1746_v2 = vmul.f32 -0.00019511016, %v1738_v8  ;;  %v8733_v25 = vor.u32 %v1939_v12, %v1938_v30  ;;  %v8735_v6 = vor.u32 %v1942_v37, %v1941_v13  ;;  %v12871_v37 = vld [vmem:[#allocation48_spill] sm:$0xff] }
 0x238   : > { %v1857_v62 = vmul.u32 %v8599_v35, %v1803_v15  ;;  %v1861_v56 = vsel %vm1859_vm4, %v1860_v17, %v1856_v26  ;;  %v1926_v55 = vor.u32 8388608, %v1925_v0  ;;  %v1935_v21 = vshll.u32 %v12675_v32, %v12869_v57  ;;  %v12872_v26 = vld [vmem:[#allocation55_spill] sm:$0xff] }
 0x239   : > { %v6442_v53 = vadd.s32 4294967169, %v5310_v28  ;;  %v1735_v29 = vsel %vm1612_vm15, %v1734_v60, %v8581_v27  ;;  %v1740_v10 = vadd.f32 0.041655596, %v1739_v20  ;;  %v1747_v36 = vadd.f32 0.008332121, %v1746_v2  ;;  %v12873_v60 = vld [vmem:[#allocation50_spill] sm:$0xff] }
 0x23a   : > { %v3160_v24 = vadd.s32 1, %v6400_v51  ;;  %v1862_v61 = vadd.s32 %v1861_v56, %v1857_v62  ;;  %v8743_v12 = vor.u32 %v1936_v43, %v1935_v21  ;;  %vm1950_vm2 = vcmp.lt.s32.totalorder %v12871_v37, 1  ;;  %v12874_v20 = vld [vmem:[#allocation54_spill] sm:$0xff] }
 0x23b   : > { %v1741_v30 = vmul.f32 %v1740_v10, %v1738_v8  ;;  %v1748_v35 = vmul.f32 %v1747_v36, %v1738_v8  ;;  %vm1952_vm1 = vcmp.lt.s32.totalorder %v12871_v37, 3  ;;  %v1962_v28 = vsel %vm1950_vm2, %v8733_v25, %v8735_v6 }
 0x23c   : > { %v1737_v27 = vsel %vm8695_vm3, 0, %v1735_v29  ;;  %v1863_v15 = vadd.s32 536870912, %v1862_v61  ;;  %v1964_v0 = vsel %vm1952_vm1, %v12873_v60, %v12872_v26  ;;  %v8757_v17 = vshll.u32 %v1926_v55, 8 }
 0x23d   : > { %v8759_v57 = vadd.s32 1, %v6442_v53  ;;  %v1742_v13 = vadd.f32 -0.4999988, %v1741_v30  ;;  %v1749_v51 = vadd.f32 -0.16666654, %v1748_v35  ;;  %vm1951_vm9 = vcmp.lt.s32.totalorder %v12871_v37, 2 }
 0x23e   : > { %v8762_v43 = vshrl.u32 %v1863_v15, 30  ;;  %v1958_v40 = vsel %vm1950_vm2, %v8743_v12, %v8733_v25  ;;  %v1960_v2 = vsel %vm1952_vm1, %v8735_v6, %v12874_v20  ;;  %v1965_v62 = vsel %vm1951_vm9, %v1962_v28, %v1964_v0 }
 0x23f   : > { %vm3161_vm13 = vcmp.gt.s32.totalorder %v3160_v24, 0  ;;  %v1743_v56 = vmul.f32 %v1742_v13, %v1738_v8  ;;  %v1750_v55 = vmul.f32 %v1749_v51, %v1738_v8  ;;  %v1754_v21 = vand.u32 3, %v1737_v27 }
 0x240   : > { %v1865_v53 = vshll.u32 %v8762_v43, 30  ;;  %v1967_v29 = vand.u32 65535, %v8757_v17  ;;  %v1969_v10 = vand.u32 65535, %v1965_v62  ;;  %v1970_v36 = vshrl.u32 %v1965_v62, 16 }
 0x241   : > { %v1744_v30 = vadd.f32 1.0, %v1743_v56  ;;  %v1751_v35 = vadd.f32 1.0, %v1750_v55  ;;  %v1961_v15 = vsel %vm1951_vm9, %v1958_v40, %v1960_v2  ;;  %v1968_v26 = vshrl.u32 %v8757_v17, 16 }
 0x242   : > { %v8784_v8 = vsel %vm12547_vm14, %v5183_v39, 1326507024  ;;  %v8786_v28 = vsel %vm3161_vm13, %v3160_v24, 0  ;;  %v1866_v27 = vsub.s32 %v1862_v61, %v1865_v53  ;;  %v1972_v60 = vmul.u32 %v1970_v36, %v1967_v29 }
 0x243   : > { %12875 = vst [vmem:[#allocation15_spill] sm:$0xff] %v8784_v8  ;;  %v1752_v0 = vmul.f32 %v1751_v35, %v1736_v3  ;;  %vm1753_vm12 = vweird.f32 %v12828_v33  ;;  %v1760_v13 = vxor.u32 2147483648, %v1744_v30  ;;  %v8789_v51 = vmul.u32 %v1969_v10, %v1968_v26 }
 0x244   : > { %vm1755_vm8 = vcmp.lt.s32.totalorder %v1754_v21, 2  ;;  %vm1867_vm3 = vcmp.lt.s32.totalorder %v1866_v27, 0  ;;  %v1868_v40 = vsub.s32 0, %v1866_v27  ;;  %v1992_v20 = vshrl.u32 %v1961_v15, 16 }
 0x245   : > { %vm5317_vm15 = vcmp.gt.s32.totalorder %v8759_v57, 0  ;;  %vm1756_vm4 = vcmp.eq.s32.totalorder %v1754_v21, 0  ;;  %v1757_v49 = vxor.u32 2147483648, %v1752_v0  ;;  %v1975_v52 = vshll.u32 %v1972_v60, 16 }
 0x246   : > { %v1991_v39 = vand.u32 65535, %v1961_v15  ;;  %vm1759_vm13 = vcmp.eq.s32.totalorder %v1754_v21, 2  ;;  %v1869_v24 = vsel %vm1867_vm3, %v1868_v40, %v1866_v27  ;;  %v1971_v61 = vmul.u32 %v1969_v10, %v1967_v29 }
 0x247   : > { %v1974_v2 = vmul.u32 %v1970_v36, %v1968_v26  ;;  %v1758_v3 = vsel %vm1756_vm4, %v1744_v30, %v1757_v49  ;;  %v1761_v62 = vsel %vm1759_vm13, %v1760_v13, %v1752_v0  ;;  %v1870_v56 = vclz %v1869_v24 }
 0x248   : > { %v1977_v55 = vshll.u32 %v8789_v51, 16  ;;  %v1762_v53 = vsel %vm1755_vm8, %v1758_v3, %v1761_v62  ;;  %vm1979_vm14 = vc.u32 %v1971_v61, %v1975_v52  ;;  %v1981_v35 = vadd.s32 %v1975_v52, %v1971_v61 }
 0x249   : > { %v1994_v41 = vmul.u32 %v1992_v20, %v1967_v29  ;;  %v1763_v47 = vsel %vm1753_vm12, nan, %v1762_v53  ;;  %v6374_v22 = vadd.s32 4294967294, %v1870_v56  ;;  %v1980_v15 = vsel %vm1979_vm14, 1, %v12710_v9  ;;  %v12877_v53 = vld [vmem:[#allocation32_spill] sm:$0xff] }
 0x24a   : > { %v1993_v46 = vmul.u32 %v1991_v39, %v1967_v29  ;;  %6452 = vmatmul.msk.f32.gmra.mxu1 %vm322_vm0, %v1763_v47  ;;  %v1982_v10 = vadd.s32 %v1980_v15, %v1974_v2  ;;  %vm1983_vm3 = vc.u32 %v1981_v35, %v1977_v55  ;;  %v1995_v36 = vmul.u32 %v1991_v39, %v1968_v26 }
 0x24b   : > { %v1997_v30 = vshll.u32 %v1994_v41, 16  ;;  %v1858_v21 = vadd.s32 %v8702_v34, %v8690_v11  ;;  %vm6375_vm8 = vcmp.lt.s32.totalorder %v6374_v22, 0  ;;  %v1955_v0 = vsel %vm1953_vm11, %v8735_v6, 2102212464 }
 0x24c   : > { %v1984_v33 = vsel %vm1983_vm3, 1, %v12710_v9  ;;  %v1873_v13 = vsel %vm6375_vm8, 0, %v6374_v22  ;;  %v1996_v49 = vmul.u32 %v1992_v20, %v1968_v26  ;;  %v1976_v52 = vshrl.u32 %v1972_v60, 16 }
 0x24d   : > { %v1986_v40 = vadd.s32 %v1984_v33, %v1982_v10  ;;  %vm2001_vm14 = vc.u32 %v1993_v46, %v1997_v30  ;;  %v1874_v29 = vsub.s32 32, %v1873_v13  ;;  %v1878_v47 = vsub.s32 4294967266, %v1873_v13  ;;  %v490_v33 = vpop.f32.mrf.mxu0 }
 0x24e   : > { %v2002_v39 = vsel %vm2001_vm14, 1, %v12710_v9  ;;  %v1934_v24 = vshrl.u32 %v12675_v32, %v12868_v19  ;;  %v1999_v11 = vshll.u32 %v1995_v36, 16  ;;  %v2003_v34 = vadd.s32 %v1997_v30, %v1993_v46 }
 0x24f   : > { %v2004_v61 = vadd.s32 %v2002_v39, %v1996_v49  ;;  %v1875_v2 = vshll.u32 %v1866_v27, %v1873_v13  ;;  %v1876_v3 = vshrl.u32 %v1858_v21, %v1874_v29  ;;  %v1879_v6 = vadd.s32 127, %v1878_v47 }
 0x250   : > { %v1987_v62 = vadd.s32 %v1986_v40, %v1976_v52  ;;  %v5318_v22 = vsel %vm5317_vm15, %v8759_v57, 0  ;;  %v1954_v26 = vsel %vm1950_vm2, %v1934_v24, %v8743_v12  ;;  %v1956_v60 = vsel %vm1952_vm1, %v8733_v25, %v1955_v0  ;;  %v12879_v40 = vld [vmem:[#allocation51_spill] sm:$0xff] }
 0x251   : > { %vm2005_vm11 = vc.u32 %v2003_v34, %v1999_v11  ;;  %v1877_v19 = vor.u32 %v1876_v3, %v1875_v2  ;;  %v1880_v46 = vshll.u32 %v1879_v6, 23  ;;  %v1978_v27 = vshrl.u32 %v8789_v51, 16 }
 0x252   : > { %v2006_v20 = vsel %vm2005_vm11, 1, %v12710_v9  ;;  %v8819_v56 = vshrl.u32 %v8786_v28, 5  ;;  %v1998_v55 = vshrl.u32 %v1994_v41, 16  ;;  %v12553_v35 = vand.u32 2147483647, %v12877_v53 }
 0x253   : > { %v2008_v57 = vadd.s32 %v2006_v20, %v2004_v61  ;;  %v8823_v12 = vand.u32 31, %v8786_v28  ;;  %v8825_v15 = vshrl.u32 %v5318_v22, 5  ;;  %v1881_v25 = vor.u32 4788187, %v1880_v46  ;;  %v12880_v28 = vld [vmem:[#allocation56_spill] sm:$0xff] }
 0x254   : > { %12876 = vst [vmem:[#allocation45_spill] sm:$0xff] %v8819_v56  ;;  %v8827_v10 = vadd.s32 %v1987_v62, %v1978_v27  ;;  %v1957_v51 = vsel %vm1951_vm9, %v1954_v26, %v1956_v60  ;;  %v2000_v30 = vshrl.u32 %v1995_v36, 16  ;;  %v8831_v21 = vadd.s32 %v2003_v34, %v1999_v11  ;;  %v12886_v26 = vld [vmem:[#allocation52_spill] sm:$0xff] }
 0x255   : > { %12878 = vst [vmem:[#allocation43_spill] sm:$0xff] %v8823_v12  ;;  %v2009_v0 = vadd.s32 %v2008_v57, %v1998_v55  ;;  %v1882_v41 = vand.u32 2147483647, %v1881_v25  ;;  %v1884_v13 = vcvt.s32.f32 %v1877_v19  ;;  %v2092_v49 = vshll.u32 %v12669_v63, %v12879_v40  ;;  %v12888_v25 = vld [vmem:[#allocation60_spill] sm:$0xff] }
 0x256   : > { %v2093_v29 = vshrl.u32 %v12677_v44, %v12880_v28  ;;  %v2079_v52 = vand.u32 8388607, %v12553_v35  ;;  %v2095_v37 = vshll.u32 %v12677_v44, %v12879_v40  ;;  %v2096_v36 = vshrl.u32 %v12668_v50, %v12880_v28 }
 0x257   : > { %v2010_v47 = vadd.s32 %v2009_v0, %v2000_v30  ;;  %v8843_v39 = vand.u32 31, %v5318_v22  ;;  %v1885_v24 = vmul.f32 %v1884_v13, %v1882_v41  ;;  %vm2013_vm2 = vc.u32 %v8827_v10, %v8831_v21 }
 0x258   : > { %v8847_v11 = vor.u32 %v2093_v29, %v2092_v49  ;;  %v8850_v34 = vadd.f32 %v8363_v58, %v490_v33  ;;  %vm1766_vm1 = vcmp.lt.s32.totalorder %v12844_v38, 0  ;;  %v8853_v2 = vor.u32 %v2096_v36, %v2095_v37 }
 0x259   : > { %12881 = vst [vmem:[#allocation48_spill] sm:$0xff] %v8843_v39  ;;  %v2014_v61 = vadd.s32 1, %v2010_v47  ;;  %v12883_v3 = vand.u32 2147483647, %v12844_v38  ;;  %v1886_v62 = vxor.u32 2147483648, %v1885_v24  ;;  %v2011_v22 = vmul.u32 %v8757_v17, %v1957_v51  ;;  %v12889_v51 = vld [vmem:[#allocation58_spill] sm:$0xff] }
 0x25a   : > { %12882 = vst [vmem:[#allocation55_spill] sm:$0xff] %v8850_v34  ;;  %vm2104_vm12 = vcmp.lt.s32.totalorder %v12886_v26, 1  ;;  %v1888_v60 = vsub.s32 4, %v8762_v43  ;;  %v2080_v19 = vor.u32 8388608, %v2079_v52  ;;  %v2090_v55 = vshrl.u32 %v12669_v63, %v12880_v28 }
 0x25b   : > { %vm8857_vm9 = vcmp.le.f32.partialorder %v12883_v3, 0.7853982  ;;  %v2015_v58 = vsel %vm2013_vm2, %v2014_v61, %v2010_v47  ;;  %v2116_v46 = vsel %vm2104_vm12, %v8847_v11, %v8853_v2  ;;  %v1887_v27 = vsel %vm1766_vm1, %v1886_v62, %v1885_v24 }
 0x25c   : > { %v2016_v20 = vadd.s32 %v2015_v58, %v2011_v22  ;;  %vm2106_vm15 = vcmp.lt.s32.totalorder %v12886_v26, 3  ;;  %v8874_v17 = vsub.s32 32, %v8823_v12  ;;  %v1890_v57 = vsel %vm8857_vm9, %v12844_v38, %v1887_v27 }
 0x25d   : > { %vm2105_vm4 = vcmp.lt.s32.totalorder %v12886_v26, 2  ;;  %v2118_v30 = vsel %vm2106_vm15, %v12889_v51, %v12888_v25  ;;  %v1892_v0 = vmul.f32 %v1890_v57, %v1890_v57  ;;  %v2089_v41 = vshll.u32 %v12675_v32, %v12879_v40 }
 0x25e   : > { %12887 = vst [vmem:[#allocation50_spill] sm:$0xff] %v8874_v17  ;;  %v2017_v33 = vadd.s32 536870912, %v2016_v20  ;;  %v2119_v13 = vsel %vm2105_vm4, %v2116_v46, %v2118_v30  ;;  %v3176_v49 = vshll.u32 %v12668_v50, %v8823_v12  ;;  %v8891_v29 = vsub.s32 32, %v8843_v39 }
 0x25f   : > { %v3307_v47 = vand.u32 2139095040, %v8850_v34  ;;  %v8894_v52 = vshll.u32 %v2080_v19, 8  ;;  %v1889_v37 = vsel %vm1766_vm1, %v1888_v60, %v8762_v43  ;;  %v1893_v36 = vmul.f32 -0.001358992, %v1892_v0 }
 0x260   : > { %12890 = vst [vmem:[#allocation54_spill] sm:$0xff] %v8891_v29  ;;  %v1900_v24 = vmul.f32 -0.00019511016, %v1892_v0  ;;  %v8899_v40 = vor.u32 %v2090_v55, %v2089_v41  ;;  %v8903_v61 = vshll.u32 %v12670_v4, %v8823_v12  ;;  %v8907_v3 = vshll.u32 %v12668_v50, %v8843_v39 }
 0x261   : > { %v8909_v62 = vshrl.u32 %v2017_v33, 30  ;;  %v2124_v22 = vshrl.u32 %v2119_v13, 16  ;;  %v3177_v58 = vshrl.u32 %v12670_v4, %v8874_v17  ;;  %v8915_v43 = vshrl.u32 %v12679_v16, %v8874_v17 }
 0x262   : > { %v1894_v60 = vadd.f32 0.041655596, %v1893_v36  ;;  %v1901_v19 = vadd.f32 0.008332121, %v1900_v24  ;;  %v8919_v46 = vshrl.u32 %v12670_v4, %v8891_v29  ;;  %v1891_v27 = vsel %vm8857_vm9, 0, %v1889_v37  ;;  %v12891_v24 = vld [vmem:[#allocation59_spill] sm:$0xff] }
 0x263   : > { %v2019_v55 = vshll.u32 %v8909_v62, 30  ;;  %v8925_v25 = vand.u32 65535, %v8894_v52  ;;  %v3308_v51 = vshrl.u32 %v3307_v47, 23  ;;  %v2112_v41 = vsel %vm2104_vm12, %v8899_v40, %v8847_v11 }
 0x264   : > { %v1895_v30 = vmul.f32 %v1894_v60, %v1892_v0  ;;  %v1902_v33 = vmul.f32 %v1901_v19, %v1892_v0  ;;  %v2114_v6 = vsel %vm2106_vm15, %v8853_v2, %v12891_v24  ;;  %v2123_v37 = vand.u32 65535, %v2119_v13 }
 0x265   : > { %v8931_v36 = vsub.s32 %v2016_v20, %v2019_v55  ;;  %v8938_v35 = vmul.u32 %v2124_v22, %v8925_v25  ;;  %v8942_v47 = vshll.u32 %v12670_v4, %v8843_v39  ;;  %v1908_v34 = vand.u32 3, %v1891_v27 }
 0x266   : > { %v1896_v60 = vadd.f32 -0.4999988, %v1895_v30  ;;  %v1903_v19 = vadd.f32 -0.16666654, %v1902_v33  ;;  %v8946_v20 = vshrl.u32 %v12679_v16, %v8891_v29  ;;  %v8951_v13 = vshrl.u32 %v8894_v52, 16 }
 0x267   : > { %vm2021_vm13 = vcmp.lt.s32.totalorder %v8931_v36, 0  ;;  %v2022_v55 = vsub.s32 0, %v8931_v36  ;;  %v8953_v24 = vor.u32 %v3177_v58, %v3176_v49  ;;  %v2115_v30 = vsel %vm2105_vm4, %v2112_v41, %v2114_v6 }
 0x268   : > { %v1897_v12 = vmul.f32 %v1896_v60, %v1892_v0  ;;  %v1904_v17 = vmul.f32 %v1903_v19, %v1892_v0  ;;  %v6403_v33 = vadd.s32 4294967169, %v3308_v51  ;;  %v8959_v29 = vmul.u32 %v2123_v37, %v8951_v13 }
 0x269   : > { %12892 = vst [vmem:[#allocation32_spill] sm:$0xff] %v8953_v24  ;;  %v2023_v27 = vsel %vm2021_vm13, %v2022_v55, %v8931_v36  ;;  %v2129_v39 = vshll.u32 %v8938_v35, 16  ;;  %vm1909_vm3 = vcmp.lt.s32.totalorder %v1908_v34, 2  ;;  %vm1910_vm8 = vcmp.eq.s32.totalorder %v1908_v34, 0 }
 0x26a   : > { %v1898_v8 = vadd.f32 1.0, %v1897_v12  ;;  %v1905_v23 = vadd.f32 1.0, %v1904_v17  ;;  %v2024_v48 = vclz %v2023_v27  ;;  %vm1913_vm14 = vcmp.eq.s32.totalorder %v1908_v34, 2 }
 0x26b   : > { %v2125_v49 = vmul.u32 %v2123_v37, %v8925_v25  ;;  %v2145_v0 = vand.u32 65535, %v2115_v30  ;;  %v2128_v51 = vmul.u32 %v2124_v22, %v8951_v13  ;;  %v2131_v6 = vshll.u32 %v8959_v29, 16 }
 0x26c   : > { %v1906_v58 = vmul.f32 %v1905_v23, %v1890_v57  ;;  %v1914_v60 = vxor.u32 2147483648, %v1898_v8  ;;  %v6377_v41 = vadd.s32 4294967294, %v2024_v48  ;;  %v2146_v55 = vshrl.u32 %v2115_v30, 16 }
 0x26d   : > { %vm2133_vm11 = vc.u32 %v2125_v49, %v2129_v39  ;;  %v2135_v19 = vadd.s32 %v2129_v39, %v2125_v49  ;;  %v2012_v12 = vadd.s32 %v8831_v21, %v8827_v10  ;;  %vm3185_vm9 = vcmp.lt.s32.totalorder %v8819_v56, 4 }
 0x26e   : > { %v1911_v1 = vxor.u32 2147483648, %v1906_v58  ;;  %vm6378_vm2 = vcmp.lt.s32.totalorder %v6377_v41, 0  ;;  %v2134_v17 = vsel %vm2133_vm11, 1, %v12710_v9  ;;  %v2148_v23 = vmul.u32 %v2146_v55, %v8925_v25 }
 0x26f   : > { %v2027_v27 = vsel %vm6378_vm2, 0, %v6377_v41  ;;  %v2136_v37 = vadd.s32 %v2134_v17, %v2128_v51  ;;  %vm2137_vm1 = vc.u32 %v2135_v19, %v2131_v6  ;;  %v1915_v57 = vsel %vm1913_vm14, %v1914_v60, %v1906_v58 }
 0x270   : > { %v1912_v48 = vsel %vm1910_vm8, %v1898_v8, %v1911_v1  ;;  %v2028_v39 = vsub.s32 32, %v2027_v27  ;;  %v2032_v22 = vsub.s32 4294967266, %v2027_v27  ;;  %vm1907_vm13 = vweird.f32 %v12844_v38  ;;  %v493_v8 = vpop.f32.mrf.mxu0 }
 0x271   : > { %v1916_v10 = vsel %vm1909_vm3, %v1912_v48, %v1915_v57  ;;  %v2138_v21 = vsel %vm2137_vm1, 1, %v12710_v9  ;;  %v2149_v30 = vmul.u32 %v2145_v0, %v8951_v13  ;;  %v2029_v41 = vshll.u32 %v8931_v36, %v2027_v27 }
 0x272   : > { %v1917_v49 = vsel %vm1907_vm13, nan, %v1916_v10  ;;  %v2030_v51 = vshrl.u32 %v2012_v12, %v2028_v39  ;;  %v2033_v6 = vadd.s32 127, %v2032_v22  ;;  %v3181_v1 = vor.u32 %v8915_v43, %v8903_v61  ;;  %v8990_v61 = vld [vmem:[%s12339_s2] ss:$0 sm:$0xff] }
 0x273   : > { %6453 = vmatmul.msk.f32.gmra.mxu1 %vm322_vm0, %v1917_v49  ;;  %v2140_v58 = vadd.s32 %v2138_v21, %v2136_v37  ;;  %v2147_v38 = vmul.u32 %v2145_v0, %v8925_v25  ;;  %v2151_v34 = vshll.u32 %v2148_v23, 16  ;;  %v8983_v60 = vor.u32 %v8919_v46, %v8907_v3 }
 0x274   : > { %v3314_v19 = vadd.s32 1, %v6403_v33  ;;  %v2031_v17 = vor.u32 %v2030_v51, %v2029_v41  ;;  %v2034_v48 = vshll.u32 %v2033_v6, 23  ;;  %v2130_v36 = vshrl.u32 %v8938_v35, 16 }
 0x275   : > { %12893 = vst [vmem:[#allocation51_spill] sm:$0xff] %v8983_v60  ;;  %v2153_v12 = vshll.u32 %v2149_v30, 16  ;;  %vm2155_vm3 = vc.u32 %v2147_v38, %v2151_v34  ;;  %v2157_v27 = vadd.s32 %v2151_v34, %v2147_v38  ;;  %vm5341_vm8 = vcmp.lt.s32.totalorder %v8825_v15, 4 }
 0x276   : > { %v8993_v43 = vadd.f32 %v8990_v61, %v493_v8  ;;  %v2035_v3 = vor.u32 4788187, %v2034_v48  ;;  %v2088_v46 = vshrl.u32 %v12675_v32, %v12880_v28  ;;  %v2150_v25 = vmul.u32 %v2146_v55, %v8951_v13  ;;  %v12897_v8 = vld [vmem:[#allocation49_spill] sm:$0xff] }
 0x277   : > { %v2109_v35 = vsel %vm2107_vm5, %v8853_v2, 2102212464  ;;  %v2141_v33 = vadd.s32 %v2140_v58, %v2130_v36  ;;  %v2156_v0 = vsel %vm2155_vm3, 1, %v12710_v9  ;;  %vm2159_vm14 = vc.u32 %v2157_v27, %v2153_v12 }
 0x278   : > { %12894 = vst [vmem:[#allocation56_spill] sm:$0xff] %v8993_v43  ;;  %v2036_v37 = vand.u32 2147483647, %v2035_v3  ;;  %v2038_v57 = vcvt.s32.f32 %v2031_v17  ;;  %v2158_v39 = vadd.s32 %v2156_v0, %v2150_v25  ;;  %v2160_v22 = vsel %vm2159_vm14, 1, %v12710_v9  ;;  %v12901_v3 = vld [vmem:[#allocation69_spill] sm:$0xff] }
 0x279   : > { %v9006_v10 = vsel %vm3185_vm9, %v8953_v24, 920167782  ;;  %v2108_v2 = vsel %vm2104_vm12, %v2088_v46, %v8899_v40  ;;  %v2132_v13 = vshrl.u32 %v8959_v29, 16  ;;  %v2110_v21 = vsel %vm2106_vm15, %v8847_v11, %v2109_v35 }
 0x27a   : > { %12895 = vst [vmem:[#allocation52_spill] sm:$0xff] %v9006_v10  ;;  %v2039_v55 = vmul.f32 %v2038_v57, %v2036_v37  ;;  %v2152_v49 = vshrl.u32 %v2148_v23, 16  ;;  %v2162_v41 = vadd.s32 %v2160_v22, %v2158_v39  ;;  %v9019_v51 = vsel %vm3185_vm9, %v3181_v1, 1326507024 }
 0x27b   : > { %12896 = vst [vmem:[#allocation60_spill] sm:$0xff] %v9019_v51  ;;  %vm3315_vm5 = vcmp.gt.s32.totalorder %v3314_v19, 0  ;;  %v9021_v6 = vadd.s32 %v2141_v33, %v2132_v13  ;;  %v12568_v58 = vand.u32 2147483647, %v12897_v8  ;;  %v3461_v40 = vand.u32 2139095040, %v8993_v43  ;;  %v12902_v33 = vld [vmem:[#allocation62_spill] sm:$0xff] }
 0x27c   : > { %v2040_v38 = vxor.u32 2147483648, %v2039_v55  ;;  %v2154_v29 = vshrl.u32 %v2149_v30, 16  ;;  %v2163_v34 = vadd.s32 %v2162_v41, %v2152_v49  ;;  %v12898_v17 = vand.u32 2147483647, %v12864_v59 }
 0x27d   : > { %vm1920_vm15 = vcmp.lt.s32.totalorder %v12864_v59, 0  ;;  %v2111_v23 = vsel %vm2105_vm4, %v2108_v2, %v2110_v21  ;;  %v9034_v1 = vadd.s32 %v2157_v27, %v2153_v12  ;;  %v2247_v30 = vshrl.u32 %v12677_v44, %v12901_v3 }
 0x27e   : > { %vm9027_vm12 = vcmp.le.f32.partialorder %v12898_v17, 0.7853982  ;;  %v2041_v48 = vsel %vm1920_vm15, %v2040_v38, %v2039_v55  ;;  %v2164_v36 = vadd.s32 %v2163_v34, %v2154_v29  ;;  %v2250_v46 = vshrl.u32 %v12668_v50, %v12901_v3 }
 0x27f   : > { %v2042_v25 = vsub.s32 4, %v8909_v62  ;;  %v2044_v35 = vsel %vm9027_vm12, %v12864_v59, %v2041_v48  ;;  %vm2167_vm4 = vc.u32 %v9021_v6, %v9034_v1  ;;  %v2233_v26 = vand.u32 8388607, %v12568_v58 }
 0x280   : > { %v2046_v12 = vmul.f32 %v2044_v35, %v2044_v35  ;;  %v2168_v27 = vadd.s32 1, %v2164_v36  ;;  %v2246_v0 = vshll.u32 %v12669_v63, %v12902_v33  ;;  %v2249_v37 = vshll.u32 %v12677_v44, %v12902_v33 }
 0x281   : > { %v9057_v57 = vsel %vm5341_vm8, %v8983_v60, 920167782  ;;  %v3316_v39 = vsel %vm3315_vm5, %v3314_v19, 0  ;;  %v3462_v22 = vshrl.u32 %v3461_v40, 23  ;;  %v2244_v2 = vshrl.u32 %v12669_v63, %v12901_v3 }
 0x282   : > { %12903 = vst [vmem:[#allocation58_spill] sm:$0xff] %v9057_v57  ;;  %v2047_v13 = vmul.f32 -0.001358992, %v2046_v12  ;;  %v2054_v55 = vmul.f32 -0.00019511016, %v2046_v12  ;;  %v9062_v21 = vor.u32 %v2247_v30, %v2246_v0  ;;  %v9064_v49 = vor.u32 %v2250_v46, %v2249_v37  ;;  %v12904_v46 = vld [vmem:[#allocation61_spill] sm:$0xff] }
 0x283   : > { %v2165_v41 = vmul.u32 %v8894_v52, %v2111_v23  ;;  %v2169_v38 = vsel %vm2167_vm4, %v2168_v27, %v2164_v36  ;;  %v2234_v29 = vor.u32 8388608, %v2233_v26  ;;  %v2243_v34 = vshll.u32 %v12675_v32, %v12902_v33  ;;  %v12905_v26 = vld [vmem:[#allocation72_spill] sm:$0xff]  ;;  %v12906_v27 = vld [vmem:[#allocation70_spill] sm:$0xff] }
 0x284   : > { %v9069_v17 = vshrl.u32 %v3316_v39, 5  ;;  %v2043_v19 = vsel %vm1920_vm15, %v2042_v25, %v8909_v62  ;;  %v2048_v40 = vadd.f32 0.041655596, %v2047_v13  ;;  %v2055_v48 = vadd.f32 0.008332121, %v2054_v55 }
 0x285   : > { %v6406_v58 = vadd.s32 4294967169, %v3462_v22  ;;  %v2170_v30 = vadd.s32 %v2169_v38, %v2165_v41  ;;  %v9074_v0 = vor.u32 %v2244_v2, %v2243_v34  ;;  %vm2258_vm11 = vcmp.lt.s32.totalorder %v12904_v46, 1  ;;  %v12907_v41 = vld [vmem:[#allocation12_spill] sm:$0xff]  ;;  %v496_v34 = vpop.f32.mrf.mxu0 }
 0x286   : > { %v2049_v52 = vmul.f32 %v2048_v40, %v2046_v12  ;;  %v2056_v23 = vmul.f32 %v2055_v48, %v2046_v12  ;;  %vm2260_vm2 = vcmp.lt.s32.totalorder %v12904_v46, 3  ;;  %v2270_v36 = vsel %vm2258_vm11, %v9062_v21, %v9064_v49 }
 0x287   : > { %v2045_v62 = vsel %vm9027_vm12, 0, %v2043_v19  ;;  %v2171_v25 = vadd.s32 536870912, %v2170_v30  ;;  %v2272_v33 = vsel %vm2260_vm2, %v12906_v27, %v12905_v26  ;;  %v9088_v37 = vshll.u32 %v2234_v29, 8 }
 0x288   : > { %v9090_v22 = vand.u32 31, %v3316_v39  ;;  %v2050_v2 = vadd.f32 -0.4999988, %v2049_v52  ;;  %v2057_v13 = vadd.f32 -0.16666654, %v2056_v23  ;;  %vm2259_vm1 = vcmp.lt.s32.totalorder %v12904_v46, 2 }
 0x289   : > { %v9093_v55 = vshrl.u32 %v2171_v25, 30  ;;  %v2266_v11 = vsel %vm2258_vm11, %v9074_v0, %v9062_v21  ;;  %v2268_v38 = vsel %vm2260_vm2, %v9064_v49, %v12907_v41  ;;  %v2273_v39 = vsel %vm2259_vm1, %v2270_v36, %v2272_v33  ;;  %v12913_v46 = vld [vmem:[#allocation65_spill] sm:$0xff] }
 0x28a   : > { %v9105_v29 = vadd.s32 1, %v6406_v58  ;;  %v2051_v19 = vmul.f32 %v2050_v2, %v2046_v12  ;;  %v2058_v40 = vmul.f32 %v2057_v13, %v2046_v12  ;;  %v2062_v48 = vand.u32 3, %v2045_v62 }
 0x28b   : > { %v2173_v52 = vshll.u32 %v9093_v55, 30  ;;  %v2275_v23 = vand.u32 65535, %v9088_v37  ;;  %v2277_v25 = vand.u32 65535, %v2273_v39  ;;  %v2278_v26 = vshrl.u32 %v2273_v39, 16 }
 0x28c   : > { %v2052_v27 = vadd.f32 1.0, %v2051_v19  ;;  %v2059_v28 = vadd.f32 1.0, %v2058_v40  ;;  %v2269_v41 = vsel %vm2259_vm1, %v2266_v11, %v2268_v38  ;;  %v2276_v43 = vshrl.u32 %v9088_v37, 16 }
 0x28d   : > { %v9113_v58 = vadd.f32 %v8990_v61, %v496_v34  ;;  %vm2061_vm13 = vweird.f32 %v12864_v59  ;;  %v2174_v12 = vsub.s32 %v2170_v30, %v2173_v52  ;;  %v2280_v36 = vmul.u32 %v2278_v26, %v2275_v23 }
 0x28e   : > { %v2060_v62 = vmul.f32 %v2059_v28, %v2044_v35  ;;  %vm2063_vm3 = vcmp.lt.s32.totalorder %v2062_v48, 2  ;;  %v2068_v33 = vxor.u32 2147483648, %v2052_v27  ;;  %v9116_v2 = vmul.u32 %v2277_v25, %v2276_v43 }
 0x28f   : > { %12908 = vst [vmem:[#allocation59_spill] sm:$0xff] %v9113_v58  ;;  %vm2064_vm14 = vcmp.eq.s32.totalorder %v2062_v48, 0  ;;  %vm2175_vm5 = vcmp.lt.s32.totalorder %v2174_v12, 0  ;;  %v2176_v13 = vsub.s32 0, %v2174_v12  ;;  %v2300_v39 = vshrl.u32 %v2269_v41, 16 }
 0x290   : > { %v2065_v19 = vxor.u32 2147483648, %v2060_v62  ;;  %vm2067_vm12 = vcmp.eq.s32.totalorder %v2062_v48, 2  ;;  %v2283_v11 = vshll.u32 %v2280_v36, 16  ;;  %v2299_v38 = vand.u32 65535, %v2269_v41 }
 0x291   : > { %v2166_v34 = vadd.s32 %v9034_v1, %v9021_v6  ;;  %v2177_v40 = vsel %vm2175_vm5, %v2176_v13, %v2174_v12  ;;  %v2279_v57 = vmul.u32 %v2277_v25, %v2275_v23  ;;  %v2282_v30 = vmul.u32 %v2278_v26, %v2276_v43 }
 0x292   : > { %v2066_v52 = vsel %vm2064_vm14, %v2052_v27, %v2065_v19  ;;  %v2069_v28 = vsel %vm2067_vm12, %v2068_v33, %v2060_v62  ;;  %v2178_v35 = vclz %v2177_v40  ;;  %v2285_v60 = vshll.u32 %v9116_v2, 16  ;;  %v12909_v40 = vld [vmem:[#allocation63_spill] sm:$0xff] }
 0x293   : > { %v2070_v10 = vsel %vm2063_vm3, %v2066_v52, %v2069_v28  ;;  %vm2287_vm15 = vc.u32 %v2279_v57, %v2283_v11  ;;  %v2289_v24 = vadd.s32 %v2283_v11, %v2279_v57  ;;  %v2302_v51 = vmul.u32 %v2300_v39, %v2275_v23 }
 0x294   : > { %v2071_v56 = vsel %vm2061_vm13, nan, %v2070_v10  ;;  %v6380_v41 = vadd.s32 4294967294, %v2178_v35  ;;  %v2288_v18 = vsel %vm2287_vm15, 1, %v12710_v9  ;;  %v2301_v6 = vmul.u32 %v2299_v38, %v2275_v23 }
 0x295   : > { %6454 = vmatmul.msk.f32.gmra.mxu1 %vm322_vm0, %v2071_v56  ;;  %v2290_v1 = vadd.s32 %v2288_v18, %v2282_v30  ;;  %vm2291_vm4 = vc.u32 %v2289_v24, %v2285_v60  ;;  %v2303_v25 = vmul.u32 %v2299_v38, %v2276_v43  ;;  %v2305_v26 = vshll.u32 %v2302_v51, 16 }
 0x296   : > { %vm6381_vm14 = vcmp.lt.s32.totalorder %v6380_v41, 0  ;;  %v2242_v48 = vshrl.u32 %v12675_v32, %v12901_v3  ;;  %v2263_v57 = vsel %vm2261_vm10, %v9064_v49, 2102212464  ;;  %v2292_v59 = vsel %vm2291_vm4, 1, %v12710_v9 }
 0x297   : > { %v2181_v10 = vsel %vm6381_vm14, 0, %v6380_v41  ;;  %v2294_v27 = vadd.s32 %v2292_v59, %v2290_v1  ;;  %v2304_v62 = vmul.u32 %v2300_v39, %v2276_v43  ;;  %vm2309_vm13 = vc.u32 %v2301_v6, %v2305_v26  ;;  %v12912_v59 = vld [vmem:[#allocation68_spill] sm:$0xff] }
 0x298   : > { %v2182_v23 = vsub.s32 32, %v2181_v10  ;;  %v2186_v56 = vsub.s32 4294967266, %v2181_v10  ;;  %v2284_v18 = vshrl.u32 %v2280_v36, 16  ;;  %v2310_v24 = vsel %vm2309_vm13, 1, %v12710_v9 }
 0x299   : > { %v2183_v60 = vshll.u32 %v2174_v12, %v2181_v10  ;;  %v2307_v33 = vshll.u32 %v2303_v25, 16  ;;  %v2311_v13 = vadd.s32 %v2305_v26, %v2301_v6  ;;  %v2312_v19 = vadd.s32 %v2310_v24, %v2304_v62 }
 0x29a   : > { %v2184_v3 = vshrl.u32 %v2166_v34, %v2182_v23  ;;  %v2187_v11 = vadd.s32 127, %v2186_v56  ;;  %v2295_v38 = vadd.s32 %v2294_v27, %v2284_v18  ;;  %v12910_v49 = vshll.u32 %v12909_v40, 16 }
 0x29b   : > { %v9137_v30 = vsub.s32 32, %v9090_v22  ;;  %v2262_v43 = vsel %vm2258_vm11, %v2242_v48, %v9074_v0  ;;  %v2264_v12 = vsel %vm2260_vm2, %v9062_v21, %v2263_v57  ;;  %vm2313_vm3 = vc.u32 %v2311_v13, %v2307_v33  ;;  %v12911_v57 = vld [vmem:[#allocation67_spill] sm:$0xff] }
 0x29c   : > { %vm4447_vm10 = vc.u32 %v8056_v31, %v12910_v49  ;;  %vm3469_vm5 = vcmp.gt.s32.totalorder %v9105_v29, 0  ;;  %v2185_v36 = vor.u32 %v2184_v3, %v2183_v60  ;;  %v2188_v39 = vshll.u32 %v2187_v11, 23 }
 0x29d   : > { %v2286_v34 = vshrl.u32 %v9116_v2, 16  ;;  %v2314_v31 = vsel %vm2313_vm3, 1, %v12710_v9  ;;  %v3615_v52 = vand.u32 2139095040, %v9113_v58  ;;  %v2306_v28 = vshrl.u32 %v2302_v51, 16 }
 0x29e   : > { %v2316_v35 = vadd.s32 %v2314_v31, %v2312_v19  ;;  %v4448_v41 = vsel %vm4447_vm10, 1, %v12710_v9  ;;  %v2189_v0 = vor.u32 4788187, %v2188_v39  ;;  %v2265_v6 = vsel %vm2259_vm1, %v2262_v43, %v2264_v12 }
 0x29f   : > { %v9152_v21 = vadd.s32 %v2295_v38, %v2286_v34  ;;  %v2308_v1 = vshrl.u32 %v2303_v25, 16  ;;  %v9154_v26 = vadd.s32 %v2311_v13, %v2307_v33  ;;  %v4461_v2 = vshll.u32 %v12911_v57, 16 }
 0x2a0   : > { %v2317_v48 = vadd.s32 %v2316_v35, %v2306_v28  ;;  %v4463_v10 = vshll.u32 %v12912_v59, 16  ;;  %v2190_v27 = vand.u32 2147483647, %v2189_v0  ;;  %v2192_v62 = vcvt.s32.f32 %v2185_v36  ;;  %v499_v0 = vpop.f32.mrf.mxu0 }
 0x2a1   : > { %v4440_v51 = vshrl.u32 %v7551_v54, 16  ;;  %v4450_v23 = vadd.s32 %v4448_v41, %v8226_v7  ;;  %v3616_v56 = vshrl.u32 %v3615_v52, 23  ;;  %vm4465_vm11 = vc.u32 %v12913_v46, %v4461_v2  ;;  %v12914_v54 = vld [vmem:[#allocation6_spill] sm:$0xff] }
 0x2a2   : > { %v2318_v18 = vadd.s32 %v2317_v48, %v2308_v1  ;;  %v4467_v24 = vadd.s32 %v4461_v2, %v12913_v46  ;;  %v2193_v25 = vmul.f32 %v2192_v62, %v2190_v27  ;;  %v2319_v60 = vmul.u32 %v9088_v37, %v2265_v6 }
 0x2a3   : > { %vm2321_vm2 = vc.u32 %v9152_v21, %v9154_v26  ;;  %v4466_v33 = vsel %vm4465_vm11, 1, %v12710_v9  ;;  %v4462_v19 = vshrl.u32 %v12911_v57, 16  ;;  %v4442_v11 = vshrl.u32 %v12909_v40, 16 }
 0x2a4   : > { %v2322_v13 = vadd.s32 1, %v2318_v18  ;;  %v4468_v3 = vadd.s32 %v4466_v33, %v12914_v54  ;;  %vm4469_vm1 = vc.u32 %v4467_v24, %v4463_v10  ;;  %v2194_v7 = vxor.u32 2147483648, %v2193_v25 }
 0x2a5   : > { %v4451_v38 = vadd.s32 %v4450_v23, %v4440_v51  ;;  %v4470_v49 = vsel %vm4469_vm1, 1, %v12710_v9  ;;  %vm2074_vm12 = vcmp.lt.s32.totalorder %v12877_v53, 0  ;;  %v4464_v43 = vshrl.u32 %v12912_v59, 16 }
 0x2a6   : > { %v2323_v37 = vsel %vm2321_vm2, %v2322_v13, %v2318_v18  ;;  %v4472_v12 = vadd.s32 %v4470_v49, %v4468_v3  ;;  %v3331_v36 = vshrl.u32 %v12670_v4, %v9137_v30  ;;  %v12915_v39 = vand.u32 2147483647, %v12877_v53 }
 0x2a7   : > { %v2195_v40 = vsel %vm2074_vm12, %v2194_v7, %v2193_v25  ;;  %v2324_v31 = vadd.s32 %v2323_v37, %v2319_v60  ;;  %v3470_v52 = vsel %vm3469_vm5, %v9105_v29, 0  ;;  %v6409_v28 = vadd.s32 4294967169, %v3616_v56 }
 0x2a8   : > { %vm9176_vm15 = vcmp.le.f32.partialorder %v12915_v39, 0.7853982  ;;  %v4473_v41 = vadd.s32 %v4472_v12, %v4462_v19  ;;  %v9188_v48 = vadd.s32 %v4451_v38, %v4442_v11  ;;  %v9190_v57 = vadd.s32 %v4467_v24, %v4463_v10 }
 0x2a9   : > { %v2198_v35 = vsel %vm9176_vm15, %v12877_v53, %v2195_v40  ;;  %v2325_v1 = vadd.s32 536870912, %v2324_v31  ;;  %v3330_v2 = vshll.u32 %v12668_v50, %v9090_v22  ;;  %v3333_v59 = vshll.u32 %v12670_v4, %v9090_v22 }
 0x2aa   : > { %v2200_v6 = vmul.f32 %v2198_v35, %v2198_v35  ;;  %v3334_v29 = vshrl.u32 %v12679_v16, %v9137_v30  ;;  %v4474_v27 = vadd.s32 %v4473_v41, %v4464_v43  ;;  %v9198_v62 = vand.u32 31, %v3470_v52  ;;  %v12925_v41 = vld [vmem:[#allocation53_spill] sm:$0xff] }
 0x2ab   : > { %v2196_v51 = vsub.s32 4, %v9093_v55  ;;  %v9201_v18 = vor.u32 %v3331_v36, %v3330_v2  ;;  %v9204_v10 = vadd.f32 %v8990_v61, %v499_v0  ;;  %v9206_v46 = vshrl.u32 %v2325_v1, 30 }
 0x2ac   : > { %12918 = vst [vmem:[#allocation49_spill] sm:$0xff] %v9198_v62  ;;  %v2201_v23 = vmul.f32 -0.001358992, %v2200_v6  ;;  %v2208_v56 = vmul.f32 -0.00019511016, %v2200_v6  ;;  %v4478_v24 = vadd.s32 1, %v4474_v27  ;;  %vm4477_vm4 = vc.u32 %v9188_v48, %v9190_v57 }
 0x2ad   : > { %12919 = vst [vmem:[#allocation69_spill] sm:$0xff] %v9201_v18  ;;  %v3622_v25 = vadd.s32 1, %v6409_v28  ;;  %v12921_v13 = vor.u32 %v8946_v20, %v8942_v47  ;;  %v3335_v54 = vor.u32 %v3334_v29, %v3333_v59  ;;  %vm12623_vm14 = vcmp.lt.s32.totalorder %v9069_v17, 4  ;;  %v12924_v28 = vld [vmem:[#allocation57_spill] sm:$0xff] }
 0x2ae   : > { %12920 = vst [vmem:[#allocation62_spill] sm:$0xff] %v9204_v10  ;;  %v2202_v60 = vadd.f32 0.041655596, %v2201_v23  ;;  %v2209_v33 = vadd.f32 0.008332121, %v2208_v56  ;;  %v2327_v3 = vshll.u32 %v9206_v46, 30  ;;  %v2197_v11 = vsel %vm2074_vm12, %v2196_v51, %v9093_v55 }
 0x2af   : > { %v9215_v19 = vsel %vm5341_vm8, %v12921_v13, 1326507024  ;;  %v9220_v7 = vsub.s32 32, %v9198_v62  ;;  %v9228_v47 = vsel %vm12623_vm14, %v9201_v18, 920167782  ;;  %v3769_v20 = vand.u32 2139095040, %v9204_v10 }
 0x2b0   : > { %v2203_v38 = vmul.f32 %v2202_v60, %v2200_v6  ;;  %v2210_v49 = vmul.f32 %v2209_v33, %v2200_v6  ;;  %12923 = vst [vmem:[#allocation72_spill] sm:$0xff] %v9228_v47  ;;  %v2328_v37 = vsub.s32 %v2324_v31, %v2327_v3  ;;  %v4479_v43 = vsel %vm4477_vm4, %v4478_v24, %v4474_v27  ;;  %v12946_v10 = vld [vmem:[#allocation81_spill] sm:$0xff] }
 0x2b1   : > { %12922 = vst [vmem:[#allocation61_spill] sm:$0xff] %v9220_v7  ;;  %v3484_v12 = vshll.u32 %v12668_v50, %v9198_v62  ;;  %vm3623_vm13 = vcmp.gt.s32.totalorder %v3622_v25, 0  ;;  %v2199_v55 = vsel %vm9176_vm15, 0, %v2197_v11  ;;  %v12926_v0 = vmul.u32 %v12924_v28, %v12925_v41 }
 0x2b2   : > { %v2204_v36 = vadd.f32 -0.4999988, %v2203_v38  ;;  %v2211_v39 = vadd.f32 -0.16666654, %v2210_v49  ;;  %vm2329_vm10 = vcmp.lt.s32.totalorder %v2328_v37, 0  ;;  %v2330_v40 = vsub.s32 0, %v2328_v37 }
 0x2b3   : > { %v4480_v1 = vadd.s32 %v4479_v43, %v12926_v0  ;;  %v3485_v2 = vshrl.u32 %v12670_v4, %v9220_v7  ;;  %v3488_v31 = vshrl.u32 %v12679_v16, %v9220_v7  ;;  %v3624_v27 = vsel %vm3623_vm13, %v3622_v25, 0 }
 0x2b4   : > { %v2205_v59 = vmul.f32 %v2204_v36, %v2200_v6  ;;  %v2212_v29 = vmul.f32 %v2211_v39, %v2200_v6  ;;  %v3770_v51 = vshrl.u32 %v3769_v20, 23  ;;  %v2331_v23 = vsel %vm2329_vm10, %v2330_v40, %v2328_v37 }
 0x2b5   : > { %v4481_v56 = vadd.s32 536870912, %v4480_v1  ;;  %v2216_v60 = vand.u32 3, %v2199_v55  ;;  %v2332_v33 = vclz %v2331_v23  ;;  %v9244_v13 = vsel %vm12623_vm14, %v3335_v54, 1326507024 }
 0x2b6   : > { %v2206_v34 = vadd.f32 1.0, %v2205_v59  ;;  %v2213_v24 = vadd.f32 1.0, %v2212_v29  ;;  %v9246_v3 = vshrl.u32 %v3470_v52, 5  ;;  %v3487_v11 = vshll.u32 %v12670_v4, %v9198_v62 }
 0x2b7   : > { %v9250_v38 = vshrl.u32 %v4481_v56, 30  ;;  %v9252_v6 = vor.u32 %v3485_v2, %v3484_v12  ;;  %v6383_v20 = vadd.s32 4294967294, %v2332_v33  ;;  %v9254_v36 = vand.u32 31, %v3624_v27 }
 0x2b8   : > { %12927 = vst [vmem:[#allocation70_spill] sm:$0xff] %v9246_v3  ;;  %v2214_v25 = vmul.f32 %v2213_v24, %v2198_v35  ;;  %v2222_v49 = vxor.u32 2147483648, %v2206_v34  ;;  %v3489_v43 = vor.u32 %v3488_v31, %v3487_v11  ;;  %v6412_v39 = vadd.s32 4294967169, %v3770_v51  ;;  %v12930_v24 = vld [vmem:[#allocation66_spill] sm:$0xff] }
 0x2b9   : > { %12928 = vst [vmem:[#allocation12_spill] sm:$0xff] %v9252_v6  ;;  %v4483_v55 = vshll.u32 %v9250_v38, 30  ;;  %vm2217_vm3 = vcmp.lt.s32.totalorder %v2216_v60, 2  ;;  %vm2218_vm5 = vcmp.eq.s32.totalorder %v2216_v60, 0  ;;  %vm6384_vm11 = vcmp.lt.s32.totalorder %v6383_v20, 0 }
 0x2ba   : > { %12929 = vst [vmem:[#allocation63_spill] sm:$0xff] %v9254_v36  ;;  %v2219_v52 = vxor.u32 2147483648, %v2214_v25  ;;  %vm2221_vm2 = vcmp.eq.s32.totalorder %v2216_v60, 2  ;;  %v2320_v54 = vadd.s32 %v9154_v26, %v9152_v21  ;;  %v2335_v40 = vsel %vm6384_vm11, 0, %v6383_v20  ;;  %v12931_v26 = vld [vmem:[#allocation17_spill] sm:$0xff] }
 0x2bb   : > { %v4484_v12 = vsub.s32 %v4480_v1, %v4483_v55  ;;  %v2223_v35 = vsel %vm2221_vm2, %v2222_v49, %v2214_v25  ;;  %v2336_v41 = vsub.s32 32, %v2335_v40  ;;  %v2340_v0 = vsub.s32 4294967266, %v2335_v40  ;;  %v12933_v25 = vld [vmem:[#allocation74_spill] sm:$0xff] }
 0x2bc   : > { %v2220_v28 = vsel %vm2218_vm5, %v2206_v34, %v2219_v52  ;;  %vm2215_vm1 = vweird.f32 %v12877_v53  ;;  %v2337_v29 = vshll.u32 %v2328_v37, %v2335_v40  ;;  %v12576_v21 = vand.u32 2147483647, %v12930_v24 }
 0x2bd   : > { %v2224_v2 = vsel %vm2217_vm3, %v2220_v28, %v2223_v35  ;;  %vm4485_vm12 = vcmp.lt.s32.totalorder %v4484_v12, 0  ;;  %v4486_v31 = vsub.s32 0, %v4484_v12  ;;  %v2338_v51 = vshrl.u32 %v2320_v54, %v2336_v41 }
 0x2be   : > { %v2225_v59 = vsel %vm2215_vm1, nan, %v2224_v2  ;;  %v2341_v23 = vadd.s32 127, %v2340_v0  ;;  %v2401_v1 = vshrl.u32 %v12677_v44, %v12931_v26  ;;  %v2404_v34 = vshrl.u32 %v12668_v50, %v12931_v26  ;;  %v502_v0 = vpop.f32.mrf.mxu0 }
 0x2bf   : > { %6455 = vmatmul.msk.f32.gmra.mxu1 %vm322_vm0, %v2225_v59  ;;  %v4487_v56 = vsel %vm4485_vm12, %v4486_v31, %v4484_v12  ;;  %vm12592_vm15 = vcmp.lt.s32.totalorder %v9246_v3, 4  ;;  %v2339_v53 = vor.u32 %v2338_v51, %v2337_v29  ;;  %v3776_v11 = vadd.s32 1, %v6412_v39 }
 0x2c0   : > { %v2342_v60 = vshll.u32 %v2341_v23, 23  ;;  %v4488_v33 = vclz %v4487_v56  ;;  %v9270_v37 = vsel %vm12592_vm15, %v9252_v6, 920167782  ;;  %v2400_v49 = vshll.u32 %v12669_v63, %v12933_v25 }
 0x2c1   : > { %12932 = vst [vmem:[#allocation67_spill] sm:$0xff] %v9270_v37  ;;  %v2403_v20 = vshll.u32 %v12677_v44, %v12933_v25  ;;  %v9278_v55 = vsel %vm12592_vm15, %v3489_v43, 1326507024  ;;  %v9280_v52 = vshrl.u32 %v3624_v27, 5  ;;  %v9283_v28 = vsub.s32 32, %v9254_v36 }
 0x2c2   : > { %12934 = vst [vmem:[#allocation68_spill] sm:$0xff] %v9278_v55  ;;  %v2343_v54 = vor.u32 4788187, %v2342_v60  ;;  %v6425_v40 = vadd.s32 4294967294, %v4488_v33  ;;  %v2387_v39 = vand.u32 8388607, %v12576_v21  ;;  %v9287_v35 = vor.u32 %v2401_v1, %v2400_v49 }
 0x2c3   : > { %12935 = vst [vmem:[#allocation65_spill] sm:$0xff] %v9283_v28  ;;  %v9289_v41 = vor.u32 %v2404_v34, %v2403_v20  ;;  %v2346_v31 = vcvt.s32.f32 %v2339_v53  ;;  %v4476_v43 = vadd.s32 %v9190_v57, %v9188_v48  ;;  %vm3777_vm13 = vcmp.gt.s32.totalorder %v3776_v11, 0  ;;  %v12937_v57 = vld [vmem:[#allocation78_spill] sm:$0xff]  ;;  %v12938_v49 = vld [vmem:[#allocation9_spill] sm:$0xff] }
 0x2c4   : > { %v2344_v2 = vand.u32 2147483647, %v2343_v54  ;;  %vm6426_vm4 = vcmp.lt.s32.totalorder %v6425_v40, 0  ;;  %vm2412_vm10 = vcmp.lt.s32.totalorder %v7729_v42, 1  ;;  %vm2414_vm3 = vcmp.lt.s32.totalorder %v7729_v42, 3 }
 0x2c5   : > { %v4491_v27 = vsel %vm6426_vm4, 0, %v6425_v40  ;;  %v9296_v56 = vadd.f32 %v8990_v61, %v502_v0  ;;  %v2388_v1 = vor.u32 8388608, %v2387_v39  ;;  %v2424_v48 = vsel %vm2412_vm10, %v9287_v35, %v9289_v41 }
 0x2c6   : > { %v2347_v59 = vmul.f32 %v2346_v31, %v2344_v2  ;;  %v4492_v29 = vsub.s32 32, %v4491_v27  ;;  %v4493_v51 = vshll.u32 %v4484_v12, %v4491_v27  ;;  %v4496_v23 = vsub.s32 4294967266, %v4491_v27 }
 0x2c7   : > { %12936 = vst [vmem:[#allocation6_spill] sm:$0xff] %v9296_v56  ;;  %v2426_v34 = vsel %vm2414_vm3, %v12937_v57, %v8030_v45  ;;  %v9306_v53 = vsel %vm3777_vm13, %v3776_v11, 0  ;;  %vm4384_vm5 = vcmp.lt.s32.totalorder %v12938_v49, 0  ;;  %v12939_v20 = vand.u32 2147483647, %v12897_v8 }
 0x2c8   : > { %v2348_v60 = vxor.u32 2147483648, %v2347_v59  ;;  %v4494_v33 = vshrl.u32 %v4476_v43, %v4492_v29  ;;  %v4497_v12 = vadd.s32 127, %v4496_v23  ;;  %vm2228_vm2 = vcmp.lt.s32.totalorder %v12897_v8, 0 }
 0x2c9   : > { %vm9311_vm11 = vcmp.le.f32.partialorder %v12939_v20, 0.7853982  ;;  %v2398_v40 = vshrl.u32 %v12669_v63, %v12931_v26  ;;  %vm2413_vm1 = vcmp.lt.s32.totalorder %v7729_v42, 2  ;;  %v3923_v2 = vand.u32 2139095040, %v9296_v56 }
 0x2ca   : > { %v2349_v45 = vsel %vm2228_vm2, %v2348_v60, %v2347_v59  ;;  %v4495_v11 = vor.u32 %v4494_v33, %v4493_v51  ;;  %v4498_v39 = vshll.u32 %v4497_v12, 23  ;;  %v9323_v0 = vsel %vm2413_vm1, %v2424_v48, %v2426_v34 }
 0x2cb   : > { %v2352_v31 = vsel %vm9311_vm11, %v12897_v8, %v2349_v45  ;;  %v2397_v43 = vshll.u32 %v12675_v32, %v12933_v25  ;;  %v9331_v27 = vshll.u32 %v2388_v1, 8  ;;  %v2350_v29 = vsub.s32 4, %v9206_v46 }
 0x2cc   : > { %v2354_v59 = vmul.f32 %v2352_v31, %v2352_v31  ;;  %v4499_v51 = vor.u32 4788187, %v4498_v39  ;;  %v4502_v23 = vcvt.s32.f32 %v4495_v11  ;;  %v3638_v48 = vshll.u32 %v12668_v50, %v9254_v36 }
 0x2cd   : > { %v9338_v57 = vshll.u32 %v12670_v4, %v9254_v36  ;;  %v9340_v34 = vor.u32 %v2398_v40, %v2397_v43  ;;  %v3639_v25 = vshrl.u32 %v12670_v4, %v9283_v28  ;;  %v9347_v20 = vshrl.u32 %v12679_v16, %v9283_v28 }
 0x2ce   : > { %v2355_v1 = vmul.f32 -0.001358992, %v2354_v59  ;;  %v2362_v33 = vmul.f32 -0.00019511016, %v2354_v59  ;;  %v4500_v12 = vand.u32 2147483647, %v4499_v51  ;;  %v2351_v40 = vsel %vm2228_vm2, %v2350_v29, %v9206_v46 }
 0x2cf   : > { %v9350_v45 = vand.u32 31, %v9306_v53  ;;  %v3924_v11 = vshrl.u32 %v3923_v2, 23  ;;  %v9353_v39 = vand.u32 65535, %v9331_v27  ;;  %v12943_v51 = vand.u32 2147483647, %v12938_v49 }
 0x2d0   : > { %v2356_v43 = vadd.f32 0.041655596, %v2355_v1  ;;  %v2363_v21 = vadd.f32 0.008332121, %v2362_v33  ;;  %v4503_v60 = vmul.f32 %v4502_v23, %v4500_v12  ;;  %v2420_v2 = vsel %vm2412_vm10, %v9340_v34, %v9287_v35 }
 0x2d1   : > { %12942 = vst [vmem:[#allocation57_spill] sm:$0xff] %v9350_v45  ;;  %vm9360_vm12 = vcmp.le.f32.partialorder %v12943_v51, 0.7853982  ;;  %v2422_v28 = vsel %vm2414_vm3, %v9289_v41, %v12946_v10  ;;  %v12947_v46 = vshrl.u32 %v9323_v0, 16  ;;  %v4506_v12 = vsub.s32 4, %v9250_v38 }
 0x2d2   : > { %v2357_v23 = vmul.f32 %v2356_v43, %v2354_v59  ;;  %v2364_v1 = vmul.f32 %v2363_v21, %v2354_v59  ;;  %v4504_v33 = vxor.u32 2147483648, %v4503_v60  ;;  %v9378_v51 = vor.u32 %v3639_v25, %v3638_v48 }
 0x2d3   : > { %v9375_v29 = vmul.u32 %v12947_v46, %v9353_v39  ;;  %v2353_v58 = vsel %vm9311_vm11, 0, %v2351_v40  ;;  %v2431_v10 = vand.u32 65535, %v9323_v0  ;;  %v9389_v21 = vsel %vm2413_vm1, %v2420_v2, %v2422_v28 }
 0x2d4   : > { %12948 = vst [vmem:[#allocation53_spill] sm:$0xff] %v9378_v51  ;;  %v2358_v37 = vadd.f32 -0.4999988, %v2357_v23  ;;  %v2365_v6 = vadd.f32 -0.16666654, %v2364_v1  ;;  %v4505_v46 = vsel %vm4384_vm5, %v4504_v33, %v4503_v60  ;;  %v9392_v48 = vsub.s32 32, %v9350_v45 }
 0x2d5   : > { %v6415_v25 = vadd.s32 4294967169, %v3924_v11  ;;  %v4508_v54 = vsel %vm9360_vm12, %v12938_v49, %v4505_v46  ;;  %v2437_v40 = vshll.u32 %v9375_v29, 16  ;;  %v4507_v60 = vsel %vm4384_vm5, %v4506_v12, %v9250_v38 }
 0x2d6   : > { %12949 = vst [vmem:[#allocation66_spill] sm:$0xff] %v9392_v48  ;;  %v2359_v43 = vmul.f32 %v2358_v37, %v2354_v59  ;;  %v2366_v23 = vmul.f32 %v2365_v6, %v2354_v59  ;;  %v4510_v1 = vmul.f32 %v4508_v54, %v4508_v54  ;;  %vm12622_vm4 = vcmp.lt.s32.totalorder %v9280_v52, 4 }
 0x2d7   : > { %v2370_v28 = vand.u32 3, %v2353_v58  ;;  %v9403_v2 = vshrl.u32 %v9331_v27, 16  ;;  %v2433_v11 = vmul.u32 %v2431_v10, %v9353_v39  ;;  %vm2369_vm13 = vweird.f32 %v12897_v8 }
 0x2d8   : > { %v2360_v46 = vadd.f32 1.0, %v2359_v43  ;;  %v2367_v36 = vadd.f32 1.0, %v2366_v23  ;;  %v4511_v55 = vmul.f32 -0.001358992, %v4510_v1  ;;  %v4518_v37 = vmul.f32 -0.00019511016, %v4510_v1 }
 0x2d9   : > { %v4509_v38 = vsel %vm9360_vm12, 0, %v4507_v60  ;;  %v9411_v6 = vmul.u32 %v2431_v10, %v9403_v2  ;;  %vm2441_vm5 = vc.u32 %v2433_v11, %v2437_v40  ;;  %vm2371_vm11 = vcmp.lt.s32.totalorder %v2370_v28, 2 }
 0x2da   : > { %v2368_v58 = vmul.f32 %v2367_v36, %v2352_v31  ;;  %v2376_v59 = vxor.u32 2147483648, %v2360_v46  ;;  %v4512_v12 = vadd.f32 0.041655596, %v4511_v55  ;;  %v4519_v3 = vadd.f32 0.008332121, %v4518_v37 }
 0x2db   : > { %vm2372_vm2 = vcmp.eq.s32.totalorder %v2370_v28, 0  ;;  %v2443_v33 = vadd.s32 %v2437_v40, %v2433_v11  ;;  %v12950_v43 = vshrl.u32 %v9389_v21, 16  ;;  %vm2375_vm15 = vcmp.eq.s32.totalorder %v2370_v28, 2 }
 0x2dc   : > { %v2373_v62 = vxor.u32 2147483648, %v2368_v58  ;;  %v4513_v56 = vmul.f32 %v4512_v12, %v4510_v1  ;;  %v4520_v60 = vmul.f32 %v4519_v3, %v4510_v1  ;;  %v4526_v7 = vand.u32 3, %v4509_v38 }
 0x2dd   : > { %v9416_v23 = vmul.u32 %v12950_v43, %v9353_v39  ;;  %v2439_v10 = vshll.u32 %v9411_v6, 16  ;;  %v2442_v36 = vsel %vm2441_vm5, 1, %v12710_v9  ;;  %v2453_v55 = vand.u32 65535, %v9389_v21 }
 0x2de   : > { %v2374_v31 = vsel %vm2372_vm2, %v2360_v46, %v2373_v62  ;;  %v2377_v37 = vsel %vm2375_vm15, %v2376_v59, %v2368_v58  ;;  %v4514_v47 = vadd.f32 -0.4999988, %v4513_v56  ;;  %v4521_v40 = vadd.f32 -0.16666654, %v4520_v60 }
 0x2df   : > { %v2378_v11 = vsel %vm2371_vm11, %v2374_v31, %v2377_v37  ;;  %v12951_v43 = vshrl.u32 %v9323_v0, 16  ;;  %vm2445_vm12 = vc.u32 %v2443_v33, %v2439_v10  ;;  %v2459_v3 = vshll.u32 %v9416_v23, 16 }
 0x2e0   : > { %v9429_v38 = vsel %vm12622_vm4, %v9378_v51, 920167782  ;;  %v2379_v62 = vsel %vm2369_vm13, nan, %v2378_v11  ;;  %v4515_v46 = vmul.f32 %v4514_v47, %v4510_v1  ;;  %v4522_v58 = vmul.f32 %v4521_v40, %v4510_v1  ;;  %v505_v11 = vpop.f32.mrf.mxu0 }
 0x2e1   : > { %v2436_v18 = vmul.u32 %v12951_v43, %v9403_v2  ;;  %12952 = vst [vmem:[#allocation17_spill] sm:$0xff] %v9429_v38  ;;  %v9434_v28 = vshrl.u32 %v9306_v53, 5  ;;  %v3930_v59 = vadd.s32 1, %v6415_v25  ;;  %6456 = vmatmul.msk.f32.gmra.mxu1 %vm322_vm0, %v2379_v62  ;;  %v2455_v33 = vmul.u32 %v2453_v55, %v9353_v39 }
 0x2e2   : > { %v4516_v12 = vadd.f32 1.0, %v4515_v46  ;;  %v4523_v56 = vadd.f32 1.0, %v4522_v58  ;;  %v2446_v60 = vsel %vm2445_vm12, 1, %v12710_v9  ;;  %v2457_v10 = vmul.u32 %v2453_v55, %v9403_v2 }
 0x2e3   : > { %12953 = vst [vmem:[#allocation74_spill] sm:$0xff] %v9434_v28  ;;  %v2444_v0 = vadd.s32 %v2442_v36, %v2436_v18  ;;  %v3792_v8 = vshll.u32 %v12668_v50, %v9350_v45  ;;  %v3793_v47 = vshrl.u32 %v12670_v4, %v9392_v48  ;;  %vm4531_vm15 = vcmp.eq.s32.totalorder %v4526_v7, 2 }
 0x2e4   : > { %vm2463_vm13 = vc.u32 %v2455_v33, %v2459_v3  ;;  %v3796_v53 = vshrl.u32 %v12679_v16, %v9392_v48  ;;  %v4524_v18 = vmul.f32 %v4523_v56, %v4508_v54  ;;  %v4532_v25 = vxor.u32 2147483648, %v4516_v12 }
 0x2e5   : > { %v2465_v39 = vadd.s32 %v2459_v3, %v2455_v33  ;;  %vm3931_vm5 = vcmp.gt.s32.totalorder %v3930_v59, 0  ;;  %vm4527_vm11 = vcmp.lt.s32.totalorder %v4526_v7, 2  ;;  %vm4528_vm2 = vcmp.eq.s32.totalorder %v4526_v7, 0 }
 0x2e6   : > { %v2448_v1 = vadd.s32 %v2446_v60, %v2444_v0  ;;  %v4529_v36 = vxor.u32 2147483648, %v4524_v18  ;;  %v4533_v55 = vsel %vm4531_vm15, %v4532_v25, %v4524_v18  ;;  %v2461_v31 = vshll.u32 %v2457_v10, 16 }
 0x2e7   : > { %v2464_v37 = vsel %vm2463_vm13, 1, %v12710_v9  ;;  %v3795_v40 = vshll.u32 %v12670_v4, %v9350_v45  ;;  %vm4525_vm12 = vweird.f32 %v12938_v49  ;;  %v2438_v43 = vshrl.u32 %v9375_v29, 16 }
 0x2e8   : > { %v12954_v54 = vshrl.u32 %v9389_v21, 16  ;;  %v9454_v62 = vor.u32 %v3793_v47, %v3792_v8  ;;  %v3932_v46 = vsel %vm3931_vm5, %v3930_v59, 0  ;;  %v4530_v58 = vsel %vm4528_vm2, %v4516_v12, %v4529_v36  ;;  %v12961_v47 = vld [vmem:[#allocation39_spill] sm:$0xff]  ;;  %v12963_v36 = vld [vmem:[#allocation13_spill] sm:$0xff] }
 0x2e9   : > { %vm2467_vm15 = vc.u32 %v2465_v39, %v2461_v31  ;;  %v4534_v0 = vsel %vm4527_vm11, %v4530_v58, %v4533_v55  ;;  %vm12956_vm13 = vcmp.lt.s32.totalorder %v7729_v42, 4  ;;  %v2449_v56 = vadd.s32 %v2448_v1, %v2438_v43  ;;  %v12964_v55 = vld [vmem:[#allocation76_spill] sm:$0xff] }
 0x2ea   : > { %v2458_v3 = vmul.u32 %v12954_v54, %v9403_v2  ;;  %12955 = vst [vmem:[#allocation78_spill] sm:$0xff] %v9454_v62  ;;  %v2417_v33 = vsel %vm12956_vm13, %v9289_v41, 2102212464  ;;  %v3797_v49 = vor.u32 %v3796_v53, %v3795_v40  ;;  %v9461_v29 = vadd.f32 %v8990_v61, %v505_v11 }
 0x2eb   : > { %v4535_v18 = vsel %vm4525_vm12, nan, %v4534_v0  ;;  %v2396_v21 = vshrl.u32 %v12675_v32, %v12931_v26  ;;  %v12958_v2 = vor.u32 %v9347_v20, %v9338_v57  ;;  %vm12610_vm5 = vcmp.lt.s32.totalorder %v9434_v28, 4 }
 0x2ec   : > { %v2466_v60 = vadd.s32 %v2464_v37, %v2458_v3  ;;  %12957 = vst [vmem:[#allocation9_spill] sm:$0xff] %v9461_v29  ;;  %6470 = vmatmul.msk.f32.vlgmr.msrb.gmra.mxu3 %vm322_vm0, %v4535_v18  ;;  %v2440_v41 = vshrl.u32 %v9411_v6, 16  ;;  %v2468_v61 = vsel %vm2467_vm15, 1, %v12710_v9  ;;  %v9479_v59 = vsel %vm12610_vm5, %v9454_v62, 920167782 }
 0x2ed   : > { %v9470_v7 = vsel %vm12622_vm4, %v12958_v2, 1326507024  ;;  %12959 = vst [vmem:[#allocation81_spill] sm:$0xff] %v9479_v59  ;;  %v9481_v26 = vand.u32 31, %v3932_v46  ;;  %v2416_v57 = vsel %vm2412_vm10, %v2396_v21, %v9340_v34  ;;  %v2418_v20 = vsel %vm2414_vm3, %v9287_v35, %v2417_v33 }
 0x2ee   : > { %v9489_v12 = vadd.s32 %v2449_v56, %v2440_v41  ;;  %v2460_v6 = vshrl.u32 %v9416_v23, 16  ;;  %v2470_v8 = vadd.s32 %v2468_v61, %v2466_v60  ;;  %v12596_v53 = vand.u32 2147483647, %v12961_v47 }
 0x2ef   : > { %12960 = vst [vmem:[#allocation98_spill] sm:$0xff] %v9481_v26  ;;  %v9495_v25 = vsel %vm12610_vm5, %v3797_v49, 1326507024  ;;  %v4077_v1 = vand.u32 2139095040, %v9461_v29  ;;  %v4553_v34 = vshll.u32 %v12675_v32, %v12963_v36  ;;  %v4554_v37 = vshrl.u32 %v12669_v63, %v12964_v55  ;;  %v12967_v49 = vld [vmem:[#allocation75_spill] sm:$0xff] }
 0x2f0   : > { %12962 = vst [vmem:[#allocation39_spill] sm:$0xff] %v9495_v25  ;;  %v2462_v35 = vshrl.u32 %v2457_v10, 16  ;;  %v9502_v40 = vadd.s32 %v2465_v39, %v2461_v31  ;;  %v2471_v11 = vadd.s32 %v2470_v8, %v2460_v6  ;;  %v4543_v23 = vand.u32 8388607, %v12596_v53  ;;  %v12973_v29 = vld [vmem:[#allocation71_spill] sm:$0xff] }
 0x2f1   : > { %v9506_v43 = vshrl.u32 %v3932_v46, 5  ;;  %v9509_v54 = vsub.s32 32, %v9481_v26  ;;  %v3946_v3 = vshll.u32 %v12668_v50, %v9481_v26  ;;  %v2419_v58 = vsel %vm2413_vm1, %v2416_v57, %v2418_v20  ;;  %v12968_v57 = vld [vmem:[#allocation82_spill] sm:$0xff]  ;;  %v12969_v20 = vld [vmem:[#allocation77_spill] sm:$0xff] }
 0x2f2   : > { %v2472_v0 = vadd.s32 %v2471_v11, %v2462_v35  ;;  %vm2475_vm10 = vc.u32 %v9489_v12, %v9502_v40  ;;  %v4544_v10 = vor.u32 8388608, %v4543_v23  ;;  %v4556_v39 = vshll.u32 %v12669_v63, %v12963_v36 }
 0x2f3   : > { %12965 = vst [vmem:[#allocation13_spill] sm:$0xff] %v9506_v43  ;;  %v4555_v31 = vor.u32 %v4554_v37, %v4553_v34  ;;  %v4557_v46 = vshrl.u32 %v12677_v44, %v12964_v55  ;;  %v4559_v33 = vshll.u32 %v12677_v44, %v12963_v36  ;;  %v4560_v56 = vshrl.u32 %v12668_v50, %v12964_v55  ;;  %v12970_v34 = vld [vmem:[#allocation79_spill] sm:$0xff] }
 0x2f4   : > { %12966 = vst [vmem:[#allocation76_spill] sm:$0xff] %v9509_v54  ;;  %v4078_v42 = vshrl.u32 %v4077_v1, 23  ;;  %v2476_v60 = vadd.s32 1, %v2472_v0  ;;  %vm4568_vm3 = vcmp.lt.s32.totalorder %v12967_v49, 1  ;;  %vm4570_vm1 = vcmp.lt.s32.totalorder %v12967_v49, 3 }
 0x2f5   : > { %v2473_v18 = vmul.u32 %v9331_v27, %v2419_v58  ;;  %v4558_v21 = vor.u32 %v4557_v46, %v4556_v39  ;;  %v4561_v2 = vor.u32 %v4560_v56, %v4559_v33  ;;  %vm4569_vm11 = vcmp.lt.s32.totalorder %v12967_v49, 2 }
 0x2f6   : > { %v9531_v41 = vshll.u32 %v12670_v4, %v9481_v26  ;;  %v2477_v61 = vsel %vm2475_vm10, %v2476_v60, %v2472_v0  ;;  %v4582_v6 = vsel %vm4570_vm1, %v12969_v20, %v12968_v57  ;;  %v9540_v8 = vshll.u32 %v4544_v10, 8 }
 0x2f7   : > { %v3947_v27 = vshrl.u32 %v12670_v4, %v9509_v54  ;;  %v2478_v1 = vadd.s32 %v2477_v61, %v2473_v18  ;;  %v4576_v36 = vsel %vm4568_vm3, %v4555_v31, %v4558_v21  ;;  %v4578_v37 = vsel %vm4570_vm1, %v4561_v2, %v12970_v34 }
 0x2f8   : > { %v9551_v35 = vshrl.u32 %v12679_v16, %v9509_v54  ;;  %v4579_v11 = vsel %vm4569_vm11, %v4576_v36, %v4578_v37  ;;  %v4580_v23 = vsel %vm4568_vm3, %v4558_v21, %v4561_v2  ;;  %v4585_v58 = vand.u32 65535, %v9540_v8 }
 0x2f9   : > { %v6418_v0 = vadd.s32 4294967169, %v4078_v42  ;;  %v2479_v10 = vadd.s32 536870912, %v2478_v1  ;;  %v4583_v39 = vsel %vm4569_vm11, %v4580_v23, %v4582_v6  ;;  %v4586_v46 = vshrl.u32 %v9540_v8, 16 }
 0x2fa   : > { %v4552_v33 = vshrl.u32 %v12675_v32, %v12964_v55  ;;  %v4587_v56 = vand.u32 65535, %v4583_v39  ;;  %v4588_v60 = vshrl.u32 %v4583_v39, 16  ;;  %v4610_v18 = vshrl.u32 %v4579_v11, 16 }
 0x2fb   : > { %v9563_v61 = vor.u32 %v3947_v27, %v3946_v3  ;;  %vm12609_vm2 = vcmp.lt.s32.totalorder %v9506_v43, 4  ;;  %v9566_v57 = vshrl.u32 %v2479_v10, 30  ;;  %v4609_v20 = vand.u32 65535, %v4579_v11 }
 0x2fc   : > { %vm12972_vm12 = vcmp.lt.s32.totalorder %v12967_v49, 4  ;;  %v4589_v36 = vmul.u32 %v4587_v56, %v4585_v58  ;;  %v4590_v6 = vmul.u32 %v4588_v60, %v4585_v58  ;;  %v4591_v34 = vmul.u32 %v4587_v56, %v4586_v46 }
 0x2fd   : > { %12971 = vst [vmem:[#allocation75_spill] sm:$0xff] %v9563_v61  ;;  %v4573_v42 = vsel %vm12972_vm12, %v4561_v2, 2102212464  ;;  %v9572_v55 = vadd.s32 1, %v6418_v0  ;;  %v2481_v23 = vshll.u32 %v9566_v57, 30  ;;  %v4612_v3 = vmul.u32 %v4610_v18, %v4585_v58 }
 0x2fe   : > { %v4572_v27 = vsel %vm4568_vm3, %v4552_v33, %v4555_v31  ;;  %v4592_v10 = vmul.u32 %v4588_v60, %v4586_v46  ;;  %v4593_v39 = vshll.u32 %v4590_v6, 16  ;;  %v4595_v11 = vshll.u32 %v4591_v34, 16 }
 0x2ff   : > { %v9577_v53 = vsub.s32 %v2478_v1, %v2481_v23  ;;  %v4574_v2 = vsel %vm4570_vm1, %v4558_v21, %v4573_v42  ;;  %v4613_v56 = vmul.u32 %v4609_v20, %v4586_v46  ;;  %v12603_v26 = vand.u32 2147483647, %v12973_v29 }
 0x300   : > { %vm4597_vm15 = vc.u32 %v4589_v36, %v4593_v39  ;;  %v4599_v0 = vadd.s32 %v4593_v39, %v4589_v36  ;;  %v4611_v37 = vmul.u32 %v4609_v20, %v4585_v58  ;;  %v4615_v54 = vshll.u32 %v4612_v3, 16 }
 0x301   : > { %v9585_v59 = vsel %vm12609_vm2, %v9563_v61, 920167782  ;;  %vm2483_vm13 = vcmp.lt.s32.totalorder %v9577_v53, 0  ;;  %v2484_v31 = vsub.s32 0, %v9577_v53  ;;  %v4598_v1 = vsel %vm4597_vm15, 1, %v12710_v9 }
 0x302   : > { %12974 = vst [vmem:[#allocation82_spill] sm:$0xff] %v9585_v59  ;;  %v2474_v21 = vadd.s32 %v9502_v40, %v9489_v12  ;;  %v4600_v33 = vadd.s32 %v4598_v1, %v4592_v10  ;;  %vm4601_vm10 = vc.u32 %v4599_v0, %v4595_v11  ;;  %v4614_v60 = vmul.u32 %v4610_v18, %v4586_v46  ;;  %v12975_v0 = vld [vmem:[#allocation80_spill] sm:$0xff]  ;;  %v12976_v1 = vld [vmem:[#allocation85_spill] sm:$0xff] }
 0x303   : > { %v2485_v58 = vsel %vm2483_vm13, %v2484_v31, %v9577_v53  ;;  %v9595_v20 = vsel %vm4569_vm11, %v4572_v27, %v4574_v2  ;;  %v4594_v42 = vshrl.u32 %v4590_v6, 16  ;;  %v4617_v36 = vshll.u32 %v4613_v56, 16 }
 0x304   : > { %vm4085_vm3 = vcmp.gt.s32.totalorder %v9572_v55, 0  ;;  %v2486_v23 = vclz %v2485_v58  ;;  %v4602_v39 = vsel %vm4601_vm10, 1, %v12710_v9  ;;  %vm4619_vm1 = vc.u32 %v4611_v37, %v4615_v54 }
 0x305   : > { %v2541_v12 = vand.u32 8388607, %v12603_v26  ;;  %v4596_v40 = vshrl.u32 %v4591_v34, 16  ;;  %v4604_v10 = vadd.s32 %v4602_v39, %v4600_v33  ;;  %v4620_v46 = vsel %vm4619_vm1, 1, %v12710_v9 }
 0x306   : > { %v4621_v18 = vadd.s32 %v4615_v54, %v4611_v37  ;;  %v6386_v11 = vadd.s32 4294967294, %v2486_v23  ;;  %v4616_v49 = vshrl.u32 %v4612_v3, 16  ;;  %v4618_v27 = vshrl.u32 %v4613_v56, 16 }
 0x307   : > { %v4622_v2 = vadd.s32 %v4620_v46, %v4614_v60  ;;  %v4605_v6 = vadd.s32 %v4604_v10, %v4594_v42  ;;  %v2551_v31 = vshll.u32 %v12675_v32, %v12975_v0  ;;  %v2552_v58 = vshrl.u32 %v12669_v63, %v12976_v1 }
 0x308   : > { %vm4623_vm11 = vc.u32 %v4621_v18, %v4617_v36  ;;  %vm6387_vm12 = vcmp.lt.s32.totalorder %v6386_v11, 0  ;;  %v2554_v34 = vshll.u32 %v12669_v63, %v12975_v0  ;;  %v2555_v54 = vshrl.u32 %v12677_v44, %v12976_v1 }
 0x309   : > { %v4624_v26 = vsel %vm4623_vm11, 1, %v12710_v9  ;;  %v2489_v37 = vsel %vm6387_vm12, 0, %v6386_v11  ;;  %v9611_v3 = vadd.s32 %v4605_v6, %v4596_v40  ;;  %v9613_v56 = vadd.s32 %v4621_v18, %v4617_v36 }
 0x30a   : > { %v4626_v33 = vadd.s32 %v4624_v26, %v4622_v2  ;;  %v12977_v60 = vand.u32 2147483647, %v12930_v24  ;;  %v2490_v23 = vsub.s32 32, %v2489_v37  ;;  %v2494_v39 = vsub.s32 4294967266, %v2489_v37 }
 0x30b   : > { %v2553_v10 = vor.u32 %v2552_v58, %v2551_v31  ;;  %v2556_v46 = vor.u32 %v2555_v54, %v2554_v34  ;;  %v4629_v61 = vmul.u32 %v9540_v8, %v9595_v20  ;;  %v2557_v40 = vshll.u32 %v12677_v44, %v12975_v0  ;;  %v12980_v58 = vld [vmem:[#allocation2_spill] sm:$0xff] }
 0x30c   : > { %vm9617_vm15 = vcmp.le.f32.partialorder %v12977_v60, 0.7853982  ;;  %v4627_v59 = vadd.s32 %v4626_v33, %v4616_v49  ;;  %v2558_v26 = vshrl.u32 %v12668_v50, %v12976_v1  ;;  %v2491_v36 = vshll.u32 %v9577_v53, %v2489_v37 }
 0x30d   : > { %v2492_v18 = vshrl.u32 %v2474_v21, %v2490_v23  ;;  %v2495_v11 = vadd.s32 127, %v2494_v39  ;;  %v2504_v2 = vsub.s32 4, %v9566_v57  ;;  %v2542_v60 = vor.u32 8388608, %v2541_v12  ;;  %v12981_v12 = vld [vmem:[#allocation20_spill] sm:$0xff]  ;;  %v12982_v39 = vld [vmem:[#allocation86_spill] sm:$0xff] }
 0x30e   : > { %v4628_v6 = vadd.s32 %v4627_v59, %v4618_v27  ;;  %v2559_v31 = vor.u32 %v2558_v26, %v2557_v40  ;;  %vm2566_vm13 = vcmp.lt.s32.totalorder %v12980_v58, 1  ;;  %vm4631_vm10 = vc.u32 %v9611_v3, %v9613_v56  ;;  %v12983_v40 = vld [vmem:[#allocation24_spill] sm:$0xff] }
 0x30f   : > { %v2493_v49 = vor.u32 %v2492_v18, %v2491_v36  ;;  %v2496_v34 = vshll.u32 %v2495_v11, 23  ;;  %v2574_v8 = vsel %vm2566_vm13, %v2553_v10, %v2556_v46  ;;  %v9637_v53 = vsel %vm4085_vm3, %v9572_v55, 0 }
 0x310   : > { %vm2382_vm1 = vcmp.lt.s32.totalorder %v12930_v24, 0  ;;  %v4632_v59 = vadd.s32 1, %v4628_v6  ;;  %vm2568_vm11 = vcmp.lt.s32.totalorder %v12980_v58, 3  ;;  %vm2567_vm12 = vcmp.lt.s32.totalorder %v12980_v58, 2 }
 0x311   : > { %v2497_v21 = vor.u32 4788187, %v2496_v34  ;;  %v2505_v20 = vsel %vm2382_vm1, %v2504_v2, %v9566_v57  ;;  %v2576_v27 = vsel %vm2568_vm11, %v2559_v31, %v12981_v12  ;;  %v2500_v0 = vcvt.s32.f32 %v2493_v49 }
 0x312   : > { %v4633_v54 = vsel %vm4631_vm10, %v4632_v59, %v4628_v6  ;;  %v9650_v55 = vsel %vm2567_vm12, %v2574_v8, %v2576_v27  ;;  %v2578_v37 = vsel %vm2566_vm13, %v2556_v46, %v2559_v31  ;;  %v2580_v57 = vsel %vm2568_vm11, %v12983_v40, %v12982_v39 }
 0x313   : > { %v2498_v33 = vand.u32 2147483647, %v2497_v21  ;;  %v4634_v23 = vadd.s32 %v4633_v54, %v4629_v61  ;;  %v9658_v26 = vshll.u32 %v2542_v60, 8  ;;  %v9661_v36 = vand.u32 31, %v9637_v53 }
 0x314   : > { %v2507_v18 = vsel %vm9617_vm15, 0, %v2505_v20  ;;  %v2550_v11 = vshrl.u32 %v12675_v32, %v12976_v1  ;;  %v2581_v2 = vsel %vm2567_vm12, %v2578_v37, %v2580_v57  ;;  %vm12985_vm3 = vcmp.lt.s32.totalorder %v12980_v58, 4 }
 0x315   : > { %12984 = vst [vmem:[#allocation77_spill] sm:$0xff] %v9661_v36  ;;  %v2501_v61 = vmul.f32 %v2500_v0, %v2498_v33  ;;  %v4635_v6 = vadd.s32 536870912, %v4634_v23  ;;  %v2571_v49 = vsel %vm12985_vm3, %v2559_v31, 2102212464  ;;  %v2608_v60 = vshrl.u32 %v9650_v55, 16 }
 0x316   : > { %v2583_v34 = vand.u32 65535, %v9658_v26  ;;  %v2584_v8 = vshrl.u32 %v9658_v26, 16  ;;  %v2585_v59 = vand.u32 65535, %v2581_v2  ;;  %v2586_v21 = vshrl.u32 %v2581_v2, 16 }
 0x317   : > { %v12986_v20 = vor.u32 %v9551_v35, %v9531_v41  ;;  %v2502_v12 = vxor.u32 2147483648, %v2501_v61  ;;  %v9681_v27 = vshrl.u32 %v4635_v6, 30  ;;  %v2570_v31 = vsel %vm2566_vm13, %v2550_v11, %v2553_v10 }
 0x318   : > { %v2572_v0 = vsel %vm2568_vm11, %v2556_v46, %v2571_v49  ;;  %v9687_v54 = vmul.u32 %v2586_v21, %v2583_v34  ;;  %v9689_v37 = vmul.u32 %v2585_v59, %v2584_v8  ;;  %v2607_v33 = vand.u32 65535, %v9650_v55 }
 0x319   : > { %v9679_v1 = vsel %vm12609_vm2, %v12986_v20, 1326507024  ;;  %v9693_v41 = vsub.s32 32, %v9661_v36  ;;  %v2503_v35 = vsel %vm2382_vm1, %v2502_v12, %v2501_v61  ;;  %v9697_v39 = vand.u32 3, %v2507_v18 }
 0x31a   : > { %12987 = vst [vmem:[#allocation79_spill] sm:$0xff] %v9679_v1  ;;  %v4637_v40 = vshll.u32 %v9681_v27, 30  ;;  %v9703_v10 = vsel %vm9617_vm15, %v12930_v24, %v2503_v35  ;;  %v2587_v46 = vmul.u32 %v2585_v59, %v2583_v34  ;;  %v2591_v57 = vshll.u32 %v9687_v54, 16 }
 0x31b   : > { %12988 = vst [vmem:[#allocation71_spill] sm:$0xff] %v9693_v41  ;;  %v9706_v11 = vmul.u32 %v2608_v60, %v2583_v34  ;;  %v2508_v55 = vmul.f32 %v9703_v10, %v9703_v10  ;;  %v9714_v18 = vsel %vm2567_vm12, %v2570_v31, %v2572_v0  ;;  %v2590_v61 = vmul.u32 %v2586_v21, %v2584_v8 }
 0x31c   : > { %v9710_v2 = vsub.s32 %v4634_v23, %v4637_v40  ;;  %v2593_v6 = vshll.u32 %v9689_v37, 16  ;;  %vm2595_vm13 = vc.u32 %v2587_v46, %v2591_v57  ;;  %v2597_v42 = vadd.s32 %v2591_v57, %v2587_v46 }
 0x31d   : > { %v9717_v49 = vmul.u32 %v2607_v33, %v2584_v8  ;;  %v2509_v59 = vmul.f32 -0.001358992, %v2508_v55  ;;  %v2516_v20 = vmul.f32 -0.00019511016, %v2508_v55  ;;  %v2596_v23 = vsel %vm2595_vm13, 1, %v12710_v9 }
 0x31e   : > { %vm4639_vm15 = vcmp.lt.s32.totalorder %v9710_v2, 0  ;;  %v4640_v12 = vsub.s32 0, %v9710_v2  ;;  %vm2599_vm10 = vc.u32 %v2597_v42, %v2593_v6  ;;  %v2609_v35 = vmul.u32 %v2607_v33, %v2583_v34 }
 0x31f   : > { %v2613_v58 = vshll.u32 %v9706_v11, 16  ;;  %v2510_v31 = vadd.f32 0.041655596, %v2509_v59  ;;  %v2517_v21 = vadd.f32 0.008332121, %v2516_v20  ;;  %v2598_v40 = vadd.s32 %v2596_v23, %v2590_v61  ;;  %v12989_v20 = vld [vmem:[#allocation73_spill] sm:$0xff] }
 0x320   : > { %v4641_v0 = vsel %vm4639_vm15, %v4640_v12, %v9710_v2  ;;  %v4630_v46 = vadd.s32 %v9613_v56, %v9611_v3  ;;  %v2600_v1 = vsel %vm2599_vm10, 1, %v12710_v9  ;;  %v2627_v43 = vmul.u32 %v9658_v26, %v9714_v18 }
 0x321   : > { %v4642_v57 = vclz %v4641_v0  ;;  %v2511_v62 = vmul.f32 %v2510_v31, %v2508_v55  ;;  %v2518_v25 = vmul.f32 %v2517_v21, %v2508_v55  ;;  %v2615_v34 = vshll.u32 %v9717_v49, 16 }
 0x322   : > { %vm2617_vm1 = vc.u32 %v2609_v35, %v2613_v58  ;;  %vm2529_vm11 = vcmp.eq.s32.totalorder %v9697_v39, 2  ;;  %v2602_v6 = vadd.s32 %v2600_v1, %v2598_v40  ;;  %v2619_v42 = vadd.s32 %v2613_v58, %v2609_v35 }
 0x323   : > { %v6428_v33 = vadd.s32 4294967294, %v4642_v57  ;;  %v2618_v61 = vsel %vm2617_vm1, 1, %v12710_v9  ;;  %v2512_v59 = vadd.f32 -0.4999988, %v2511_v62  ;;  %v2519_v3 = vadd.f32 -0.16666654, %v2518_v25 }
 0x324   : > { %v2612_v56 = vmul.u32 %v2608_v60, %v2584_v8  ;;  %v12608_v12 = vand.u32 2147483647, %v12989_v20  ;;  %vm2526_vm12 = vcmp.eq.s32.totalorder %v9697_v39, 0  ;;  %v4660_v23 = vsub.s32 4, %v9681_v27 }
 0x325   : > { %vm6429_vm3 = vcmp.lt.s32.totalorder %v6428_v33, 0  ;;  %v2592_v31 = vshrl.u32 %v9687_v54, 16  ;;  %vm2621_vm13 = vc.u32 %v2619_v42, %v2615_v34  ;;  %v2513_v21 = vmul.f32 %v2512_v59, %v2508_v55 }
 0x326   : > { %v2520_v0 = vmul.f32 %v2519_v3, %v2508_v55  ;;  %vm2525_vm15 = vcmp.lt.s32.totalorder %v9697_v39, 2  ;;  %v4645_v1 = vsel %vm6429_vm3, 0, %v6428_v33  ;;  %v2620_v40 = vadd.s32 %v2618_v61, %v2612_v56 }
 0x327   : > { %vm2523_vm10 = vweird.f32 %v12930_v24  ;;  %v4646_v62 = vsub.s32 32, %v4645_v1  ;;  %v4647_v25 = vshll.u32 %v9710_v2, %v4645_v1  ;;  %v4650_v60 = vsub.s32 4294967266, %v4645_v1 }
 0x328   : > { %v2603_v8 = vadd.s32 %v2602_v6, %v2592_v31  ;;  %v2514_v35 = vadd.f32 1.0, %v2513_v21  ;;  %v2521_v58 = vadd.f32 1.0, %v2520_v0  ;;  %v2622_v57 = vsel %vm2621_vm13, 1, %v12710_v9 }
 0x329   : > { %v4697_v54 = vand.u32 8388607, %v12608_v12  ;;  %vm4538_vm1 = vcmp.lt.s32.totalorder %v12961_v47, 0  ;;  %v4648_v55 = vshrl.u32 %v4630_v46, %v4646_v62  ;;  %v4651_v59 = vadd.s32 127, %v4650_v60 }
 0x32a   : > { %v2594_v33 = vshrl.u32 %v9689_v37, 16  ;;  %v2614_v61 = vshrl.u32 %v9706_v11, 16  ;;  %v2522_v3 = vmul.f32 %v2521_v58, %v9703_v10  ;;  %v2530_v2 = vxor.u32 2147483648, %v2514_v35  ;;  %v12993_v58 = vld [vmem:[#allocation84_spill] sm:$0xff] }
 0x32b   : > { %v2616_v6 = vshrl.u32 %v9717_v49, 16  ;;  %v2624_v56 = vadd.s32 %v2622_v57, %v2620_v40  ;;  %v12990_v31 = vand.u32 2147483647, %v12961_v47  ;;  %v4649_v0 = vor.u32 %v4648_v55, %v4647_v25 }
 0x32c   : > { %v4652_v1 = vshll.u32 %v4651_v59, 23  ;;  %v9753_v46 = vadd.s32 %v2603_v8, %v2594_v33  ;;  %v9755_v62 = vadd.s32 %v2619_v42, %v2615_v34  ;;  %v2527_v37 = vxor.u32 2147483648, %v2522_v3 }
 0x32d   : > { %vm9749_vm3 = vcmp.le.f32.partialorder %v12990_v31, 0.7853982  ;;  %v2531_v10 = vsel %vm2529_vm11, %v2530_v2, %v2522_v3  ;;  %v2625_v11 = vadd.s32 %v2624_v56, %v2614_v61  ;;  %v4698_v60 = vor.u32 8388608, %v4697_v54  ;;  %v12994_v31 = vld [vmem:[#allocation16_spill] sm:$0xff] }
 0x32e   : > { %v4653_v49 = vor.u32 4788187, %v4652_v1  ;;  %v4656_v40 = vcvt.s32.f32 %v4649_v0  ;;  %v4707_v57 = vshll.u32 %v12675_v32, %v12993_v58  ;;  %v4708_v12 = vshrl.u32 %v12669_v63, %v12994_v31 }
 0x32f   : > { %v2528_v25 = vsel %vm2526_vm12, %v2514_v35, %v2527_v37  ;;  %v2626_v8 = vadd.s32 %v2625_v11, %v2616_v6  ;;  %v4710_v34 = vshll.u32 %v12669_v63, %v12993_v58  ;;  %v4711_v42 = vshrl.u32 %v12677_v44, %v12994_v31  ;;  %v12995_v6 = vld [vmem:[#allocation83_spill] sm:$0xff] }
 0x330   : > { %v2532_v54 = vsel %vm2525_vm15, %v2528_v25, %v2531_v10  ;;  %v4654_v55 = vand.u32 2147483647, %v4653_v49  ;;  %vm2629_vm11 = vc.u32 %v9753_v46, %v9755_v62  ;;  %v4713_v59 = vshll.u32 %v12677_v44, %v12993_v58  ;;  %v12996_v10 = vld [vmem:[#allocation89_spill] sm:$0xff]  ;;  %v12998_v25 = vld [vmem:[#allocation87_spill] sm:$0xff] }
 0x331   : > { %v2533_v35 = vsel %vm2523_vm10, nan, %v2532_v54  ;;  %v2630_v33 = vadd.s32 1, %v2626_v8  ;;  %v9777_v61 = vor.u32 %v4711_v42, %v4710_v34  ;;  %v4714_v3 = vshrl.u32 %v12668_v50, %v12994_v31 }
 0x332   : > { %6457 = vmatmul.msk.f32.gmra.mxu1 %vm322_vm0, %v2533_v35  ;;  %v4657_v39 = vmul.f32 %v4656_v40, %v4654_v55  ;;  %v9782_v2 = vor.u32 %v4708_v12, %v4707_v57  ;;  %vm4722_vm12 = vcmp.lt.s32.totalorder %v12995_v6, 1  ;;  %vm4724_vm13 = vcmp.lt.s32.totalorder %v12995_v6, 3  ;;  %v12997_v12 = vld [vmem:[#allocation25_spill] sm:$0xff] }
 0x333   : > { %v4661_v24 = vsel %vm4538_vm1, %v4660_v23, %v9681_v27  ;;  %v2631_v56 = vsel %vm2629_vm11, %v2630_v33, %v2626_v8  ;;  %v4715_v0 = vor.u32 %v4714_v3, %v4713_v59  ;;  %vm4723_vm15 = vcmp.lt.s32.totalorder %v12995_v6, 2 }
 0x334   : > { %v4658_v1 = vxor.u32 2147483648, %v4657_v39  ;;  %v2632_v37 = vadd.s32 %v2631_v56, %v2627_v43  ;;  %v4736_v11 = vsel %vm4724_vm13, %v12997_v12, %v12996_v10  ;;  %v9797_v49 = vshll.u32 %v4698_v60, 8 }
 0x335   : > { %v4100_v40 = vshll.u32 %v12668_v50, %v9661_v36  ;;  %v4101_v27 = vshrl.u32 %v12670_v4, %v9693_v41  ;;  %v9805_v23 = vshrl.u32 %v12679_v16, %v9693_v41  ;;  %v4734_v43 = vsel %vm4722_vm12, %v9777_v61, %v4715_v0 }
 0x336   : > { %v4659_v26 = vsel %vm4538_vm1, %v4658_v1, %v4657_v39  ;;  %v4663_v18 = vsel %vm9749_vm3, 0, %v4661_v24  ;;  %v2633_v60 = vadd.s32 536870912, %v2632_v37  ;;  %v4730_v58 = vsel %vm4722_vm12, %v9782_v2, %v9777_v61 }
 0x337   : > { %v9821_v57 = vsel %vm9749_vm3, %v12961_v47, %v4659_v26  ;;  %v4732_v8 = vsel %vm4724_vm13, %v4715_v0, %v12998_v25  ;;  %v4737_v34 = vsel %vm4723_vm15, %v4734_v43, %v4736_v11  ;;  %v4739_v42 = vand.u32 65535, %v9797_v49 }
 0x338   : > { %v4664_v54 = vmul.f32 %v9821_v57, %v9821_v57  ;;  %v9831_v55 = vshrl.u32 %v2633_v60, 30  ;;  %v9834_v59 = vshrl.u32 %v9797_v49, 16  ;;  %v4741_v21 = vand.u32 65535, %v4737_v34 }
 0x339   : > { %v9837_v35 = vshrl.u32 %v9637_v53, 5  ;;  %v9841_v33 = vshll.u32 %v12670_v4, %v9661_v36  ;;  %v9843_v3 = vand.u32 3, %v4663_v18  ;;  %v4742_v39 = vshrl.u32 %v4737_v34, 16 }
 0x33a   : > { %v9845_v24 = vor.u32 %v4101_v27, %v4100_v40  ;;  %v4665_v56 = vmul.f32 -0.001358992, %v4664_v54  ;;  %v4672_v1 = vmul.f32 -0.00019511016, %v4664_v54  ;;  %v2635_v10 = vshll.u32 %v9831_v55, 30 }
 0x33b   : > { %12999 = vst [vmem:[#allocation80_spill] sm:$0xff] %v9837_v35  ;;  %v4733_v53 = vsel %vm4723_vm15, %v4730_v58, %v4732_v8  ;;  %v4743_v11 = vmul.u32 %v4741_v21, %v4739_v42  ;;  %v9852_v43 = vmul.u32 %v4742_v39, %v4739_v42  ;;  %v9857_v40 = vmul.u32 %v4741_v21, %v9834_v59 }
 0x33c   : > { %13000 = vst [vmem:[#allocation85_spill] sm:$0xff] %v9845_v24  ;;  %v4666_v26 = vadd.f32 0.041655596, %v4665_v56  ;;  %v4673_v60 = vadd.f32 0.008332121, %v4672_v1  ;;  %v9854_v18 = vsub.s32 %v2632_v37, %v2635_v10  ;;  %vm4685_vm10 = vcmp.eq.s32.totalorder %v9843_v3, 2 }
 0x33d   : > { %v2628_v27 = vadd.s32 %v9755_v62, %v9753_v46  ;;  %v4706_v25 = vshrl.u32 %v12675_v32, %v12994_v31  ;;  %vm13001_vm1 = vcmp.lt.s32.totalorder %v12995_v6, 4  ;;  %v4747_v8 = vshll.u32 %v9852_v43, 16 }
 0x33e   : > { %v4727_v58 = vsel %vm13001_vm1, %v4715_v0, 2102212464  ;;  %v4667_v34 = vmul.f32 %v4666_v26, %v4664_v54  ;;  %v4674_v56 = vmul.f32 %v4673_v60, %v4664_v54  ;;  %vm2637_vm3 = vcmp.lt.s32.totalorder %v9854_v18, 0 }
 0x33f   : > { %v2638_v37 = vsub.s32 0, %v9854_v18  ;;  %vm4682_vm11 = vcmp.eq.s32.totalorder %v9843_v3, 0  ;;  %v4746_v21 = vmul.u32 %v4742_v39, %v9834_v59  ;;  %vm4751_vm2 = vc.u32 %v4743_v11, %v4747_v8 }
 0x340   : > { %v4763_v46 = vand.u32 65535, %v4733_v53  ;;  %v4764_v62 = vshrl.u32 %v4733_v53, 16  ;;  %v4668_v1 = vadd.f32 -0.4999988, %v4667_v34  ;;  %v4675_v31 = vadd.f32 -0.16666654, %v4674_v56 }
 0x341   : > { %vm4681_vm5 = vcmp.lt.s32.totalorder %v9843_v3, 2  ;;  %v2639_v0 = vsel %vm2637_vm3, %v2638_v37, %v9854_v18  ;;  %v4749_v10 = vshll.u32 %v9857_v40, 16  ;;  %vm4679_vm1 = vweird.f32 %v12961_v47  ;;  %v13002_v53 = vld [vmem:[#allocation11_spill] sm:$0xff] }
 0x342   : > { %v2640_v26 = vclz %v2639_v0  ;;  %v4726_v60 = vsel %vm4722_vm12, %v4706_v25, %v9782_v2  ;;  %v4728_v39 = vsel %vm4724_vm13, %v9777_v61, %v4727_v58  ;;  %v12621_v34 = vand.u32 2147483647, %v13002_v53 }
 0x343   : > { %v4669_v56 = vmul.f32 %v4668_v1, %v4664_v54  ;;  %v4676_v12 = vmul.f32 %v4675_v31, %v4664_v54  ;;  %v4752_v36 = vsel %vm4751_vm2, 1, %v12710_v9  ;;  %v4753_v37 = vadd.s32 %v4747_v8, %v4743_v11 }
 0x344   : > { %v6389_v41 = vadd.s32 4294967294, %v2640_v26  ;;  %v4748_v28 = vshrl.u32 %v9852_v43, 16  ;;  %v4754_v45 = vadd.s32 %v4752_v36, %v4746_v21  ;;  %v4766_v0 = vmul.u32 %v4764_v62, %v4739_v42 }
 0x345   : > { %v4670_v48 = vadd.f32 1.0, %v4669_v56  ;;  %v4677_v38 = vadd.f32 1.0, %v4676_v12  ;;  %vm4755_vm3 = vc.u32 %v4753_v37, %v4749_v10  ;;  %v4767_v2 = vmul.u32 %v4763_v46, %v9834_v59 }
 0x346   : > { %vm6390_vm12 = vcmp.lt.s32.totalorder %v6389_v41, 0  ;;  %v4756_v61 = vsel %vm4755_vm3, 1, %v12710_v9  ;;  %v4765_v25 = vmul.u32 %v4763_v46, %v4739_v42  ;;  %v4769_v58 = vshll.u32 %v4766_v0, 16 }
 0x347   : > { %v4678_v54 = vmul.f32 %v4677_v38, %v9821_v57  ;;  %v4686_v1 = vxor.u32 2147483648, %v4670_v48  ;;  %v2643_v31 = vsel %vm6390_vm12, 0, %v6389_v41  ;;  %v4758_v11 = vadd.s32 %v4756_v61, %v4754_v45 }
 0x348   : > { %v2644_v8 = vsub.s32 32, %v2643_v31  ;;  %v2648_v26 = vsub.s32 4294967266, %v2643_v31  ;;  %v9889_v36 = vsel %vm4723_vm15, %v4726_v60, %v4728_v39  ;;  %v4768_v12 = vmul.u32 %v4764_v62, %v9834_v59 }
 0x349   : > { %v4683_v43 = vxor.u32 2147483648, %v4678_v54  ;;  %v4687_v21 = vsel %vm4685_vm10, %v4686_v1, %v4678_v54  ;;  %v4750_v42 = vshrl.u32 %v9857_v40, 16  ;;  %v4771_v46 = vshll.u32 %v4767_v2, 16  ;;  %v13003_v54 = vld [vmem:[#allocation88_spill] sm:$0xff] }
 0x34a   : > { %v2645_v38 = vshll.u32 %v9854_v18, %v2643_v31  ;;  %v2646_v57 = vshrl.u32 %v2628_v27, %v2644_v8  ;;  %v2649_v41 = vadd.s32 127, %v2648_v26  ;;  %vm4773_vm2 = vc.u32 %v4765_v25, %v4769_v58  ;;  %v13004_v31 = vld [vmem:[#allocation3_spill] sm:$0xff] }
 0x34b   : > { %v4684_v45 = vsel %vm4682_vm11, %v4670_v48, %v4683_v43  ;;  %v4759_v6 = vadd.s32 %v4758_v11, %v4748_v28  ;;  %v4774_v10 = vsel %vm4773_vm2, 1, %v12710_v9  ;;  %v4775_v60 = vadd.s32 %v4769_v58, %v4765_v25 }
 0x34c   : > { %v4688_v59 = vsel %vm4681_vm5, %v4684_v45, %v4687_v21  ;;  %v2647_v62 = vor.u32 %v2646_v57, %v2645_v38  ;;  %v2650_v39 = vshll.u32 %v2649_v41, 23  ;;  %v4776_v56 = vadd.s32 %v4774_v10, %v4768_v12  ;;  %v13005_v45 = vld [vmem:[#allocation90_spill] sm:$0xff] }
 0x34d   : > { %v4689_v40 = vsel %vm4679_vm1, nan, %v4688_v59  ;;  %vm2536_vm13 = vcmp.lt.s32.totalorder %v12973_v29, 0  ;;  %v4770_v18 = vshrl.u32 %v4766_v0, 16  ;;  %vm4777_vm15 = vc.u32 %v4775_v60, %v4771_v46  ;;  %v13007_v59 = vld [vmem:[#allocation21_spill] sm:$0xff] }
 0x34e   : > { %6471 = vmatmul.msk.f32.gmra.mxu3 %vm322_vm0, %v4689_v40  ;;  %v2651_v48 = vor.u32 4788187, %v2650_v39  ;;  %v4772_v28 = vshrl.u32 %v4767_v2, 16  ;;  %v4778_v27 = vsel %vm4777_vm15, 1, %v12710_v9  ;;  %v4783_v3 = vmul.u32 %v9797_v49, %v9889_v36 }
 0x34f   : > { %v9908_v37 = vadd.s32 %v4759_v6, %v4750_v42  ;;  %v9910_v61 = vadd.s32 %v4775_v60, %v4771_v46  ;;  %v4780_v25 = vadd.s32 %v4778_v27, %v4776_v56  ;;  %v2695_v47 = vand.u32 8388607, %v12621_v34  ;;  %v13006_v60 = vld [vmem:[#allocation23_spill] sm:$0xff] }
 0x350   : > { %v2652_v58 = vand.u32 2147483647, %v2651_v48  ;;  %v2654_v0 = vcvt.s32.f32 %v2647_v62  ;;  %v2705_v1 = vshll.u32 %v12675_v32, %v13003_v54  ;;  %v2706_v2 = vshrl.u32 %v12669_v63, %v13004_v31  ;;  %v13011_v48 = vld [vmem:[#allocation30_spill] sm:$0xff] }
 0x351   : > { %v4781_v11 = vadd.s32 %v4780_v25, %v4770_v18  ;;  %v2696_v8 = vor.u32 8388608, %v2695_v47  ;;  %v2708_v49 = vshll.u32 %v12669_v63, %v13003_v54  ;;  %v2709_v26 = vshrl.u32 %v12677_v44, %v13004_v31 }
 0x352   : > { %vm4109_vm5 = vcmp.lt.s32.totalorder %v9837_v35, 4  ;;  %v2655_v36 = vmul.f32 %v2654_v0, %v2652_v58  ;;  %v9923_v12 = vor.u32 %v2706_v2, %v2705_v1  ;;  %v2711_v43 = vshll.u32 %v12677_v44, %v13003_v54  ;;  %v508_v0 = vpop.f32.mrf.mxu0 }
 0x353   : > { %v2712_v21 = vshrl.u32 %v12668_v50, %v13004_v31  ;;  %v2658_v42 = vsub.s32 4, %v9831_v55  ;;  %v4782_v46 = vadd.s32 %v4781_v11, %v4772_v28  ;;  %vm4785_vm10 = vc.u32 %v9908_v37, %v9910_v61 }
 0x354   : > { %v9932_v38 = vor.u32 %v2709_v26, %v2708_v49  ;;  %v2656_v57 = vxor.u32 2147483648, %v2655_v36  ;;  %vm2720_vm11 = vcmp.lt.s32.totalorder %v13005_v45, 1  ;;  %vm2722_vm1 = vcmp.lt.s32.totalorder %v13005_v45, 3 }
 0x355   : > { %v2713_v41 = vor.u32 %v2712_v21, %v2711_v43  ;;  %v4786_v6 = vadd.s32 1, %v4782_v46  ;;  %v2734_v62 = vsel %vm2722_vm1, %v13007_v59, %v13006_v60  ;;  %v9944_v39 = vshll.u32 %v2696_v8, 8 }
 0x356   : > { %v2728_v10 = vsel %vm2720_vm11, %v9923_v12, %v9932_v38  ;;  %v13008_v56 = vand.u32 2147483647, %v12973_v29  ;;  %v2657_v18 = vsel %vm2536_vm13, %v2656_v57, %v2655_v36  ;;  %v2659_v25 = vsel %vm2536_vm13, %v2658_v42, %v9831_v55 }
 0x357   : > { %v2730_v28 = vsel %vm2722_vm1, %v2713_v41, %v13011_v48  ;;  %v2732_v27 = vsel %vm2720_vm11, %v9932_v38, %v2713_v41  ;;  %v4787_v58 = vsel %vm4785_vm10, %v4786_v6, %v4782_v46  ;;  %vm2721_vm12 = vcmp.lt.s32.totalorder %v13005_v45, 2  ;;  %v6645_v46 = vld [vmem:[%s12339_s2] ss:$0 sm:$0xff] }
 0x358   : > { %vm9948_vm3 = vcmp.le.f32.partialorder %v13008_v56, 0.7853982  ;;  %v4788_v1 = vadd.s32 %v4787_v58, %v4783_v3  ;;  %v9976_v2 = vsel %vm2721_vm12, %v2728_v10, %v2730_v28  ;;  %v2735_v55 = vsel %vm2721_vm12, %v2732_v27, %v2734_v62 }
 0x359   : > { %v9966_v47 = vsel %vm9948_vm3, %v12973_v29, %v2657_v18  ;;  %v2737_v11 = vand.u32 65535, %v9944_v39  ;;  %v2738_v8 = vshrl.u32 %v9944_v39, 16  ;;  %v2739_v49 = vand.u32 65535, %v2735_v55 }
 0x35a   : > { %v2662_v54 = vmul.f32 %v9966_v47, %v9966_v47  ;;  %v2740_v26 = vshrl.u32 %v2735_v55, 16  ;;  %v2661_v36 = vsel %vm9948_vm3, 0, %v2659_v25  ;;  %v4789_v42 = vadd.s32 536870912, %v4788_v1 }
 0x35b   : > { %v9987_v3 = vsel %vm4109_vm5, %v9845_v24, 920167782  ;;  %v9992_v57 = vadd.f32 %v6645_v46, %v508_v0  ;;  %v9994_v10 = vmul.u32 %v2739_v49, %v2738_v8  ;;  %v2762_v56 = vshrl.u32 %v9976_v2, 16 }
 0x35c   : > { %v2663_v43 = vmul.f32 -0.001358992, %v2662_v54  ;;  %v2670_v21 = vmul.f32 -0.00019511016, %v2662_v54  ;;  %13012 = vst [vmem:[#allocation2_spill] sm:$0xff] %v9987_v3  ;;  %v2742_v6 = vmul.u32 %v2740_v26, %v2737_v11  ;;  %v9996_v62 = vshrl.u32 %v4789_v42, 30 }
 0x35d   : > { %13013 = vst [vmem:[#allocation20_spill] sm:$0xff] %v9992_v57  ;;  %v2678_v40 = vand.u32 3, %v2661_v36  ;;  %v2741_v18 = vmul.u32 %v2739_v49, %v2737_v11  ;;  %v2761_v28 = vand.u32 65535, %v9976_v2  ;;  %v2704_v0 = vshrl.u32 %v12675_v32, %v13004_v31 }
 0x35e   : > { %v2664_v60 = vadd.f32 0.041655596, %v2663_v43  ;;  %v2671_v59 = vadd.f32 0.008332121, %v2670_v21  ;;  %v2745_v48 = vshll.u32 %v2742_v6, 16  ;;  %v4791_v58 = vshll.u32 %v9996_v62, 30 }
 0x35f   : > { %v2747_v55 = vshll.u32 %v9994_v10, 16  ;;  %v10004_v21 = vmul.u32 %v2762_v56, %v2737_v11  ;;  %vm13014_vm13 = vcmp.lt.s32.totalorder %v13005_v45, 4  ;;  %vm2680_vm15 = vcmp.eq.s32.totalorder %v2678_v40, 0 }
 0x360   : > { %v2665_v27 = vmul.f32 %v2664_v60, %v2662_v54  ;;  %v2672_v25 = vmul.f32 %v2671_v59, %v2662_v54  ;;  %vm2749_vm2 = vc.u32 %v2741_v18, %v2745_v48  ;;  %v2751_v43 = vadd.s32 %v2745_v48, %v2741_v18 }
 0x361   : > { %v10006_v36 = vsub.s32 %v4788_v1, %v4791_v58  ;;  %v2725_v2 = vsel %vm13014_vm13, %v2713_v41, 2102212464  ;;  %v2744_v49 = vmul.u32 %v2740_v26, %v2738_v8  ;;  %v2750_v60 = vsel %vm2749_vm2, 1, %v12710_v9 }
 0x362   : > { %v2666_v42 = vadd.f32 -0.4999988, %v2665_v27  ;;  %v2673_v46 = vadd.f32 -0.16666654, %v2672_v25  ;;  %vm2753_vm10 = vc.u32 %v2751_v43, %v2747_v55  ;;  %v10011_v59 = vmul.u32 %v2761_v28, %v2738_v8 }
 0x363   : > { %vm2679_vm3 = vcmp.lt.s32.totalorder %v2678_v40, 2  ;;  %vm4793_vm4 = vcmp.lt.s32.totalorder %v10006_v36, 0  ;;  %v4794_v18 = vsub.s32 0, %v10006_v36  ;;  %vm2677_vm14 = vweird.f32 %v12973_v29 }
 0x364   : > { %v2667_v31 = vmul.f32 %v2666_v42, %v2662_v54  ;;  %v2674_v34 = vmul.f32 %v2673_v46, %v2662_v54  ;;  %v2724_v41 = vsel %vm2720_vm11, %v2704_v0, %v9923_v12  ;;  %v2752_v1 = vadd.s32 %v2750_v60, %v2744_v49 }
 0x365   : > { %v2754_v26 = vsel %vm2753_vm10, 1, %v12710_v9  ;;  %v2767_v48 = vshll.u32 %v10004_v21, 16  ;;  %v4795_v54 = vsel %vm4793_vm4, %v4794_v18, %v10006_v36  ;;  %v2763_v58 = vmul.u32 %v2761_v28, %v2737_v11 }
 0x366   : > { %v2668_v27 = vadd.f32 1.0, %v2667_v31  ;;  %v2675_v25 = vadd.f32 1.0, %v2674_v34  ;;  %v4796_v55 = vclz %v4795_v54  ;;  %v2726_v43 = vsel %vm2722_vm1, %v9932_v38, %v2725_v2 }
 0x367   : > { %v2756_v42 = vadd.s32 %v2754_v26, %v2752_v1  ;;  %v2769_v46 = vshll.u32 %v10011_v59, 16  ;;  %vm2771_vm11 = vc.u32 %v2763_v58, %v2767_v48  ;;  %v2773_v49 = vadd.s32 %v2767_v48, %v2763_v58 }
 0x368   : > { %v2676_v12 = vmul.f32 %v2675_v25, %v9966_v47  ;;  %v2684_v0 = vxor.u32 2147483648, %v2668_v27  ;;  %v6431_v60 = vadd.s32 4294967294, %v4796_v55  ;;  %v2746_v3 = vshrl.u32 %v2742_v6, 16  ;;  %v13015_v55 = vld [vmem:[#allocation8_spill] sm:$0xff] }
 0x369   : > { %v2766_v31 = vmul.u32 %v2762_v56, %v2738_v8  ;;  %v2772_v34 = vsel %vm2771_vm11, 1, %v12710_v9  ;;  %vm2683_vm4 = vcmp.eq.s32.totalorder %v2678_v40, 2  ;;  %vm4692_vm2 = vcmp.lt.s32.totalorder %v12989_v20, 0 }
 0x36a   : > { %v2681_v18 = vxor.u32 2147483648, %v2676_v12  ;;  %v4784_v38 = vadd.s32 %v9910_v61, %v9908_v37  ;;  %vm2775_vm1 = vc.u32 %v2773_v49, %v2769_v46  ;;  %vm6432_vm13 = vcmp.lt.s32.totalorder %v6431_v60, 0 }
 0x36b   : > { %v2727_v47 = vsel %vm2721_vm12, %v2724_v41, %v2726_v43  ;;  %v2757_v11 = vadd.s32 %v2756_v42, %v2746_v3  ;;  %v2774_v28 = vadd.s32 %v2772_v34, %v2766_v31  ;;  %v2685_v6 = vsel %vm2683_vm4, %v2684_v0, %v2676_v12  ;;  %v13016_v43 = vld [vmem:[#allocation92_spill] sm:$0xff] }
 0x36c   : > { %v2682_v2 = vsel %vm2680_vm15, %v2668_v27, %v2681_v18  ;;  %v4799_v8 = vsel %vm6432_vm13, 0, %v6431_v60  ;;  %v2776_v56 = vsel %vm2775_vm1, 1, %v12710_v9  ;;  %v4814_v61 = vsub.s32 4, %v9996_v62 }
 0x36d   : > { %v2686_v1 = vsel %vm2679_vm3, %v2682_v2, %v2685_v6  ;;  %v4800_v26 = vsub.s32 32, %v4799_v8  ;;  %v4801_v48 = vshll.u32 %v10006_v36, %v4799_v8  ;;  %v4804_v25 = vsub.s32 4294967266, %v4799_v8 }
 0x36e   : > { %v2687_v37 = vsel %vm2677_vm14, nan, %v2686_v1  ;;  %v2748_v45 = vshrl.u32 %v9994_v10, 16  ;;  %v2768_v3 = vshrl.u32 %v10004_v21, 16  ;;  %v2770_v40 = vshrl.u32 %v10011_v59, 16  ;;  %v13017_v21 = vld [vmem:[#allocation10_spill] sm:$0xff] }
 0x36f   : > { %6458 = vmatmul.msk.f32.gmra.mxu1 %vm322_vm0, %v2687_v37  ;;  %v4802_v41 = vshrl.u32 %v4784_v38, %v4800_v26  ;;  %v4805_v27 = vadd.s32 127, %v4804_v25  ;;  %v2778_v54 = vadd.s32 %v2776_v56, %v2774_v28  ;;  %v10046_v36 = vadd.s32 %v2773_v49, %v2769_v46  ;;  %v13018_v26 = vld [vmem:[#allocation91_spill] sm:$0xff] }
 0x370   : > { %v10044_v58 = vadd.s32 %v2757_v11, %v2748_v45  ;;  %v12625_v29 = vand.u32 2147483647, %v13015_v55  ;;  %v4861_v42 = vshll.u32 %v12675_v32, %v13016_v43  ;;  %v4862_v60 = vshrl.u32 %v12669_v63, %v13017_v21  ;;  %v13020_v45 = vld [vmem:[#allocation27_spill] sm:$0xff] }
 0x371   : > { %v4803_v12 = vor.u32 %v4802_v41, %v4801_v48  ;;  %v4806_v10 = vshll.u32 %v4805_v27, 23  ;;  %v2779_v0 = vadd.s32 %v2778_v54, %v2768_v3  ;;  %v4864_v59 = vshll.u32 %v12669_v63, %v13016_v43 }
 0x372   : > { %v4851_v31 = vand.u32 8388607, %v12625_v29  ;;  %v4865_v46 = vshrl.u32 %v12677_v44, %v13017_v21  ;;  %v4867_v49 = vshll.u32 %v12677_v44, %v13016_v43  ;;  %v4815_v38 = vsel %vm4692_vm2, %v4814_v61, %v9996_v62  ;;  %v13019_v61 = vld [vmem:[#allocation19_spill] sm:$0xff] }
 0x373   : > { %v4807_v34 = vor.u32 4788187, %v4806_v10  ;;  %v4810_v18 = vcvt.s32.f32 %v4803_v12  ;;  %v2780_v11 = vadd.s32 %v2779_v0, %v2770_v40  ;;  %vm2783_vm14 = vc.u32 %v10044_v58, %v10046_v36 }
 0x374   : > { %v4852_v28 = vor.u32 8388608, %v4851_v31  ;;  %v10066_v2 = vor.u32 %v4865_v46, %v4864_v59  ;;  %v4868_v6 = vshrl.u32 %v12668_v50, %v13017_v21  ;;  %v2781_v56 = vmul.u32 %v9944_v39, %v2727_v47 }
 0x375   : > { %v4808_v8 = vand.u32 2147483647, %v4807_v34  ;;  %v2784_v1 = vadd.s32 1, %v2780_v11  ;;  %vm4876_vm12 = vcmp.lt.s32.totalorder %v13018_v26, 1  ;;  %v4863_v48 = vor.u32 %v4862_v60, %v4861_v42 }
 0x376   : > { %v4869_v25 = vor.u32 %v4868_v6, %v4867_v49  ;;  %vm4877_vm15 = vcmp.lt.s32.totalorder %v13018_v26, 2  ;;  %vm4878_vm10 = vcmp.lt.s32.totalorder %v13018_v26, 3  ;;  %v10078_v41 = vshll.u32 %v4852_v28, 8  ;;  %v13024_v49 = vld [vmem:[#allocation64_spill] sm:$0xff] }
 0x377   : > { %v4811_v62 = vmul.f32 %v4810_v18, %v4808_v8  ;;  %v2785_v37 = vsel %vm2783_vm14, %v2784_v1, %v2780_v11  ;;  %v4890_v3 = vsel %vm4878_vm10, %v13020_v45, %v13019_v61  ;;  %v4231_v39 = vand.u32 2139095040, %v9992_v57 }
 0x378   : > { %v13021_v47 = vand.u32 2147483647, %v12989_v20  ;;  %v2786_v40 = vadd.s32 %v2785_v37, %v2781_v56  ;;  %v4888_v54 = vsel %vm4876_vm12, %v10066_v2, %v4869_v25  ;;  %v12624_v43 = vand.u32 2147483647, %v9992_v57 }
 0x379   : > { %v4812_v42 = vxor.u32 2147483648, %v4811_v62  ;;  %v4891_v10 = vsel %vm4877_vm15, %v4888_v54, %v4890_v3  ;;  %v4884_v60 = vsel %vm4876_vm12, %v4863_v48, %v10066_v2  ;;  %v4893_v31 = vand.u32 65535, %v10078_v41 }
 0x37a   : > { %vm10083_vm3 = vcmp.le.f32.partialorder %v13021_v47, 0.7853982  ;;  %v2787_v0 = vadd.s32 536870912, %v2786_v40  ;;  %v10100_v59 = vshrl.u32 %v10078_v41, 16  ;;  %v4886_v34 = vsel %vm4878_vm10, %v4869_v25, %v13024_v49 }
 0x37b   : > { %v4817_v12 = vsel %vm10083_vm3, 0, %v4815_v38  ;;  %v4813_v46 = vsel %vm4692_vm2, %v4812_v42, %v4811_v62  ;;  %v4895_v18 = vand.u32 65535, %v4891_v10  ;;  %v4896_v38 = vshrl.u32 %v4891_v10, 16 }
 0x37c   : > { %v13025_v11 = vor.u32 %v9805_v23, %v9841_v33  ;;  %v10114_v6 = vshrl.u32 %v4231_v39, 23  ;;  %v4816_v8 = vsel %vm10083_vm3, %v12989_v20, %v4813_v46  ;;  %v10119_v56 = vshrl.u32 %v2787_v0, 30 }
 0x37d   : > { %v4818_v1 = vmul.f32 %v4816_v8, %v4816_v8  ;;  %v4897_v62 = vmul.u32 %v4895_v18, %v4893_v31  ;;  %v4898_v37 = vmul.u32 %v4896_v38, %v4893_v31  ;;  %v10122_v61 = vmul.u32 %v4895_v18, %v10100_v59 }
 0x37e   : > { %v10112_v28 = vsel %vm4109_vm5, %v13025_v11, 1326507024  ;;  %v10126_v23 = vand.u32 8388607, %v12624_v43  ;;  %v10128_v33 = vand.u32 3, %v4817_v12  ;;  %v2789_v45 = vshll.u32 %v10119_v56, 30 }
 0x37f   : > { %13026 = vst [vmem:[#allocation86_spill] sm:$0xff] %v10112_v28  ;;  %v4887_v3 = vsel %vm4877_vm15, %v4884_v60, %v4886_v34  ;;  %v4819_v39 = vmul.f32 -0.001358992, %v4818_v1  ;;  %v4826_v47 = vmul.f32 -0.00019511016, %v4818_v1  ;;  %v4900_v27 = vmul.u32 %v4896_v38, %v10100_v59 }
 0x380   : > { %v4901_v54 = vshll.u32 %v4898_v37, 16  ;;  %v10134_v42 = vsub.s32 %v2786_v40, %v2789_v45  ;;  %v4860_v10 = vshrl.u32 %v12675_v32, %v13017_v21  ;;  %vm13027_vm11 = vcmp.lt.s32.totalorder %v13018_v26, 4 }
 0x381   : > { %v4881_v0 = vsel %vm13027_vm11, %v4869_v25, 2102212464  ;;  %v4917_v12 = vand.u32 65535, %v4887_v3  ;;  %v4820_v46 = vadd.f32 0.041655596, %v4819_v39  ;;  %v4903_v18 = vshll.u32 %v10122_v61, 16 }
 0x382   : > { %v4827_v49 = vadd.f32 0.008332121, %v4826_v47  ;;  %vm4905_vm4 = vc.u32 %v4897_v62, %v4901_v54  ;;  %vm4839_vm2 = vcmp.eq.s32.totalorder %v10128_v33, 2  ;;  %vm2791_vm1 = vcmp.lt.s32.totalorder %v10134_v42, 0 }
 0x383   : > { %v2792_v60 = vsub.s32 0, %v10134_v42  ;;  %v4906_v40 = vsel %vm4905_vm4, 1, %v12710_v9  ;;  %v4918_v34 = vshrl.u32 %v4887_v3, 16  ;;  %v4821_v38 = vmul.f32 %v4820_v46, %v4818_v1 }
 0x384   : > { %v4828_v21 = vmul.f32 %v4827_v49, %v4818_v1  ;;  %v4907_v11 = vadd.s32 %v4901_v54, %v4897_v62  ;;  %v4908_v45 = vadd.s32 %v4906_v40, %v4900_v27  ;;  %vm4836_vm13 = vcmp.eq.s32.totalorder %v10128_v33, 0 }
 0x385   : > { %v2793_v25 = vsel %vm2791_vm1, %v2792_v60, %v10134_v42  ;;  %v4880_v39 = vsel %vm4876_vm12, %v4860_v10, %v4863_v48  ;;  %v4882_v47 = vsel %vm4878_vm10, %v10066_v2, %v4881_v0  ;;  %v4919_v43 = vmul.u32 %v4917_v12, %v4893_v31 }
 0x386   : > { %v4822_v29 = vadd.f32 -0.4999988, %v4821_v38  ;;  %v4829_v57 = vadd.f32 -0.16666654, %v4828_v21  ;;  %vm4835_vm14 = vcmp.lt.s32.totalorder %v10128_v33, 2  ;;  %v2794_v3 = vclz %v2793_v25 }
 0x387   : > { %vm4909_vm3 = vc.u32 %v4907_v11, %v4903_v18  ;;  %vm4833_vm11 = vweird.f32 %v12989_v20  ;;  %v4902_v62 = vshrl.u32 %v4898_v37, 16  ;;  %v4920_v54 = vmul.u32 %v4918_v34, %v4893_v31  ;;  %v13030_v20 = vld [vmem:[#allocation94_spill] sm:$0xff] }
 0x388   : > { %v4910_v27 = vsel %vm4909_vm3, 1, %v12710_v9  ;;  %v4921_v46 = vmul.u32 %v4917_v12, %v10100_v59  ;;  %v4823_v48 = vmul.f32 %v4822_v29, %v4818_v1  ;;  %v4830_v10 = vmul.f32 %v4829_v57, %v4818_v1 }
 0x389   : > { %v6392_v49 = vadd.s32 4294967294, %v2794_v3  ;;  %v4912_v60 = vadd.s32 %v4910_v27, %v4908_v45  ;;  %v2782_v2 = vadd.s32 %v10046_v36, %v10044_v58  ;;  %v10160_v0 = vsel %vm4877_vm15, %v4880_v39, %v4882_v47 }
 0x38a   : > { %v4923_v18 = vshll.u32 %v4920_v54, 16  ;;  %v4925_v40 = vshll.u32 %v4921_v46, 16  ;;  %v4824_v38 = vadd.f32 1.0, %v4823_v48  ;;  %v4831_v37 = vadd.f32 1.0, %v4830_v10 }
 0x38b   : > { %vm6393_vm12 = vcmp.lt.s32.totalorder %v6392_v49, 0  ;;  %v4922_v31 = vmul.u32 %v4918_v34, %v10100_v59  ;;  %v4904_v29 = vshrl.u32 %v10122_v61, 16  ;;  %v4913_v58 = vadd.s32 %v4912_v60, %v4902_v62 }
 0x38c   : > { %v2797_v21 = vsel %vm6393_vm12, 0, %v6392_v49  ;;  %vm4927_vm10 = vc.u32 %v4919_v43, %v4923_v18  ;;  %v4929_v57 = vadd.s32 %v4923_v18, %v4919_v43  ;;  %v4832_v1 = vmul.f32 %v4831_v37, %v4816_v8  ;;  %v13028_v8 = vld [vmem:[#allocation93_spill] sm:$0xff] }
 0x38d   : > { %v4840_v12 = vxor.u32 2147483648, %v4824_v38  ;;  %v2798_v11 = vsub.s32 32, %v2797_v21  ;;  %v2802_v36 = vsub.s32 4294967266, %v2797_v21  ;;  %v4924_v26 = vshrl.u32 %v4920_v54, 16 }
 0x38e   : > { %v4928_v45 = vsel %vm4927_vm10, 1, %v12710_v9  ;;  %vm4931_vm15 = vc.u32 %v4929_v57, %v4925_v40  ;;  %v4837_v25 = vxor.u32 2147483648, %v4832_v1  ;;  %v2799_v34 = vshll.u32 %v10134_v42, %v2797_v21 }
 0x38f   : > { %v4841_v39 = vsel %vm4839_vm2, %v4840_v12, %v4832_v1  ;;  %v2800_v47 = vshrl.u32 %v2782_v2, %v2798_v11  ;;  %v4930_v59 = vadd.s32 %v4928_v45, %v4922_v31  ;;  %v2803_v61 = vadd.s32 127, %v2802_v36 }
 0x390   : > { %v4932_v43 = vsel %vm4931_vm15, 1, %v12710_v9  ;;  %v12629_v3 = vand.u32 2147483647, %v13028_v8  ;;  %v4838_v62 = vsel %vm4836_vm13, %v4824_v38, %v4837_v25  ;;  %v10172_v27 = vadd.s32 %v4913_v58, %v4904_v29  ;;  %v13031_v25 = vld [vmem:[#allocation4_spill] sm:$0xff] }
 0x391   : > { %v10174_v54 = vadd.s32 %v4929_v57, %v4925_v40  ;;  %v4934_v48 = vadd.s32 %v4932_v43, %v4930_v59  ;;  %v4842_v10 = vsel %vm4835_vm14, %v4838_v62, %v4841_v39  ;;  %v2801_v49 = vor.u32 %v2800_v47, %v2799_v34  ;;  %v13032_v34 = vld [vmem:[#allocation36_spill] sm:$0xff] }
 0x392   : > { %v2804_v60 = vshll.u32 %v2803_v61, 23  ;;  %v4926_v2 = vshrl.u32 %v4921_v46, 16  ;;  %v6421_v42 = vadd.s32 4294967169, %v10114_v6  ;;  %v4236_v18 = vor.u32 8388608, %v10126_v23  ;;  %v13029_v6 = vld [vmem:[#allocation95_spill] sm:$0xff]  ;;  %v13033_v61 = vld [vmem:[#allocation28_spill] sm:$0xff] }
 0x393   : > { %v4843_v37 = vsel %vm4833_vm11, nan, %v4842_v10  ;;  %v4937_v38 = vmul.u32 %v10078_v41, %v10160_v0  ;;  %v2812_v31 = vsub.s32 4, %v10119_v56  ;;  %v4935_v33 = vadd.s32 %v4934_v48, %v4924_v26 }
 0x394   : > { %6472 = vmatmul.msk.f32.gmra.mxu3 %vm322_vm0, %v4843_v37  ;;  %v2805_v40 = vor.u32 4788187, %v2804_v60  ;;  %v2849_v21 = vand.u32 8388607, %v12629_v3  ;;  %vm4939_vm4 = vc.u32 %v10172_v27, %v10174_v54  ;;  %v2860_v23 = vshrl.u32 %v12669_v63, %v13029_v6 }
 0x395   : > { %v2862_v46 = vshll.u32 %v12669_v63, %v13030_v20  ;;  %v2863_v41 = vshrl.u32 %v12677_v44, %v13029_v6  ;;  %v2808_v29 = vcvt.s32.f32 %v2801_v49  ;;  %v4936_v57 = vadd.s32 %v4935_v33, %v4926_v2 }
 0x396   : > { %v2806_v0 = vand.u32 2147483647, %v2805_v40  ;;  %v2850_v1 = vor.u32 8388608, %v2849_v21  ;;  %v2859_v12 = vshll.u32 %v12675_v32, %v13030_v20  ;;  %v2865_v58 = vshll.u32 %v12677_v44, %v13030_v20 }
 0x397   : > { %v10198_v11 = vor.u32 %v2863_v41, %v2862_v46  ;;  %v2866_v36 = vshrl.u32 %v12668_v50, %v13029_v6  ;;  %vm2690_vm2 = vcmp.lt.s32.totalorder %v13002_v53, 0  ;;  %v4940_v45 = vadd.s32 1, %v4936_v57 }
 0x398   : > { %v2809_v26 = vmul.f32 %v2808_v29, %v2806_v0  ;;  %vm2876_vm1 = vcmp.lt.s32.totalorder %v13031_v25, 3  ;;  %v2813_v39 = vsel %vm2690_vm2, %v2812_v31, %v10119_v56  ;;  %v2861_v47 = vor.u32 %v2860_v23, %v2859_v12  ;;  %v13037_v23 = vld [vmem:[#allocation35_spill] sm:$0xff] }
 0x399   : > { %v2867_v59 = vor.u32 %v2866_v36, %v2865_v58  ;;  %v2888_v43 = vsel %vm2876_vm1, %v13033_v61, %v13032_v34  ;;  %v4941_v48 = vsel %vm4939_vm4, %v4940_v45, %v4936_v57  ;;  %vm2874_vm13 = vcmp.lt.s32.totalorder %v13031_v25, 1 }
 0x39a   : > { %v2810_v62 = vxor.u32 2147483648, %v2809_v26  ;;  %v10217_v10 = vshll.u32 %v2850_v1, 8  ;;  %v13034_v49 = vand.u32 2147483647, %v13002_v53  ;;  %v4942_v60 = vadd.s32 %v4941_v48, %v4937_v38 }
 0x39b   : > { %vm2875_vm3 = vcmp.lt.s32.totalorder %v13031_v25, 2  ;;  %v2886_v2 = vsel %vm2874_vm13, %v10198_v11, %v2867_v59  ;;  %v10229_v37 = vadd.s32 1, %v6421_v42  ;;  %v2882_v42 = vsel %vm2874_vm13, %v2861_v47, %v10198_v11 }
 0x39c   : > { %vm10221_vm14 = vcmp.le.f32.partialorder %v13034_v49, 0.7853982  ;;  %v2811_v40 = vsel %vm2690_vm2, %v2810_v62, %v2809_v26  ;;  %v2889_v33 = vsel %vm2875_vm3, %v2886_v2, %v2888_v43  ;;  %v4943_v21 = vadd.s32 536870912, %v4942_v60 }
 0x39d   : > { %v2815_v31 = vsel %vm10221_vm14, 0, %v2813_v39  ;;  %v10240_v38 = vsel %vm10221_vm14, %v13002_v53, %v2811_v40  ;;  %v2884_v20 = vsel %vm2876_vm1, %v2867_v59, %v13037_v23  ;;  %v2891_v41 = vand.u32 65535, %v10217_v10 }
 0x39e   : > { %v2816_v46 = vmul.f32 %v10240_v38, %v10240_v38  ;;  %v2893_v0 = vand.u32 65535, %v2889_v33  ;;  %v2894_v29 = vshrl.u32 %v2889_v33, 16  ;;  %v10251_v57 = vshll.u32 %v4236_v18, 8 }
 0x39f   : > { %v10253_v1 = vand.u32 3, %v2815_v31  ;;  %v10255_v12 = vshrl.u32 %v4943_v21, 30  ;;  %v2892_v58 = vshrl.u32 %v10217_v10, 16  ;;  %v2885_v45 = vsel %vm2875_vm3, %v2882_v42, %v2884_v20 }
 0x3a0   : > { %13038 = vst [vmem:[#allocation24_spill] sm:$0xff] %v10251_v57  ;;  %v2817_v36 = vmul.f32 -0.001358992, %v2816_v46  ;;  %v2824_v26 = vmul.f32 -0.00019511016, %v2816_v46  ;;  %v2896_v39 = vmul.u32 %v2894_v29, %v2891_v41  ;;  %v2858_v61 = vshrl.u32 %v12675_v32, %v13029_v6 }
 0x3a1   : > { %v4945_v34 = vshll.u32 %v10255_v12, 30  ;;  %vm13039_vm11 = vcmp.lt.s32.totalorder %v13031_v25, 4  ;;  %v10265_v43 = vmul.u32 %v2893_v0, %v2892_v58  ;;  %v2895_v49 = vmul.u32 %v2893_v0, %v2891_v41 }
 0x3a2   : > { %v2879_v18 = vsel %vm13039_vm11, %v2867_v59, 2102212464  ;;  %v2818_v62 = vadd.f32 0.041655596, %v2817_v36  ;;  %v2825_v48 = vadd.f32 0.008332121, %v2824_v26  ;;  %v2898_v40 = vmul.u32 %v2894_v29, %v2892_v58 }
 0x3a3   : > { %v2899_v56 = vshll.u32 %v2896_v39, 16  ;;  %v10267_v2 = vsub.s32 %v4942_v60, %v4945_v34  ;;  %v2915_v31 = vand.u32 65535, %v2885_v45  ;;  %v2916_v33 = vshrl.u32 %v2885_v45, 16 }
 0x3a4   : > { %v2819_v21 = vmul.f32 %v2818_v62, %v2816_v46  ;;  %v2826_v42 = vmul.f32 %v2825_v48, %v2816_v46  ;;  %v2901_v23 = vshll.u32 %v10265_v43, 16  ;;  %v2878_v60 = vsel %vm2874_vm13, %v2858_v61, %v2861_v47 }
 0x3a5   : > { %vm2903_vm12 = vc.u32 %v2895_v49, %v2899_v56  ;;  %vm4947_vm10 = vcmp.lt.s32.totalorder %v10267_v2, 0  ;;  %v4948_v6 = vsub.s32 0, %v10267_v2  ;;  %v2905_v20 = vadd.s32 %v2899_v56, %v2895_v49 }
 0x3a6   : > { %v2904_v59 = vsel %vm2903_vm12, 1, %v12710_v9  ;;  %v2820_v36 = vadd.f32 -0.4999988, %v2819_v21  ;;  %v2827_v0 = vadd.f32 -0.16666654, %v2826_v42  ;;  %vm2834_vm15 = vcmp.eq.s32.totalorder %v10253_v1, 0 }
 0x3a7   : > { %v2906_v29 = vadd.s32 %v2904_v59, %v2898_v40  ;;  %vm2837_vm4 = vcmp.eq.s32.totalorder %v10253_v1, 2  ;;  %v4949_v26 = vsel %vm4947_vm10, %v4948_v6, %v10267_v2  ;;  %v2880_v45 = vsel %vm2876_vm1, %v10198_v11, %v2879_v18 }
 0x3a8   : > { %vm2907_vm2 = vc.u32 %v2905_v20, %v2901_v23  ;;  %v2918_v34 = vmul.u32 %v2916_v33, %v2891_v41  ;;  %v2821_v62 = vmul.f32 %v2820_v36, %v2816_v46  ;;  %v2828_v48 = vmul.f32 %v2827_v0, %v2816_v46 }
 0x3a9   : > { %vm2833_vm14 = vcmp.lt.s32.totalorder %v10253_v1, 2  ;;  %v4950_v49 = vclz %v4949_v26  ;;  %v2908_v47 = vsel %vm2907_vm2, 1, %v12710_v9  ;;  %vm2831_vm13 = vweird.f32 %v13002_v53 }
 0x3aa   : > { %v4938_v61 = vadd.s32 %v10174_v54, %v10172_v27  ;;  %v2910_v56 = vadd.s32 %v2908_v47, %v2906_v29  ;;  %v2917_v40 = vmul.u32 %v2915_v31, %v2891_v41  ;;  %v2921_v21 = vshll.u32 %v2918_v34, 16 }
 0x3ab   : > { %v2822_v42 = vadd.f32 1.0, %v2821_v62  ;;  %v2829_v6 = vadd.f32 1.0, %v2828_v48  ;;  %vm4846_vm1 = vcmp.lt.s32.totalorder %v13015_v55, 0  ;;  %v6434_v11 = vadd.s32 4294967294, %v4950_v49 }
 0x3ac   : > { %v2919_v18 = vmul.u32 %v2915_v31, %v2892_v58  ;;  %v10289_v46 = vsel %vm2875_vm3, %v2878_v60, %v2880_v45  ;;  %v2900_v23 = vshrl.u32 %v2896_v39, 16  ;;  %vm2925_vm11 = vc.u32 %v2917_v40, %v2921_v21 }
 0x3ad   : > { %v2927_v59 = vadd.s32 %v2921_v21, %v2917_v40  ;;  %v2830_v20 = vmul.f32 %v2829_v6, %v10240_v38  ;;  %v2838_v36 = vxor.u32 2147483648, %v2822_v42  ;;  %vm6435_vm12 = vcmp.lt.s32.totalorder %v6434_v11, 0  ;;  %v13040_v21 = vld [vmem:[#allocation14_spill] sm:$0xff] }
 0x3ae   : > { %v2926_v27 = vsel %vm2925_vm11, 1, %v12710_v9  ;;  %v4953_v54 = vsel %vm6435_vm12, 0, %v6434_v11  ;;  %v4968_v41 = vsub.s32 4, %v10255_v12  ;;  %v2911_v0 = vadd.s32 %v2910_v56, %v2900_v23 }
 0x3af   : > { %v2920_v29 = vmul.u32 %v2916_v33, %v2892_v58  ;;  %v2835_v26 = vxor.u32 2147483648, %v2830_v20  ;;  %v4954_v31 = vsub.s32 32, %v4953_v54  ;;  %v4955_v25 = vshll.u32 %v10267_v2, %v4953_v54 }
 0x3b0   : > { %v2923_v60 = vshll.u32 %v2919_v18, 16  ;;  %v4958_v45 = vsub.s32 4294967266, %v4953_v54  ;;  %v2902_v39 = vshrl.u32 %v10265_v43, 16  ;;  %v2922_v62 = vshrl.u32 %v2918_v34, 16 }
 0x3b1   : > { %v2928_v48 = vadd.s32 %v2926_v27, %v2920_v29  ;;  %v2836_v38 = vsel %vm2834_vm15, %v2822_v42, %v2835_v26  ;;  %v2839_v49 = vsel %vm2837_vm4, %v2838_v36, %v2830_v20  ;;  %v4956_v47 = vshrl.u32 %v4938_v61, %v4954_v31  ;;  %v13041_v36 = vld [vmem:[#allocation96_spill] sm:$0xff] }
 0x3b2   : > { %vm2929_vm3 = vc.u32 %v2927_v59, %v2923_v60  ;;  %v2840_v58 = vsel %vm2833_vm14, %v2836_v38, %v2839_v49  ;;  %v4959_v33 = vadd.s32 127, %v4958_v45  ;;  %v10302_v56 = vadd.s32 %v2911_v0, %v2902_v39  ;;  %v13042_v0 = vld [vmem:[#allocation18_spill] sm:$0xff] }
 0x3b3   : > { %v2930_v2 = vsel %vm2929_vm3, 1, %v12710_v9  ;;  %v2841_v43 = vsel %vm2831_vm13, nan, %v2840_v58  ;;  %v4957_v34 = vor.u32 %v4956_v47, %v4955_v25  ;;  %v12628_v42 = vand.u32 2147483647, %v13040_v21  ;;  %v13043_v45 = vld [vmem:[#allocation22_spill] sm:$0xff]  ;;  %v13045_v58 = vld [vmem:[#allocation5_spill] sm:$0xff] }
 0x3b4   : > { %v2932_v40 = vadd.s32 %v2930_v2, %v2928_v48  ;;  %6459 = vmatmul.msk.f32.gmra.mxu1 %vm322_vm0, %v2841_v43  ;;  %v4960_v6 = vshll.u32 %v4959_v33, 23  ;;  %v4969_v1 = vsel %vm4846_vm1, %v4968_v41, %v10255_v12  ;;  %v2924_v61 = vshrl.u32 %v2919_v18, 16  ;;  %v13044_v47 = vld [vmem:[#allocation26_spill] sm:$0xff] }
 0x3b5   : > { %v10312_v11 = vadd.s32 %v2927_v59, %v2923_v60  ;;  %v4964_v23 = vcvt.s32.f32 %v4957_v34  ;;  %v5005_v53 = vand.u32 8388607, %v12628_v42  ;;  %v5015_v27 = vshll.u32 %v12675_v32, %v13041_v36 }
 0x3b6   : > { %v2933_v20 = vadd.s32 %v2932_v40, %v2922_v62  ;;  %v4961_v54 = vor.u32 4788187, %v4960_v6  ;;  %v5016_v29 = vshrl.u32 %v12669_v63, %v13042_v0  ;;  %v5018_v26 = vshll.u32 %v12669_v63, %v13041_v36 }
 0x3b7   : > { %v5019_v12 = vshrl.u32 %v12677_v44, %v13042_v0  ;;  %vm2937_vm10 = vc.u32 %v10302_v56, %v10312_v11  ;;  %v5021_v59 = vshll.u32 %v12677_v44, %v13041_v36  ;;  %v5022_v41 = vshrl.u32 %v12668_v50, %v13042_v0 }
 0x3b8   : > { %v2934_v18 = vadd.s32 %v2933_v20, %v2924_v61  ;;  %v4962_v31 = vand.u32 2147483647, %v4961_v54  ;;  %v5006_v25 = vor.u32 8388608, %v5005_v53  ;;  %vm5030_vm15 = vcmp.lt.s32.totalorder %v13043_v45, 1  ;;  %v13050_v20 = vld [vmem:[#allocation29_spill] sm:$0xff] }
 0x3b9   : > { %v10330_v60 = vor.u32 %v5019_v12, %v5018_v26  ;;  %v10333_v62 = vor.u32 %v5016_v29, %v5015_v27  ;;  %v10335_v48 = vor.u32 %v5022_v41, %v5021_v59  ;;  %vm5032_vm4 = vcmp.lt.s32.totalorder %v13043_v45, 3 }
 0x3ba   : > { %v2938_v39 = vadd.s32 1, %v2934_v18  ;;  %v4965_v38 = vmul.f32 %v4964_v23, %v4962_v31  ;;  %v2935_v49 = vmul.u32 %v10217_v10, %v10289_v46  ;;  %vm5031_vm2 = vcmp.lt.s32.totalorder %v13043_v45, 2 }
 0x3bb   : > { %v5044_v33 = vsel %vm5032_vm4, %v13045_v58, %v13044_v47  ;;  %vm4239_vm14 = vcmp.gt.s32.totalorder %v10229_v37, 0  ;;  %v13046_v2 = vand.u32 2147483647, %v13015_v55  ;;  %v5042_v10 = vsel %vm5030_vm15, %v10330_v60, %v10335_v48 }
 0x3bc   : > { %v2939_v34 = vsel %vm2937_vm10, %v2938_v39, %v2934_v18  ;;  %v10360_v46 = vand.u32 65535, %v10251_v57  ;;  %v4966_v40 = vxor.u32 2147483648, %v4965_v38  ;;  %v5038_v23 = vsel %vm5030_vm15, %v10333_v62, %v10330_v60 }
 0x3bd   : > { %vm10348_vm13 = vcmp.le.f32.partialorder %v13046_v2, 0.7853982  ;;  %v2940_v61 = vadd.s32 %v2939_v34, %v2935_v49  ;;  %v5040_v53 = vsel %vm5032_vm4, %v10335_v48, %v13050_v20  ;;  %v5045_v36 = vsel %vm5031_vm2, %v5042_v10, %v5044_v33 }
 0x3be   : > { %13049 = vst [vmem:[#allocation73_spill] sm:$0xff] %v10360_v46  ;;  %v4971_v6 = vsel %vm10348_vm13, 0, %v4969_v1  ;;  %v10374_v27 = vshll.u32 %v5006_v25, 8  ;;  %v4967_v54 = vsel %vm4846_vm1, %v4966_v40, %v4965_v38  ;;  %v5049_v29 = vand.u32 65535, %v5045_v36 }
 0x3bf   : > { %v2941_v1 = vadd.s32 536870912, %v2940_v61  ;;  %v5050_v26 = vshrl.u32 %v5045_v36, 16  ;;  %v4240_v12 = vsel %vm4239_vm14, %v10229_v37, 0  ;;  %v4970_v18 = vsel %vm10348_vm13, %v13015_v55, %v4967_v54 }
 0x3c0   : > { %v5047_v59 = vand.u32 65535, %v10374_v27  ;;  %v5048_v41 = vshrl.u32 %v10374_v27, 16  ;;  %v10387_v31 = vshrl.u32 %v10251_v57, 16  ;;  %v4972_v25 = vmul.f32 %v4970_v18, %v4970_v18 }
 0x3c1   : > { %v10389_v39 = vshrl.u32 %v2941_v1, 30  ;;  %v5041_v38 = vsel %vm5031_vm2, %v5038_v23, %v5040_v53  ;;  %v10393_v49 = vand.u32 3, %v4971_v6  ;;  %v10397_v33 = vshrl.u32 %v4240_v12, 5 }
 0x3c2   : > { %13051 = vst [vmem:[#allocation84_spill] sm:$0xff] %v10387_v31  ;;  %v5051_v37 = vmul.u32 %v5049_v29, %v5047_v59  ;;  %v5052_v47 = vmul.u32 %v5050_v26, %v5047_v59  ;;  %v10395_v58 = vmul.u32 %v5049_v29, %v5048_v41  ;;  %v4973_v2 = vmul.f32 -0.001358992, %v4972_v25 }
 0x3c3   : > { %v4980_v43 = vmul.f32 -0.00019511016, %v4972_v25  ;;  %v2943_v34 = vshll.u32 %v10389_v39, 30  ;;  %v10400_v10 = vand.u32 31, %v4240_v12  ;;  %v5072_v36 = vshrl.u32 %v5041_v38, 16 }
 0x3c4   : > { %v5055_v40 = vshll.u32 %v5052_v47, 16  ;;  %v5057_v20 = vshll.u32 %v10395_v58, 16  ;;  %v4974_v54 = vadd.f32 0.041655596, %v4973_v2  ;;  %v5054_v53 = vmul.u32 %v5050_v26, %v5048_v41 }
 0x3c5   : > { %v4981_v23 = vadd.f32 0.008332121, %v4980_v43  ;;  %v10403_v6 = vsub.s32 %v2940_v61, %v2943_v34  ;;  %vm4993_vm1 = vcmp.eq.s32.totalorder %v10393_v49, 2  ;;  %v5071_v29 = vand.u32 65535, %v5041_v38 }
 0x3c6   : > { %vm5059_vm11 = vc.u32 %v5051_v37, %v5055_v40  ;;  %v5061_v1 = vadd.s32 %v5055_v40, %v5051_v37  ;;  %v4975_v42 = vmul.f32 %v4974_v54, %v4972_v25  ;;  %vm4990_vm3 = vcmp.eq.s32.totalorder %v10393_v49, 0 }
 0x3c7   : > { %v4982_v3 = vmul.f32 %v4981_v23, %v4972_v25  ;;  %vm2945_vm12 = vcmp.lt.s32.totalorder %v10403_v6, 0  ;;  %v2946_v12 = vsub.s32 0, %v10403_v6  ;;  %v5014_v2 = vshrl.u32 %v12675_v32, %v13042_v0 }
 0x3c8   : > { %v5060_v61 = vsel %vm5059_vm11, 1, %v12710_v9  ;;  %vm5063_vm10 = vc.u32 %v5061_v1, %v5057_v20  ;;  %v10412_v26 = vmul.u32 %v5072_v36, %v5047_v59  ;;  %v4976_v43 = vadd.f32 -0.4999988, %v4975_v42 }
 0x3c9   : > { %v4983_v34 = vadd.f32 -0.16666654, %v4982_v3  ;;  %vm4989_vm14 = vcmp.lt.s32.totalorder %v10393_v49, 2  ;;  %v2947_v38 = vsel %vm2945_vm12, %v2946_v12, %v10403_v6  ;;  %v5062_v37 = vadd.s32 %v5060_v61, %v5054_v53 }
 0x3ca   : > { %vm4987_vm13 = vweird.f32 %v13015_v55  ;;  %v2936_v40 = vadd.s32 %v10312_v11, %v10302_v56  ;;  %v2948_v54 = vclz %v2947_v38  ;;  %v5035_v0 = vsel %vm5033_vm7, %v10335_v48, 2102212464  ;;  %v13054_v55 = vld [vmem:[#allocation41_spill] sm:$0xff] }
 0x3cb   : > { %v5073_v20 = vmul.u32 %v5071_v29, %v5047_v59  ;;  %v4977_v23 = vmul.f32 %v4976_v43, %v4972_v25  ;;  %v4984_v1 = vmul.f32 %v4983_v34, %v4972_v25  ;;  %v5056_v42 = vshrl.u32 %v5052_v47, 16  ;;  %v13052_v59 = vld [vmem:[#allocation31_spill] sm:$0xff] }
 0x3cc   : > { %v5064_v3 = vsel %vm5063_vm10, 1, %v12710_v9  ;;  %v6395_v57 = vadd.s32 4294967294, %v2948_v54  ;;  %v5075_v12 = vmul.u32 %v5071_v29, %v5048_v41  ;;  %v5077_v53 = vshll.u32 %v10412_v26, 16 }
 0x3cd   : > { %v5066_v24 = vadd.s32 %v5064_v3, %v5062_v37  ;;  %v4978_v61 = vadd.f32 1.0, %v4977_v23  ;;  %v4985_v28 = vadd.f32 1.0, %v4984_v1  ;;  %v5034_v56 = vsel %vm5030_vm15, %v5014_v2, %v10333_v62 }
 0x3ce   : > { %v5036_v11 = vsel %vm5032_vm4, %v10330_v60, %v5035_v0  ;;  %vm6396_vm7 = vcmp.lt.s32.totalorder %v6395_v57, 0  ;;  %v5076_v48 = vmul.u32 %v5072_v36, %v5048_v41  ;;  %vm5081_vm11 = vc.u32 %v5073_v20, %v5077_v53 }
 0x3cf   : > { %v12632_v25 = vand.u32 2147483647, %v13052_v59  ;;  %v4986_v47 = vmul.f32 %v4985_v28, %v4970_v18  ;;  %v4994_v43 = vxor.u32 2147483648, %v4978_v61  ;;  %v2951_v29 = vsel %vm6396_vm7, 0, %v6395_v57 }
 0x3d0   : > { %v5058_v34 = vshrl.u32 %v10395_v58, 16  ;;  %v2952_v38 = vsub.s32 32, %v2951_v29  ;;  %v2956_v37 = vsub.s32 4294967266, %v2951_v29  ;;  %v5067_v54 = vadd.s32 %v5066_v24, %v5056_v42 }
 0x3d1   : > { %v5079_v23 = vshll.u32 %v5075_v12, 16  ;;  %v4991_v1 = vxor.u32 2147483648, %v4986_v47  ;;  %v4995_v62 = vsel %vm4993_vm1, %v4994_v43, %v4986_v47  ;;  %vm2844_vm15 = vcmp.lt.s32.totalorder %v13028_v8, 0  ;;  %v13053_v47 = vld [vmem:[#allocation34_spill] sm:$0xff] }
 0x3d2   : > { %v2953_v60 = vshll.u32 %v10403_v6, %v2951_v29  ;;  %v5082_v41 = vsel %vm5081_vm11, 1, %v12710_v9  ;;  %v2954_v36 = vshrl.u32 %v2936_v40, %v2952_v38  ;;  %v2957_v28 = vadd.s32 127, %v2956_v37 }
 0x3d3   : > { %v5083_v18 = vadd.s32 %v5077_v53, %v5073_v20  ;;  %v5084_v57 = vadd.s32 %v5082_v41, %v5076_v48  ;;  %v4992_v58 = vsel %vm4990_vm3, %v4978_v61, %v4991_v1  ;;  %v5037_v24 = vsel %vm5031_vm2, %v5034_v56, %v5036_v11 }
 0x3d4   : > { %v5078_v2 = vshrl.u32 %v10412_v26, 16  ;;  %v3003_v0 = vand.u32 8388607, %v12632_v25  ;;  %v4996_v6 = vsel %vm4989_vm14, %v4992_v58, %v4995_v62  ;;  %v2955_v42 = vor.u32 %v2954_v36, %v2953_v60 }
 0x3d5   : > { %v2958_v3 = vshll.u32 %v2957_v28, 23  ;;  %vm5085_vm4 = vc.u32 %v5083_v18, %v5079_v23  ;;  %v4997_v40 = vsel %vm4987_vm13, nan, %v4996_v6  ;;  %v2966_v20 = vsub.s32 4, %v10389_v39 }
 0x3d6   : > { %v5080_v53 = vshrl.u32 %v5075_v12, 16  ;;  %v5086_v45 = vsel %vm5085_vm4, 1, %v12710_v9  ;;  %6473 = vmatmul.msk.f32.gmra.mxu3 %vm322_vm0, %v4997_v40  ;;  %v10451_v61 = vadd.s32 %v5067_v54, %v5058_v34  ;;  %v10453_v56 = vadd.s32 %v5083_v18, %v5079_v23 }
 0x3d7   : > { %v2959_v26 = vor.u32 4788187, %v2958_v3  ;;  %v5088_v49 = vadd.s32 %v5086_v45, %v5084_v57  ;;  %v2962_v11 = vcvt.s32.f32 %v2955_v42  ;;  %v3004_v48 = vor.u32 8388608, %v3003_v0  ;;  %v13059_v42 = vld [vmem:[#allocation44_spill] sm:$0xff] }
 0x3d8   : > { %v3013_v43 = vshll.u32 %v12675_v32, %v13053_v47  ;;  %v3014_v29 = vshrl.u32 %v12669_v63, %v13054_v55  ;;  %v3016_v37 = vshll.u32 %v12669_v63, %v13053_v47  ;;  %v3017_v34 = vshrl.u32 %v12677_v44, %v13054_v55 }
 0x3d9   : > { %v2960_v38 = vand.u32 2147483647, %v2959_v26  ;;  %v5089_v12 = vadd.s32 %v5088_v49, %v5078_v2  ;;  %v5091_v54 = vmul.u32 %v10374_v27, %v5037_v24  ;;  %v3019_v1 = vshll.u32 %v12677_v44, %v13053_v47  ;;  %v13055_v24 = vld [vmem:[#allocation40_spill] sm:$0xff] }
 0x3da   : > { %v10464_v23 = vor.u32 %v3014_v29, %v3013_v43  ;;  %v3020_v62 = vshrl.u32 %v12668_v50, %v13054_v55  ;;  %v2967_v41 = vsel %vm2844_vm15, %v2966_v20, %v10389_v39  ;;  %v10473_v28 = vor.u32 %v3017_v34, %v3016_v37 }
 0x3db   : > { %v2963_v60 = vmul.f32 %v2962_v11, %v2960_v38  ;;  %v5090_v36 = vadd.s32 %v5089_v12, %v5080_v53  ;;  %vm5093_vm2 = vc.u32 %v10451_v61, %v10453_v56  ;;  %vm3030_vm1 = vcmp.lt.s32.totalorder %v8488_v5, 3 }
 0x3dc   : > { %v3021_v27 = vor.u32 %v3020_v62, %v3019_v1  ;;  %v10478_v18 = vshll.u32 %v3004_v48, 8  ;;  %vm3028_vm12 = vcmp.lt.s32.totalorder %v8488_v5, 1  ;;  %v3042_v39 = vsel %vm3030_vm1, %v13055_v24, %v8724_v14 }
 0x3dd   : > { %v2964_v57 = vxor.u32 2147483648, %v2963_v60  ;;  %v5094_v58 = vadd.s32 1, %v5090_v36  ;;  %v13056_v2 = vand.u32 2147483647, %v13028_v8  ;;  %v3036_v6 = vsel %vm3028_vm12, %v10464_v23, %v10473_v28 }
 0x3de   : > { %v3038_v3 = vsel %vm3030_vm1, %v3021_v27, %v13059_v42  ;;  %v3040_v40 = vsel %vm3028_vm12, %v10473_v28, %v3021_v27  ;;  %vm3029_vm10 = vcmp.lt.s32.totalorder %v8488_v5, 2  ;;  %v3045_v11 = vand.u32 65535, %v10478_v18 }
 0x3df   : > { %vm10487_vm3 = vcmp.le.f32.partialorder %v13056_v2, 0.7853982  ;;  %v2965_v14 = vsel %vm2844_vm15, %v2964_v57, %v2963_v60  ;;  %v5095_v53 = vsel %vm5093_vm2, %v5094_v58, %v5090_v36  ;;  %v3043_v49 = vsel %vm3029_vm10, %v3040_v40, %v3042_v39 }
 0x3e0   : > { %v2969_v20 = vsel %vm10487_vm3, 0, %v2967_v41  ;;  %v10509_v45 = vsel %vm10487_vm3, %v13028_v8, %v2965_v14  ;;  %v5096_v26 = vadd.s32 %v5095_v53, %v5091_v54  ;;  %v3039_v47 = vsel %vm3029_vm10, %v3036_v6, %v3038_v3 }
 0x3e1   : > { %v2970_v48 = vmul.f32 %v10509_v45, %v10509_v45  ;;  %v3047_v43 = vand.u32 65535, %v3043_v49  ;;  %v3048_v29 = vshrl.u32 %v3043_v49, 16  ;;  %v10519_v38 = vsub.s32 32, %v10400_v10 }
 0x3e2   : > { %v10523_v12 = vshll.u32 %v12675_v32, %v10400_v10  ;;  %v5097_v37 = vadd.s32 536870912, %v5096_v26  ;;  %v3046_v34 = vshrl.u32 %v10478_v18, 16  ;;  %v10528_v54 = vshll.u32 %v12669_v63, %v10400_v10 }
 0x3e3   : > { %v2971_v1 = vmul.f32 -0.001358992, %v2970_v48  ;;  %v2978_v62 = vmul.f32 -0.00019511016, %v2970_v48  ;;  %v10530_v60 = vmul.u32 %v3048_v29, %v3045_v11  ;;  %v10532_v41 = vand.u32 3, %v2969_v20 }
 0x3e4   : > { %v10534_v36 = vshrl.u32 %v5097_v37, 30  ;;  %v10536_v57 = vmul.u32 %v3047_v43, %v3046_v34  ;;  %v3070_v58 = vshrl.u32 %v3039_v47, 16  ;;  %v3049_v2 = vmul.u32 %v3047_v43, %v3045_v11 }
 0x3e5   : > { %v2972_v24 = vadd.f32 0.041655596, %v2971_v1  ;;  %v2979_v39 = vadd.f32 0.008332121, %v2978_v62  ;;  %v3053_v0 = vshll.u32 %v10530_v60, 16  ;;  %v3012_v42 = vshrl.u32 %v12675_v32, %v13054_v55 }
 0x3e6   : > { %v5099_v6 = vshll.u32 %v10534_v36, 30  ;;  %v3052_v3 = vmul.u32 %v3048_v29, %v3046_v34  ;;  %v3069_v40 = vand.u32 65535, %v3039_v47  ;;  %v3055_v37 = vshll.u32 %v10536_v57, 16 }
 0x3e7   : > { %v2973_v14 = vmul.f32 %v2972_v24, %v2970_v48  ;;  %v2980_v20 = vmul.f32 %v2979_v39, %v2970_v48  ;;  %vm3057_vm14 = vc.u32 %v3049_v2, %v3053_v0  ;;  %v3059_v53 = vadd.s32 %v3053_v0, %v3049_v2 }
 0x3e8   : > { %v10542_v49 = vsub.s32 %v5096_v26, %v5099_v6  ;;  %v3058_v1 = vsel %vm3057_vm14, 1, %v12710_v9  ;;  %v10546_v43 = vmul.u32 %v3070_v58, %v3045_v11  ;;  %v3033_v35 = vsel %vm3031_vm6, %v3021_v27, 2102212464 }
 0x3e9   : > { %v2974_v62 = vadd.f32 -0.4999988, %v2973_v14  ;;  %v2981_v25 = vadd.f32 -0.16666654, %v2980_v20  ;;  %v3060_v55 = vadd.s32 %v3058_v1, %v3052_v3  ;;  %vm2988_vm13 = vcmp.eq.s32.totalorder %v10532_v41, 0 }
 0x3ea   : > { %vm5101_vm7 = vcmp.lt.s32.totalorder %v10542_v49, 0  ;;  %v5102_v47 = vsub.s32 0, %v10542_v49  ;;  %vm3061_vm11 = vc.u32 %v3059_v53, %v3055_v37  ;;  %v10553_v26 = vmul.u32 %v3069_v40, %v3046_v34 }
 0x3eb   : > { %v2975_v29 = vmul.f32 %v2974_v62, %v2970_v48  ;;  %v2982_v24 = vmul.f32 %v2981_v25, %v2970_v48  ;;  %vm2987_vm15 = vcmp.lt.s32.totalorder %v10532_v41, 2  ;;  %v3032_v39 = vsel %vm3028_vm12, %v3012_v42, %v10464_v23 }
 0x3ec   : > { %v3062_v27 = vsel %vm3061_vm11, 1, %v12710_v9  ;;  %vm2985_vm6 = vweird.f32 %v13028_v8  ;;  %v5103_v2 = vsel %vm5101_vm7, %v5102_v47, %v10542_v49  ;;  %v3034_v0 = vsel %vm3030_vm1, %v10473_v28, %v3033_v35 }
 0x3ed   : > { %v3071_v6 = vmul.u32 %v3069_v40, %v3045_v11  ;;  %v3075_v3 = vshll.u32 %v10546_v43, 16  ;;  %v2976_v25 = vadd.f32 1.0, %v2975_v29  ;;  %v2983_v48 = vadd.f32 1.0, %v2982_v24 }
 0x3ee   : > { %v5104_v14 = vclz %v5103_v2  ;;  %v3074_v20 = vmul.u32 %v3070_v58, %v3046_v34  ;;  %v3064_v53 = vadd.s32 %v3062_v27, %v3060_v55  ;;  %v3077_v23 = vshll.u32 %v10553_v26, 16 }
 0x3ef   : > { %vm3079_vm4 = vc.u32 %v3071_v6, %v3075_v3  ;;  %v3081_v42 = vadd.s32 %v3075_v3, %v3071_v6  ;;  %v2984_v37 = vmul.f32 %v2983_v48, %v10509_v45  ;;  %v2992_v1 = vxor.u32 2147483648, %v2976_v25 }
 0x3f0   : > { %v6437_v62 = vadd.s32 4294967294, %v5104_v14  ;;  %v3080_v47 = vsel %vm3079_vm4, 1, %v12710_v9  ;;  %vm2991_vm2 = vcmp.eq.s32.totalorder %v10532_v41, 2  ;;  %v5092_v35 = vadd.s32 %v10453_v56, %v10451_v61  ;;  %v13060_v14 = vld [vmem:[#allocation97_spill] sm:$0xff] }
 0x3f1   : > { %v3054_v28 = vshrl.u32 %v10530_v60, 16  ;;  %vm3083_vm1 = vc.u32 %v3081_v42, %v3077_v23  ;;  %v2989_v11 = vxor.u32 2147483648, %v2984_v37  ;;  %v3035_v34 = vsel %vm3029_vm10, %v3032_v39, %v3034_v0 }
 0x3f2   : > { %vm6438_vm12 = vcmp.lt.s32.totalorder %v6437_v62, 0  ;;  %v3082_v58 = vadd.s32 %v3080_v47, %v3074_v20  ;;  %v2993_v40 = vsel %vm2991_vm2, %v2992_v1, %v2984_v37  ;;  %v3084_v29 = vsel %vm3083_vm1, 1, %v12710_v9  ;;  %v5844_v1 = vld [vmem:[%s12342_s5 + $0x38] sm:$0xff] }
 0x3f3   : > { %v5107_v45 = vsel %vm6438_vm12, 0, %v6437_v62  ;;  %v3065_v55 = vadd.s32 %v3064_v53, %v3054_v28  ;;  %v2990_v24 = vsel %vm2988_vm13, %v2976_v25, %v2989_v11  ;;  %v5122_v2 = vsub.s32 4, %v10534_v36  ;;  %v5843_v62 = vld [vmem:[%s12342_s5 + $0x30] sm:$0xff]  ;;  %5954 = vmatpush.msra.mxu2 %v5844_v1  ;;  %6551 = vmatpush.msra.mxu3 %v5844_v1 }
 0x3f4   : > { %v5108_v27 = vsub.s32 32, %v5107_v45  ;;  %v5109_v61 = vshll.u32 %v10542_v49, %v5107_v45  ;;  %v5112_v56 = vsub.s32 4294967266, %v5107_v45  ;;  %v2994_v60 = vsel %vm2987_vm15, %v2990_v24, %v2993_v40 }
 0x3f5   : > { %v3056_v5 = vshrl.u32 %v10536_v57, 16  ;;  %v3076_v39 = vshrl.u32 %v10546_v43, 16  ;;  %v2995_v0 = vsel %vm2985_vm6, nan, %v2994_v60  ;;  %v3086_v48 = vadd.s32 %v3084_v29, %v3082_v58  ;;  %v13061_v43 = vld [vmem:[#allocation38_spill] sm:$0xff]  ;;  %5955 = vmatpush.msra.mxu2 %v5843_v62  ;;  %6552 = vmatpush.msra.mxu3 %v5843_v62 }
 0x3f6   : > { %v5110_v6 = vshrl.u32 %v5092_v35, %v5108_v27  ;;  %v5113_v3 = vadd.s32 127, %v5112_v56  ;;  %6460 = vmatmul.msk.f32.gmra.mxu1 %vm322_vm0, %v2995_v0  ;;  %v3078_v49 = vshrl.u32 %v10553_v26, 16  ;;  %v10590_v41 = vadd.s32 %v3081_v42, %v3077_v23  ;;  %v13062_v23 = vld [vmem:[#allocation7_spill] sm:$0xff] }
 0x3f7   : > { %v10587_v25 = vadd.s32 %v3065_v55, %v3056_v5  ;;  %v12635_v20 = vand.u32 2147483647, %v13060_v14  ;;  %v3087_v37 = vadd.s32 %v3086_v48, %v3076_v39  ;;  %v5169_v8 = vshll.u32 %v12675_v32, %v13061_v43  ;;  %v13063_v5 = vld [vmem:[#allocation42_spill] sm:$0xff]  ;;  %v13067_v48 = vld [vmem:[#allocation15_spill] sm:$0xff] }
 0x3f8   : > { %v5111_v53 = vor.u32 %v5110_v6, %v5109_v61  ;;  %v5114_v57 = vshll.u32 %v5113_v3, 23  ;;  %v5170_v42 = vshrl.u32 %v12669_v63, %v13062_v23  ;;  %v5172_v47 = vshll.u32 %v12669_v63, %v13061_v43 }
 0x3f9   : > { %v5159_v26 = vand.u32 8388607, %v12635_v20  ;;  %v5173_v35 = vshrl.u32 %v12677_v44, %v13062_v23  ;;  %v3088_v58 = vadd.s32 %v3087_v37, %v3078_v49  ;;  %v5175_v40 = vshll.u32 %v12677_v44, %v13061_v43  ;;  %v13068_v49 = vld [vmem:[#allocation47_spill] sm:$0xff] }
 0x3fa   : > { %v5115_v28 = vor.u32 4788187, %v5114_v57  ;;  %v5118_v11 = vcvt.s32.f32 %v5111_v53  ;;  %vm5000_vm3 = vcmp.lt.s32.totalorder %v13040_v21, 0  ;;  %v3089_v45 = vmul.u32 %v10478_v18, %v3035_v34 }
 0x3fb   : > { %vm3091_vm10 = vc.u32 %v10587_v25, %v10590_v41  ;;  %v5160_v55 = vor.u32 8388608, %v5159_v26  ;;  %v3092_v24 = vadd.s32 1, %v3088_v58  ;;  %v5174_v27 = vor.u32 %v5173_v35, %v5172_v47  ;;  %v13069_v47 = vld [vmem:[#allocation46_spill] sm:$0xff] }
 0x3fc   : > { %v5116_v29 = vand.u32 2147483647, %v5115_v28  ;;  %v5176_v61 = vshrl.u32 %v12668_v50, %v13062_v23  ;;  %v5123_v56 = vsel %vm5000_vm3, %v5122_v2, %v10534_v36  ;;  %v5171_v60 = vor.u32 %v5170_v42, %v5169_v8 }
 0x3fd   : > { %vm5184_vm14 = vcmp.lt.s32.totalorder %v13063_v5, 1  ;;  %vm5186_vm13 = vcmp.lt.s32.totalorder %v13063_v5, 3  ;;  %v3093_v34 = vsel %vm3091_vm10, %v3092_v24, %v3088_v58  ;;  %vm5185_vm7 = vcmp.lt.s32.totalorder %v13063_v5, 2 }
 0x3fe   : > { %v5119_v18 = vmul.f32 %v5118_v11, %v5116_v29  ;;  %v5177_v39 = vor.u32 %v5176_v61, %v5175_v40  ;;  %v13064_v0 = vand.u32 2147483647, %v13040_v21  ;;  %v3094_v3 = vadd.s32 %v3093_v34, %v3089_v45 }
 0x3ff   : > { %v5198_v36 = vsel %vm5186_vm13, %v13068_v49, %v13067_v48  ;;  %v10633_v2 = vshll.u32 %v5160_v55, 8  ;;  %v10637_v53 = vshll.u32 %v12677_v44, %v10400_v10  ;;  %v5168_v1 = vshrl.u32 %v12675_v32, %v13062_v23 }
 0x400   : > { %vm10625_vm11 = vcmp.le.f32.partialorder %v13064_v0, 0.7853982  ;;  %v5120_v57 = vxor.u32 2147483648, %v5119_v18  ;;  %v5196_v43 = vsel %vm5184_vm14, %v5174_v27, %v5177_v39  ;;  %v3095_v8 = vadd.s32 536870912, %v3094_v3 }
 0x401   : > { %v5125_v37 = vsel %vm10625_vm11, 0, %v5123_v56  ;;  %v5192_v62 = vsel %vm5184_vm14, %v5171_v60, %v5174_v27  ;;  %v5199_v26 = vsel %vm5185_vm7, %v5196_v43, %v5198_v36  ;;  %v5194_v35 = vsel %vm5186_vm13, %v5177_v39, %v13069_v47 }
 0x402   : > { %v5121_v42 = vsel %vm5000_vm3, %v5120_v57, %v5119_v18  ;;  %v5201_v28 = vand.u32 65535, %v10633_v2  ;;  %v5202_v11 = vshrl.u32 %v10633_v2, 16  ;;  %v10661_v58 = vshrl.u32 %v3095_v8, 30 }
 0x403   : > { %v10659_v23 = vsel %vm10625_vm11, %v13040_v21, %v5121_v42  ;;  %v5203_v40 = vand.u32 65535, %v5199_v26  ;;  %v5204_v45 = vshrl.u32 %v5199_v26, 16  ;;  %v10665_v55 = vshrl.u32 %v12669_v63, %v10519_v38 }
 0x404   : > { %v10669_v29 = vshrl.u32 %v12677_v44, %v10519_v38  ;;  %v5126_v24 = vmul.f32 %v10659_v23, %v10659_v23  ;;  %v10673_v61 = vand.u32 3, %v5125_v37  ;;  %v3097_v56 = vshll.u32 %v10661_v58, 30 }
 0x405   : > { %vm13070_vm15 = vcmp.lt.s32.totalorder %v13063_v5, 4  ;;  %v5195_v34 = vsel %vm5185_vm7, %v5192_v62, %v5194_v35  ;;  %v5206_v0 = vmul.u32 %v5204_v45, %v5201_v28  ;;  %v5205_v49 = vmul.u32 %v5203_v40, %v5201_v28 }
 0x406   : > { %v5189_v18 = vsel %vm13070_vm15, %v5177_v39, 2102212464  ;;  %v5127_v6 = vmul.f32 -0.001358992, %v5126_v24  ;;  %v5134_v48 = vmul.f32 -0.00019511016, %v5126_v24  ;;  %v10680_v36 = vmul.u32 %v5203_v40, %v5202_v11 }
 0x407   : > { %v3090_v57 = vadd.s32 %v10590_v41, %v10587_v25  ;;  %v10684_v43 = vsub.s32 %v3094_v3, %v3097_v56  ;;  %v5188_v37 = vsel %vm5184_vm14, %v5168_v1, %v5171_v60  ;;  %v5209_v8 = vshll.u32 %v5206_v0, 16 }
 0x408   : > { %v5128_v26 = vadd.f32 0.041655596, %v5127_v6  ;;  %v5135_v39 = vadd.f32 0.008332121, %v5134_v48  ;;  %v5190_v62 = vsel %vm5186_vm13, %v5174_v27, %v5189_v18  ;;  %v5226_v42 = vshrl.u32 %v5195_v34, 16 }
 0x409   : > { %vm5147_vm6 = vcmp.eq.s32.totalorder %v10673_v61, 2  ;;  %vm3099_vm4 = vcmp.lt.s32.totalorder %v10684_v43, 0  ;;  %v3100_v47 = vsub.s32 0, %v10684_v43  ;;  %v5208_v35 = vmul.u32 %v5204_v45, %v5202_v11 }
 0x40a   : > { %v5211_v25 = vshll.u32 %v10680_v36, 16  ;;  %v5129_v41 = vmul.f32 %v5128_v26, %v5126_v24  ;;  %v5136_v3 = vmul.f32 %v5135_v39, %v5126_v24  ;;  %vm5213_vm2 = vc.u32 %v5205_v49, %v5209_v8 }
 0x40b   : > { %v5215_v60 = vadd.s32 %v5209_v8, %v5205_v49  ;;  %vm5144_vm1 = vcmp.eq.s32.totalorder %v10673_v61, 0  ;;  %v3101_v1 = vsel %vm3099_vm4, %v3100_v47, %v10684_v43  ;;  %v10698_v27 = vsel %vm5185_vm7, %v5188_v37, %v5190_v62 }
 0x40c   : > { %v5210_v40 = vshrl.u32 %v5206_v0, 16  ;;  %v5225_v56 = vand.u32 65535, %v5195_v34  ;;  %v5130_v18 = vadd.f32 -0.4999988, %v5129_v41  ;;  %v5137_v6 = vadd.f32 -0.16666654, %v5136_v3 }
 0x40d   : > { %vm5143_vm12 = vcmp.lt.s32.totalorder %v10673_v61, 2  ;;  %v3102_v45 = vclz %v3101_v1  ;;  %v5214_v48 = vsel %vm5213_vm2, 1, %v12710_v9  ;;  %vm5141_vm3 = vweird.f32 %v13040_v21 }
 0x40e   : > { %v5212_v49 = vshrl.u32 %v10680_v36, 16  ;;  %v5216_v8 = vadd.s32 %v5214_v48, %v5208_v35  ;;  %vm5217_vm10 = vc.u32 %v5215_v60, %v5211_v25  ;;  %v5228_v26 = vmul.u32 %v5226_v42, %v5201_v28 }
 0x40f   : > { %v5131_v39 = vmul.f32 %v5130_v18, %v5126_v24  ;;  %v5138_v5 = vmul.f32 %v5137_v6, %v5126_v24  ;;  %v6398_v37 = vadd.s32 4294967294, %v3102_v45  ;;  %v5218_v0 = vsel %vm5217_vm10, 1, %v12710_v9 }
 0x410   : > { %v5220_v34 = vadd.s32 %v5218_v0, %v5216_v8  ;;  %v5227_v62 = vmul.u32 %v5225_v56, %v5201_v28  ;;  %v5229_v47 = vmul.u32 %v5225_v56, %v5202_v11  ;;  %v5231_v41 = vshll.u32 %v5228_v26, 16 }
 0x411   : > { %v5132_v3 = vadd.f32 1.0, %v5131_v39  ;;  %v5139_v1 = vadd.f32 1.0, %v5138_v5  ;;  %vm6399_vm14 = vcmp.lt.s32.totalorder %v6398_v37, 0  ;;  %v5230_v20 = vmul.u32 %v5226_v42, %v5202_v11 }
 0x412   : > { %v3105_v31 = vsel %vm6399_vm14, 0, %v6398_v37  ;;  %v5221_v46 = vadd.s32 %v5220_v34, %v5210_v40  ;;  %v5232_v51 = vshrl.u32 %v5228_v26, 16  ;;  %v5233_v36 = vshll.u32 %v5229_v47, 16  ;;  %v13071_v37 = vld [vmem:[#allocation37_spill] sm:$0xff] }
 0x413   : > { %v5140_v35 = vmul.f32 %v5139_v1, %v10659_v23  ;;  %v5148_v25 = vxor.u32 2147483648, %v5132_v3  ;;  %v3106_v60 = vsub.s32 32, %v3105_v31  ;;  %v5234_v24 = vshrl.u32 %v5229_v47, 16 }
 0x414   : > { %v3107_v18 = vshll.u32 %v10684_v43, %v3105_v31  ;;  %v3110_v6 = vsub.s32 4294967266, %v3105_v31  ;;  %vm5235_vm13 = vc.u32 %v5227_v62, %v5231_v41  ;;  %v5237_v28 = vadd.s32 %v5231_v41, %v5227_v62 }
 0x415   : > { %v5145_v56 = vxor.u32 2147483648, %v5140_v35  ;;  %v5149_v45 = vsel %vm5147_vm6, %v5148_v25, %v5140_v35  ;;  %v3108_v48 = vshrl.u32 %v3090_v57, %v3106_v60  ;;  %v5236_v11 = vsel %vm5235_vm13, 1, %v12710_v9  ;;  %v13073_v35 = vld [vmem:[#allocation43_spill] sm:$0xff] }
 0x416   : > { %v3111_v42 = vadd.s32 127, %v3110_v6  ;;  %v10710_v40 = vadd.s32 %v5221_v46, %v5212_v49  ;;  %v5238_v8 = vadd.s32 %v5236_v11, %v5230_v20  ;;  %vm5239_vm7 = vc.u32 %v5237_v28, %v5233_v36 }
 0x417   : > { %v5146_v23 = vsel %vm5144_vm1, %v5132_v3, %v5145_v56  ;;  %v3109_v26 = vor.u32 %v3108_v48, %v3107_v18  ;;  %v5240_v31 = vsel %vm5239_vm7, 1, %v12710_v9  ;;  %v10715_v43 = vadd.s32 %v5237_v28, %v5233_v36  ;;  %v13074_v48 = vld [vmem:[#allocation45_spill] sm:$0xff] }
 0x418   : > { %v5150_v39 = vsel %vm5143_vm12, %v5146_v23, %v5149_v45  ;;  %v3112_v5 = vshll.u32 %v3111_v42, 23  ;;  %v5242_v57 = vadd.s32 %v5240_v31, %v5238_v8  ;;  %v3150_v0 = vand.u32 2147483647, %v13071_v37 }
 0x419   : > { %v10722_v46 = vshrl.u32 %v12675_v32, %v10519_v38  ;;  %v4252_v20 = vshrl.u32 %v12668_v50, %v10519_v38  ;;  %v4254_v49 = vshll.u32 %v12668_v50, %v10400_v10  ;;  %v5151_v34 = vsel %vm5141_vm3, nan, %v5150_v39 }
 0x41a   : > { %v10732_v61 = vor.u32 %v10665_v55, %v10523_v12  ;;  %v10736_v62 = vor.u32 %v10669_v29, %v10528_v54  ;;  %6474 = vmatmul.msk.f32.gmra.mxu3 %vm322_vm0, %v5151_v34  ;;  %v3113_v47 = vor.u32 4788187, %v3112_v5  ;;  %v5243_v41 = vadd.s32 %v5242_v57, %v5232_v51  ;;  %v13072_v29 = vld [vmem:[#allocation50_spill] sm:$0xff] }
 0x41b   : > { %v4255_v3 = vshrl.u32 %v12670_v4, %v10519_v38  ;;  %v3116_v1 = vcvt.s32.f32 %v3109_v26  ;;  %v5245_v21 = vmul.u32 %v10633_v2, %v10698_v27  ;;  %vm5247_vm11 = vc.u32 %v10710_v40, %v10715_v43 }
 0x41c   : > { %v3114_v12 = vand.u32 2147483647, %v3113_v47  ;;  %v5244_v55 = vadd.s32 %v5243_v41, %v5234_v24  ;;  %v3157_v54 = vand.u32 8388607, %v3150_v0  ;;  %v3168_v36 = vshrl.u32 %v12669_v63, %v13072_v29 }
 0x41d   : > { %v3170_v51 = vshll.u32 %v12669_v63, %v13073_v35  ;;  %v3171_v25 = vshrl.u32 %v12677_v44, %v13072_v29  ;;  %v3173_v2 = vshll.u32 %v12677_v44, %v13073_v35  ;;  %v3174_v27 = vshrl.u32 %v12668_v50, %v13072_v29 }
 0x41e   : > { %v10759_v60 = vshll.u32 %v12670_v4, %v10400_v10  ;;  %v3117_v24 = vmul.f32 %v3116_v1, %v3114_v12  ;;  %v3120_v18 = vsub.s32 4, %v10661_v58  ;;  %v5248_v6 = vadd.s32 1, %v5244_v55  ;;  %v13075_v4 = vld [vmem:[#allocation60_spill] sm:$0xff] }
 0x41f   : > { %v3167_v28 = vshll.u32 %v12675_v32, %v13073_v35  ;;  %v10764_v56 = vor.u32 %v3171_v25, %v3170_v51  ;;  %v3175_v45 = vor.u32 %v3174_v27, %v3173_v2  ;;  %vm3184_vm15 = vcmp.lt.s32.totalorder %v13074_v48, 3  ;;  %v13076_v10 = vld [vmem:[#allocation32_spill] sm:$0xff] }
 0x420   : > { %v3118_v11 = vxor.u32 2147483648, %v3117_v24  ;;  %v5249_v42 = vsel %vm5247_vm11, %v5248_v6, %v5244_v55  ;;  %v3158_v8 = vor.u32 8388608, %v3157_v54  ;;  %v3196_v23 = vsel %vm3184_vm15, %v13076_v10, %v13075_v4  ;;  %v13080_v51 = vld [vmem:[#allocation52_spill] sm:$0xff] }
 0x421   : > { %vm2998_vm6 = vcmp.lt.s32.totalorder %v13052_v59, 0  ;;  %v5250_v26 = vadd.s32 %v5249_v42, %v5245_v21  ;;  %v3169_v31 = vor.u32 %v3168_v36, %v3167_v28  ;;  %vm3182_vm4 = vcmp.lt.s32.totalorder %v13074_v48, 1 }
 0x422   : > { %v13077_v39 = vand.u32 2147483647, %v13052_v59  ;;  %v3119_v57 = vsel %vm2998_vm6, %v3118_v11, %v3117_v24  ;;  %vm3183_vm1 = vcmp.lt.s32.totalorder %v13074_v48, 2  ;;  %v3194_v34 = vsel %vm3182_vm4, %v10764_v56, %v3175_v45 }
 0x423   : > { %v3121_v47 = vsel %vm2998_vm6, %v3120_v18, %v10661_v58  ;;  %v5251_v1 = vadd.s32 536870912, %v5250_v26  ;;  %v3197_v21 = vsel %vm3183_vm1, %v3194_v34, %v3196_v23  ;;  %v10793_v12 = vor.u32 %v4252_v20, %v10637_v53 }
 0x424   : > { %vm10778_vm2 = vcmp.le.f32.partialorder %v13077_v39, 0.7853982  ;;  %v10795_v54 = vshll.u32 %v3158_v8, 8  ;;  %v3202_v36 = vshrl.u32 %v3197_v21, 16  ;;  %v3190_v58 = vsel %vm3182_vm4, %v3169_v31, %v10764_v56 }
 0x425   : > { %v3122_v41 = vsel %vm10778_vm2, %v13052_v59, %v3119_v57  ;;  %v10797_v35 = vshrl.u32 %v5251_v1, 30  ;;  %v3192_v25 = vsel %vm3184_vm15, %v3175_v45, %v13080_v51  ;;  %v3201_v2 = vand.u32 65535, %v3197_v21 }
 0x426   : > { %v3124_v55 = vmul.f32 %v3122_v41, %v3122_v41  ;;  %v3123_v27 = vsel %vm10778_vm2, 0, %v3121_v47  ;;  %v3199_v24 = vand.u32 65535, %v10795_v54  ;;  %v10808_v18 = vor.u32 %v4255_v3, %v4254_v49 }
 0x427   : > { %v10812_v6 = vshrl.u32 %v12679_v16, %v10519_v38  ;;  %v5253_v28 = vshll.u32 %v10797_v35, 30  ;;  %v3200_v11 = vshrl.u32 %v10795_v54, 16  ;;  %v3193_v4 = vsel %vm3183_vm1, %v3190_v58, %v3192_v25 }
 0x428   : > { %v3125_v53 = vmul.f32 -0.001358992, %v3124_v55  ;;  %v3132_v20 = vmul.f32 -0.00019511016, %v3124_v55  ;;  %v10818_v10 = vmul.u32 %v3202_v36, %v3199_v24  ;;  %v3140_v23 = vand.u32 3, %v3123_v27 }
 0x429   : > { %v10820_v39 = vsub.s32 %v5250_v26, %v5253_v28  ;;  %v3166_v49 = vshrl.u32 %v12675_v32, %v13072_v29  ;;  %v10824_v3 = vmul.u32 %v3201_v2, %v3200_v11  ;;  %v3203_v5 = vmul.u32 %v3201_v2, %v3199_v24 }
 0x42a   : > { %v3126_v42 = vadd.f32 0.041655596, %v3125_v53  ;;  %v3133_v8 = vadd.f32 0.008332121, %v3132_v20  ;;  %v3207_v57 = vshll.u32 %v10818_v10, 16  ;;  %v3224_v1 = vshrl.u32 %v3193_v4, 16 }
 0x42b   : > { %vm5255_vm12 = vcmp.lt.s32.totalorder %v10820_v39, 0  ;;  %v5256_v34 = vsub.s32 0, %v10820_v39  ;;  %v3187_v47 = vsel %vm3185_vm9, %v3175_v45, 2102212464  ;;  %v3223_v58 = vand.u32 65535, %v3193_v4 }
 0x42c   : > { %v3127_v16 = vmul.f32 %v3126_v42, %v3124_v55  ;;  %v3134_v38 = vmul.f32 %v3133_v8, %v3124_v55  ;;  %vm3211_vm3 = vc.u32 %v3203_v5, %v3207_v57  ;;  %vm3142_vm10 = vcmp.eq.s32.totalorder %v3140_v23, 0 }
 0x42d   : > { %v5257_v29 = vsel %vm5255_vm12, %v5256_v34, %v10820_v39  ;;  %v3209_v51 = vshll.u32 %v10824_v3, 16  ;;  %v3212_v25 = vsel %vm3211_vm3, 1, %v12710_v9  ;;  %v3213_v2 = vadd.s32 %v3207_v57, %v3203_v5 }
 0x42e   : > { %v3128_v26 = vadd.f32 -0.4999988, %v3127_v16  ;;  %v3135_v21 = vadd.f32 -0.16666654, %v3134_v38  ;;  %vm3141_vm14 = vcmp.lt.s32.totalorder %v3140_v23, 2  ;;  %v5258_v20 = vclz %v5257_v29 }
 0x42f   : > { %v3206_v28 = vmul.u32 %v3202_v36, %v3200_v11  ;;  %vm3139_vm9 = vweird.f32 %v13052_v59  ;;  %v3186_v45 = vsel %vm3182_vm4, %v3166_v49, %v3169_v31  ;;  %v3188_v42 = vsel %vm3184_vm15, %v10764_v56, %v3187_v47 }
 0x430   : > { %v3129_v27 = vmul.f32 %v3128_v26, %v3124_v55  ;;  %v3136_v53 = vmul.f32 %v3135_v21, %v3124_v55  ;;  %vm3215_vm13 = vc.u32 %v3213_v2, %v3209_v51  ;;  %v10840_v8 = vmul.u32 %v3224_v1, %v3199_v24  ;;  %v13081_v21 = vld [vmem:[#allocation33_spill] sm:$0xff] }
 0x431   : > { %v6440_v38 = vadd.s32 4294967294, %v5258_v20  ;;  %v3214_v5 = vadd.s32 %v3212_v25, %v3206_v28  ;;  %vm3145_vm7 = vcmp.eq.s32.totalorder %v3140_v23, 2  ;;  %v5246_v55 = vadd.s32 %v10715_v43, %v10710_v40 }
 0x432   : > { %v3130_v4 = vadd.f32 1.0, %v3129_v27  ;;  %v3137_v16 = vadd.f32 1.0, %v3136_v53  ;;  %v3216_v36 = vsel %vm3215_vm13, 1, %v12710_v9  ;;  %v10845_v57 = vmul.u32 %v3223_v58, %v3200_v11 }
 0x433   : > { %vm6441_vm11 = vcmp.lt.s32.totalorder %v6440_v38, 0  ;;  %v3229_v56 = vshll.u32 %v10840_v8, 16  ;;  %v10850_v47 = vsel %vm3183_vm1, %v3186_v45, %v3188_v42  ;;  %v3225_v26 = vmul.u32 %v3223_v58, %v3199_v24 }
 0x434   : > { %v3138_v31 = vmul.f32 %v3137_v16, %v3122_v41  ;;  %v3146_v49 = vxor.u32 2147483648, %v3130_v4  ;;  %v5261_v34 = vsel %vm6441_vm11, 0, %v6440_v38  ;;  %v5306_v29 = vand.u32 2147483647, %v13081_v21 }
 0x435   : > { %v5262_v25 = vsub.s32 32, %v5261_v34  ;;  %v5263_v40 = vshll.u32 %v10820_v39, %v5261_v34  ;;  %v3218_v43 = vadd.s32 %v3216_v36, %v3214_v5  ;;  %vm5154_vm15 = vcmp.lt.s32.totalorder %v13060_v14, 0  ;;  %v5842_v5 = vld [vmem:[%s12342_s5 + $0x28] sm:$0xff] }
 0x436   : > { %v3143_v51 = vxor.u32 2147483648, %v3138_v31  ;;  %v5266_v41 = vsub.s32 4294967266, %v5261_v34  ;;  %v3208_v2 = vshrl.u32 %v10818_v10, 16  ;;  %v3228_v27 = vmul.u32 %v3224_v1, %v3200_v11  ;;  %5956 = vmatpush.msra.mxu2 %v5842_v5  ;;  %6553 = vmatpush.msra.mxu3 %v5842_v5 }
 0x437   : > { %v3231_v53 = vshll.u32 %v10845_v57, 16  ;;  %v3147_v20 = vsel %vm3145_vm7, %v3146_v49, %v3138_v31  ;;  %v5264_v24 = vshrl.u32 %v5246_v55, %v5262_v25  ;;  %vm3233_vm6 = vc.u32 %v3225_v26, %v3229_v56  ;;  %v5841_v55 = vld [vmem:[%s12342_s5 + $0x20] sm:$0xff] }
 0x438   : > { %v3144_v48 = vsel %vm3142_vm10, %v3130_v4, %v3143_v51  ;;  %v5267_v28 = vadd.s32 127, %v5266_v41  ;;  %v3234_v39 = vsel %vm3233_vm6, 1, %v12710_v9  ;;  %v3235_v45 = vadd.s32 %v3229_v56, %v3225_v26  ;;  %v5840_v51 = vld [vmem:[%s12342_s5 + $0x18] sm:$0xff]  ;;  %5957 = vmatpush.msra.mxu2 %v5841_v55  ;;  %6554 = vmatpush.msra.mxu3 %v5841_v55 }
 0x439   : > { %v3148_v58 = vsel %vm3141_vm14, %v3144_v48, %v3147_v20  ;;  %v5265_v16 = vor.u32 %v5264_v24, %v5263_v40  ;;  %v3219_v10 = vadd.s32 %v3218_v43, %v3208_v2  ;;  %v3236_v11 = vadd.s32 %v3234_v39, %v3228_v27  ;;  %v13085_v40 = vld [vmem:[#allocation48_spill] sm:$0xff] }
 0x43a   : > { %v3149_v42 = vsel %vm3139_vm9, nan, %v3148_v58  ;;  %v13082_v1 = vand.u32 2147483647, %v13060_v14  ;;  %v5268_v23 = vshll.u32 %v5267_v28, 23  ;;  %v5276_v38 = vsub.s32 4, %v10797_v35  ;;  %v5839_v48 = vld [vmem:[%s12342_s5 + $0x10] sm:$0xff]  ;;  %5958 = vmatpush.msra.mxu2 %v5840_v51  ;;  %6555 = vmatpush.msra.mxu3 %v5840_v51 }
 0x43b   : > { %6461 = vmatmul.msk.f32.gmra.mxu1 %vm322_vm0, %v3149_v42  ;;  %vm3237_vm2 = vc.u32 %v3235_v45, %v3231_v53  ;;  %v5313_v59 = vand.u32 8388607, %v5306_v29  ;;  %v3210_v36 = vshrl.u32 %v10824_v3, 16  ;;  %v3230_v31 = vshrl.u32 %v10840_v8, 16  ;;  %v13086_v3 = vld [vmem:[#allocation54_spill] sm:$0xff] }
 0x43c   : > { %vm10866_vm4 = vcmp.le.f32.partialorder %v13082_v1, 0.7853982  ;;  %v3232_v49 = vshrl.u32 %v10845_v57, 16  ;;  %v3238_v56 = vsel %vm3237_vm2, 1, %v12710_v9  ;;  %v5269_v34 = vor.u32 4788187, %v5268_v23  ;;  %5959 = vmatpush.msra.mxu2 %v5839_v48  ;;  %6556 = vmatpush.msra.mxu3 %v5839_v48 }
 0x43d   : > { %v5272_v26 = vcvt.s32.f32 %v5265_v16  ;;  %v3240_v25 = vadd.s32 %v3238_v56, %v3236_v11  ;;  %v5323_v43 = vshll.u32 %v12675_v32, %v13085_v40  ;;  %v10888_v41 = vadd.s32 %v3219_v10, %v3210_v36 }
 0x43e   : > { %v5324_v8 = vshrl.u32 %v12669_v63, %v13086_v3  ;;  %v5326_v57 = vshll.u32 %v12669_v63, %v13085_v40  ;;  %v5327_v2 = vshrl.u32 %v12677_v44, %v13086_v3  ;;  %v5270_v27 = vand.u32 2147483647, %v5269_v34 }
 0x43f   : > { %v3241_v20 = vadd.s32 %v3240_v25, %v3230_v31  ;;  %v5314_v24 = vor.u32 8388608, %v5313_v59  ;;  %v5329_v58 = vshll.u32 %v12677_v44, %v13085_v40  ;;  %v5277_v28 = vsel %vm5154_vm15, %v5276_v38, %v10797_v35 }
 0x440   : > { %v3239_v39 = vadd.s32 %v3235_v45, %v3231_v53  ;;  %v10904_v42 = vor.u32 %v5327_v2, %v5326_v57  ;;  %v5330_v16 = vshrl.u32 %v12668_v50, %v13086_v3  ;;  %v5273_v10 = vmul.f32 %v5272_v26, %v5270_v27  ;;  %v13087_v45 = vld [vmem:[#allocation51_spill] sm:$0xff] }
 0x441   : > { %v3242_v11 = vadd.s32 %v3241_v20, %v3232_v49  ;;  %v5325_v1 = vor.u32 %v5324_v8, %v5323_v43  ;;  %vm5338_vm1 = vcmp.lt.s32.totalorder %v8825_v15, 1  ;;  %vm5339_vm3 = vcmp.lt.s32.totalorder %v8825_v15, 2 }
 0x442   : > { %vm3245_vm12 = vc.u32 %v10888_v41, %v3239_v39  ;;  %v5331_v23 = vor.u32 %v5330_v16, %v5329_v58  ;;  %vm5340_vm10 = vcmp.lt.s32.totalorder %v8825_v15, 3  ;;  %v5274_v35 = vxor.u32 2147483648, %v5273_v10 }
 0x443   : > { %v3246_v53 = vadd.s32 1, %v3242_v11  ;;  %v5352_v38 = vsel %vm5340_vm10, %v13087_v45, %v9215_v19  ;;  %v10916_v5 = vshll.u32 %v5314_v24, 8  ;;  %v4259_v59 = vor.u32 %v10812_v6, %v10759_v60 }
 0x444   : > { %vm4260_vm14 = vcmp.lt.s32.totalorder %v10397_v33, 1  ;;  %v3243_v55 = vmul.u32 %v10795_v54, %v10850_v47  ;;  %v5350_v36 = vsel %vm5338_vm1, %v10904_v42, %v5331_v23  ;;  %v5275_v31 = vsel %vm5154_vm15, %v5274_v35, %v5273_v10  ;;  %v13088_v47 = vld [vmem:[#allocation58_spill] sm:$0xff] }
 0x445   : > { %v5279_v19 = vsel %vm10866_vm4, 0, %v5277_v28  ;;  %v3247_v49 = vsel %vm3245_vm12, %v3246_v53, %v3242_v11  ;;  %v5346_v56 = vsel %vm5338_vm1, %v5325_v1, %v10904_v42  ;;  %v10936_v34 = vsel %vm10866_vm4, %v13060_v14, %v5275_v31 }
 0x446   : > { %v3248_v54 = vadd.s32 %v3247_v49, %v3243_v55  ;;  %v5348_v26 = vsel %vm5340_vm10, %v5331_v23, %v13088_v47  ;;  %v5353_v51 = vsel %vm5339_vm3, %v5350_v36, %v5352_v38  ;;  %v5280_v25 = vmul.f32 %v10936_v34, %v10936_v34 }
 0x447   : > { %v5355_v40 = vand.u32 65535, %v10916_v5  ;;  %v10947_v43 = vshrl.u32 %v10916_v5, 16  ;;  %v5357_v8 = vand.u32 65535, %v5353_v51  ;;  %vm4263_vm9 = vcmp.lt.s32.totalorder %v10397_v33, 4 }
 0x448   : > { %v10950_v4 = vand.u32 3, %v5279_v19  ;;  %v3249_v57 = vadd.s32 536870912, %v3248_v54  ;;  %v5358_v2 = vshrl.u32 %v5353_v51, 16  ;;  %v5281_v27 = vmul.f32 -0.001358992, %v5280_v25 }
 0x449   : > { %v5288_v48 = vmul.f32 -0.00019511016, %v5280_v25  ;;  %v5322_v20 = vshrl.u32 %v12675_v32, %v13086_v3  ;;  %v5349_v24 = vsel %vm5339_vm3, %v5346_v56, %v5348_v26  ;;  %v5359_v28 = vmul.u32 %v5357_v8, %v5355_v40 }
 0x44a   : > { %v10956_v58 = vshrl.u32 %v3249_v57, 30  ;;  %v5360_v16 = vmul.u32 %v5358_v2, %v5355_v40  ;;  %v10959_v10 = vmul.u32 %v5357_v8, %v10947_v43  ;;  %v10965_v11 = vsel %vm4260_vm14, %v10722_v46, %v10732_v61 }
 0x44b   : > { %v10970_v3 = vsel %vm4263_vm9, %v10808_v18, 920167782  ;;  %v5282_v35 = vadd.f32 0.041655596, %v5281_v27  ;;  %v5289_v53 = vadd.f32 0.008332121, %v5288_v48  ;;  %v10974_v45 = vadd.s32 %v3239_v39, %v10888_v41 }
 0x44c   : > { %vm5301_vm13 = vcmp.eq.s32.totalorder %v10950_v4, 2  ;;  %v3251_v38 = vshll.u32 %v10956_v58, 30  ;;  %v5363_v55 = vshll.u32 %v5360_v16, 16  ;;  %v5380_v36 = vshrl.u32 %v5349_v24, 16 }
 0x44d   : > { %v5283_v31 = vmul.f32 %v5282_v35, %v5280_v25  ;;  %v5290_v19 = vmul.f32 %v5289_v53, %v5280_v25  ;;  %v10979_v46 = vsel %vm5338_vm1, %v5322_v20, %v5325_v1  ;;  %v5362_v49 = vmul.u32 %v5358_v2, %v10947_v43  ;;  %v13089_v20 = vld [vmem:[#allocation55_spill] sm:$0xff] }
 0x44e   : > { %vm5298_vm7 = vcmp.eq.s32.totalorder %v10950_v4, 0  ;;  %v10983_v56 = vsub.s32 %v3248_v54, %v3251_v38  ;;  %v5365_v47 = vshll.u32 %v10959_v10, 16  ;;  %vm5367_vm11 = vc.u32 %v5359_v28, %v5363_v55 }
 0x44f   : > { %v5379_v41 = vand.u32 65535, %v5349_v24  ;;  %v5284_v39 = vadd.f32 -0.4999988, %v5283_v31  ;;  %v5291_v26 = vadd.f32 -0.16666654, %v5290_v19  ;;  %vm5297_vm15 = vcmp.lt.s32.totalorder %v10950_v4, 2 }
 0x450   : > { %v5368_v51 = vsel %vm5367_vm11, 1, %v12710_v9  ;;  %v5369_v8 = vadd.s32 %v5363_v55, %v5359_v28  ;;  %vm5295_vm6 = vweird.f32 %v13060_v14  ;;  %vm3253_vm4 = vcmp.lt.s32.totalorder %v10983_v56, 0 }
 0x451   : > { %v3254_v1 = vsub.s32 0, %v10983_v56  ;;  %v5343_v54 = vsel %vm5341_vm8, %v5331_v23, 2102212464  ;;  %v5382_v57 = vmul.u32 %v5380_v36, %v5355_v40  ;;  %v5285_v2 = vmul.f32 %v5284_v39, %v5280_v25 }
 0x452   : > { %v5292_v27 = vmul.f32 %v5291_v26, %v5280_v25  ;;  %v5370_v48 = vadd.s32 %v5368_v51, %v5362_v49  ;;  %v3304_v24 = vand.u32 2147483647, %v13089_v20  ;;  %v5364_v53 = vshrl.u32 %v5360_v16, 16 }
 0x453   : > { %v3255_v35 = vsel %vm3253_vm4, %v3254_v1, %v10983_v56  ;;  %v5381_v38 = vmul.u32 %v5379_v41, %v5355_v40  ;;  %v5383_v28 = vmul.u32 %v5379_v41, %v10947_v43  ;;  %v5286_v55 = vadd.f32 1.0, %v5285_v2 }
 0x454   : > { %v5293_v31 = vadd.f32 1.0, %v5292_v27  ;;  %v3256_v19 = vclz %v3255_v35  ;;  %vm5371_vm2 = vc.u32 %v5369_v8, %v5365_v47  ;;  %vm4262_vm1 = vcmp.lt.s32.totalorder %v10397_v33, 3 }
 0x455   : > { %v5344_v23 = vsel %vm5340_vm10, %v10904_v42, %v5343_v54  ;;  %v5366_v25 = vshrl.u32 %v10959_v10, 16  ;;  %v5372_v49 = vsel %vm5371_vm2, 1, %v12710_v9  ;;  %v5385_v39 = vshll.u32 %v5382_v57, 16 }
 0x456   : > { %v5294_v16 = vmul.f32 %v5293_v31, %v10936_v34  ;;  %v5302_v40 = vxor.u32 2147483648, %v5286_v55  ;;  %v6401_v26 = vadd.s32 4294967294, %v3256_v19  ;;  %v5374_v41 = vadd.s32 %v5372_v49, %v5370_v48  ;;  %v5581_v19 = vpop.f32.mrf.mxu1 }
 0x457   : > { %v5384_v51 = vmul.u32 %v5380_v36, %v10947_v43  ;;  %v5387_v1 = vshll.u32 %v5383_v28, 16  ;;  %vm5389_vm8 = vc.u32 %v5381_v38, %v5385_v39  ;;  %v5391_v47 = vadd.s32 %v5385_v39, %v5381_v38  ;;  %v11014_v36 = vld [vmem:[%s12341_s4] ss:$0 sm:$0xff] }
 0x458   : > { %v5299_v8 = vxor.u32 2147483648, %v5294_v16  ;;  %v5303_v2 = vsel %vm5301_vm13, %v5302_v40, %v5294_v16  ;;  %vm6402_vm12 = vcmp.lt.s32.totalorder %v6401_v26, 0  ;;  %v5375_v42 = vadd.s32 %v5374_v41, %v5364_v53 }
 0x459   : > { %v3259_v10 = vsel %vm6402_vm12, 0, %v6401_v26  ;;  %v5386_v54 = vshrl.u32 %v5382_v57, 16  ;;  %v5390_v27 = vsel %vm5389_vm8, 1, %v12710_v9  ;;  %vm5393_vm10 = vc.u32 %v5391_v47, %v5387_v1 }
 0x45a   : > { %v5300_v34 = vsel %vm5298_vm7, %v5286_v55, %v5299_v8  ;;  %v3260_v48 = vsub.s32 32, %v3259_v10  ;;  %v3264_v35 = vsub.s32 4294967266, %v3259_v10  ;;  %v11009_v43 = vadd.s32 %v5391_v47, %v5387_v1 }
 0x45b   : > { %v5304_v53 = vsel %vm5297_vm15, %v5300_v34, %v5303_v2  ;;  %v3261_v57 = vshll.u32 %v10983_v56, %v3259_v10  ;;  %v5392_v38 = vadd.s32 %v5390_v27, %v5384_v51  ;;  %v5394_v31 = vsel %vm5393_vm10, 1, %v12710_v9 }
 0x45c   : > { %v5305_v55 = vsel %vm5295_vm6, nan, %v5304_v53  ;;  %v3262_v49 = vshrl.u32 %v10974_v45, %v3260_v48  ;;  %v3265_v39 = vadd.s32 127, %v3264_v35  ;;  %v11023_v16 = vadd.s32 %v5375_v42, %v5366_v25 }
 0x45d   : > { %v4268_v4 = vsel %vm4260_vm14, %v10732_v61, %v10736_v62  ;;  %6475 = vmatmul.msk.f32.gmra.mxu3 %vm322_vm0, %v5305_v55  ;;  %v5345_v56 = vsel %vm5339_vm3, %v10979_v46, %v5344_v23  ;;  %v5388_v40 = vshrl.u32 %v5383_v28, 16  ;;  %v5396_v26 = vadd.s32 %v5394_v31, %v5392_v38 }
 0x45e   : > { %v4270_v14 = vsel %vm4262_vm1, %v10793_v12, %v10970_v3  ;;  %v3263_v45 = vor.u32 %v3262_v49, %v3261_v57  ;;  %v3266_v25 = vshll.u32 %v3265_v39, 23  ;;  %v3311_v41 = vand.u32 8388607, %v3304_v24 }
 0x45f   : > { %v11040_v61 = vadd.f32 %v11014_v36, %v5581_v19  ;;  %v3274_v51 = vsub.s32 4, %v10956_v58  ;;  %v5397_v1 = vadd.s32 %v5396_v26, %v5386_v54  ;;  %v3322_v15 = vshrl.u32 %v12669_v63, %v9137_v30  ;;  %v13092_v19 = vld [vmem:[#allocation69_spill] sm:$0xff] }
 0x460   : > { %v3267_v46 = vor.u32 4788187, %v3266_v25  ;;  %v5399_v28 = vmul.u32 %v10916_v5, %v5345_v56  ;;  %vm5401_vm3 = vc.u32 %v11023_v16, %v11009_v43  ;;  %v3312_v3 = vor.u32 8388608, %v3311_v41 }
 0x461   : > { %v5398_v23 = vadd.s32 %v5397_v1, %v5388_v40  ;;  %v3321_v47 = vshll.u32 %v12675_v32, %v9090_v22  ;;  %v3324_v8 = vshll.u32 %v12669_v63, %v9090_v22  ;;  %v3325_v2 = vshrl.u32 %v12677_v44, %v9137_v30  ;;  %v13093_v40 = vld [vmem:[#allocation72_spill] sm:$0xff] }
 0x462   : > { %vm4261_vm13 = vcmp.lt.s32.totalorder %v10397_v33, 2  ;;  %v3268_v42 = vand.u32 2147483647, %v3267_v46  ;;  %v3270_v10 = vcvt.s32.f32 %v3263_v45  ;;  %v3327_v5 = vshll.u32 %v12677_v44, %v9090_v22 }
 0x463   : > { %v3328_v54 = vshrl.u32 %v12668_v50, %v9137_v30  ;;  %v5709_v27 = vmul.f32 1.442695, %v11040_v61  ;;  %v5402_v34 = vadd.s32 1, %v5398_v23  ;;  %v11060_v48 = vor.u32 %v3322_v15, %v3321_v47 }
 0x464   : > { %v11062_v35 = vor.u32 %v3325_v2, %v3324_v8  ;;  %v3271_v53 = vmul.f32 %v3270_v10, %v3268_v42  ;;  %vm3338_vm7 = vcmp.lt.s32.totalorder %v9069_v17, 3  ;;  %v11067_v38 = vshll.u32 %v3312_v3, 8 }
 0x465   : > { %v11064_v57 = vor.u32 %v3328_v54, %v3327_v5  ;;  %vm11071_vm11 = vcmp.le.f32.partialorder %v3150_v0, 0.7853982  ;;  %vm3152_vm15 = vcmp.lt.s32.totalorder %v13071_v37, 0  ;;  %v5403_v31 = vsel %vm5401_vm3, %v5402_v34, %v5398_v23 }
 0x466   : > { %v3350_v55 = vsel %vm3338_vm7, %v13092_v19, %v9244_v13  ;;  %v3272_v49 = vxor.u32 2147483648, %v3271_v53  ;;  %v3275_v39 = vsel %vm3152_vm15, %v3274_v51, %v10956_v58  ;;  %v5404_v56 = vadd.s32 %v5403_v31, %v5399_v28  ;;  %v5584_v31 = vpop.f32.mrf.mxu1 }
 0x467   : > { %vm3336_vm6 = vcmp.lt.s32.totalorder %v9069_v17, 1  ;;  %vm3337_vm4 = vcmp.lt.s32.totalorder %v9069_v17, 2  ;;  %v3346_v26 = vsel %vm3338_vm7, %v11064_v57, %v13093_v40  ;;  %v3353_v41 = vand.u32 65535, %v11067_v38 }
 0x468   : > { %v3344_v0 = vsel %vm3336_vm6, %v11060_v48, %v11062_v35  ;;  %v3348_v13 = vsel %vm3336_vm6, %v11062_v35, %v11064_v57  ;;  %v3273_v58 = vsel %vm3152_vm15, %v3272_v49, %v3271_v53  ;;  %v5405_v45 = vadd.s32 536870912, %v5404_v56 }
 0x469   : > { %v3351_v25 = vsel %vm3337_vm4, %v3348_v13, %v3350_v55  ;;  %v11104_v51 = vsel %vm11071_vm11, %v13071_v37, %v3273_v58  ;;  %v11107_v1 = vshrl.u32 %v11067_v38, 16  ;;  %v11112_v28 = vsel %vm4263_vm9, %v10793_v12, 2102212464 }
 0x46a   : > { %v3355_v15 = vand.u32 65535, %v3351_v25  ;;  %v3356_v46 = vshrl.u32 %v3351_v25, 16  ;;  %v3278_v3 = vmul.f32 %v11104_v51, %v11104_v51  ;;  %v11116_v23 = vshrl.u32 %v5405_v45, 30 }
 0x46b   : > { %v11120_v47 = vsel %vm3337_vm4, %v3344_v0, %v3346_v26  ;;  %v11124_v8 = vsel %vm4261_vm13, %v4268_v4, %v4270_v14  ;;  %v3277_v2 = vsel %vm11071_vm11, 0, %v3275_v39  ;;  %v11137_v5 = vsel %vm4260_vm14, %v10736_v62, %v10793_v12 }
 0x46c   : > { %v11128_v42 = vmul.u32 %v3356_v46, %v3353_v41  ;;  %v11131_v10 = vmul.u32 %v3355_v15, %v11107_v1  ;;  %v3279_v54 = vmul.f32 -0.001358992, %v3278_v3  ;;  %v3286_v34 = vmul.f32 -0.00019511016, %v3278_v3 }
 0x46d   : > { %v5407_v53 = vshll.u32 %v11116_v23, 30  ;;  %6578 = vpow2.f32 %v5709_v27  ;;  %v3357_v4 = vmul.u32 %v3355_v15, %v3353_v41  ;;  %v3378_v22 = vshrl.u32 %v11120_v47, 16 }
 0x46e   : > { %v3361_v14 = vshll.u32 %v11128_v42, 16  ;;  %v3280_v19 = vadd.f32 0.041655596, %v3279_v54  ;;  %v3287_v55 = vadd.f32 0.008332121, %v3286_v34  ;;  %v11142_v49 = vand.u32 3, %v3277_v2 }
 0x46f   : > { %v11144_v39 = vsub.s32 %v5404_v56, %v5407_v53  ;;  %v3363_v12 = vshll.u32 %v11131_v10, 16  ;;  %v3377_v40 = vand.u32 65535, %v11120_v47  ;;  %v11151_v58 = vadd.f32 %v11014_v36, %v5584_v31 }
 0x470   : > { %vm3365_vm14 = vc.u32 %v3357_v4, %v3361_v14  ;;  %v3367_v0 = vadd.s32 %v3361_v14, %v3357_v4  ;;  %v3281_v26 = vmul.f32 %v3280_v19, %v3278_v3  ;;  %v3288_v27 = vmul.f32 %v3287_v55, %v3278_v3 }
 0x471   : > { %vm5409_vm2 = vcmp.lt.s32.totalorder %v11144_v39, 0  ;;  %v5410_v13 = vsub.s32 0, %v11144_v39  ;;  %v3360_v45 = vmul.u32 %v3356_v46, %v11107_v1  ;;  %v3366_v56 = vsel %vm3365_vm14, 1, %v12710_v9 }
 0x472   : > { %v11155_v25 = vmul.u32 %v3378_v22, %v3353_v41  ;;  %v3282_v15 = vadd.f32 -0.4999988, %v3281_v26  ;;  %v3289_v2 = vadd.f32 -0.16666654, %v3288_v27  ;;  %vm11158_vm8 = vc.u32 %v3367_v0, %v3363_v12 }
 0x473   : > { %v5411_v54 = vsel %vm5409_vm2, %v5410_v13, %v11144_v39  ;;  %v6579_v34 = vpop.eup %6578  ;;  %vm3296_vm12 = vcmp.eq.s32.totalorder %v11142_v49, 0  ;;  %v3320_v4 = vshrl.u32 %v12675_v32, %v9137_v30  ;;  %vm13096_vm10 = vcmp.lt.s32.totalorder %v9069_v17, 4 }
 0x474   : > { %v5412_v53 = vclz %v5411_v54  ;;  %v3341_v46 = vsel %vm13096_vm10, %v11064_v57, 2102212464  ;;  %v3383_v14 = vshll.u32 %v11155_v25, 16  ;;  %v3283_v31 = vmul.f32 %v3282_v15, %v3278_v3 }
 0x475   : > { %v3290_v19 = vmul.f32 %v3289_v2, %v3278_v3  ;;  %vm3295_vm3 = vcmp.lt.s32.totalorder %v11142_v49, 2  ;;  %v3368_v55 = vadd.s32 %v3366_v56, %v3360_v45  ;;  %v3379_v12 = vmul.u32 %v3377_v40, %v3353_v41 }
 0x476   : > { %vm3293_vm11 = vweird.f32 %v13071_v37  ;;  %vm3299_vm15 = vcmp.eq.s32.totalorder %v11142_v49, 2  ;;  %v5400_v0 = vadd.s32 %v11009_v43, %v11023_v16  ;;  %v6443_v30 = vadd.s32 4294967294, %v5412_v53  ;;  %v13097_v43 = vld [vmem:[#allocation56_spill] sm:$0xff] }
 0x477   : > { %v3370_v57 = vsel %vm11158_vm8, 1, %v12710_v9  ;;  %v3284_v26 = vadd.f32 1.0, %v3283_v31  ;;  %v3291_v27 = vadd.f32 1.0, %v3290_v19  ;;  %v3340_v3 = vsel %vm3336_vm6, %v3320_v4, %v11060_v48 }
 0x478   : > { %vm3387_vm14 = vc.u32 %v3379_v12, %v3383_v14  ;;  %vm6444_vm2 = vcmp.lt.s32.totalorder %v6443_v30, 0  ;;  %v3342_v41 = vsel %vm3338_vm7, %v11062_v35, %v3341_v46  ;;  %v3381_v13 = vmul.u32 %v3377_v40, %v11107_v1 }
 0x479   : > { %v3458_v16 = vand.u32 2147483647, %v13097_v43  ;;  %v3292_v45 = vmul.f32 %v3291_v27, %v11104_v51  ;;  %v3300_v56 = vxor.u32 2147483648, %v3284_v26  ;;  %vm5308_vm8 = vcmp.lt.s32.totalorder %v13081_v21, 0 }
 0x47a   : > { %v5415_v15 = vsel %vm6444_vm2, 0, %v6443_v30  ;;  %v3372_v2 = vadd.s32 %v3370_v57, %v3368_v55  ;;  %v3388_v53 = vsel %vm3387_vm14, 1, %v12710_v9  ;;  %v5430_v35 = vsub.s32 4, %v11116_v23 }
 0x47b   : > { %v5416_v54 = vsub.s32 32, %v5415_v15  ;;  %v5417_v48 = vshll.u32 %v11144_v39, %v5415_v15  ;;  %v5420_v47 = vsub.s32 4294967266, %v5415_v15  ;;  %v3297_v4 = vxor.u32 2147483648, %v3292_v45 }
 0x47c   : > { %v3362_v40 = vshrl.u32 %v11128_v42, 16  ;;  %v3382_v46 = vmul.u32 %v3378_v22, %v11107_v1  ;;  %v3385_v19 = vshll.u32 %v3381_v13, 16  ;;  %v3389_v27 = vadd.s32 %v3383_v14, %v3379_v12  ;;  %v5838_v14 = vld [vmem:[%s12342_s5 + $0x8] sm:$0xff] }
 0x47d   : > { %v5418_v31 = vshrl.u32 %v5400_v0, %v5416_v54  ;;  %v5421_v51 = vadd.s32 127, %v5420_v47  ;;  %v3298_v55 = vsel %vm3296_vm12, %v3284_v26, %v3297_v4  ;;  %v3301_v39 = vsel %vm3299_vm15, %v3300_v56, %v3292_v45  ;;  %5960 = vmatpush.msra.mxu2 %v5838_v14  ;;  %6557 = vmatpush.msra.mxu3 %v5838_v14 }
 0x47e   : > { %vm11198_vm7 = vcmp.le.f32.partialorder %v5306_v29, 0.7853982  ;;  %v3373_v57 = vadd.s32 %v3372_v2, %v3362_v40  ;;  %v3390_v42 = vadd.s32 %v3388_v53, %v3382_v46  ;;  %v3302_v1 = vsel %vm3295_vm3, %v3298_v55, %v3301_v39  ;;  %v5837_v29 = vld [vmem:[%s12342_s5] sm:$0xff]  ;;  %v13100_v40 = vld [vmem:[#allocation61_spill] sm:$0xff] }
 0x47f   : > { %v5419_v22 = vor.u32 %v5418_v31, %v5417_v48  ;;  %v5422_v0 = vshll.u32 %v5421_v51, 23  ;;  %vm3391_vm6 = vc.u32 %v3389_v27, %v3385_v19  ;;  %v3303_v12 = vsel %vm3293_vm11, nan, %v3302_v1  ;;  %5961 = vmatpush.msra.mxu2 %v5837_v29  ;;  %6558 = vmatpush.msra.mxu3 %v5837_v29  ;;  %v13101_v55 = vld [vmem:[#allocation49_spill] sm:$0xff]  ;;  %v13103_v29 = vld [vmem:[#allocation68_spill] sm:$0xff] }
 0x480   : > { %v6477_v26 = vadd.f32 -1.0, %v6579_v34  ;;  %vm5849_vm12 = vcmask 523264   ;;  %v3392_v49 = vsel %vm3391_vm6, 1, %v12710_v9  ;;  %6462 = vmatmul.msk.f32.gmra.mxu1 %vm322_vm0, %v3303_v12  ;;  %vm5677_vm10 = vcmp.gt.f32.partialorder %v11040_v61, 0.0 }
 0x481   : > { %v5423_v45 = vor.u32 4788187, %v5422_v0  ;;  %v5426_v56 = vcvt.s32.f32 %v5419_v22  ;;  %v3364_v15 = vshrl.u32 %v11131_v10, 16  ;;  %v3384_v2 = vshrl.u32 %v11155_v25, 16 }
 0x482   : > { %v5805_v37 = vsel %vm5677_vm10, %v11040_v61, %v6477_v26  ;;  %v3394_v54 = vadd.s32 %v3392_v49, %v3390_v42  ;;  %v3465_v34 = vand.u32 8388607, %v3458_v16  ;;  %v5431_v47 = vsel %vm5308_vm8, %v5430_v35, %v11116_v23  ;;  %v13104_v26 = vld [vmem:[#allocation12_spill] sm:$0xff] }
 0x483   : > { %v5424_v48 = vand.u32 2147483647, %v5423_v45  ;;  %6509 = vmatmul.msk.f32.vlgmr.msra.gmra.mxu2 %vm5849_vm12, %v5805_v37  ;;  %v3343_v10 = vsel %vm3337_vm4, %v3340_v3, %v3342_v41  ;;  %v11226_v53 = vadd.s32 %v3373_v57, %v3364_v15  ;;  %v3386_v61 = vshrl.u32 %v3381_v13, 16  ;;  %v13105_v37 = vld [vmem:[#allocation67_spill] sm:$0xff] }
 0x484   : > { %v11228_v4 = vadd.s32 %v3389_v27, %v3385_v19  ;;  %v3395_v25 = vadd.s32 %v3394_v54, %v3384_v2  ;;  %v3476_v46 = vshrl.u32 %v12669_v63, %v13100_v40  ;;  %v3466_v51 = vor.u32 8388608, %v3465_v34 }
 0x485   : > { %v5427_v31 = vmul.f32 %v5426_v56, %v5424_v48  ;;  %v3475_v39 = vshll.u32 %v12675_v32, %v13101_v55  ;;  %v3479_v23 = vshrl.u32 %v12677_v44, %v13100_v40  ;;  %v3478_v17 = vshll.u32 %v12669_v63, %v13101_v55 }
 0x486   : > { %v3396_v35 = vadd.s32 %v3395_v25, %v3386_v61  ;;  %v3481_v3 = vshll.u32 %v12677_v44, %v13101_v55  ;;  %v3482_v41 = vshrl.u32 %v12668_v50, %v13100_v40  ;;  %v4273_v13 = vsel %vm4263_vm9, %v4259_v59, 1326507024  ;;  %v13102_v59 = vld [vmem:[#allocation70_spill] sm:$0xff] }
 0x487   : > { %v5428_v19 = vxor.u32 2147483648, %v5427_v31  ;;  %v5433_v27 = vsel %vm11198_vm7, 0, %v5431_v47  ;;  %vm3399_vm4 = vc.u32 %v11226_v53, %v11228_v4  ;;  %v11251_v42 = vor.u32 %v3476_v46, %v3475_v39 }
 0x488   : > { %v3400_v57 = vadd.s32 1, %v3396_v35  ;;  %v11253_v1 = vor.u32 %v3479_v23, %v3478_v17  ;;  %v11255_v22 = vor.u32 %v3482_v41, %v3481_v3  ;;  %v5711_v0 = vmul.f32 1.442695, %v11151_v58 }
 0x489   : > { %v5429_v60 = vsel %vm5308_vm8, %v5428_v19, %v5427_v31  ;;  %v3397_v6 = vmul.u32 %v11067_v38, %v3343_v10  ;;  %vm3492_vm9 = vcmp.lt.s32.totalorder %v13102_v59, 3  ;;  %v11271_v45 = vshll.u32 %v3466_v51, 8 }
 0x48a   : > { %v11265_v14 = vsel %vm11198_vm7, %v13081_v21, %v5429_v60  ;;  %v3401_v12 = vsel %vm3399_vm4, %v3400_v57, %v3396_v35  ;;  %v3504_v49 = vsel %vm3492_vm9, %v13104_v26, %v13103_v29  ;;  %v11275_v15 = vand.u32 3, %v5433_v27 }
 0x48b   : > { %v5434_v56 = vmul.f32 %v11265_v14, %v11265_v14  ;;  %v3402_v38 = vadd.s32 %v3401_v12, %v3397_v6  ;;  %vm3490_vm3 = vcmp.lt.s32.totalorder %v13102_v59, 1  ;;  %vm3491_vm11 = vcmp.lt.s32.totalorder %v13102_v59, 2 }
 0x48c   : > { %v3498_v30 = vsel %vm3490_vm3, %v11251_v42, %v11253_v1  ;;  %v3500_v2 = vsel %vm3492_vm9, %v11255_v22, %v13105_v37  ;;  %v3502_v54 = vsel %vm3490_vm3, %v11253_v1, %v11255_v22  ;;  %v3507_v61 = vand.u32 65535, %v11271_v45 }
 0x48d   : > { %v5435_v34 = vmul.f32 -0.001358992, %v5434_v56  ;;  %v5442_v48 = vmul.f32 -0.00019511016, %v5434_v56  ;;  %v3403_v47 = vadd.s32 536870912, %v3402_v38  ;;  %v3505_v10 = vsel %vm3491_vm11, %v3502_v54, %v3504_v49 }
 0x48e   : > { %v3508_v25 = vshrl.u32 %v11271_v45, 16  ;;  %v3509_v46 = vand.u32 65535, %v3505_v10  ;;  %v3510_v31 = vshrl.u32 %v3505_v10, 16  ;;  %v3501_v23 = vsel %vm3491_vm11, %v3498_v30, %v3500_v2 }
 0x48f   : > { %v5436_v51 = vadd.f32 0.041655596, %v5435_v34  ;;  %v5443_v55 = vadd.f32 0.008332121, %v5442_v48  ;;  %v11295_v39 = vshrl.u32 %v3403_v47, 30  ;;  %v11302_v35 = vsel %vm4262_vm1, %v10808_v18, %v4273_v13 }
 0x490   : > { %v4301_v17 = vand.u32 65535, %v11124_v8  ;;  %v3512_v3 = vmul.u32 %v3510_v31, %v3507_v61  ;;  %v11305_v41 = vmul.u32 %v3509_v46, %v3508_v25  ;;  %v4302_v19 = vshrl.u32 %v11124_v8, 16 }
 0x491   : > { %v5437_v27 = vmul.f32 %v5436_v51, %v5434_v56  ;;  %v5444_v57 = vmul.f32 %v5443_v55, %v5434_v56  ;;  %v3405_v60 = vshll.u32 %v11295_v39, 30  ;;  %6580 = vpow2.f32 %v5711_v0 }
 0x492   : > { %v3511_v6 = vmul.u32 %v3509_v46, %v3507_v61  ;;  %v3515_v12 = vshll.u32 %v3512_v3, 16  ;;  %v3532_v29 = vshrl.u32 %v3501_v23, 16  ;;  %vm5451_vm15 = vcmp.lt.s32.totalorder %v11275_v15, 2 }
 0x493   : > { %v5438_v26 = vadd.f32 -0.4999988, %v5437_v27  ;;  %v5445_v49 = vadd.f32 -0.16666654, %v5444_v57  ;;  %v11310_v18 = vsub.s32 %v3402_v38, %v3405_v60  ;;  %v3531_v13 = vand.u32 65535, %v3501_v23 }
 0x494   : > { %vm5449_vm14 = vweird.f32 %v13081_v21  ;;  %v3514_v30 = vmul.u32 %v3510_v31, %v3508_v25  ;;  %v3517_v37 = vshll.u32 %v11305_v41, 16  ;;  %vm3519_vm2 = vc.u32 %v3511_v6, %v3515_v12  ;;  %v13107_v21 = vld [vmem:[#allocation59_spill] sm:$0xff] }
 0x495   : > { %v3521_v2 = vadd.s32 %v3515_v12, %v3511_v6  ;;  %v5439_v54 = vmul.f32 %v5438_v26, %v5434_v56  ;;  %v5446_v34 = vmul.f32 %v5445_v49, %v5434_v56  ;;  %vm3407_vm8 = vcmp.lt.s32.totalorder %v11310_v18, 0 }
 0x496   : > { %v3408_v0 = vsub.s32 0, %v11310_v18  ;;  %vm5452_vm7 = vcmp.eq.s32.totalorder %v11275_v15, 0  ;;  %v3520_v48 = vsel %vm3519_vm2, 1, %v12710_v9  ;;  %v3534_v38 = vmul.u32 %v3532_v29, %v3507_v61 }
 0x497   : > { %vm3523_vm6 = vc.u32 %v3521_v2, %v3517_v37  ;;  %v5440_v47 = vadd.f32 1.0, %v5439_v54  ;;  %v5447_v10 = vadd.f32 1.0, %v5446_v34  ;;  %v3522_v31 = vadd.s32 %v3520_v48, %v3514_v30  ;;  %v6581_v51 = vpop.eup %6580 }
 0x498   : > { %v3409_v46 = vsel %vm3407_vm8, %v3408_v0, %v11310_v18  ;;  %vm5455_vm10 = vcmp.eq.s32.totalorder %v11275_v15, 2  ;;  %v3398_v56 = vadd.s32 %v11228_v4, %v11226_v53  ;;  %v3474_v23 = vshrl.u32 %v12675_v32, %v13100_v40 }
 0x499   : > { %v3410_v55 = vclz %v3409_v46  ;;  %v5448_v27 = vmul.f32 %v5447_v10, %v11265_v14  ;;  %v5456_v57 = vxor.u32 2147483648, %v5440_v47  ;;  %v3524_v60 = vsel %vm3523_vm6, 1, %v12710_v9 }
 0x49a   : > { %v3535_v6 = vmul.u32 %v3531_v13, %v3508_v25  ;;  %v3526_v26 = vadd.s32 %v3524_v60, %v3522_v31  ;;  %v3533_v49 = vmul.u32 %v3531_v13, %v3507_v61  ;;  %v3537_v30 = vshll.u32 %v3534_v38, 16 }
 0x49b   : > { %v6404_v12 = vadd.s32 4294967294, %v3410_v55  ;;  %v5453_v37 = vxor.u32 2147483648, %v5448_v27  ;;  %v5457_v2 = vsel %vm5455_vm10, %v5456_v57, %v5448_v27  ;;  %vm13106_vm4 = vcmp.lt.s32.totalorder %v13102_v59, 4 }
 0x49c   : > { %v3495_v53 = vsel %vm13106_vm4, %v11255_v22, 2102212464  ;;  %v3516_v4 = vshrl.u32 %v3512_v3, 16  ;;  %v3536_v54 = vmul.u32 %v3532_v29, %v3508_v25  ;;  %v3539_v40 = vshll.u32 %v3535_v6, 16 }
 0x49d   : > { %vm6405_vm2 = vcmp.lt.s32.totalorder %v6404_v12, 0  ;;  %vm3541_vm8 = vc.u32 %v3533_v49, %v3537_v30  ;;  %v5454_v14 = vsel %vm5452_vm7, %v5440_v47, %v5453_v37  ;;  %v3543_v48 = vadd.s32 %v3537_v30, %v3533_v49 }
 0x49e   : > { %v3413_v34 = vsel %vm6405_vm2, 0, %v6404_v12  ;;  %v3542_v0 = vsel %vm3541_vm8, 1, %v12710_v9  ;;  %v5458_v61 = vsel %vm5451_vm15, %v5454_v14, %v5457_v2  ;;  %v3527_v46 = vadd.s32 %v3526_v26, %v3516_v4  ;;  %v5587_v12 = vpop.f32.mrf.mxu1  ;;  %v13110_v14 = vld [vmem:[#allocation63_spill] sm:$0xff] }
 0x49f   : > { %v3414_v13 = vsub.s32 32, %v3413_v34  ;;  %v3418_v10 = vsub.s32 4294967266, %v3413_v34  ;;  %v5459_v22 = vsel %vm5449_vm14, nan, %v5458_v61  ;;  %v3518_v25 = vshrl.u32 %v11305_v41, 16 }
 0x4a0   : > { %v3544_v3 = vadd.s32 %v3542_v0, %v3536_v54  ;;  %vm3545_vm6 = vc.u32 %v3543_v48, %v3539_v40  ;;  %6476 = vmatmul.msk.f32.gmra.mxu3 %vm322_vm0, %v5459_v22  ;;  %v3415_v29 = vshll.u32 %v11310_v18, %v3413_v34  ;;  %v3494_v15 = vsel %vm3490_vm3, %v3474_v23, %v11251_v42  ;;  %v13111_v0 = vld [vmem:[#allocation65_spill] sm:$0xff] }
 0x4a1   : > { %v3416_v47 = vshrl.u32 %v3398_v56, %v3414_v13  ;;  %v3419_v31 = vadd.s32 127, %v3418_v10  ;;  %v3546_v55 = vsel %vm3545_vm6, 1, %v12710_v9  ;;  %v3538_v27 = vshrl.u32 %v3534_v38, 16 }
 0x4a2   : > { %v3548_v57 = vadd.s32 %v3546_v55, %v3544_v3  ;;  %v3612_v60 = vand.u32 2147483647, %v13107_v21  ;;  %v3496_v49 = vsel %vm3492_vm9, %v11253_v1, %v3495_v53  ;;  %v11347_v18 = vadd.s32 %v3527_v46, %v3518_v25 }
 0x4a3   : > { %v3417_v41 = vor.u32 %v3416_v47, %v3415_v29  ;;  %v3420_v26 = vshll.u32 %v3419_v31, 23  ;;  %v11353_v56 = vsel %vm4261_vm13, %v11137_v5, %v11302_v35  ;;  %v6478_v42 = vadd.f32 -1.0, %v6581_v51  ;;  %v13112_v31 = vld [vmem:[#allocation53_spill] sm:$0xff] }
 0x4a4   : > { %v3540_v38 = vshrl.u32 %v3535_v6, 16  ;;  %v3549_v23 = vadd.s32 %v3548_v57, %v3538_v27  ;;  %vm11357_vm3 = vcmp.le.f32.partialorder %v3304_v24, 0.7853982  ;;  %vm5678_vm9 = vcmp.gt.f32.partialorder %v11151_v58, 0.0 }
 0x4a5   : > { %v3421_v37 = vor.u32 4788187, %v3420_v26  ;;  %v11362_v1 = vadd.s32 %v3543_v48, %v3539_v40  ;;  %v3619_v2 = vand.u32 8388607, %v3612_v60  ;;  %v11367_v5 = vadd.f32 %v11014_v36, %v5587_v12 }
 0x4a6   : > { %v5806_v35 = vsel %vm5678_vm9, %v11151_v58, %v6478_v42  ;;  %v3497_v51 = vsel %vm3491_vm11, %v3494_v15, %v3496_v49  ;;  %v3550_v24 = vadd.s32 %v3549_v23, %v3540_v38  ;;  %v3424_v53 = vcvt.s32.f32 %v3417_v41 }
 0x4a7   : > { %v3422_v6 = vand.u32 2147483647, %v3421_v37  ;;  %v3428_v4 = vsub.s32 4, %v11295_v39  ;;  %6510 = vmatmul.msk.f32.gmra.mxu2 %vm5849_vm12, %v5806_v35  ;;  %vm3553_vm15 = vc.u32 %v11347_v18, %v11362_v1  ;;  %v3620_v40 = vor.u32 8388608, %v3619_v2 }
 0x4a8   : > { %v3554_v54 = vadd.s32 1, %v3550_v24  ;;  %v3632_v34 = vshll.u32 %v12669_v63, %v13110_v14  ;;  %v3633_v58 = vshrl.u32 %v12677_v44, %v13111_v0  ;;  %v3551_v48 = vmul.u32 %v11271_v45, %v3497_v51 }
 0x4a9   : > { %v3425_v59 = vmul.f32 %v3424_v53, %v3422_v6  ;;  %v3635_v61 = vshll.u32 %v12677_v44, %v13110_v14  ;;  %v3636_v13 = vshrl.u32 %v12668_v50, %v13111_v0  ;;  %vm3306_vm11 = vcmp.lt.s32.totalorder %v13089_v20, 0 }
 0x4aa   : > { %v3555_v10 = vsel %vm3553_vm15, %v3554_v54, %v3550_v24  ;;  %v3630_v46 = vshrl.u32 %v12669_v63, %v13111_v0  ;;  %v3634_v22 = vor.u32 %v3633_v58, %v3632_v34  ;;  %vm3646_vm14 = vcmp.lt.s32.totalorder %v9280_v52, 3  ;;  %v13113_v58 = vld [vmem:[#allocation17_spill] sm:$0xff] }
 0x4ab   : > { %v3426_v25 = vxor.u32 2147483648, %v3425_v59  ;;  %v3556_v3 = vadd.s32 %v3555_v10, %v3551_v48  ;;  %v3637_v29 = vor.u32 %v3636_v13, %v3635_v61  ;;  %v3429_v45 = vsel %vm3306_vm11, %v3428_v4, %v11295_v39 }
 0x4ac   : > { %v3629_v47 = vshll.u32 %v12675_v32, %v13110_v14  ;;  %v3658_v55 = vsel %vm3646_vm14, %v13112_v31, %v9470_v7  ;;  %v11396_v15 = vshll.u32 %v3620_v40, 8  ;;  %v5713_v27 = vmul.f32 1.442695, %v11367_v5 }
 0x4ad   : > { %v3427_v57 = vsel %vm3306_vm11, %v3426_v25, %v3425_v59  ;;  %v3557_v12 = vadd.s32 536870912, %v3556_v3  ;;  %vm3644_vm7 = vcmp.lt.s32.totalorder %v9280_v52, 1  ;;  %vm3645_vm10 = vcmp.lt.s32.totalorder %v9280_v52, 2 }
 0x4ae   : > { %v11403_v39 = vsel %vm11357_vm3, %v13089_v20, %v3427_v57  ;;  %v3631_v41 = vor.u32 %v3630_v46, %v3629_v47  ;;  %v3656_v26 = vsel %vm3644_vm7, %v3634_v22, %v3637_v29  ;;  %v3431_v7 = vsel %vm11357_vm3, 0, %v3429_v45 }
 0x4af   : > { %v3432_v49 = vmul.f32 %v11403_v39, %v11403_v39  ;;  %v11412_v42 = vshrl.u32 %v3557_v12, 30  ;;  %v3659_v38 = vsel %vm3645_vm10, %v3656_v26, %v3658_v55  ;;  %v11417_v23 = vand.u32 65535, %v11396_v15 }
 0x4b0   : > { %v11420_v37 = vshrl.u32 %v11396_v15, 16  ;;  %v3663_v2 = vand.u32 65535, %v3659_v38  ;;  %v3664_v35 = vshrl.u32 %v3659_v38, 16  ;;  %6582 = vpow2.f32 %v5713_v27 }
 0x4b1   : > { %v3433_v51 = vmul.f32 -0.001358992, %v3432_v49  ;;  %v3440_v30 = vmul.f32 -0.00019511016, %v3432_v49  ;;  %v3559_v24 = vshll.u32 %v11412_v42, 30  ;;  %v11423_v6 = vand.u32 3, %v3431_v7 }
 0x4b2   : > { %v3652_v53 = vsel %vm3644_vm7, %v3631_v41, %v3634_v22  ;;  %v11428_v4 = vmul.u32 %v3664_v35, %v11417_v23  ;;  %v11431_v54 = vmul.u32 %v3663_v2, %v11420_v37  ;;  %v3654_v59 = vsel %vm3646_vm14, %v3637_v29, %v13113_v58 }
 0x4b3   : > { %v3434_v40 = vadd.f32 0.041655596, %v3433_v51  ;;  %v3441_v14 = vadd.f32 0.008332121, %v3440_v30  ;;  %v11433_v34 = vsub.s32 %v3556_v3, %v3559_v24  ;;  %v3628_v48 = vshrl.u32 %v12675_v32, %v13111_v0 }
 0x4b4   : > { %vm13114_vm4 = vcmp.lt.s32.totalorder %v9280_v52, 4  ;;  %v3665_v13 = vmul.u32 %v3663_v2, %v11417_v23  ;;  %v3669_v10 = vshll.u32 %v11428_v4, 16  ;;  %v3655_v45 = vsel %vm3645_vm10, %v3652_v53, %v3654_v59 }
 0x4b5   : > { %v3649_v61 = vsel %vm13114_vm4, %v3637_v29, 2102212464  ;;  %v3435_v46 = vmul.f32 %v3434_v40, %v3432_v49  ;;  %v3442_v25 = vmul.f32 %v3441_v14, %v3432_v49  ;;  %vm3561_vm2 = vcmp.lt.s32.totalorder %v11433_v34, 0 }
 0x4b6   : > { %v3562_v3 = vsub.s32 0, %v11433_v34  ;;  %v3671_v47 = vshll.u32 %v11431_v54, 16  ;;  %vm3673_vm8 = vc.u32 %v3665_v13, %v3669_v10  ;;  %v3675_v0 = vadd.s32 %v3669_v10, %v3665_v13  ;;  %v6583_v31 = vpop.eup %6582 }
 0x4b7   : > { %v3436_v55 = vadd.f32 -0.4999988, %v3435_v46  ;;  %v3443_v29 = vadd.f32 -0.16666654, %v3442_v25  ;;  %v3674_v57 = vsel %vm3673_vm8, 1, %v12710_v9  ;;  %vm3450_vm6 = vcmp.eq.s32.totalorder %v11423_v6, 0 }
 0x4b8   : > { %v3563_v27 = vsel %vm3561_vm2, %v3562_v3, %v11433_v34  ;;  %v3648_v26 = vsel %vm3644_vm7, %v3628_v48, %v3631_v41  ;;  %v3668_v7 = vmul.u32 %v3664_v35, %v11420_v37  ;;  %vm3449_vm3 = vcmp.lt.s32.totalorder %v11423_v6, 2 }
 0x4b9   : > { %v3564_v12 = vclz %v3563_v27  ;;  %v3437_v38 = vmul.f32 %v3436_v55, %v3432_v49  ;;  %v3444_v2 = vmul.f32 %v3443_v29, %v3432_v49  ;;  %v3650_v51 = vsel %vm3646_vm14, %v3634_v22, %v3649_v61 }
 0x4ba   : > { %vm3677_vm9 = vc.u32 %v3675_v0, %v3671_v47  ;;  %vm3447_vm15 = vweird.f32 %v13089_v20  ;;  %v3676_v24 = vadd.s32 %v3674_v57, %v3668_v7  ;;  %v3685_v53 = vand.u32 65535, %v3655_v45 }
 0x4bb   : > { %v6407_v30 = vadd.s32 4294967294, %v3564_v12  ;;  %v3686_v40 = vshrl.u32 %v3655_v45, 16  ;;  %v3438_v14 = vadd.f32 1.0, %v3437_v38  ;;  %v3445_v58 = vadd.f32 1.0, %v3444_v2 }
 0x4bc   : > { %vm3453_vm11 = vcmp.eq.s32.totalorder %v11423_v6, 2  ;;  %v3678_v41 = vsel %vm3677_vm9, 1, %v12710_v9  ;;  %v3552_v49 = vadd.s32 %v11362_v1, %v11347_v18  ;;  %v11465_v22 = vsel %vm3645_vm10, %v3648_v26, %v3650_v51 }
 0x4bd   : > { %vm6408_vm7 = vcmp.lt.s32.totalorder %v6407_v30, 0  ;;  %v3688_v35 = vmul.u32 %v3686_v40, %v11417_v23  ;;  %v3446_v59 = vmul.f32 %v3445_v58, %v11403_v39  ;;  %v3454_v48 = vxor.u32 2147483648, %v3438_v14  ;;  %v13115_v58 = vld [vmem:[#allocation62_spill] sm:$0xff] }
 0x4be   : > { %v3567_v61 = vsel %vm6408_vm7, 0, %v6407_v30  ;;  %v3689_v13 = vmul.u32 %v3685_v53, %v11420_v37  ;;  %v3670_v25 = vshrl.u32 %v11428_v4, 16  ;;  %v3680_v3 = vadd.s32 %v3678_v41, %v3676_v24 }
 0x4bf   : > { %v3568_v10 = vsub.s32 32, %v3567_v61  ;;  %v3572_v46 = vsub.s32 4294967266, %v3567_v61  ;;  %v3451_v45 = vxor.u32 2147483648, %v3446_v59  ;;  %v3569_v18 = vshll.u32 %v11433_v34, %v3567_v61 }
 0x4c0   : > { %v3687_v52 = vmul.u32 %v3685_v53, %v11417_v23  ;;  %v3691_v1 = vshll.u32 %v3688_v35, 16  ;;  %v3455_v47 = vsel %vm3453_vm11, %v3454_v48, %v3446_v59  ;;  %v3690_v55 = vmul.u32 %v3686_v40, %v11420_v37  ;;  %v5590_v37 = vpop.f32.mrf.mxu1 }
 0x4c1   : > { %v3570_v0 = vshrl.u32 %v3552_v49, %v3568_v10  ;;  %v3573_v39 = vadd.s32 127, %v3572_v46  ;;  %v3452_v29 = vsel %vm3450_vm6, %v3438_v14, %v3451_v45  ;;  %v3693_v27 = vshll.u32 %v3689_v13, 16  ;;  %v13118_v46 = vld [vmem:[#allocation66_spill] sm:$0xff] }
 0x4c2   : > { %vm3695_vm14 = vc.u32 %v3687_v52, %v3691_v1  ;;  %v3697_v4 = vadd.s32 %v3691_v1, %v3687_v52  ;;  %v3456_v57 = vsel %vm3449_vm3, %v3452_v29, %v3455_v47  ;;  %v6479_v7 = vadd.f32 -1.0, %v6583_v31 }
 0x4c3   : > { %v3571_v34 = vor.u32 %v3570_v0, %v3569_v18  ;;  %v3574_v12 = vshll.u32 %v3573_v39, 23  ;;  %v3696_v23 = vsel %vm3695_vm14, 1, %v12710_v9  ;;  %v3457_v26 = vsel %vm3447_vm15, nan, %v3456_v57  ;;  %v13119_v18 = vld [vmem:[#allocation57_spill] sm:$0xff] }
 0x4c4   : > { %v3681_v38 = vadd.s32 %v3680_v3, %v3670_v25  ;;  %v3698_v2 = vadd.s32 %v3696_v23, %v3690_v55  ;;  %6463 = vmatmul.msk.f32.gmra.mxu1 %vm322_vm0, %v3457_v26  ;;  %v3582_v30 = vsub.s32 4, %v11412_v42  ;;  %vm5679_vm10 = vcmp.gt.f32.partialorder %v11367_v5, 0.0  ;;  %v13122_v23 = vld [vmem:[#allocation78_spill] sm:$0xff] }
 0x4c5   : > { %v3575_v51 = vor.u32 4788187, %v3574_v12  ;;  %vm3699_vm4 = vc.u32 %v3697_v4, %v3693_v27  ;;  %v5807_v6 = vsel %vm5679_vm10, %v11367_v5, %v6479_v7  ;;  %v3672_v24 = vshrl.u32 %v11431_v54, 16  ;;  %v13121_v12 = vld [vmem:[#allocation39_spill] sm:$0xff] }
 0x4c6   : > { %v3692_v53 = vshrl.u32 %v3688_v35, 16  ;;  %v3700_v20 = vsel %vm3699_vm4, 1, %v12710_v9  ;;  %v3578_v31 = vcvt.s32.f32 %v3571_v34  ;;  %6511 = vmatmul.msk.f32.gmra.mxu2 %vm5849_vm12, %v5807_v6  ;;  %v3766_v41 = vand.u32 2147483647, %v13115_v58 }
 0x4c7   : > { %v3576_v40 = vand.u32 2147483647, %v3575_v51  ;;  %v3702_v14 = vadd.s32 %v3700_v20, %v3698_v2  ;;  %v11492_v49 = vadd.f32 %v11014_v36, %v5590_v37  ;;  %vm11496_vm2 = vcmp.le.f32.partialorder %v3458_v16, 0.7853982 }
 0x4c8   : > { %vm3460_vm8 = vcmp.lt.s32.totalorder %v13097_v43, 0  ;;  %v11501_v5 = vadd.s32 %v3681_v38, %v3672_v24  ;;  %v3694_v48 = vshrl.u32 %v3689_v13, 16  ;;  %v11506_v10 = vadd.s32 %v3697_v4, %v3693_v27  ;;  %v13120_v4 = vld [vmem:[#allocation74_spill] sm:$0xff] }
 0x4c9   : > { %v3579_v54 = vmul.f32 %v3578_v31, %v3576_v40  ;;  %v3583_v35 = vsel %vm3460_vm8, %v3582_v30, %v11412_v42  ;;  %v3703_v61 = vadd.s32 %v3702_v14, %v3692_v53  ;;  %v3705_v36 = vmul.u32 %v11396_v15, %v11465_v22 }
 0x4ca   : > { %v3773_v16 = vand.u32 8388607, %v3766_v41  ;;  %v3784_v25 = vshrl.u32 %v12669_v63, %v13118_v46  ;;  %v3786_v52 = vshll.u32 %v12669_v63, %v13119_v18  ;;  %v3787_v42 = vshrl.u32 %v12677_v44, %v13118_v46 }
 0x4cb   : > { %v3580_v3 = vxor.u32 2147483648, %v3579_v54  ;;  %v3704_v45 = vadd.s32 %v3703_v61, %v3694_v48  ;;  %vm3707_vm6 = vc.u32 %v11501_v5, %v11506_v10  ;;  %v3783_v15 = vshll.u32 %v12675_v32, %v13119_v18 }
 0x4cc   : > { %v3789_v22 = vshll.u32 %v12677_v44, %v13119_v18  ;;  %v3790_v13 = vshrl.u32 %v12668_v50, %v13118_v46  ;;  %v3774_v0 = vor.u32 8388608, %v3773_v16  ;;  %v11528_v39 = vor.u32 %v3787_v42, %v3786_v52 }
 0x4cd   : > { %v3581_v1 = vsel %vm3460_vm8, %v3580_v3, %v3579_v54  ;;  %v3708_v47 = vadd.s32 1, %v3704_v45  ;;  %v11533_v29 = vor.u32 %v3784_v25, %v3783_v15  ;;  %vm3800_vm3 = vcmp.lt.s32.totalorder %v13120_v4, 3  ;;  %v13124_v25 = vld [vmem:[#allocation73_spill] sm:$0xff] }
 0x4ce   : > { %v3584_v55 = vsel %vm11496_vm2, %v13097_v43, %v3581_v1  ;;  %v11535_v27 = vor.u32 %v3790_v13, %v3789_v22  ;;  %vm3798_vm9 = vcmp.lt.s32.totalorder %v13120_v4, 1  ;;  %v3812_v26 = vsel %vm3800_vm3, %v13122_v23, %v13121_v12  ;;  %v13125_v1 = vld [vmem:[#allocation84_spill] sm:$0xff] }
 0x4cf   : > { %v3586_v57 = vmul.f32 %v3584_v55, %v3584_v55  ;;  %v3709_v34 = vsel %vm3707_vm6, %v3708_v47, %v3704_v45  ;;  %v4279_v7 = vand.u32 65535, %v11353_v56  ;;  %v5715_v38 = vmul.f32 1.442695, %v11492_v49 }
 0x4d0   : > { %v3710_v2 = vadd.s32 %v3709_v34, %v3705_v36  ;;  %v3810_v37 = vsel %vm3798_vm9, %v11528_v39, %v11535_v27  ;;  %v4280_v51 = vshrl.u32 %v11353_v56, 16  ;;  %vm3799_vm15 = vcmp.lt.s32.totalorder %v13120_v4, 2  ;;  %v13123_v36 = vld [vmem:[#allocation81_spill] sm:$0xff] }
 0x4d1   : > { %v3587_v30 = vmul.f32 -0.001358992, %v3586_v57  ;;  %v3594_v6 = vmul.f32 -0.00019511016, %v3586_v57  ;;  %v3585_v24 = vsel %vm11496_vm2, 0, %v3583_v35  ;;  %v3813_v20 = vsel %vm3799_vm15, %v3810_v37, %v3812_v26 }
 0x4d2   : > { %v3711_v53 = vadd.s32 536870912, %v3710_v2  ;;  %v11555_v40 = vshll.u32 %v3774_v0, 8  ;;  %v3806_v54 = vsel %vm3798_vm9, %v11533_v29, %v11528_v39  ;;  %v3818_v48 = vshrl.u32 %v3813_v20, 16 }
 0x4d3   : > { %v3588_v31 = vadd.f32 0.041655596, %v3587_v30  ;;  %v3595_v14 = vadd.f32 0.008332121, %v3594_v6  ;;  %v3808_v59 = vsel %vm3800_vm3, %v11535_v27, %v13123_v36  ;;  %v3817_v16 = vand.u32 65535, %v3813_v20 }
 0x4d4   : > { %v11561_v61 = vshrl.u32 %v3711_v53, 30  ;;  %v3815_v35 = vand.u32 65535, %v11555_v40  ;;  %v11571_v3 = vmul.u32 %v4301_v17, %v13124_v25  ;;  %v3602_v52 = vand.u32 3, %v3585_v24 }
 0x4d5   : > { %v3589_v45 = vmul.f32 %v3588_v31, %v3586_v57  ;;  %v3596_v18 = vmul.f32 %v3595_v14, %v3586_v57  ;;  %v11576_v42 = vmul.u32 %v4302_v19, %v13124_v25  ;;  %v3816_v22 = vshrl.u32 %v11555_v40, 16 }
 0x4d6   : > { %v3713_v15 = vshll.u32 %v11561_v61, 30  ;;  %v3820_v13 = vmul.u32 %v3818_v48, %v3815_v35  ;;  %v11583_v47 = vmul.u32 %v4301_v17, %v13125_v1  ;;  %v3809_v12 = vsel %vm3799_vm15, %v3806_v54, %v3808_v59 }
 0x4d7   : > { %v3590_v0 = vadd.f32 -0.4999988, %v3589_v45  ;;  %v3597_v34 = vadd.f32 -0.16666654, %v3596_v18  ;;  %6584 = vpow2.f32 %v5715_v38  ;;  %v11589_v26 = vmul.u32 %v3817_v16, %v3816_v22 }
 0x4d8   : > { %v11587_v23 = vsub.s32 %v3710_v2, %v3713_v15  ;;  %v3823_v37 = vshll.u32 %v3820_v13, 16  ;;  %vm3603_vm11 = vcmp.lt.s32.totalorder %v3602_v52, 2  ;;  %vm3604_vm7 = vcmp.eq.s32.totalorder %v3602_v52, 0 }
 0x4d9   : > { %v3591_v30 = vmul.f32 %v3590_v0, %v3586_v57  ;;  %v3598_v6 = vmul.f32 %v3597_v34, %v3586_v57  ;;  %v3819_v24 = vmul.u32 %v3817_v16, %v3815_v35  ;;  %vm3601_vm14 = vweird.f32 %v13097_v43 }
 0x4da   : > { %vm3607_vm10 = vcmp.eq.s32.totalorder %v3602_v52, 2  ;;  %vm3715_vm4 = vcmp.lt.s32.totalorder %v11587_v23, 0  ;;  %v3716_v17 = vsub.s32 0, %v11587_v23  ;;  %v3840_v53 = vshrl.u32 %v3809_v12, 16 }
 0x4db   : > { %v3592_v20 = vadd.f32 1.0, %v3591_v30  ;;  %v3599_v38 = vadd.f32 1.0, %v3598_v6  ;;  %vm3827_vm2 = vc.u32 %v3819_v24, %v3823_v37  ;;  %v3829_v2 = vadd.s32 %v3823_v37, %v3819_v24 }
 0x4dc   : > { %v3717_v31 = vsel %vm3715_vm4, %v3716_v17, %v11587_v23  ;;  %v3822_v14 = vmul.u32 %v3818_v48, %v3816_v22  ;;  %v3825_v57 = vshll.u32 %v11589_v26, 16  ;;  %v3839_v54 = vand.u32 65535, %v3809_v12 }
 0x4dd   : > { %v3600_v36 = vmul.f32 %v3599_v38, %v3584_v55  ;;  %v3608_v59 = vxor.u32 2147483648, %v3592_v20  ;;  %v3718_v16 = vclz %v3717_v31  ;;  %v3828_v45 = vsel %vm3827_vm2, 1, %v12710_v9  ;;  %v6585_v18 = vpop.eup %6584 }
 0x4de   : > { %v3782_v15 = vshrl.u32 %v12675_v32, %v13118_v46  ;;  %v3830_v0 = vadd.s32 %v3828_v45, %v3822_v14  ;;  %vm3831_vm8 = vc.u32 %v3829_v2, %v3825_v57  ;;  %v3842_v34 = vmul.u32 %v3840_v53, %v3815_v35 }
 0x4df   : > { %v3605_v30 = vxor.u32 2147483648, %v3600_v36  ;;  %v3706_v37 = vadd.s32 %v11506_v10, %v11501_v5  ;;  %v6410_v48 = vadd.s32 4294967294, %v3718_v16  ;;  %v3832_v6 = vsel %vm3831_vm8, 1, %v12710_v9 }
 0x4e0   : > { %v3802_v55 = vsel %vm3798_vm9, %v3782_v15, %v11533_v29  ;;  %v3834_v12 = vadd.s32 %v3832_v6, %v3830_v0  ;;  %v3843_v24 = vmul.u32 %v3839_v54, %v3816_v22  ;;  %v3845_v17 = vshll.u32 %v3842_v34, 16 }
 0x4e1   : > { %v3606_v38 = vsel %vm3604_vm7, %v3592_v20, %v3605_v30  ;;  %v3609_v46 = vsel %vm3607_vm10, %v3608_v59, %v3600_v36  ;;  %vm6411_vm6 = vcmp.lt.s32.totalorder %v6410_v48, 0  ;;  %vm13126_vm4 = vcmp.lt.s32.totalorder %v13120_v4, 4  ;;  %v13130_v4 = vld [vmem:[#allocation76_spill] sm:$0xff] }
 0x4e2   : > { %v3803_v2 = vsel %vm13126_vm4, %v11535_v27, 2102212464  ;;  %v3610_v5 = vsel %vm3603_vm11, %v3606_v38, %v3609_v46  ;;  %v3721_v10 = vsel %vm6411_vm6, 0, %v6410_v48  ;;  %v3824_v31 = vshrl.u32 %v3820_v13, 16  ;;  %v13127_v13 = vld [vmem:[#allocation6_spill] sm:$0xff] }
 0x4e3   : > { %v3841_v14 = vmul.u32 %v3839_v54, %v3815_v35  ;;  %v3611_v29 = vsel %vm3601_vm14, nan, %v3610_v5  ;;  %v3722_v57 = vsub.s32 32, %v3721_v10  ;;  %v3726_v16 = vsub.s32 4294967266, %v3721_v10 }
 0x4e4   : > { %v3844_v45 = vmul.u32 %v3840_v53, %v3816_v22  ;;  %6464 = vmatmul.msk.f32.gmra.mxu1 %vm322_vm0, %v3611_v29  ;;  %v3835_v20 = vadd.s32 %v3834_v12, %v3824_v31  ;;  %v3847_v36 = vshll.u32 %v3843_v24, 16  ;;  %v3723_v15 = vshll.u32 %v11587_v23, %v3721_v10  ;;  %v5593_v31 = vpop.f32.mrf.mxu1  ;;  %v13131_v29 = vld [vmem:[#allocation98_spill] sm:$0xff] }
 0x4e5   : > { %vm3849_vm9 = vc.u32 %v3841_v14, %v3845_v17  ;;  %v3851_v59 = vadd.s32 %v3845_v17, %v3841_v14  ;;  %v3724_v27 = vshrl.u32 %v3706_v37, %v3722_v57  ;;  %v3727_v52 = vadd.s32 127, %v3726_v16 }
 0x4e6   : > { %v3850_v0 = vsel %vm3849_vm9, 1, %v12710_v9  ;;  %v3804_v43 = vsel %vm3800_vm3, %v11528_v39, %v3803_v2  ;;  %v3920_v22 = vand.u32 2147483647, %v13127_v13  ;;  %v3826_v30 = vshrl.u32 %v11589_v26, 16 }
 0x4e7   : > { %v3852_v35 = vadd.s32 %v3850_v0, %v3844_v45  ;;  %vm3853_vm11 = vc.u32 %v3851_v59, %v3847_v36  ;;  %v3725_v53 = vor.u32 %v3724_v27, %v3723_v15  ;;  %v3728_v54 = vshll.u32 %v3727_v52, 23  ;;  %v11657_v27 = vld [vmem:[%s12341_s4] ss:$0 sm:$0xff] }
 0x4e8   : > { %v3854_v48 = vsel %vm3853_vm11, 1, %v12710_v9  ;;  %vm3614_vm7 = vcmp.lt.s32.totalorder %v13107_v21, 0  ;;  %v6480_v23 = vadd.f32 -1.0, %v6585_v18  ;;  %v3846_v37 = vshrl.u32 %v3842_v34, 16 }
 0x4e9   : > { %v3856_v6 = vadd.s32 %v3854_v48, %v3852_v35  ;;  %vm11625_vm14 = vcmp.le.f32.partialorder %v3612_v60, 0.7853982  ;;  %v3729_v39 = vor.u32 4788187, %v3728_v54  ;;  %vm5680_vm3 = vcmp.gt.f32.partialorder %v11492_v49, 0.0  ;;  %v13132_v48 = vld [vmem:[#allocation13_spill] sm:$0xff] }
 0x4ea   : > { %v3805_v17 = vsel %vm3799_vm15, %v3802_v55, %v3804_v43  ;;  %v11632_v26 = vadd.s32 %v3835_v20, %v3826_v30  ;;  %v5808_v38 = vsel %vm5680_vm3, %v11492_v49, %v6480_v23  ;;  %v3848_v46 = vshrl.u32 %v3843_v24, 16 }
 0x4eb   : > { %v3857_v18 = vadd.s32 %v3856_v6, %v3846_v37  ;;  %v3927_v34 = vand.u32 8388607, %v3920_v22  ;;  %v3730_v2 = vand.u32 2147483647, %v3729_v39  ;;  %v3732_v60 = vcvt.s32.f32 %v3725_v53  ;;  %6512 = vmatmul.msk.f32.gmra.mxu2 %vm5849_vm12, %v5808_v38  ;;  %v13133_v6 = vld [vmem:[#allocation79_spill] sm:$0xff] }
 0x4ec   : > { %v3736_v5 = vsub.s32 4, %v11561_v61  ;;  %v3855_v10 = vadd.s32 %v3851_v59, %v3847_v36  ;;  %v3938_v55 = vshrl.u32 %v12669_v63, %v13130_v4  ;;  %v3940_v49 = vshll.u32 %v12669_v63, %v13131_v29  ;;  %v13134_v39 = vld [vmem:[#allocation75_spill] sm:$0xff] }
 0x4ed   : > { %v3858_v14 = vadd.s32 %v3857_v18, %v3848_v46  ;;  %v3941_v24 = vshrl.u32 %v12677_v44, %v13130_v4  ;;  %v3733_v57 = vmul.f32 %v3732_v60, %v3730_v2  ;;  %v3928_v16 = vor.u32 8388608, %v3927_v34 }
 0x4ee   : > { %vm3861_vm15 = vc.u32 %v11632_v26, %v3855_v10  ;;  %v3937_v45 = vshll.u32 %v12675_v32, %v13131_v29  ;;  %v3943_v59 = vshll.u32 %v12677_v44, %v13131_v29  ;;  %v3944_v15 = vshrl.u32 %v12668_v50, %v13130_v4 }
 0x4ef   : > { %v3862_v20 = vadd.s32 1, %v3858_v14  ;;  %v11648_v36 = vor.u32 %v3941_v24, %v3940_v49  ;;  %v11660_v52 = vadd.f32 %v11657_v27, %v5593_v31  ;;  %v3734_v0 = vxor.u32 2147483648, %v3733_v57  ;;  %v13135_v49 = vld [vmem:[#allocation82_spill] sm:$0xff] }
 0x4f0   : > { %v3737_v43 = vsel %vm3614_vm7, %v3736_v5, %v11561_v61  ;;  %v3859_v35 = vmul.u32 %v11555_v40, %v3805_v17  ;;  %v11666_v54 = vor.u32 %v3938_v55, %v3937_v45  ;;  %v3945_v30 = vor.u32 %v3944_v15, %v3943_v59 }
 0x4f1   : > { %v3863_v53 = vsel %vm3861_vm15, %v3862_v20, %v3858_v14  ;;  %vm3954_vm10 = vcmp.lt.s32.totalorder %v13132_v48, 3  ;;  %v3735_v23 = vsel %vm3614_vm7, %v3734_v0, %v3733_v57  ;;  %vm3952_vm2 = vcmp.lt.s32.totalorder %v13132_v48, 1 }
 0x4f2   : > { %v3864_v37 = vadd.s32 %v3863_v53, %v3859_v35  ;;  %v3966_v38 = vsel %vm3954_vm10, %v13134_v39, %v13133_v6  ;;  %v11679_v40 = vmul.u32 %v4302_v19, %v13125_v1  ;;  %v11684_v61 = vsel %vm11625_vm14, %v13107_v21, %v3735_v23 }
 0x4f3   : > { %v3964_v17 = vsel %vm3952_vm2, %v11648_v36, %v3945_v30  ;;  %v11689_v46 = vshll.u32 %v3928_v16, 8  ;;  %v11694_v18 = vmul.u32 %v4279_v7, %v13124_v25  ;;  %v3740_v8 = vmul.f32 %v11684_v61, %v11684_v61 }
 0x4f4   : > { %v3865_v19 = vadd.s32 536870912, %v3864_v37  ;;  %vm3953_vm8 = vcmp.lt.s32.totalorder %v13132_v48, 2  ;;  %v5717_v34 = vmul.f32 1.442695, %v11660_v52  ;;  %v3739_v2 = vsel %vm11625_vm14, 0, %v3737_v43 }
 0x4f5   : > { %v3960_v60 = vsel %vm3952_vm2, %v11666_v54, %v11648_v36  ;;  %v3967_v5 = vsel %vm3953_vm8, %v3964_v17, %v3966_v38  ;;  %v3741_v31 = vmul.f32 -0.001358992, %v3740_v8  ;;  %v3748_v14 = vmul.f32 -0.00019511016, %v3740_v8 }
 0x4f6   : > { %v11708_v55 = vshrl.u32 %v3865_v19, 30  ;;  %v3971_v29 = vand.u32 65535, %v3967_v5  ;;  %v3962_v24 = vsel %vm3954_vm10, %v3945_v30, %v13135_v49  ;;  %v3969_v12 = vand.u32 65535, %v11689_v46 }
 0x4f7   : > { %v11715_v57 = vshrl.u32 %v11689_v46, 16  ;;  %v3972_v16 = vshrl.u32 %v3967_v5, 16  ;;  %v11720_v45 = vmul.u32 %v4280_v51, %v13124_v25  ;;  %v3742_v20 = vadd.f32 0.041655596, %v3741_v31 }
 0x4f8   : > { %v3749_v59 = vadd.f32 0.008332121, %v3748_v14  ;;  %v3867_v15 = vshll.u32 %v11708_v55, 30  ;;  %v11726_v0 = vmul.u32 %v4279_v7, %v13125_v1  ;;  %v11728_v43 = vand.u32 3, %v3739_v2 }
 0x4f9   : > { %v11730_v35 = vmul.u32 %v3972_v16, %v3969_v12  ;;  %v11733_v53 = vmul.u32 %v3971_v29, %v11715_v57  ;;  %v3743_v23 = vmul.f32 %v3742_v20, %v3740_v8  ;;  %v3963_v39 = vsel %vm3953_vm8, %v3960_v60, %v3962_v24 }
 0x4fa   : > { %v3750_v6 = vmul.f32 %v3749_v59, %v3740_v8  ;;  %v11735_v25 = vsub.s32 %v3864_v37, %v3867_v15  ;;  %6586 = vpow2.f32 %v5717_v34  ;;  %v3860_v38 = vadd.s32 %v3855_v10, %v11632_v26 }
 0x4fb   : > { %v3973_v17 = vmul.u32 %v3971_v29, %v3969_v12  ;;  %v3977_v7 = vshll.u32 %v11730_v35, 16  ;;  %v3744_v19 = vadd.f32 -0.4999988, %v3743_v23  ;;  %vm3758_vm4 = vcmp.eq.s32.totalorder %v11728_v43, 0 }
 0x4fc   : > { %v3751_v2 = vadd.f32 -0.16666654, %v3750_v6  ;;  %vm3869_vm6 = vcmp.lt.s32.totalorder %v11735_v25, 0  ;;  %v3870_v5 = vsub.s32 0, %v11735_v25  ;;  %vm3761_vm9 = vcmp.eq.s32.totalorder %v11728_v43, 2 }
 0x4fd   : > { %v3979_v37 = vshll.u32 %v11733_v53, 16  ;;  %vm3981_vm11 = vc.u32 %v3973_v17, %v3977_v7  ;;  %v3983_v60 = vadd.s32 %v3977_v7, %v3973_v17  ;;  %v3994_v34 = vshrl.u32 %v3963_v39, 16 }
 0x4fe   : > { %v3745_v31 = vmul.f32 %v3744_v19, %v3740_v8  ;;  %v3752_v26 = vmul.f32 %v3751_v2, %v3740_v8  ;;  %vm3757_vm7 = vcmp.lt.s32.totalorder %v11728_v43, 2  ;;  %v3871_v10 = vsel %vm3869_vm6, %v3870_v5, %v11735_v25 }
 0x4ff   : > { %v3982_v14 = vsel %vm3981_vm11, 1, %v12710_v9  ;;  %vm3755_vm14 = vweird.f32 %v13107_v21  ;;  %v3872_v29 = vclz %v3871_v10  ;;  %v3936_v49 = vshrl.u32 %v12675_v32, %v13130_v4 }
 0x500   : > { %vm13136_vm3 = vcmp.lt.s32.totalorder %v13132_v48, 4  ;;  %v3976_v20 = vmul.u32 %v3972_v16, %v11715_v57  ;;  %v3746_v59 = vadd.f32 1.0, %v3745_v31  ;;  %v3753_v15 = vadd.f32 1.0, %v3752_v26  ;;  %v6587_v23 = vpop.eup %6586 }
 0x501   : > { %v3957_v24 = vsel %vm13136_vm3, %v3945_v30, 2102212464  ;;  %vm3985_vm15 = vc.u32 %v3983_v60, %v3979_v37  ;;  %v3993_v8 = vand.u32 65535, %v3963_v39  ;;  %v6413_v6 = vadd.s32 4294967294, %v3872_v29 }
 0x502   : > { %v3956_v17 = vsel %vm3952_vm2, %v3936_v49, %v11666_v54  ;;  %v3984_v7 = vadd.s32 %v3982_v14, %v3976_v20  ;;  %v3996_v19 = vmul.u32 %v3994_v34, %v3969_v12  ;;  %v3754_v2 = vmul.f32 %v3753_v15, %v11684_v61 }
 0x503   : > { %v3762_v4 = vxor.u32 2147483648, %v3746_v59  ;;  %v3958_v30 = vsel %vm3954_vm10, %v11648_v36, %v3957_v24  ;;  %v3986_v16 = vsel %vm3985_vm15, 1, %v12710_v9  ;;  %vm3768_vm6 = vcmp.lt.s32.totalorder %v13115_v58, 0  ;;  %v5596_v24 = vpop.f32.mrf.mxu1 }
 0x504   : > { %vm6414_vm11 = vcmp.lt.s32.totalorder %v6413_v6, 0  ;;  %v3890_v39 = vsub.s32 4, %v11708_v55  ;;  %v3978_v5 = vshrl.u32 %v11730_v35, 16  ;;  %v3999_v37 = vshll.u32 %v3996_v19, 16 }
 0x505   : > { %v3759_v54 = vxor.u32 2147483648, %v3754_v2  ;;  %v3875_v60 = vsel %vm6414_vm11, 0, %v6413_v6  ;;  %v3995_v31 = vmul.u32 %v3993_v8, %v3969_v12  ;;  %v3997_v61 = vmul.u32 %v3993_v8, %v11715_v57 }
 0x506   : > { %v3876_v26 = vsub.s32 32, %v3875_v60  ;;  %v3880_v10 = vsub.s32 4294967266, %v3875_v60  ;;  %v3988_v14 = vadd.s32 %v3986_v16, %v3984_v7  ;;  %v3998_v36 = vmul.u32 %v3994_v34, %v11715_v57 }
 0x507   : > { %v3760_v29 = vsel %vm3758_vm4, %v3746_v59, %v3759_v54  ;;  %v3763_v49 = vsel %vm3761_vm9, %v3762_v4, %v3754_v2  ;;  %v3877_v35 = vshll.u32 %v11735_v25, %v3875_v60  ;;  %vm4003_vm10 = vc.u32 %v3995_v31, %v3999_v37 }
 0x508   : > { %v3764_v12 = vsel %vm3757_vm7, %v3760_v29, %v3763_v49  ;;  %v3878_v20 = vshrl.u32 %v3860_v38, %v3876_v26  ;;  %v3881_v15 = vadd.s32 127, %v3880_v10  ;;  %v4004_v8 = vsel %vm4003_vm10, 1, %v12710_v9  ;;  %v13140_v29 = vld [vmem:[#allocation71_spill] sm:$0xff] }
 0x509   : > { %v3765_v57 = vsel %vm3755_vm14, nan, %v3764_v12  ;;  %vm11780_vm2 = vcmp.le.f32.partialorder %v3766_v41, 0.7853982  ;;  %v4001_v59 = vshll.u32 %v3997_v61, 16  ;;  %v4005_v6 = vadd.s32 %v3999_v37, %v3995_v31  ;;  %v13139_v41 = vld [vmem:[#allocation9_spill] sm:$0xff] }
 0x50a   : > { %v4006_v25 = vadd.s32 %v4004_v8, %v3998_v36  ;;  %6465 = vmatmul.msk.f32.gmra.mxu1 %vm322_vm0, %v3765_v57  ;;  %v11786_v43 = vadd.f32 %v11657_v27, %v5596_v24  ;;  %v3879_v38 = vor.u32 %v3878_v20, %v3877_v35  ;;  %v3882_v7 = vshll.u32 %v3881_v15, 23 }
 0x50b   : > { %v3989_v2 = vadd.s32 %v3988_v14, %v3978_v5  ;;  %v6481_v4 = vadd.f32 -1.0, %v6587_v23  ;;  %v3959_v21 = vsel %vm3953_vm8, %v3956_v17, %v3958_v30  ;;  %vm4007_vm4 = vc.u32 %v4005_v6, %v4001_v59 }
 0x50c   : > { %v4074_v16 = vand.u32 2147483647, %v13139_v41  ;;  %v3883_v54 = vor.u32 4788187, %v3882_v7  ;;  %vm5681_vm9 = vcmp.gt.f32.partialorder %v11660_v52, 0.0  ;;  %v3980_v37 = vshrl.u32 %v11733_v53, 16 }
 0x50d   : > { %v4008_v60 = vsel %vm4007_vm4, 1, %v12710_v9  ;;  %v3891_v31 = vsel %vm3768_vm6, %v3890_v39, %v11708_v55  ;;  %v5809_v5 = vsel %vm5681_vm9, %v11660_v52, %v6481_v4  ;;  %v4000_v23 = vshrl.u32 %v3996_v19, 16  ;;  %v13141_v52 = vld [vmem:[#allocation77_spill] sm:$0xff]  ;;  %v13143_v7 = vld [vmem:[#allocation86_spill] sm:$0xff] }
 0x50e   : > { %v4010_v26 = vadd.s32 %v4008_v60, %v4006_v25  ;;  %v3884_v48 = vand.u32 2147483647, %v3883_v54  ;;  %v3886_v17 = vcvt.s32.f32 %v3879_v38  ;;  %6513 = vmatmul.msk.f32.gmra.mxu2 %vm5849_vm12, %v5809_v5  ;;  %v11799_v30 = vadd.s32 %v3989_v2, %v3980_v37  ;;  %v13144_v2 = vld [vmem:[#allocation85_spill] sm:$0xff] }
 0x50f   : > { %v4002_v10 = vshrl.u32 %v3997_v61, 16  ;;  %v11801_v14 = vadd.s32 %v4005_v6, %v4001_v59  ;;  %v4081_v36 = vand.u32 8388607, %v4074_v16  ;;  %v4092_v55 = vshrl.u32 %v12669_v63, %v13140_v29 }
 0x510   : > { %v4011_v53 = vadd.s32 %v4010_v26, %v4000_v23  ;;  %v3887_v39 = vmul.f32 %v3886_v17, %v3884_v48  ;;  %v4091_v19 = vshll.u32 %v12675_v32, %v13141_v52  ;;  %v4094_v49 = vshll.u32 %v12669_v63, %v13141_v52 }
 0x511   : > { %v4095_v24 = vshrl.u32 %v12677_v44, %v13140_v29  ;;  %v4082_v35 = vor.u32 8388608, %v4081_v36  ;;  %v4097_v12 = vshll.u32 %v12677_v44, %v13141_v52  ;;  %v4098_v20 = vshrl.u32 %v12668_v50, %v13140_v29 }
 0x512   : > { %v4012_v61 = vadd.s32 %v4011_v53, %v4002_v10  ;;  %v11820_v15 = vmul.u32 %v4280_v51, %v13125_v1  ;;  %v3888_v8 = vxor.u32 2147483648, %v3887_v39  ;;  %v3893_v63 = vsel %vm11780_vm2, 0, %v3891_v31  ;;  %v13142_v1 = vld [vmem:[#allocation80_spill] sm:$0xff] }
 0x513   : > { %vm4015_vm8 = vc.u32 %v11799_v30, %v11801_v14  ;;  %v11826_v59 = vor.u32 %v4092_v55, %v4091_v19  ;;  %v11828_v6 = vor.u32 %v4095_v24, %v4094_v49  ;;  %v11830_v44 = vor.u32 %v4098_v20, %v4097_v12 }
 0x514   : > { %v4016_v57 = vadd.s32 1, %v4012_v61  ;;  %v5719_v50 = vmul.f32 1.442695, %v11786_v43  ;;  %v3889_v56 = vsel %vm3768_vm6, %v3888_v8, %v3887_v39  ;;  %v4013_v51 = vmul.u32 %v11689_v46, %v3959_v21  ;;  %v13145_v21 = vld [vmem:[#allocation2_spill] sm:$0xff] }
 0x515   : > { %vm4108_vm7 = vcmp.lt.s32.totalorder %v13142_v1, 3  ;;  %v11840_v25 = vsel %vm11780_vm2, %v13115_v58, %v3889_v56  ;;  %v11846_v54 = vshll.u32 %v4082_v35, 8  ;;  %v11850_v60 = vand.u32 3, %v3893_v63 }
 0x516   : > { %v4017_v38 = vsel %vm4015_vm8, %v4016_v57, %v4012_v61  ;;  %v4120_v4 = vsel %vm4108_vm7, %v13144_v2, %v13143_v7  ;;  %v3894_v37 = vmul.f32 %v11840_v25, %v11840_v25  ;;  %vm4106_vm14 = vcmp.lt.s32.totalorder %v13142_v1, 1 }
 0x517   : > { %v4018_v46 = vadd.s32 %v4017_v38, %v4013_v51  ;;  %vm4107_vm3 = vcmp.lt.s32.totalorder %v13142_v1, 2  ;;  %v4114_v34 = vsel %vm4106_vm14, %v11826_v59, %v11828_v6  ;;  %v4116_v31 = vsel %vm4108_vm7, %v11830_v44, %v13145_v21 }
 0x518   : > { %v4118_v5 = vsel %vm4106_vm14, %v11828_v6, %v11830_v44  ;;  %v3895_v23 = vmul.f32 -0.001358992, %v3894_v37  ;;  %v3902_v26 = vmul.f32 -0.00019511016, %v3894_v37  ;;  %v4123_v10 = vand.u32 65535, %v11846_v54 }
 0x519   : > { %v4019_v48 = vadd.s32 536870912, %v4018_v46  ;;  %v4121_v17 = vsel %vm4107_vm3, %v4118_v5, %v4120_v4  ;;  %v4124_v53 = vshrl.u32 %v11846_v54, 16  ;;  %v4117_v49 = vsel %vm4107_vm3, %v4114_v34, %v4116_v31 }
 0x51a   : > { %v4125_v36 = vand.u32 65535, %v4121_v17  ;;  %v4126_v55 = vshrl.u32 %v4121_v17, 16  ;;  %v3896_v39 = vadd.f32 0.041655596, %v3895_v23  ;;  %v3903_v52 = vadd.f32 0.008332121, %v3902_v26 }
 0x51b   : > { %v11870_v19 = vshrl.u32 %v4019_v48, 30  ;;  %v4285_v24 = vshll.u32 %v11720_v45, 16  ;;  %v4287_v61 = vshll.u32 %v11726_v0, 16  ;;  %6588 = vpow2.f32 %v5719_v50 }
 0x51c   : > { %v4128_v35 = vmul.u32 %v4126_v55, %v4123_v10  ;;  %v11876_v12 = vmul.u32 %v4125_v36, %v4124_v53  ;;  %v3897_v20 = vmul.f32 %v3896_v39, %v3894_v37  ;;  %v3904_v8 = vmul.f32 %v3903_v52, %v3894_v37 }
 0x51d   : > { %v4021_v63 = vshll.u32 %v11870_v19, 30  ;;  %vm3915_vm15 = vcmp.eq.s32.totalorder %v11850_v60, 2  ;;  %v4127_v57 = vmul.u32 %v4125_v36, %v4123_v10  ;;  %v4148_v51 = vshrl.u32 %v4117_v49, 16 }
 0x51e   : > { %v4131_v56 = vshll.u32 %v4128_v35, 16  ;;  %v3898_v38 = vadd.f32 -0.4999988, %v3897_v20  ;;  %v3905_v7 = vadd.f32 -0.16666654, %v3904_v8  ;;  %v4147_v4 = vand.u32 65535, %v4117_v49 }
 0x51f   : > { %v11880_v2 = vsub.s32 %v4018_v46, %v4021_v63  ;;  %vm3912_vm6 = vcmp.eq.s32.totalorder %v11850_v60, 0  ;;  %v4130_v34 = vmul.u32 %v4126_v55, %v4124_v53  ;;  %v4133_v21 = vshll.u32 %v11876_v12, 16 }
 0x520   : > { %vm4135_vm11 = vc.u32 %v4127_v57, %v4131_v56  ;;  %v4137_v50 = vadd.s32 %v4131_v56, %v4127_v57  ;;  %v3899_v31 = vmul.f32 %v3898_v38, %v3894_v37  ;;  %v3906_v5 = vmul.f32 %v3905_v7, %v3894_v37 }
 0x521   : > { %vm3911_vm10 = vcmp.lt.s32.totalorder %v11850_v60, 2  ;;  %vm4023_vm2 = vcmp.lt.s32.totalorder %v11880_v2, 0  ;;  %v4024_v23 = vsub.s32 0, %v11880_v2  ;;  %vm11890_vm4 = vc.u32 %v11694_v18, %v4285_v24  ;;  %v6589_v17 = vpop.eup %6588 }
 0x522   : > { %vm3909_vm9 = vweird.f32 %v13115_v58  ;;  %v4090_v26 = vshrl.u32 %v12675_v32, %v13140_v29  ;;  %v4136_v37 = vsel %vm4135_vm11, 1, %v12710_v9  ;;  %vm4139_vm8 = vc.u32 %v4137_v50, %v4133_v21 }
 0x523   : > { %v4150_v48 = vmul.u32 %v4148_v51, %v4123_v10  ;;  %v3900_v36 = vadd.f32 1.0, %v3899_v31  ;;  %v3907_v55 = vadd.f32 1.0, %v3906_v5  ;;  %v4025_v39 = vsel %vm4023_vm2, %v4024_v23, %v11880_v2 }
 0x524   : > { %v4138_v52 = vadd.s32 %v4136_v37, %v4130_v34  ;;  %v4014_v49 = vadd.s32 %v11801_v14, %v11799_v30  ;;  %v4026_v20 = vclz %v4025_v39  ;;  %v4110_v8 = vsel %vm4106_vm14, %v4090_v26, %v11826_v59 }
 0x525   : > { %v4132_v63 = vshrl.u32 %v4128_v35, 16  ;;  %v3908_v32 = vmul.f32 %v3907_v55, %v11840_v25  ;;  %v3916_v29 = vxor.u32 2147483648, %v3900_v36  ;;  %v4140_v57 = vsel %vm4139_vm8, 1, %v12710_v9 }
 0x526   : > { %v4151_v56 = vmul.u32 %v4147_v4, %v4124_v53  ;;  %v6416_v38 = vadd.s32 4294967294, %v4026_v20  ;;  %v4142_v7 = vadd.s32 %v4140_v57, %v4138_v52  ;;  %v4149_v21 = vmul.u32 %v4147_v4, %v4123_v10 }
 0x527   : > { %v4153_v50 = vshll.u32 %v4150_v48, 16  ;;  %v3913_v34 = vxor.u32 2147483648, %v3908_v32  ;;  %v3917_v30 = vsel %vm3915_vm15, %v3916_v29, %v3908_v32  ;;  %v4111_v14 = vsel %vm4109_vm5, %v11830_v44, 2102212464 }
 0x528   : > { %v4152_v59 = vmul.u32 %v4148_v51, %v4124_v53  ;;  %vm6417_vm14 = vcmp.lt.s32.totalorder %v6416_v38, 0  ;;  %v4143_v35 = vadd.s32 %v4142_v7, %v4132_v63  ;;  %v4155_v25 = vshll.u32 %v4151_v56, 16 }
 0x529   : > { %vm4157_vm11 = vc.u32 %v4149_v21, %v4153_v50  ;;  %v3914_v31 = vsel %vm3912_vm6, %v3900_v36, %v3913_v34  ;;  %v4029_v5 = vsel %vm6417_vm14, 0, %v6416_v38  ;;  %v4159_v4 = vadd.s32 %v4153_v50, %v4149_v21 }
 0x52a   : > { %v4158_v10 = vsel %vm4157_vm11, 1, %v12710_v9  ;;  %v3918_v23 = vsel %vm3911_vm10, %v3914_v31, %v3917_v30  ;;  %v4030_v26 = vsub.s32 32, %v4029_v5  ;;  %v4034_v37 = vsub.s32 4294967266, %v4029_v5 }
 0x52b   : > { %v4112_v44 = vsel %vm4108_vm7, %v11828_v6, %v4111_v14  ;;  %v3919_v53 = vsel %vm3909_vm9, nan, %v3918_v23  ;;  %v4134_v51 = vshrl.u32 %v11876_v12, 16  ;;  %v4160_v55 = vadd.s32 %v4158_v10, %v4152_v59 }
 0x52c   : > { %vm4161_vm5 = vc.u32 %v4159_v4, %v4155_v25  ;;  %6466 = vmatmul.msk.f32.gmra.mxu1 %vm322_vm0, %v3919_v53  ;;  %v4031_v36 = vshll.u32 %v11880_v2, %v4029_v5  ;;  %v4032_v39 = vshrl.u32 %v4014_v49, %v4030_v26  ;;  %v4035_v60 = vadd.s32 127, %v4034_v37  ;;  %v5599_v26 = vpop.f32.mrf.mxu1 }
 0x52d   : > { %v4162_v52 = vsel %vm4161_vm5, 1, %v12710_v9  ;;  %v4290_v20 = vsel %vm11890_vm4, 1, %v12710_v9  ;;  %v11928_v6 = vadd.s32 %v4143_v35, %v4134_v51  ;;  %v4154_v58 = vshrl.u32 %v4150_v48, 16 }
 0x52e   : > { %v4164_v63 = vadd.s32 %v4162_v52, %v4160_v55  ;;  %v4291_v12 = vadd.s32 %v4285_v24, %v11694_v18  ;;  %v4033_v32 = vor.u32 %v4032_v39, %v4031_v36  ;;  %v4036_v29 = vshll.u32 %v4035_v60, 23 }
 0x52f   : > { %v4113_v2 = vsel %vm4107_vm3, %v4110_v8, %v4112_v44  ;;  %v6482_v49 = vadd.f32 -1.0, %v6589_v17  ;;  %v4156_v57 = vshrl.u32 %v4151_v56, 16  ;;  %v11935_v38 = vadd.s32 %v4159_v4, %v4155_v25 }
 0x530   : > { %v4165_v7 = vadd.s32 %v4164_v63, %v4154_v58  ;;  %v4292_v46 = vadd.s32 %v4290_v20, %v11820_v15  ;;  %v4037_v21 = vor.u32 4788187, %v4036_v29  ;;  %vm5682_vm7 = vcmp.gt.f32.partialorder %v11786_v43, 0.0 }
 0x531   : > { %v4307_v48 = vshll.u32 %v11576_v42, 16  ;;  %v5810_v50 = vsel %vm5682_vm7, %v11786_v43, %v6482_v49  ;;  %v4167_v24 = vmul.u32 %v11846_v54, %v4113_v2  ;;  %vm4169_vm3 = vc.u32 %v11928_v6, %v11935_v38 }
 0x532   : > { %v4166_v18 = vadd.s32 %v4165_v7, %v4156_v57  ;;  %v4038_v1 = vand.u32 2147483647, %v4037_v21  ;;  %v4040_v17 = vcvt.s32.f32 %v4033_v32  ;;  %6514 = vmatmul.msk.f32.gmra.mxu2 %vm5849_vm12, %v5810_v50  ;;  %vm4293_vm15 = vc.u32 %v4291_v12, %v4287_v61  ;;  %v13150_v12 = vld [vmem:[#allocation24_spill] sm:$0xff] }
 0x533   : > { %v4309_v15 = vshll.u32 %v11583_v47, 16  ;;  %v4294_v56 = vsel %vm4293_vm15, 1, %v12710_v9  ;;  %vm4311_vm6 = vc.u32 %v11571_v3, %v4307_v48  ;;  %v4313_v43 = vadd.s32 %v4307_v48, %v11571_v3 }
 0x534   : > { %v4170_v8 = vadd.s32 1, %v4166_v18  ;;  %v4041_v54 = vmul.f32 %v4040_v17, %v4038_v1  ;;  %v4286_v34 = vshrl.u32 %v11720_v45, 16  ;;  %v4296_v30 = vadd.s32 %v4294_v56, %v4292_v46  ;;  %v5602_v17 = vpop.f32.mrf.mxu1 }
 0x535   : > { %v4312_v14 = vsel %vm4311_vm6, 1, %v12710_v9  ;;  %v4288_v35 = vshrl.u32 %v11726_v0, 16  ;;  %vm4315_vm10 = vc.u32 %v4313_v43, %v4309_v15  ;;  %v4266_v3 = vsel %vm4262_vm1, %v10736_v62, %v11112_v28 }
 0x536   : > { %v4171_v59 = vsel %vm4169_vm3, %v4170_v8, %v4166_v18  ;;  %v4314_v61 = vadd.s32 %v4312_v14, %v11679_v40  ;;  %v4042_v25 = vxor.u32 2147483648, %v4041_v54  ;;  %v4297_v5 = vadd.s32 %v4296_v30, %v4286_v34 }
 0x537   : > { %v4172_v31 = vadd.s32 %v4171_v59, %v4167_v24  ;;  %v4316_v10 = vsel %vm4315_vm10, 1, %v12710_v9  ;;  %vm3922_vm2 = vcmp.lt.s32.totalorder %v13127_v13, 0  ;;  %v4308_v45 = vshrl.u32 %v11576_v42, 16 }
 0x538   : > { %v4318_v4 = vadd.s32 %v4316_v10, %v4314_v61  ;;  %vm11964_vm4 = vcmp.le.f32.partialorder %v3920_v22, 0.7853982  ;;  %v4043_v0 = vsel %vm3922_vm2, %v4042_v25, %v4041_v54  ;;  %v11970_v23 = vadd.s32 %v4297_v5, %v4288_v35 }
 0x539   : > { %v4173_v9 = vadd.s32 536870912, %v4172_v31  ;;  %v4046_v62 = vsel %vm11964_vm4, %v13127_v13, %v4043_v0  ;;  %v4310_v28 = vshrl.u32 %v11583_v47, 16  ;;  %v11978_v22 = vadd.s32 %v4313_v43, %v4309_v15 }
 0x53a   : > { %v4319_v42 = vadd.s32 %v4318_v4, %v4308_v45  ;;  %v4048_v37 = vmul.f32 %v4046_v62, %v4046_v62  ;;  %v4267_v53 = vsel %vm4261_vm13, %v10965_v11, %v4266_v3  ;;  %v4044_v51 = vsub.s32 4, %v11870_v19 }
 0x53b   : > { %v11976_v44 = vshrl.u32 %v4173_v9, 30  ;;  %vm4323_vm1 = vc.u32 %v11970_v23, %v11978_v22  ;;  %v11988_v47 = vadd.f32 %v11657_v27, %v5599_v26  ;;  %v4321_v33 = vmul.u32 %v13150_v12, %v4267_v53 }
 0x53c   : > { %v4320_v55 = vadd.s32 %v4319_v42, %v4310_v28  ;;  %v4049_v36 = vmul.f32 -0.001358992, %v4048_v37  ;;  %v4056_v39 = vmul.f32 -0.00019511016, %v4048_v37  ;;  %v4045_v11 = vsel %vm3922_vm2, %v4044_v51, %v11870_v19  ;;  %v5605_v53 = vpop.f32.mrf.mxu1 }
 0x53d   : > { %v4175_v60 = vshll.u32 %v11976_v44, 30  ;;  %v5721_v57 = vmul.f32 1.442695, %v11988_v47  ;;  %v4047_v46 = vsel %vm11964_vm4, 0, %v4045_v11  ;;  %v12000_v34 = vadd.f32 %v11657_v27, %v5602_v17 }
 0x53e   : > { %v4324_v52 = vadd.s32 1, %v4320_v55  ;;  %v4050_v20 = vadd.f32 0.041655596, %v4049_v36  ;;  %v4057_v58 = vadd.f32 0.008332121, %v4056_v39  ;;  %v4064_v19 = vand.u32 3, %v4047_v46 }
 0x53f   : > { %v4176_v63 = vsub.s32 %v4172_v31, %v4175_v60  ;;  %6590 = vpow2.f32 %v5721_v57  ;;  %v4168_v61 = vadd.s32 %v11935_v38, %v11928_v6  ;;  %v5723_v45 = vmul.f32 1.442695, %v12000_v34 }
 0x540   : > { %v4325_v32 = vsel %vm4323_vm1, %v4324_v52, %v4320_v55  ;;  %v4051_v29 = vmul.f32 %v4050_v20, %v4048_v37  ;;  %v4058_v2 = vmul.f32 %v4057_v58, %v4048_v37  ;;  %vm4065_vm8 = vcmp.lt.s32.totalorder %v4064_v19, 2 }
 0x541   : > { %vm4177_vm13 = vcmp.lt.s32.totalorder %v4176_v63, 0  ;;  %v4178_v49 = vsub.s32 0, %v4176_v63  ;;  %v4326_v7 = vadd.s32 %v4325_v32, %v4321_v33  ;;  %vm4066_vm14 = vcmp.eq.s32.totalorder %v4064_v19, 0 }
 0x542   : > { %v4052_v21 = vadd.f32 -0.4999988, %v4051_v29  ;;  %v4059_v48 = vadd.f32 -0.16666654, %v4058_v2  ;;  %vm4069_vm11 = vcmp.eq.s32.totalorder %v4064_v19, 2  ;;  %vm4063_vm7 = vweird.f32 %v13127_v13 }
 0x543   : > { %v4179_v50 = vsel %vm4177_vm13, %v4178_v49, %v4176_v63  ;;  %v4327_v15 = vadd.s32 536870912, %v4326_v7  ;;  %vm5683_vm3 = vcmp.gt.f32.partialorder %v11988_v47, 0.0  ;;  %v5606_v36 = vadd.f32 %v11657_v27, %v5605_v53 }
 0x544   : > { %v4180_v18 = vclz %v4179_v50  ;;  %v4053_v24 = vmul.f32 %v4052_v21, %v4048_v37  ;;  %v4060_v1 = vmul.f32 %v4059_v48, %v4048_v37  ;;  %6592 = vpow2.f32 %v5723_v45  ;;  %v13153_v45 = vld [vmem:[#allocation20_spill] sm:$0xff] }
 0x545   : > { %v11997_v54 = vshrl.u32 %v4327_v15, 30  ;;  %v6591_v3 = vpop.eup %6590  ;;  %v5725_v20 = vmul.f32 1.442695, %v5606_v36  ;;  %v4322_v12 = vadd.s32 %v11978_v22, %v11970_v23  ;;  %vm12017_vm6 = vcmp.le.f32.partialorder %v4074_v16, 0.7853982 }
 0x546   : > { %v6419_v8 = vadd.s32 4294967294, %v4180_v18  ;;  %v4054_v56 = vadd.f32 1.0, %v4053_v24  ;;  %v4061_v43 = vadd.f32 1.0, %v4060_v1  ;;  %v6483_v37 = vadd.f32 -1.0, %v6591_v3  ;;  %v5608_v18 = vpop.f32.mrf.mxu1 }
 0x547   : > { %v4329_v35 = vshll.u32 %v11997_v54, 30  ;;  %6594 = vpow2.f32 %v5725_v20  ;;  %vm4076_vm10 = vcmp.lt.s32.totalorder %v13139_v41, 0  ;;  %v4198_v22 = vsub.s32 4, %v11976_v44 }
 0x548   : > { %vm6420_vm9 = vcmp.lt.s32.totalorder %v6419_v8, 0  ;;  %v4062_v30 = vmul.f32 %v4061_v43, %v4046_v62  ;;  %v4070_v14 = vxor.u32 2147483648, %v4054_v56  ;;  %v5811_v60 = vsel %vm5683_vm3, %v11988_v47, %v6483_v37 }
 0x549   : > { %v4183_v59 = vsel %vm6420_vm9, 0, %v6419_v8  ;;  %v4330_v10 = vsub.s32 %v4326_v7, %v4329_v35  ;;  %6515 = vmatmul.msk.f32.gmra.mxu2 %vm5849_vm12, %v5811_v60  ;;  %vm5684_vm2 = vcmp.gt.f32.partialorder %v12000_v34, 0.0  ;;  %v4199_v19 = vsel %vm4076_vm10, %v4198_v22, %v11976_v44 }
 0x54a   : > { %v4184_v25 = vsub.s32 32, %v4183_v59  ;;  %v4188_v31 = vsub.s32 4294967266, %v4183_v59  ;;  %v4067_v5 = vxor.u32 2147483648, %v4062_v30  ;;  %v4185_v4 = vshll.u32 %v4176_v63, %v4183_v59  ;;  %v6593_v2 = vpop.eup %6592 }
 0x54b   : > { %v4071_v62 = vsel %vm4069_vm11, %v4070_v14, %v4062_v30  ;;  %vm4331_vm5 = vcmp.lt.s32.totalorder %v4330_v10, 0  ;;  %v4332_v28 = vsub.s32 0, %v4330_v10  ;;  %v6484_v50 = vadd.f32 -1.0, %v6593_v2 }
 0x54c   : > { %v4186_v40 = vshrl.u32 %v4168_v61, %v4184_v25  ;;  %v4189_v0 = vadd.s32 127, %v4188_v31  ;;  %v4068_v9 = vsel %vm4066_vm14, %v4054_v56, %v4067_v5  ;;  %v5609_v56 = vadd.f32 %v11657_v27, %v5608_v18 }
 0x54d   : > { %v4072_v6 = vsel %vm4065_vm8, %v4068_v9, %v4071_v62  ;;  %v4333_v51 = vsel %vm4331_vm5, %v4332_v28, %v4330_v10  ;;  %v6595_v24 = vpop.eup %6594  ;;  %v5812_v8 = vsel %vm5684_vm2, %v12000_v34, %v6484_v50  ;;  %vm5685_vm4 = vcmp.gt.f32.partialorder %v5606_v36, 0.0 }
 0x54e   : > { %v4187_v38 = vor.u32 %v4186_v40, %v4185_v4  ;;  %v4190_v42 = vshll.u32 %v4189_v0, 23  ;;  %v4073_v26 = vsel %vm4063_vm7, nan, %v4072_v6  ;;  %v4334_v39 = vclz %v4333_v51  ;;  %v5611_v9 = vpop.f32.mrf.mxu1 }
 0x54f   : > { %6467 = vmatmul.msk.f32.gmra.mxu1 %vm322_vm0, %v4073_v26  ;;  %v5727_v35 = vmul.f32 1.442695, %v5609_v56  ;;  %v6485_v61 = vadd.f32 -1.0, %v6595_v24  ;;  %vm4230_vm1 = vcmp.lt.s32.totalorder %v13153_v45, 0  ;;  %v13154_v4 = vand.u32 2147483647, %v13153_v45 }
 0x550   : > { %v4191_v55 = vor.u32 4788187, %v4190_v42  ;;  %v4194_v52 = vcvt.s32.f32 %v4187_v38  ;;  %v6422_v58 = vadd.s32 4294967294, %v4334_v39  ;;  %v5612_v38 = vadd.f32 %v11657_v27, %v5611_v9 }
 0x551   : > { %6516 = vmatmul.msk.f32.gmra.mxu2 %vm5849_vm12, %v5812_v8  ;;  %6596 = vpow2.f32 %v5727_v35  ;;  %vm12040_vm13 = vcmp.le.f32.partialorder %v13154_v4, 0.7853982  ;;  %v5813_v0 = vsel %vm5685_vm4, %v5606_v36, %v6485_v61  ;;  %v4352_v20 = vsub.s32 4, %v11997_v54 }
 0x552   : > { %v4192_v13 = vand.u32 2147483647, %v4191_v55  ;;  %vm6423_vm15 = vcmp.lt.s32.totalorder %v6422_v58, 0  ;;  %v5729_v55 = vmul.f32 1.442695, %v5612_v38  ;;  %vm5686_vm8 = vcmp.gt.f32.partialorder %v5609_v56, 0.0 }
 0x553   : > { %v4337_v33 = vsel %vm6423_vm15, 0, %v6422_v58  ;;  %vm4217_vm5 = vweird.f32 %v13139_v41  ;;  %vm5687_vm7 = vcmp.gt.f32.partialorder %v5612_v38, 0.0 }
 0x554   : > { %v4195_v63 = vmul.f32 %v4194_v52, %v4192_v13  ;;  %v4338_v32 = vsub.s32 32, %v4337_v33  ;;  %v4342_v29 = vsub.s32 4294967266, %v4337_v33  ;;  %v4339_v57 = vshll.u32 %v4330_v10, %v4337_v33 }
 0x555   : > { %v4201_v10 = vsel %vm12017_vm6, 0, %v4199_v19  ;;  %6598 = vpow2.f32 %v5729_v55 }
 0x556   : > { %v4196_v11 = vxor.u32 2147483648, %v4195_v63  ;;  %v4340_v7 = vshrl.u32 %v4322_v12, %v4338_v32  ;;  %v4343_v23 = vadd.s32 127, %v4342_v29  ;;  %v4218_v42 = vand.u32 3, %v4201_v10  ;;  %v5614_v29 = vpop.f32.mrf.mxu1 }
 0x557   : > { %v6597_v36 = vpop.eup %6596 }
 0x558   : > { %v4197_v49 = vsel %vm4076_vm10, %v4196_v11, %v4195_v63  ;;  %v4341_v48 = vor.u32 %v4340_v7, %v4339_v57  ;;  %v4344_v16 = vshll.u32 %v4343_v23, 23  ;;  %vm4223_vm9 = vcmp.eq.s32.totalorder %v4218_v42, 2 }
 0x559   : > { %v4200_v46 = vsel %vm12017_vm6, %v13139_v41, %v4197_v49  ;;  %6517 = vmatmul.msk.f32.gmra.mxu2 %vm5849_vm12, %v5813_v0  ;;  %v6486_v58 = vadd.f32 -1.0, %v6597_v36  ;;  %vm4219_vm14 = vcmp.lt.s32.totalorder %v4218_v42, 2  ;;  %vm4220_vm11 = vcmp.eq.s32.totalorder %v4218_v42, 0  ;;  %v5963_v42 = vpop.f32.mrf.mxu2 }
 0x55a   : > { %v4202_v21 = vmul.f32 %v4200_v46, %v4200_v46  ;;  %v4345_v15 = vor.u32 4788187, %v4344_v16  ;;  %v4348_v59 = vcvt.s32.f32 %v4341_v48  ;;  %v5615_v57 = vadd.f32 %v11657_v27, %v5614_v29 }
 0x55b   : > { %v5814_v32 = vsel %vm5686_vm8, %v5609_v56, %v6486_v58  ;;  %v4353_v23 = vsel %vm4230_vm1, %v4352_v20, %v11997_v54  ;;  %v6599_v48 = vpop.eup %6598  ;;  %vm4371_vm10 = vweird.f32 %v13153_v45 }
 0x55c   : > { %v4203_v1 = vmul.f32 -0.001358992, %v4202_v21  ;;  %v4210_v17 = vmul.f32 -0.00019511016, %v4202_v21  ;;  %v4346_v14 = vand.u32 2147483647, %v4345_v15 }
 0x55d   : > { %v5731_v16 = vmul.f32 1.442695, %v5615_v57  ;;  %v4355_v50 = vsel %vm12040_vm13, 0, %v4353_v23  ;;  %v6487_v41 = vadd.f32 -1.0, %v6599_v48  ;;  %vm5688_vm2 = vcmp.gt.f32.partialorder %v5615_v57, 0.0 }
 0x55e   : > { %v4204_v43 = vadd.f32 0.041655596, %v4203_v1  ;;  %v4211_v30 = vadd.f32 0.008332121, %v4210_v17  ;;  %v4349_v5 = vmul.f32 %v4348_v59, %v4346_v14  ;;  %v4372_v54 = vand.u32 3, %v4355_v50  ;;  %v5617_v19 = vpop.f32.mrf.mxu1 }
 0x55f   : > { %6600 = vpow2.f32 %v5731_v16  ;;  %v5815_v15 = vsel %vm5687_vm7, %v5612_v38, %v6487_v41  ;;  %v12077_v38 = vld [vmem:[%s12343_s6] ss:$0 sm:$0xff] }
 0x560   : > { %v4205_v25 = vmul.f32 %v4204_v43, %v4202_v21  ;;  %v4212_v31 = vmul.f32 %v4211_v30, %v4202_v21  ;;  %v4350_v34 = vxor.u32 2147483648, %v4349_v5  ;;  %v5618_v43 = vadd.f32 %v11657_v27, %v5617_v19 }
 0x561   : > { %6518 = vmatmul.msk.f32.gmra.mxu2 %vm5849_vm12, %v5814_v32  ;;  %vm4373_vm3 = vcmp.lt.s32.totalorder %v4372_v54, 2  ;;  %vm4374_vm15 = vcmp.eq.s32.totalorder %v4372_v54, 0  ;;  %vm4377_vm6 = vcmp.eq.s32.totalorder %v4372_v54, 2 }
 0x562   : > { %v4206_v44 = vadd.f32 -0.4999988, %v4205_v25  ;;  %v4213_v3 = vadd.f32 -0.16666654, %v4212_v31  ;;  %v4351_v6 = vsel %vm4230_vm1, %v4350_v34, %v4349_v5  ;;  %v5733_v14 = vmul.f32 1.442695, %v5618_v43 }
 0x563   : > { %v4354_v26 = vsel %vm12040_vm13, %v13153_v45, %v4351_v6  ;;  %vm5689_vm4 = vcmp.gt.f32.partialorder %v5618_v43, 0.0 }
 0x564   : > { %v4207_v62 = vmul.f32 %v4206_v44, %v4202_v21  ;;  %v4214_v28 = vmul.f32 %v4213_v3, %v4202_v21  ;;  %v4356_v51 = vmul.f32 %v4354_v26, %v4354_v26  ;;  %6602 = vpow2.f32 %v5733_v14  ;;  %v12068_v44 = vld [vmem:[%s12341_s4] ss:$0 sm:$0xff] }
 0x565   : > { %v6601_v59 = vpop.eup %6600 }
 0x566   : > { %v4208_v37 = vadd.f32 1.0, %v4207_v62  ;;  %v4215_v53 = vadd.f32 1.0, %v4214_v28  ;;  %v4357_v13 = vmul.f32 -0.001358992, %v4356_v51  ;;  %v4364_v52 = vmul.f32 -0.00019511016, %v4356_v51  ;;  %v5620_v10 = vpop.f32.mrf.mxu1 }
 0x567   : > { %v6488_v25 = vadd.f32 -1.0, %v6601_v59  ;;  %v5621_v3 = vadd.f32 %v12068_v44, %v5620_v10 }
 0x568   : > { %v4216_v39 = vmul.f32 %v4215_v53, %v4200_v46  ;;  %v4224_v60 = vxor.u32 2147483648, %v4208_v37  ;;  %v4358_v12 = vadd.f32 0.041655596, %v4357_v13  ;;  %v4365_v33 = vadd.f32 0.008332121, %v4364_v52 }
 0x569   : > { %6519 = vmatmul.msk.f32.gmra.mxu2 %vm5849_vm12, %v5815_v15  ;;  %v5816_v27 = vsel %vm5688_vm2, %v5615_v57, %v6488_v25  ;;  %v5735_v4 = vmul.f32 1.442695, %v5621_v3 }
 0x56a   : > { %v4221_v63 = vxor.u32 2147483648, %v4216_v39  ;;  %v4225_v11 = vsel %vm4223_vm9, %v4224_v60, %v4216_v39  ;;  %v4359_v47 = vmul.f32 %v4358_v12, %v4356_v51  ;;  %v4366_v49 = vmul.f32 %v4365_v33, %v4356_v51  ;;  %v6603_v34 = vpop.eup %6602  ;;  %v5966_v60 = vpop.f32.mrf.mxu2 }
 0x56b   : > { %v6489_v40 = vadd.f32 -1.0, %v6603_v34  ;;  %6604 = vpow2.f32 %v5735_v4  ;;  %v12087_v13 = vadd.f32 %v12077_v38, %v5966_v60 }
 0x56c   : > { %v4222_v2 = vsel %vm4220_vm11, %v4208_v37, %v4221_v63  ;;  %v4360_v46 = vadd.f32 -0.4999988, %v4359_v47  ;;  %v4367_v21 = vadd.f32 -0.16666654, %v4366_v49 }
 0x56d   : > { %v4226_v7 = vsel %vm4219_vm14, %v4222_v2, %v4225_v11  ;;  %v5817_v45 = vsel %vm5689_vm4, %v5618_v43, %v6489_v40 }
 0x56e   : > { %v4227_v22 = vsel %vm4217_vm5, nan, %v4226_v7  ;;  %v4361_v18 = vmul.f32 %v4360_v46, %v4356_v51  ;;  %v4368_v24 = vmul.f32 %v4367_v21, %v4356_v51  ;;  %v5623_v0 = vpop.f32.mrf.mxu1 }
 0x56f   : > { %6468 = vmatmul.msk.f32.gmra.mxu1 %vm322_vm0, %v4227_v22  ;;  %v5624_v9 = vadd.f32 %v12068_v44, %v5623_v0 }
 0x570   : > { %v4362_v1 = vadd.f32 1.0, %v4361_v18  ;;  %v4369_v17 = vadd.f32 1.0, %v4368_v24 }
 0x571   : > { %6520 = vmatmul.msk.f32.gmra.mxu2 %vm5849_vm12, %v5816_v27  ;;  %v6605_v62 = vpop.eup %6604  ;;  %v5737_v28 = vmul.f32 1.442695, %v5624_v9  ;;  %vm5691_vm1 = vcmp.gt.f32.partialorder %v5624_v9, 0.0 }
 0x572   : > { %v4370_v8 = vmul.f32 %v4369_v17, %v4354_v26  ;;  %v4378_v56 = vxor.u32 2147483648, %v4362_v1  ;;  %v6490_v6 = vadd.f32 -1.0, %v6605_v62  ;;  %v12080_v26 = vadd.f32 %v12077_v38, %v5963_v42  ;;  %v5969_v11 = vpop.f32.mrf.mxu2 }
 0x573   : > { %6606 = vpow2.f32 %v5737_v28  ;;  %v12094_v32 = vadd.f32 %v12077_v38, %v5969_v11 }
 0x574   : > { %v4375_v30 = vxor.u32 2147483648, %v4370_v8  ;;  %v4379_v61 = vsel %vm4377_vm6, %v4378_v56, %v4370_v8  ;;  %6091 = vrot.lane.b32.xlu0 %v12080_v26, %s6663_s18 }
 0x575   : > { %6095 = vrot.lane.b32.xlu1 %v12094_v32, %s6663_s18 }
 0x576   : > { %v4376_v35 = vsel %vm4374_vm15, %v4362_v1, %v4375_v30  ;;  %v5626_v53 = vpop.f32.mrf.mxu1 }
 0x577   : > { %v4380_v31 = vsel %vm4373_vm3, %v4376_v35, %v4379_v61  ;;  %v5627_v51 = vadd.f32 %v12068_v44, %v5626_v53 }
 0x578   : > { %v4381_v5 = vsel %vm4371_vm10, nan, %v4380_v31 }
 0x579   : > { %6469 = vmatmul.msk.f32.gmra.mxu1 %vm322_vm0, %v4381_v5  ;;  %6521 = vmatmul.msk.f32.gmra.mxu2 %vm5849_vm12, %v5817_v45  ;;  %vm5690_vm0 = vcmp.gt.f32.partialorder %v5621_v3, 0.0  ;;  %v6607_v55 = vpop.eup %6606  ;;  %v5739_v36 = vmul.f32 1.442695, %v5627_v51  ;;  %vm5692_vm13 = vcmp.gt.f32.partialorder %v5627_v51, 0.0 }
 0x57a   : > { %v5818_v37 = vsel %vm5690_vm0, %v5621_v3, %v6490_v6  ;;  %v6491_v39 = vadd.f32 -1.0, %v6607_v55  ;;  %v5972_v23 = vpop.f32.mrf.mxu2  ;;  %v5656_v55 = vpop.f32.mrf.mxu3  ;;  %vm6219_vm0 = vcmask 7168  }
 0x57b   : > { %6608 = vpow2.f32 %v5739_v36  ;;  %v12101_v22 = vadd.f32 %v12077_v38, %v5972_v23 }
 0x57c   : > { %v5819_v52 = vsel %vm5691_vm1, %v5624_v9, %v6491_v39  ;;  %6093 = vrot.lane.b32.xlu0 %v12087_v13, %s6663_s18 }
 0x57d   : > { %6097 = vrot.lane.b32.xlu1 %v12101_v22, %s6663_s18 }
 0x57e   : > { %v5629_v20 = vpop.f32.mrf.mxu1 }
 0x57f   : > { %v5630_v58 = vadd.f32 %v12068_v44, %v5629_v20 }
 0x581   : > { %6522 = vmatmul.msk.f32.gmra.mxu2 %vm5849_vm12, %v5818_v37  ;;  %v6609_v63 = vpop.eup %6608  ;;  %v5741_v12 = vmul.f32 1.442695, %v5630_v58  ;;  %vm5693_vm9 = vcmp.gt.f32.partialorder %v5630_v58, 0.0 }
 0x582   : > { %v6492_v33 = vadd.f32 -1.0, %v6609_v63 }
 0x583   : > { %6610 = vpow2.f32 %v5741_v12 }
 0x584   : > { %v5820_v29 = vsel %vm5692_vm13, %v5627_v51, %v6492_v33 }
 0x586   : > { %v5632_v2 = vpop.f32.mrf.mxu1 }
 0x587   : > { %v5633_v47 = vadd.f32 %v12068_v44, %v5632_v2  ;;  %v5657_v2 = vadd.f32 %v12068_v44, %v5656_v55 }
 0x589   : > { %6523 = vmatmul.msk.f32.gmra.mxu2 %vm5849_vm12, %v5819_v52  ;;  %v6611_v49 = vpop.eup %6610  ;;  %v5743_v57 = vmul.f32 1.442695, %v5633_v47  ;;  %vm5694_vm8 = vcmp.gt.f32.partialorder %v5633_v47, 0.0  ;;  %vm5702_vm10 = vcmp.gt.f32.partialorder %v5657_v2, 0.0 }
 0x58a   : > { %v6493_v7 = vadd.f32 -1.0, %v6611_v49 }
 0x58b   : > { %6612 = vpow2.f32 %v5743_v57 }
 0x58c   : > { %v5821_v46 = vsel %vm5693_vm9, %v5630_v58, %v6493_v7  ;;  %v5659_v58 = vpop.f32.mrf.mxu3  ;;  %v5759_v7 = vmul.f32 1.442695, %v5657_v2 }
 0x58e   : > { %v5635_v21 = vpop.f32.mrf.mxu1 }
 0x58f   : > { %v5636_v48 = vadd.f32 %v12068_v44, %v5635_v21 }
 0x591   : > { %6524 = vmatmul.msk.f32.gmra.mxu2 %vm5849_vm12, %v5820_v29  ;;  %v6613_v16 = vpop.eup %6612  ;;  %v5745_v50 = vmul.f32 1.442695, %v5636_v48  ;;  %vm5695_vm14 = vcmp.gt.f32.partialorder %v5636_v48, 0.0  ;;  %v5975_v19 = vpop.f32.mrf.mxu2 }
 0x592   : > { %v6494_v18 = vadd.f32 -1.0, %v6613_v16  ;;  %v12110_v43 = vadd.f32 %v12077_v38, %v5975_v19 }
 0x593   : > { %6614 = vpow2.f32 %v5745_v50 }
 0x594   : > { %v5822_v24 = vsel %vm5694_vm8, %v5633_v47, %v6494_v18  ;;  %6099 = vrot.lane.b32.xlu2 %v12110_v43, %s6663_s18  ;;  %v5662_v23 = vpop.f32.mrf.mxu3 }
 0x596   : > { %v5638_v41 = vpop.f32.mrf.mxu1 }
 0x597   : > { %v5639_v1 = vadd.f32 %v12068_v44, %v5638_v41 }
 0x599   : > { %6525 = vmatmul.msk.f32.gmra.mxu2 %vm5849_vm12, %v5821_v46  ;;  %v6615_v17 = vpop.eup %6614  ;;  %v5747_v54 = vmul.f32 1.442695, %v5639_v1  ;;  %vm5696_vm11 = vcmp.gt.f32.partialorder %v5639_v1, 0.0 }
 0x59a   : > { %v6495_v15 = vadd.f32 -1.0, %v6615_v17 }
 0x59b   : > { %6616 = vpow2.f32 %v5747_v54 }
 0x59c   : > { %v5823_v8 = vsel %vm5695_vm14, %v5636_v48, %v6495_v15  ;;  %v5660_v48 = vadd.f32 %v12068_v44, %v5659_v58  ;;  %v5665_v54 = vpop.f32.mrf.mxu3  ;;  %v5663_v15 = vadd.f32 %v12068_v44, %v5662_v23 }
 0x59e   : > { %v5641_v56 = vpop.f32.mrf.mxu1  ;;  %v5761_v18 = vmul.f32 1.442695, %v5660_v48  ;;  %vm5703_vm2 = vcmp.gt.f32.partialorder %v5660_v48, 0.0  ;;  %vm5704_vm4 = vcmp.gt.f32.partialorder %v5663_v15, 0.0 }
 0x59f   : > { %v5642_v30 = vadd.f32 %v12068_v44, %v5641_v56 }
 0x5a1   : > { %6526 = vmatmul.msk.f32.gmra.mxu2 %vm5849_vm12, %v5822_v24  ;;  %v6617_v14 = vpop.eup %6616  ;;  %v5749_v59 = vmul.f32 1.442695, %v5642_v30  ;;  %vm5697_vm5 = vcmp.gt.f32.partialorder %v5642_v30, 0.0 }
 0x5a2   : > { %v6496_v35 = vadd.f32 -1.0, %v6617_v14 }
 0x5a3   : > { %6618 = vpow2.f32 %v5749_v59 }
 0x5a4   : > { %v5824_v61 = vsel %vm5696_vm11, %v5639_v1, %v6496_v35  ;;  %v5666_v35 = vadd.f32 %v12068_v44, %v5665_v54 }
 0x5a6   : > { %vm5705_vm1 = vcmp.gt.f32.partialorder %v5666_v35, 0.0 }
 0x5a9   : > { %6527 = vmatmul.msk.f32.gmra.mxu2 %vm5849_vm12, %v5823_v8  ;;  %v5644_v25 = vpop.f32.mrf.mxu1  ;;  %v6619_v5 = vpop.eup %6618  ;;  %v5763_v8 = vmul.f32 1.442695, %v5663_v15 }
 0x5aa   : > { %v5645_v31 = vadd.f32 %v12068_v44, %v5644_v25  ;;  %v6497_v10 = vadd.f32 -1.0, %v6619_v5 }
 0x5ac   : > { %v5751_v27 = vmul.f32 1.442695, %v5645_v31  ;;  %v5825_v3 = vsel %vm5697_vm5, %v5642_v30, %v6497_v10  ;;  %vm5698_vm7 = vcmp.gt.f32.partialorder %v5645_v31, 0.0 }
 0x5ae   : > { %6620 = vpow2.f32 %v5751_v27 }
 0x5b1   : > { %6528 = vmatmul.msk.f32.gmra.mxu2 %vm5849_vm12, %v5824_v61  ;;  %v5668_v61 = vpop.f32.mrf.mxu3 }
 0x5b4   : > { %v6621_v34 = vpop.eup %6620 }
 0x5b5   : > { %v6498_v4 = vadd.f32 -1.0, %v6621_v34  ;;  %v5978_v62 = vpop.f32.mrf.mxu2  ;;  %v5669_v34 = vadd.f32 %v12068_v44, %v5668_v61 }
 0x5b6   : > { %v12122_v28 = vadd.f32 %v12077_v38, %v5978_v62 }
 0x5b7   : > { %v5826_v40 = vsel %vm5698_vm7, %v5645_v31, %v6498_v4  ;;  %v5765_v31 = vmul.f32 1.442695, %v5666_v35  ;;  %vm5706_vm13 = vcmp.gt.f32.partialorder %v5669_v34, 0.0 }
 0x5b8   : > { %6101 = vrot.lane.b32.xlu2 %v12122_v28, %s6663_s18 }
 0x5b9   : > { %6529 = vmatmul.msk.f32.gmra.mxu2 %vm5849_vm12, %v5825_v3 }
 0x5c1   : > { %6530 = vmatmul.msk.f32.gmra.mxu2 %vm5849_vm12, %v5826_v40  ;;  %v5671_v40 = vpop.f32.mrf.mxu3 }
 0x5cc   : > { %v5647_v45 = vpop.f32.mrf.mxu1  ;;  %v5981_v53 = vpop.f32.mrf.mxu2 }
 0x5cd   : > { %v5648_v0 = vadd.f32 %v12068_v44, %v5647_v45  ;;  %v12128_v51 = vadd.f32 %v12077_v38, %v5981_v53  ;;  %v5767_v45 = vmul.f32 1.442695, %v5669_v34 }
 0x5cf   : > { %v5753_v9 = vmul.f32 1.442695, %v5648_v0  ;;  %vm5699_vm3 = vcmp.gt.f32.partialorder %v5648_v0, 0.0  ;;  %6103 = vrot.lane.b32.xlu0 %v12128_v51, %s6663_s18 }
 0x5d1   : > { %6622 = vpow2.f32 %v5753_v9 }
 0x5d4   : > { %v5984_v60 = vpop.f32.mrf.mxu2 }
 0x5d5   : > { %v12134_v20 = vadd.f32 %v12077_v38, %v5984_v60 }
 0x5d7   : > { %v6623_v6 = vpop.eup %6622  ;;  %6105 = vrot.lane.b32.xlu1 %v12134_v20, %s6663_s18 }
 0x5d8   : > { %v6499_v42 = vadd.f32 -1.0, %v6623_v6 }
 0x5da   : > { %v5827_v37 = vsel %vm5699_vm3, %v5648_v0, %v6499_v42 }
 0x5db   : > { %6531 = vmatmul.msk.f32.gmra.mxu2 %vm5849_vm12, %v5827_v37 }
 0x5dc   : > { %v5987_v63 = vpop.f32.mrf.mxu2 }
 0x5dd   : > { %v12139_v33 = vadd.f32 %v12077_v38, %v5987_v63 }
 0x5df   : > { %6107 = vrot.lane.b32.xlu2 %v12139_v33, %s6663_s18 }
 0x5e4   : > { %v5990_v46 = vpop.f32.mrf.mxu2 }
 0x5e5   : > { %v12147_v21 = vadd.f32 %v12077_v38, %v5990_v46 }
 0x5e6   : > { %v6092_v42 = vpop.permute.xlu0 %6091 }
 0x5e7   : > { %6109 = vrot.lane.b32.xlu0 %v12147_v21, %s6663_s18  ;;  %v6187_v53 = vmul.f32 %v6092_v42, %v12080_v26 }
 0x5e9   : > { %6220 = vst.msk [vmem:[%s12178_s21] sm:$0xff] %vm6219_vm0, %v6187_v53 }
 0x5ec   : > { %v5650_v36 = vpop.f32.mrf.mxu1  ;;  %v5993_v41 = vpop.f32.mrf.mxu2 }
 0x5ed   : > { %v5651_v39 = vadd.f32 %v12068_v44, %v5650_v36  ;;  %v12154_v17 = vadd.f32 %v12077_v38, %v5993_v41  ;;  %v6096_v36 = vpop.permute.xlu1 %6095 }
 0x5ee   : > { %v6100_v37 = vpop.permute.xlu2 %6099  ;;  %v6189_v60 = vmul.f32 %v6096_v36, %v12094_v32  ;;  %v6094_v32 = vpop.permute.xlu0 %6093 }
 0x5ef   : > { %v5755_v52 = vmul.f32 1.442695, %v5651_v39  ;;  %vm5700_vm15 = vcmp.gt.f32.partialorder %v5651_v39, 0.0  ;;  %6111 = vrot.lane.b32.xlu1 %v12154_v17, %s6663_s18  ;;  %v6191_v55 = vmul.f32 %v6100_v37, %v12110_v43  ;;  %v5674_v43 = vpop.f32.mrf.mxu3 }
 0x5f0   : > { %6222 = vst.msk [vmem:[%s12178_s21 + $0x10] sm:$0xff] %vm6219_vm0, %v6189_v60 }
 0x5f1   : > { %6624 = vpow2.f32 %v5755_v52  ;;  %6224 = vst.msk [vmem:[%s12178_s21 + $0x20] sm:$0xff] %vm6219_vm0, %v6191_v55 }
 0x5f4   : > { %v5996_v30 = vpop.f32.mrf.mxu2 }
 0x5f5   : > { %v12161_v59 = vadd.f32 %v12077_v38, %v5996_v30 }
 0x5f6   : > { %v5653_v11 = vpop.f32.mrf.mxu1 }
 0x5f7   : > { %v6625_v12 = vpop.eup %6624  ;;  %v5654_v47 = vadd.f32 %v12068_v44, %v5653_v11  ;;  %6113 = vrot.lane.b32.xlu2 %v12161_v59, %s6663_s18 }
 0x5f8   : > { %v6500_v29 = vadd.f32 -1.0, %v6625_v12 }
 0x5f9   : > { %v5757_v57 = vmul.f32 1.442695, %v5654_v47  ;;  %vm5701_vm6 = vcmp.gt.f32.partialorder %v5654_v47, 0.0 }
 0x5fa   : > { %v5828_v49 = vsel %vm5700_vm15, %v5651_v39, %v6500_v29  ;;  %v5672_v39 = vadd.f32 %v12068_v44, %v5671_v40  ;;  %v6188_v29 = vmul.f32 %v6094_v32, %v12087_v13 }
 0x5fb   : > { %6532 = vmatmul.msk.f32.gmra.mxu2 %vm5849_vm12, %v5828_v49  ;;  %6626 = vpow2.f32 %v5757_v57 }
 0x5fc   : > { %6628 = vpow2.f32 %v5759_v7  ;;  %v5999_v27 = vpop.f32.mrf.mxu2  ;;  %v5769_v26 = vmul.f32 1.442695, %v5672_v39  ;;  %6221 = vst.msk [vmem:[%s12178_s21 + $0x8] sm:$0xff] %vm6219_vm0, %v6188_v29  ;;  %vm5707_vm9 = vcmp.gt.f32.partialorder %v5672_v39, 0.0 }
 0x5fd   : > { %6630 = vpow2.f32 %v5761_v18  ;;  %v12168_v3 = vadd.f32 %v12077_v38, %v5999_v27 }
 0x5fe   : > { %6632 = vpow2.f32 %v5763_v8 }
 0x5ff   : > { %6634 = vpow2.f32 %v5765_v31  ;;  %6115 = vrot.lane.b32.xlu0 %v12168_v3, %s6663_s18 }
 0x600   : > { %6636 = vpow2.f32 %v5767_v45 }
 0x601   : > { %v6627_v16 = vpop.eup %6626  ;;  %6638 = vpow2.f32 %v5769_v26 }
 0x602   : > { %v6501_v50 = vadd.f32 -1.0, %v6627_v16  ;;  %v6629_v1 = vpop.eup %6628 }
 0x603   : > { %v6502_v19 = vadd.f32 -1.0, %v6629_v1  ;;  %v6631_v14 = vpop.eup %6630 }
 0x604   : > { %v5829_v24 = vsel %vm5701_vm6, %v5654_v47, %v6501_v50  ;;  %v6503_v25 = vadd.f32 -1.0, %v6631_v14  ;;  %v6633_v10 = vpop.eup %6632  ;;  %v6002_v9 = vpop.f32.mrf.mxu2  ;;  %v5675_v47 = vadd.f32 %v12068_v44, %v5674_v43 }
 0x605   : > { %6533 = vmatmul.msk.f32.vlgmr.msra.gmra.mxu3 %vm5849_vm12, %v5829_v24  ;;  %v5830_v56 = vsel %vm5702_vm10, %v5657_v2, %v6502_v19  ;;  %v6504_v4 = vadd.f32 -1.0, %v6633_v10  ;;  %v6635_v62 = vpop.eup %6634  ;;  %v12182_v6 = vadd.f32 %v12077_v38, %v6002_v9  ;;  %v6098_v2 = vpop.permute.xlu1 %6097 }
 0x606   : > { %v5831_v5 = vsel %vm5703_vm2, %v5660_v48, %v6503_v25  ;;  %v6505_v52 = vadd.f32 -1.0, %v6635_v62  ;;  %v6637_v12 = vpop.eup %6636  ;;  %v6190_v49 = vmul.f32 %v6098_v2, %v12101_v22  ;;  %v5771_v7 = vmul.f32 1.442695, %v5675_v47 }
 0x607   : > { %v5832_v0 = vsel %vm5704_vm4, %v5663_v15, %v6504_v4  ;;  %6117 = vrot.lane.b32.xlu1 %v12182_v6, %s6663_s18  ;;  %v6506_v57 = vadd.f32 -1.0, %v6637_v12  ;;  %v6639_v48 = vpop.eup %6638  ;;  %vm5708_vm8 = vcmp.gt.f32.partialorder %v5675_v47, 0.0 }
 0x608   : > { %v5833_v58 = vsel %vm5705_vm1, %v5666_v35, %v6505_v52  ;;  %6223 = vst.msk [vmem:[%s12178_s21 + $0x18] sm:$0xff] %vm6219_vm0, %v6190_v49  ;;  %6640 = vpow2.f32 %v5771_v7  ;;  %v6507_v22 = vadd.f32 -1.0, %v6639_v48 }
 0x609   : > { %v5834_v23 = vsel %vm5706_vm13, %v5669_v34, %v6506_v57 }
 0x60a   : > { %v5835_v50 = vsel %vm5707_vm9, %v5672_v39, %v6507_v22 }
 0x60c   : > { %v6005_v63 = vpop.f32.mrf.mxu2 }
 0x60d   : > { %6534 = vmatmul.msk.f32.gmra.mxu3 %vm5849_vm12, %v5830_v56  ;;  %v12198_v11 = vadd.f32 %v12077_v38, %v6005_v63 }
 0x60e   : > { %v6641_v24 = vpop.eup %6640 }
 0x60f   : > { %6119 = vrot.lane.b32.xlu2 %v12198_v11, %s6663_s18 }
 0x612   : > { %v6102_v13 = vpop.permute.xlu2 %6101 }
 0x613   : > { %v6192_v16 = vmul.f32 %v6102_v13, %v12122_v28  ;;  %v6508_v28 = vadd.f32 -1.0, %v6641_v24 }
 0x614   : > { %v6008_v46 = vpop.f32.mrf.mxu2 }
 0x615   : > { %6535 = vmatmul.msk.f32.gmra.mxu3 %vm5849_vm12, %v5831_v5  ;;  %v12211_v44 = vadd.f32 %v12077_v38, %v6008_v46  ;;  %6225 = vst.msk [vmem:[%s12178_s21 + $0x28] sm:$0xff] %vm6219_vm0, %v6192_v16  ;;  %v5836_v1 = vsel %vm5708_vm8, %v5675_v47, %v6508_v28 }
 0x617   : > { %6121 = vrot.lane.b32.xlu0 %v12211_v44, %s6663_s18 }
 0x61c   : > { %v6011_v18 = vpop.f32.mrf.mxu2 }
 0x61d   : > { %6536 = vmatmul.msk.f32.gmra.mxu3 %vm5849_vm12, %v5832_v0  ;;  %v12220_v41 = vadd.f32 %v12077_v38, %v6011_v18 }
 0x61f   : > { %6123 = vrot.lane.b32.xlu1 %v12220_v41, %s6663_s18 }
 0x624   : > { %v6014_v54 = vpop.f32.mrf.mxu2 }
 0x625   : > { %6537 = vmatmul.msk.f32.gmra.mxu3 %vm5849_vm12, %v5833_v58  ;;  %v6015_v15 = vadd.f32 %v12077_v38, %v6014_v54 }
 0x627   : > { %6125 = vrot.lane.b32.xlu2 %v6015_v15, %s6663_s18 }
 0x62c   : > { %v6017_v19 = vpop.f32.mrf.mxu2 }
 0x62d   : > { %6538 = vmatmul.msk.f32.gmra.mxu3 %vm5849_vm12, %v5834_v23  ;;  %v12228_v8 = vadd.f32 %v12077_v38, %v6017_v19 }
 0x62f   : > { %6127 = vrot.lane.b32.xlu0 %v12228_v8, %s6663_s18 }
 0x634   : > { %v6020_v56 = vpop.f32.mrf.mxu2 }
 0x635   : > { %6539 = vmatmul.msk.f32.gmra.mxu3 %vm5849_vm12, %v5835_v50  ;;  %v12233_v30 = vadd.f32 %v12077_v38, %v6020_v56 }
 0x637   : > { %6129 = vrot.lane.b32.xlu1 %v12233_v30, %s6663_s18 }
 0x639   : > { %v6108_v14 = vpop.permute.xlu2 %6107 }
 0x63a   : > { %v6195_v35 = vmul.f32 %v6108_v14, %v12139_v33 }
 0x63c   : > { %6228 = vst.msk [vmem:[%s12178_s21 + $0x40] sm:$0xff] %vm6219_vm0, %v6195_v35  ;;  %v6023_v61 = vpop.f32.mrf.mxu2 }
 0x63d   : > { %6540 = vmatmul.msk.f32.gmra.mxu3 %vm5849_vm12, %v5836_v1  ;;  %v6024_v25 = vadd.f32 %v12077_v38, %v6023_v61 }
 0x63f   : > { %6131 = vrot.lane.b32.xlu2 %v6024_v25, %s6663_s18 }
 0x641   : > { %v6104_v31 = vpop.permute.xlu0 %6103 }
 0x642   : > { %v6193_v5 = vmul.f32 %v6104_v31, %v12128_v51 }
 0x644   : > { %6226 = vst.msk [vmem:[%s12178_s21 + $0x30] sm:$0xff] %vm6219_vm0, %v6193_v5  ;;  %v6026_v27 = vpop.f32.mrf.mxu2 }
 0x645   : > { %v12246_v10 = vadd.f32 %v12077_v38, %v6026_v27 }
 0x647   : > { %6133 = vrot.lane.b32.xlu0 %v12246_v10, %s6663_s18 }
 0x649   : > { %v6106_v33 = vpop.permute.xlu1 %6105 }
 0x64a   : > { %v6194_v34 = vmul.f32 %v6106_v33, %v12134_v20 }
 0x64c   : > { %6227 = vst.msk [vmem:[%s12178_s21 + $0x38] sm:$0xff] %vm6219_vm0, %v6194_v34 }
 0x651   : > { %v6114_v51 = vpop.permute.xlu2 %6113 }
 0x652   : > { %v6198_v45 = vmul.f32 %v6114_v51, %v12161_v59 }
 0x654   : > { %6231 = vst.msk [vmem:[%s12178_s21 + $0x58] sm:$0xff] %vm6219_vm0, %v6198_v45 }
 0x659   : > { %v6110_v0 = vpop.permute.xlu0 %6109 }
 0x65a   : > { %v6196_v9 = vmul.f32 %v6110_v0, %v12147_v21 }
 0x65c   : > { %6229 = vst.msk [vmem:[%s12178_s21 + $0x48] sm:$0xff] %vm6219_vm0, %v6196_v9 }
 0x65e   : > { %v6029_v4 = vpop.f32.mrf.mxu2 }
 0x65f   : > { %v12254_v40 = vadd.f32 %v12077_v38, %v6029_v4 }
 0x661   : > { %6135 = vrot.lane.b32.xlu1 %v12254_v40, %s6663_s18  ;;  %v6112_v20 = vpop.permute.xlu1 %6111 }
 0x662   : > { %v6197_v62 = vmul.f32 %v6112_v20, %v12154_v17 }
 0x664   : > { %6230 = vst.msk [vmem:[%s12178_s21 + $0x50] sm:$0xff] %vm6219_vm0, %v6197_v62 }
 0x669   : > { %v6120_v59 = vpop.permute.xlu2 %6119 }
 0x66a   : > { %v6201_v53 = vmul.f32 %v6120_v59, %v12198_v11 }
 0x66c   : > { %6234 = vst.msk [vmem:[%s12178_s21 + $0x70] sm:$0xff] %vm6219_vm0, %v6201_v53 }
 0x671   : > { %v6116_v36 = vpop.permute.xlu0 %6115 }
 0x672   : > { %v6199_v17 = vmul.f32 %v6116_v36, %v12168_v3 }
 0x674   : > { %6232 = vst.msk [vmem:[%s12178_s21 + $0x60] sm:$0xff] %vm6219_vm0, %v6199_v17 }
 0x679   : > { %v6118_v52 = vpop.permute.xlu1 %6117 }
 0x67a   : > { %v6200_v26 = vmul.f32 %v6118_v52, %v12182_v6 }
 0x67c   : > { %6233 = vst.msk [vmem:[%s12178_s21 + $0x68] sm:$0xff] %vm6219_vm0, %v6200_v26 }
 0x67e   : > { %v6032_v42 = vpop.f32.mrf.mxu2 }
 0x67f   : > { %v6033_v37 = vadd.f32 %v12077_v38, %v6032_v42 }
 0x681   : > { %6137 = vrot.lane.b32.xlu2 %v6033_v37, %s6663_s18  ;;  %v6126_v3 = vpop.permute.xlu2 %6125 }
 0x682   : > { %v6204_v63 = vmul.f32 %v6126_v3, %v6015_v15 }
 0x684   : > { %6237 = vst.msk [vmem:[%s12178_s21 + $0x88] sm:$0xff] %vm6219_vm0, %v6204_v63 }
 0x688   : > { %v6035_v21 = vpop.f32.mrf.mxu3 }
 0x689   : > { %v6036_v55 = vadd.f32 %v12077_v38, %v6035_v21  ;;  %v6122_v32 = vpop.permute.xlu0 %6121 }
 0x68a   : > { %v6202_v6 = vmul.f32 %v6122_v32, %v12211_v44 }
 0x68b   : > { %6139 = vrot.lane.b32.xlu0 %v6036_v55, %s6663_s18 }
 0x68c   : > { %6235 = vst.msk [vmem:[%s12178_s21 + $0x78] sm:$0xff] %vm6219_vm0, %v6202_v6 }
 0x690   : > { %v6038_v39 = vpop.f32.mrf.mxu3 }
 0x691   : > { %v6039_v60 = vadd.f32 %v12077_v38, %v6038_v39  ;;  %v6124_v47 = vpop.permute.xlu1 %6123 }
 0x692   : > { %v6203_v49 = vmul.f32 %v6124_v47, %v12220_v41 }
 0x693   : > { %6141 = vrot.lane.b32.xlu1 %v6039_v60, %s6663_s18 }
 0x694   : > { %6236 = vst.msk [vmem:[%s12178_s21 + $0x80] sm:$0xff] %vm6219_vm0, %v6203_v49 }
 0x698   : > { %v6041_v43 = vpop.f32.mrf.mxu3 }
 0x699   : > { %v6042_v58 = vadd.f32 %v12077_v38, %v6041_v43  ;;  %v6132_v23 = vpop.permute.xlu2 %6131 }
 0x69a   : > { %v6207_v46 = vmul.f32 %v6132_v23, %v6024_v25 }
 0x69b   : > { %6143 = vrot.lane.b32.xlu2 %v6042_v58, %s6663_s18 }
 0x69c   : > { %6240 = vst.msk [vmem:[%s12178_s21 + $0xa0] sm:$0xff] %vm6219_vm0, %v6207_v46 }
 0x6a0   : > { %v6044_v12 = vpop.f32.mrf.mxu3 }
 0x6a1   : > { %v6045_v11 = vadd.f32 %v12077_v38, %v6044_v12  ;;  %v6128_v44 = vpop.permute.xlu0 %6127 }
 0x6a2   : > { %v6205_v16 = vmul.f32 %v6128_v44, %v12228_v8 }
 0x6a3   : > { %6145 = vrot.lane.b32.xlu0 %v6045_v11, %s6663_s18 }
 0x6a4   : > { %6238 = vst.msk [vmem:[%s12178_s21 + $0x90] sm:$0xff] %vm6219_vm0, %v6205_v16 }
 0x6a8   : > { %v6047_v29 = vpop.f32.mrf.mxu3 }
 0x6a9   : > { %v6048_v2 = vadd.f32 %v12077_v38, %v6047_v29  ;;  %v6130_v18 = vpop.permute.xlu1 %6129 }
 0x6aa   : > { %v6206_v24 = vmul.f32 %v6130_v18, %v12233_v30 }
 0x6ab   : > { %6147 = vrot.lane.b32.xlu1 %v6048_v2, %s6663_s18 }
 0x6ac   : > { %6239 = vst.msk [vmem:[%s12178_s21 + $0x98] sm:$0xff] %vm6219_vm0, %v6206_v24 }
 0x6b0   : > { %v6050_v57 = vpop.f32.mrf.mxu3 }
 0x6b1   : > { %v6051_v7 = vadd.f32 %v12077_v38, %v6050_v57 }
 0x6b3   : > { %6149 = vrot.lane.b32.xlu2 %v6051_v7, %s6663_s18 }
 0x6b8   : > { %v6053_v13 = vpop.f32.mrf.mxu3 }
 0x6b9   : > { %v6054_v48 = vadd.f32 %v12077_v38, %v6053_v13  ;;  %v6134_v41 = vpop.permute.xlu0 %6133 }
 0x6ba   : > { %v6208_v28 = vmul.f32 %v6134_v41, %v12246_v10 }
 0x6bb   : > { %6151 = vrot.lane.b32.xlu0 %v6054_v48, %s6663_s18 }
 0x6bc   : > { %6241 = vst.msk [vmem:[%s12178_s21 + $0xa8] sm:$0xff] %vm6219_vm0, %v6208_v28 }
 0x6c0   : > { %v6056_v22 = vpop.f32.mrf.mxu3 }
 0x6c1   : > { %v6057_v50 = vadd.f32 %v12077_v38, %v6056_v22 }
 0x6c3   : > { %6153 = vrot.lane.b32.xlu1 %v6057_v50, %s6663_s18 }
 0x6d3   : > { %v6136_v54 = vpop.permute.xlu1 %6135 }
 0x6d4   : > { %v6209_v38 = vmul.f32 %v6136_v54, %v12254_v40 }
 0x6d6   : > { %6242 = vst.msk [vmem:[%s12178_s21 + $0xb0] sm:$0xff] %vm6219_vm0, %v6209_v38 }
 0x6db   : > { %v6138_v1 = vpop.permute.xlu2 %6137 }
 0x6dc   : > { %v6210_v15 = vmul.f32 %v6138_v1, %v6033_v37 }
 0x6de   : > { %6243 = vst.msk [vmem:[%s12178_s21 + $0xb8] sm:$0xff] %vm6219_vm0, %v6210_v15 }
 0x6f5   : > { %v6144_v19 = vpop.permute.xlu2 %6143 }
 0x6f6   : > { %v6213_v8 = vmul.f32 %v6144_v19, %v6042_v58 }
 0x6f8   : > { %6246 = vst.msk [vmem:[%s12178_s21 + $0xd0] sm:$0xff] %vm6219_vm0, %v6213_v8 }
 0x6fd   : > { %v6140_v56 = vpop.permute.xlu0 %6139 }
 0x6fe   : > { %v6211_v30 = vmul.f32 %v6140_v56, %v6036_v55 }
 0x700   : > { %6244 = vst.msk [vmem:[%s12178_s21 + $0xc0] sm:$0xff] %vm6219_vm0, %v6211_v30 }
 0x705   : > { %v6142_v14 = vpop.permute.xlu1 %6141 }
 0x706   : > { %v6212_v35 = vmul.f32 %v6142_v14, %v6039_v60 }
 0x708   : > { %6245 = vst.msk [vmem:[%s12178_s21 + $0xc8] sm:$0xff] %vm6219_vm0, %v6212_v35 }
 0x70d   : > { %v6150_v61 = vpop.permute.xlu2 %6149 }
 0x70e   : > { %v6216_v25 = vmul.f32 %v6150_v61, %v6051_v7 }
 0x710   : > { %6249 = vst.msk [vmem:[%s12178_s21 + $0xe8] sm:$0xff] %vm6219_vm0, %v6216_v25 }
 0x715   : > { %v6146_v31 = vpop.permute.xlu0 %6145 }
 0x716   : > { %v6214_v5 = vmul.f32 %v6146_v31, %v6045_v11 }
 0x718   : > { %6247 = vst.msk [vmem:[%s12178_s21 + $0xd8] sm:$0xff] %vm6219_vm0, %v6214_v5 }
 0x71d   : > { %v6148_v27 = vpop.permute.xlu1 %6147 }
 0x71e   : > { %v6215_v10 = vmul.f32 %v6148_v27, %v6048_v2 }
 0x720   : > { %6248 = vst.msk [vmem:[%s12178_s21 + $0xe0] sm:$0xff] %vm6219_vm0, %v6215_v10 }
 0x72d   : > { %v6152_v33 = vpop.permute.xlu0 %6151 }
 0x72e   : > { %v6217_v34 = vmul.f32 %v6152_v33, %v6054_v48 }
 0x730   : > { %6250 = vst.msk [vmem:[%s12178_s21 + $0xf0] sm:$0xff] %vm6219_vm0, %v6217_v34 }
 0x735   : > { %v6154_v4 = vpop.permute.xlu1 %6153 }
 0x736   : > { %v6218_v40 = vmul.f32 %v6154_v4, %v6057_v50 }
 0x738   : > { %6251 = vst.msk [vmem:[%s12178_s21 + $0xf8] sm:$0xff] %vm6219_vm0, %v6218_v40 }
 0x739 PF: > { %s17_s24 = sadd.s32 1, %s6654_s24  }
 0x73a   : > { %p14_p4 = scmp.ge.s32.totalorder %s17_s24, 4  }
 0x73c   :  { %16 = sbr.rel (!%p14_p4) target bundleno = 1 (0x1), region = 78 }

</bundles_post_ra>
